<compile_context>
chip_gen: v7x
topology: tpu7x:2x2x1
jax: 0.10.0
libtpu: 0.0.40
codegen_flags: <defaults>
</compile_context>

<pallas_src>
import jax
import jax.numpy as jnp
from jax.experimental import pallas as pl
from jax.experimental.pallas import tpu as pltpu

NUM_FILTERS = 64
HIDDEN = 512


# ----------------------- Fused conv body (3x conv3x3+ReLU) -------------------
def fused_conv_kernel(x_ref, w0_ref, b0_ref, w1_ref, b1_ref, w2_ref, b2_ref,
                      feat_ref, pad0_ref, pad_ref):
    # x_ref:   (N, H, W, Cin)            NHWC input (f32)
    # w*_ref:  (9, Cin_l, F)             per-tap 3x3 weights (kh-major, kw)
    # b*_ref:  (1, F)
    # feat_ref:(N, H*W, F)  bf16         NHWC-flatten-ordered features
    # pad0_ref:(N, H+2, W+2, Cin) f32    VMEM halo scratch (layer 1)
    # pad_ref: (N, H+2, W+2, F)   f32    VMEM halo scratch (layers 2, 3)
    N, H, W, Cin = x_ref.shape
    F = w0_ref.shape[-1]
    HW = H * W

    # Zero only the 1-pixel halo ring of each padded scratch, once.  The
    # interior is fully overwritten by every layer's store, and the ring stays
    # zero because interior stores only touch [1:H+1, 1:W+1].
    for p_ref in (pad0_ref, pad_ref):
        C = p_ref.shape[-1]
        zrow = jnp.zeros((N, 1, W + 2, C), jnp.float32)
        zcol = jnp.zeros((N, H + 2, 1, C), jnp.float32)
        p_ref[:, 0:1, :, :] = zrow
        p_ref[:, H + 1:H + 2, :, :] = zrow
        p_ref[:, :, 0:1, :] = zcol
        p_ref[:, :, W + 1:W + 2, :] = zcol

    def conv_layer(p_ref, x4, w_ref, b_ref):
        # Per-tap accumulated matmuls: no lane-dim concatenate; each shifted
        # window keeps channels on the lane dim and feeds the MXU directly.
        C = p_ref.shape[-1]
        p_ref[:, 1:H + 1, 1:W + 1, :] = x4
        acc = jnp.zeros((N * HW, F), jnp.float32)
        for kh in range(3):
            for kw in range(3):
                win = p_ref[:, kh:kh + H, kw:kw + W, :].reshape(N * HW, C)
                acc = acc + jnp.dot(win, w_ref[3 * kh + kw],
                                    preferred_element_type=jnp.float32)
        return jnp.maximum(acc + b_ref[...], 0.0)       # (N*HW, F)

    a = conv_layer(pad0_ref, x_ref[...], w0_ref, b0_ref)
    a = conv_layer(pad_ref, a.reshape(N, H, W, F), w1_ref, b1_ref)
    a = conv_layer(pad_ref, a.reshape(N, H, W, F), w2_ref, b2_ref)
    # bf16 features for the bandwidth-bound heads (f32 accumulation there).
    feat_ref[...] = a.reshape(N, HW, F).astype(feat_ref.dtype)


def fused_conv_body(x_nhwc, w0, b0, w1, b1, w2, b2):
    N, H, W, Cin = x_nhwc.shape
    F = w0.shape[-1]
    vmem = pl.BlockSpec(memory_space=pltpu.MemorySpace.VMEM)
    return pl.pallas_call(
        fused_conv_kernel,
        out_shape=jax.ShapeDtypeStruct((N, H * W, F), jnp.bfloat16),
        in_specs=[vmem] * 7,
        out_specs=vmem,
        scratch_shapes=[
            pltpu.VMEM((N, H + 2, W + 2, Cin), jnp.float32),
            pltpu.VMEM((N, H + 2, W + 2, F), jnp.float32),
        ],
        compiler_params=pltpu.CompilerParams(vmem_limit_bytes=32 << 20),
    )(x_nhwc, w0, b0, w1, b1, w2, b2)


# --------------------------- Fused value+policy heads ------------------------
def fused_head_kernel(flat_ref, w1_ref, b1_ref, vo_w_ref, vo_b_ref,
                      po_w_ref, po_b_ref, policy_ref, value_ref, acc_ref):
    k = pl.program_id(0)

    @pl.when(k == 0)
    def _():
        acc_ref[...] = jnp.zeros_like(acc_ref)

    # Streamed bf16 K-tile of the fused (feat, 1024) hidden-layer weight;
    # f32 accumulation in VMEM scratch.
    acc_ref[...] += jnp.dot(flat_ref[...], w1_ref[...],
                            preferred_element_type=jnp.float32)

    @pl.when(k == pl.num_programs(0) - 1)
    def _():
        hidden = acc_ref.shape[1] // 2
        h = jnp.maximum(acc_ref[...] + b1_ref[...], 0.0)   # (N, 1024), ReLU
        h_v = h[:, :hidden]
        h_p = h[:, hidden:]

        v = jnp.dot(h_v, vo_w_ref[...], preferred_element_type=jnp.float32)
        value_ref[...] = jnp.tanh(v + vo_b_ref[...])

        logits = (jnp.dot(h_p, po_w_ref[...], preferred_element_type=jnp.float32)
                  + po_b_ref[...])
        m = jnp.max(logits, axis=1, keepdims=True)
        e = jnp.exp(logits - m)
        policy_ref[...] = e / jnp.sum(e, axis=1, keepdims=True)


def fused_heads(flat, w1c, b1c, vo_w, vo_b, po_w, po_b):
    N, feat = flat.shape
    two_h = w1c.shape[1]          # 2 * HIDDEN (value || policy)
    P = po_w.shape[1]
    tk = next((t for t in (2048, 1024, 512, 256, 128) if feat % t == 0), feat)
    kt = feat // tk

    cost = pl.CostEstimate(
        flops=2 * N * feat * two_h + 2 * N * (two_h // 2) * (1 + P),
        transcendentals=N * (1 + P),
        bytes_accessed=(2 * (feat * two_h + N * feat)             # bf16 streams
                        + 4 * ((two_h // 2) * (1 + P) + N * (1 + P) + two_h)),
    )
    return pl.pallas_call(
        fused_head_kernel,
        out_shape=(jax.ShapeDtypeStruct((N, P), jnp.float32),
                   jax.ShapeDtypeStruct((N, 1), jnp.float32)),
        grid=(kt,),
        in_specs=[
            pl.BlockSpec((N, tk), lambda k: (0, k)),        # bf16 features (K tile)
            pl.BlockSpec((tk, two_h), lambda k: (k, 0)),    # bf16 fused w1 (K tile)
            pl.BlockSpec((1, two_h), lambda k: (0, 0)),     # fused b1
            pl.BlockSpec(vo_w.shape, lambda k: (0, 0)),
            pl.BlockSpec((1, 1), lambda k: (0, 0)),
            pl.BlockSpec(po_w.shape, lambda k: (0, 0)),
            pl.BlockSpec((1, P), lambda k: (0, 0)),
        ],
        out_specs=(pl.BlockSpec((N, P), lambda k: (0, 0)),
                   pl.BlockSpec((N, 1), lambda k: (0, 0))),
        scratch_shapes=[pltpu.VMEM((N, two_h), jnp.float32)],
        compiler_params=pltpu.CompilerParams(
            dimension_semantics=("arbitrary",),
            vmem_limit_bytes=32 << 20),
        cost_estimate=cost,
    )(flat, w1c, b1c, vo_w, vo_b, po_w, po_b)


# ------------------------------- Parameters ----------------------------------
def make_params(key, input_shape, num_points):
    """'Torch-layout' params: conv weights HWIO, linear weights (in, out) with
    the `in` axis in PyTorch NCHW-flatten order (c*H*W + h*W + w)."""
    c_in, h, w = input_shape
    feat = NUM_FILTERS * h * w
    ks = jax.random.split(key, 7)

    def w_init(k, shape, scale=0.05):
        return scale * jax.random.normal(k, shape, dtype=jnp.float32)

    return dict(
        conv_in_w=w_init(ks[0], (3, 3, c_in, NUM_FILTERS)),
        conv_in_b=jnp.zeros((NUM_FILTERS,), jnp.float32),
        conv1_w=w_init(ks[1], (3, 3, NUM_FILTERS, NUM_FILTERS)),
        conv1_b=jnp.zeros((NUM_FILTERS,), jnp.float32),
        conv2_w=w_init(ks[2], (3, 3, NUM_FILTERS, NUM_FILTERS)),
        conv2_b=jnp.zeros((NUM_FILTERS,), jnp.float32),
        vh_w=w_init(ks[3], (feat, HIDDEN), 0.02),
        vh_b=jnp.zeros((HIDDEN,), jnp.float32),
        vo_w=w_init(ks[4], (HIDDEN, 1), 0.02),
        vo_b=jnp.zeros((1,), jnp.float32),
        ph_w=w_init(ks[5], (feat, HIDDEN), 0.02),
        ph_b=jnp.zeros((HIDDEN,), jnp.float32),
        po_w=w_init(ks[6], (HIDDEN, num_points), 0.02),
        po_b=jnp.zeros((num_points,), jnp.float32),
    )


def prepare_kernel_params(params, input_shape):
    """One-time host-side transforms: per-tap (9, Cin, Cout) conv-weight reshape,
    NCHW->NHWC row permutation of the head weights (removes the runtime
    transpose before flatten), value/policy hidden-layer fusion and bf16 cast
    of the bandwidth-dominant fused weight."""
    _, h, w = input_shape
    F = NUM_FILTERS

    def to_nhwc_rows(wm):
        out_dim = wm.shape[1]
        # row c*H*W + h*W + w  ->  row (h*W + w)*F + c
        return wm.reshape(F, h, w, out_dim).transpose(1, 2, 0, 3).reshape(-1, out_dim)

    w1c = jnp.concatenate([to_nhwc_rows(params["vh_w"]),
                           to_nhwc_rows(params["ph_w"])],
                          axis=1).astype(jnp.bfloat16)
    b1c = jnp.concatenate([params["vh_b"], params["ph_b"]]).reshape(1, -1)

    def per_tap(wm):          # HWIO (3,3,C,F) -> (9, C, F), tap = 3*kh + kw
        return wm.reshape(9, wm.shape[2], wm.shape[3])

    return dict(
        w0=per_tap(params["conv_in_w"]), b0=params["conv_in_b"].reshape(1, F),
        w1=per_tap(params["conv1_w"]),   b1=params["conv1_b"].reshape(1, F),
        w2=per_tap(params["conv2_w"]),   b2=params["conv2_b"].reshape(1, F),
        w1c=w1c, b1c=b1c,
        vo_w=params["vo_w"], vo_b=params["vo_b"].reshape(1, 1),
        po_w=params["po_w"], po_b=params["po_b"].reshape(1, -1),
    )


# ------------------------------- Full network --------------------------------
def simple5_forward(kp, x_nchw):
    # NCHW -> NHWC (channels on the lane dim for the conv kernel).
    x = jnp.transpose(x_nchw, (0, 2, 3, 1)).astype(jnp.float32)
    feat3 = fused_conv_body(x, kp["w0"], kp["b0"], kp["w1"], kp["b1"],
                            kp["w2"], kp["b2"])            # (N, H*W, F) bf16
    # Free (contiguous) reshape; NCHW-flatten equivalence is baked into w1c rows.
    flat = feat3.reshape(feat3.shape[0], -1)               # (N, F*H*W) bf16
    policy, value = fused_heads(flat, kp["w1c"], kp["b1c"],
                                kp["vo_w"], kp["vo_b"], kp["po_w"], kp["po_b"])
    return policy, value


if __name__ == "__main__":
    input_shape = (4, 8, 8)     # (C, H, W) -> conv_2_out_size = 64*8*8 = 4096
    num_points = 64
    batch = 2

    key = jax.random.PRNGKey(0)
    k_params, k_x = jax.random.split(key)
    params = make_params(k_params, input_shape, num_points)
    kparams = prepare_kernel_params(params, input_shape)
    x = jax.random.normal(k_x, (batch,) + input_shape, dtype=jnp.float32)

    fwd = jax.jit(simple5_forward)
    policy, value = jax.block_until_ready(fwd(kparams, x))

    assert policy.shape == (batch, num_points)
    assert value.shape == (batch, 1)
    assert bool(jnp.all(jnp.isfinite(policy))) and bool(jnp.all(jnp.isfinite(value)))
    assert bool(jnp.allclose(jnp.sum(policy, axis=1), 1.0, atol=1e-4))
    print("KERNEL_OK")
</pallas_src>

<mosaic_0001>
module attributes {stable_mosaic.version = 11 : i64} {
  func.func @fused_conv_kernel(%arg0: memref<2x8x8x4xf32, #tpu.memory_space<vmem>>, %arg1: memref<9x4x64xf32, #tpu.memory_space<vmem>>, %arg2: memref<1x64xf32, #tpu.memory_space<vmem>>, %arg3: memref<9x64x64xf32, #tpu.memory_space<vmem>>, %arg4: memref<1x64xf32, #tpu.memory_space<vmem>>, %arg5: memref<9x64x64xf32, #tpu.memory_space<vmem>>, %arg6: memref<1x64xf32, #tpu.memory_space<vmem>>, %arg7: memref<2x64x64xbf16, #tpu.memory_space<vmem>>, %arg8: memref<2x10x10x4xf32, #tpu.memory_space<vmem>>, %arg9: memref<2x10x10x64xf32, #tpu.memory_space<vmem>>) attributes {dimension_semantics = [], scalar_prefetch = 0 : i64, scratch_operands = 2 : i64, tpu.core_type = #tpu.core_type<tc>} {
    %cst = arith.constant 0.000000e+00 : f32
    %0 = vector.broadcast %cst : f32 to vector<2x1x10x4xf32>
    %cst_0 = arith.constant 0.000000e+00 : f32
    %1 = vector.broadcast %cst_0 : f32 to vector<2x10x1x4xf32>
    %c0 = arith.constant 0 : index
    %c0_1 = arith.constant 0 : index
    %c0_2 = arith.constant 0 : index
    %c0_3 = arith.constant 0 : index
    %2 = vector.load %arg8[%c0, %c0_1, %c0_2, %c0_3] : memref<2x10x10x4xf32, #tpu.memory_space<vmem>>, vector<2x1x10x4xf32>
    tpu.vector_store %arg8[%c0, %c0_1, %c0_2, %c0_3], %0 {strides = array<i32>} : memref<2x10x10x4xf32, #tpu.memory_space<vmem>>, vector<2x1x10x4xf32>,
    %c0_4 = arith.constant 0 : index
    %c9 = arith.constant 9 : index
    %c0_5 = arith.constant 0 : index
    %c0_6 = arith.constant 0 : index
    %3 = vector.load %arg8[%c0_4, %c9, %c0_5, %c0_6] : memref<2x10x10x4xf32, #tpu.memory_space<vmem>>, vector<2x1x10x4xf32>
    tpu.vector_store %arg8[%c0_4, %c9, %c0_5, %c0_6], %0 {strides = array<i32>} : memref<2x10x10x4xf32, #tpu.memory_space<vmem>>, vector<2x1x10x4xf32>,
    %c0_7 = arith.constant 0 : index
    %c0_8 = arith.constant 0 : index
    %c0_9 = arith.constant 0 : index
    %c0_10 = arith.constant 0 : index
    %4 = vector.load %arg8[%c0_7, %c0_8, %c0_9, %c0_10] : memref<2x10x10x4xf32, #tpu.memory_space<vmem>>, vector<2x10x1x4xf32>
    tpu.vector_store %arg8[%c0_7, %c0_8, %c0_9, %c0_10], %1 {strides = array<i32>} : memref<2x10x10x4xf32, #tpu.memory_space<vmem>>, vector<2x10x1x4xf32>,
    %c0_11 = arith.constant 0 : index
    %c0_12 = arith.constant 0 : index
    %c9_13 = arith.constant 9 : index
    %c0_14 = arith.constant 0 : index
    %5 = vector.load %arg8[%c0_11, %c0_12, %c9_13, %c0_14] : memref<2x10x10x4xf32, #tpu.memory_space<vmem>>, vector<2x10x1x4xf32>
    tpu.vector_store %arg8[%c0_11, %c0_12, %c9_13, %c0_14], %1 {strides = array<i32>} : memref<2x10x10x4xf32, #tpu.memory_space<vmem>>, vector<2x10x1x4xf32>,
    %cst_15 = arith.constant 0.000000e+00 : f32
    %6 = vector.broadcast %cst_15 : f32 to vector<2x1x10x64xf32>
    %cst_16 = arith.constant 0.000000e+00 : f32
    %7 = vector.broadcast %cst_16 : f32 to vector<2x10x1x64xf32>
    %c0_17 = arith.constant 0 : index
    %c0_18 = arith.constant 0 : index
    %c0_19 = arith.constant 0 : index
    %c0_20 = arith.constant 0 : index
    %8 = vector.load %arg9[%c0_17, %c0_18, %c0_19, %c0_20] : memref<2x10x10x64xf32, #tpu.memory_space<vmem>>, vector<2x1x10x64xf32>
    tpu.vector_store %arg9[%c0_17, %c0_18, %c0_19, %c0_20], %6 {strides = array<i32>} : memref<2x10x10x64xf32, #tpu.memory_space<vmem>>, vector<2x1x10x64xf32>,
    %c0_21 = arith.constant 0 : index
    %c9_22 = arith.constant 9 : index
    %c0_23 = arith.constant 0 : index
    %c0_24 = arith.constant 0 : index
    %9 = vector.load %arg9[%c0_21, %c9_22, %c0_23, %c0_24] : memref<2x10x10x64xf32, #tpu.memory_space<vmem>>, vector<2x1x10x64xf32>
    tpu.vector_store %arg9[%c0_21, %c9_22, %c0_23, %c0_24], %6 {strides = array<i32>} : memref<2x10x10x64xf32, #tpu.memory_space<vmem>>, vector<2x1x10x64xf32>,
    %c0_25 = arith.constant 0 : index
    %c0_26 = arith.constant 0 : index
    %c0_27 = arith.constant 0 : index
    %c0_28 = arith.constant 0 : index
    %10 = vector.load %arg9[%c0_25, %c0_26, %c0_27, %c0_28] : memref<2x10x10x64xf32, #tpu.memory_space<vmem>>, vector<2x10x1x64xf32>
    tpu.vector_store %arg9[%c0_25, %c0_26, %c0_27, %c0_28], %7 {strides = array<i32>} : memref<2x10x10x64xf32, #tpu.memory_space<vmem>>, vector<2x10x1x64xf32>,
    %c0_29 = arith.constant 0 : index
    %c0_30 = arith.constant 0 : index
    %c9_31 = arith.constant 9 : index
    %c0_32 = arith.constant 0 : index
    %11 = vector.load %arg9[%c0_29, %c0_30, %c9_31, %c0_32] : memref<2x10x10x64xf32, #tpu.memory_space<vmem>>, vector<2x10x1x64xf32>
    tpu.vector_store %arg9[%c0_29, %c0_30, %c9_31, %c0_32], %7 {strides = array<i32>} : memref<2x10x10x64xf32, #tpu.memory_space<vmem>>, vector<2x10x1x64xf32>,
    %c0_33 = arith.constant 0 : index
    %c0_34 = arith.constant 0 : index
    %c0_35 = arith.constant 0 : index
    %c0_36 = arith.constant 0 : index
    %12 = vector.load %arg0[%c0_33, %c0_34, %c0_35, %c0_36] : memref<2x8x8x4xf32, #tpu.memory_space<vmem>>, vector<2x8x8x4xf32>
    %c0_37 = arith.constant 0 : index
    %c1 = arith.constant 1 : index
    %c1_38 = arith.constant 1 : index
    %c0_39 = arith.constant 0 : index
    %13 = vector.load %arg8[%c0_37, %c1, %c1_38, %c0_39] : memref<2x10x10x4xf32, #tpu.memory_space<vmem>>, vector<2x8x8x4xf32>
    tpu.vector_store %arg8[%c0_37, %c1, %c1_38, %c0_39], %12 {strides = array<i32>} : memref<2x10x10x4xf32, #tpu.memory_space<vmem>>, vector<2x8x8x4xf32>,
    %cst_40 = arith.constant 0.000000e+00 : f32
    %14 = vector.broadcast %cst_40 : f32 to vector<128x64xf32>
    %c0_41 = arith.constant 0 : index
    %c0_42 = arith.constant 0 : index
    %c0_43 = arith.constant 0 : index
    %c0_44 = arith.constant 0 : index
    %15 = vector.load %arg8[%c0_41, %c0_42, %c0_43, %c0_44] : memref<2x10x10x4xf32, #tpu.memory_space<vmem>>, vector<2x8x8x4xf32>
    %16 = vector.shape_cast %15 : vector<2x8x8x4xf32> to vector<128x4xf32>
    %c0_45 = arith.constant 0 : index
    %c0_46 = arith.constant 0 : index
    %c0_47 = arith.constant 0 : index
    %17 = vector.load %arg1[%c0_45, %c0_46, %c0_47] : memref<9x4x64xf32, #tpu.memory_space<vmem>>, vector<1x4x64xf32>
    %18 = vector.shape_cast %17 : vector<1x4x64xf32> to vector<4x64xf32>
    %cst_48 = arith.constant dense<0.000000e+00> : vector<128x64xf32>
    %19 = tpu.matmul %16, %18, %cst_48 {dimension_numbers = #tpu.dot_dimension_numbers<[1], [0], [0], [1], [0, 0, 1, 1], [], []>} : vector<128x4xf32>, vector<4x64xf32>, vector<128x64xf32> -> vector<128x64xf32>
    %20 = arith.addf %14, %19 : vector<128x64xf32>
    %c0_49 = arith.constant 0 : index
    %c0_50 = arith.constant 0 : index
    %c1_51 = arith.constant 1 : index
    %c0_52 = arith.constant 0 : index
    %21 = vector.load %arg8[%c0_49, %c0_50, %c1_51, %c0_52] : memref<2x10x10x4xf32, #tpu.memory_space<vmem>>, vector<2x8x8x4xf32>
    %22 = vector.shape_cast %21 : vector<2x8x8x4xf32> to vector<128x4xf32>
    %c1_53 = arith.constant 1 : index
    %c0_54 = arith.constant 0 : index
    %c0_55 = arith.constant 0 : index
    %23 = vector.load %arg1[%c1_53, %c0_54, %c0_55] : memref<9x4x64xf32, #tpu.memory_space<vmem>>, vector<1x4x64xf32>
    %24 = vector.shape_cast %23 : vector<1x4x64xf32> to vector<4x64xf32>
    %cst_56 = arith.constant dense<0.000000e+00> : vector<128x64xf32>
    %25 = tpu.matmul %22, %24, %cst_56 {dimension_numbers = #tpu.dot_dimension_numbers<[1], [0], [0], [1], [0, 0, 1, 1], [], []>} : vector<128x4xf32>, vector<4x64xf32>, vector<128x64xf32> -> vector<128x64xf32>
    %26 = arith.addf %20, %25 : vector<128x64xf32>
    %c0_57 = arith.constant 0 : index
    %c0_58 = arith.constant 0 : index
    %c2 = arith.constant 2 : index
    %c0_59 = arith.constant 0 : index
    %27 = vector.load %arg8[%c0_57, %c0_58, %c2, %c0_59] : memref<2x10x10x4xf32, #tpu.memory_space<vmem>>, vector<2x8x8x4xf32>
    %28 = vector.shape_cast %27 : vector<2x8x8x4xf32> to vector<128x4xf32>
    %c2_60 = arith.constant 2 : index
    %c0_61 = arith.constant 0 : index
    %c0_62 = arith.constant 0 : index
    %29 = vector.load %arg1[%c2_60, %c0_61, %c0_62] : memref<9x4x64xf32, #tpu.memory_space<vmem>>, vector<1x4x64xf32>
    %30 = vector.shape_cast %29 : vector<1x4x64xf32> to vector<4x64xf32>
    %cst_63 = arith.constant dense<0.000000e+00> : vector<128x64xf32>
    %31 = tpu.matmul %28, %30, %cst_63 {dimension_numbers = #tpu.dot_dimension_numbers<[1], [0], [0], [1], [0, 0, 1, 1], [], []>} : vector<128x4xf32>, vector<4x64xf32>, vector<128x64xf32> -> vector<128x64xf32>
    %32 = arith.addf %26, %31 : vector<128x64xf32>
    %c0_64 = arith.constant 0 : index
    %c1_65 = arith.constant 1 : index
    %c0_66 = arith.constant 0 : index
    %c0_67 = arith.constant 0 : index
    %33 = vector.load %arg8[%c0_64, %c1_65, %c0_66, %c0_67] : memref<2x10x10x4xf32, #tpu.memory_space<vmem>>, vector<2x8x8x4xf32>
    %34 = vector.shape_cast %33 : vector<2x8x8x4xf32> to vector<128x4xf32>
    %c3 = arith.constant 3 : index
    %c0_68 = arith.constant 0 : index
    %c0_69 = arith.constant 0 : index
    %35 = vector.load %arg1[%c3, %c0_68, %c0_69] : memref<9x4x64xf32, #tpu.memory_space<vmem>>, vector<1x4x64xf32>
    %36 = vector.shape_cast %35 : vector<1x4x64xf32> to vector<4x64xf32>
    %cst_70 = arith.constant dense<0.000000e+00> : vector<128x64xf32>
    %37 = tpu.matmul %34, %36, %cst_70 {dimension_numbers = #tpu.dot_dimension_numbers<[1], [0], [0], [1], [0, 0, 1, 1], [], []>} : vector<128x4xf32>, vector<4x64xf32>, vector<128x64xf32> -> vector<128x64xf32>
    %38 = arith.addf %32, %37 : vector<128x64xf32>
    %c0_71 = arith.constant 0 : index
    %c1_72 = arith.constant 1 : index
    %c1_73 = arith.constant 1 : index
    %c0_74 = arith.constant 0 : index
    %39 = vector.load %arg8[%c0_71, %c1_72, %c1_73, %c0_74] : memref<2x10x10x4xf32, #tpu.memory_space<vmem>>, vector<2x8x8x4xf32>
    %40 = vector.shape_cast %39 : vector<2x8x8x4xf32> to vector<128x4xf32>
    %c4 = arith.constant 4 : index
    %c0_75 = arith.constant 0 : index
    %c0_76 = arith.constant 0 : index
    %41 = vector.load %arg1[%c4, %c0_75, %c0_76] : memref<9x4x64xf32, #tpu.memory_space<vmem>>, vector<1x4x64xf32>
    %42 = vector.shape_cast %41 : vector<1x4x64xf32> to vector<4x64xf32>
    %cst_77 = arith.constant dense<0.000000e+00> : vector<128x64xf32>
    %43 = tpu.matmul %40, %42, %cst_77 {dimension_numbers = #tpu.dot_dimension_numbers<[1], [0], [0], [1], [0, 0, 1, 1], [], []>} : vector<128x4xf32>, vector<4x64xf32>, vector<128x64xf32> -> vector<128x64xf32>
    %44 = arith.addf %38, %43 : vector<128x64xf32>
    %c0_78 = arith.constant 0 : index
    %c1_79 = arith.constant 1 : index
    %c2_80 = arith.constant 2 : index
    %c0_81 = arith.constant 0 : index
    %45 = vector.load %arg8[%c0_78, %c1_79, %c2_80, %c0_81] : memref<2x10x10x4xf32, #tpu.memory_space<vmem>>, vector<2x8x8x4xf32>
    %46 = vector.shape_cast %45 : vector<2x8x8x4xf32> to vector<128x4xf32>
    %c5 = arith.constant 5 : index
    %c0_82 = arith.constant 0 : index
    %c0_83 = arith.constant 0 : index
    %47 = vector.load %arg1[%c5, %c0_82, %c0_83] : memref<9x4x64xf32, #tpu.memory_space<vmem>>, vector<1x4x64xf32>
    %48 = vector.shape_cast %47 : vector<1x4x64xf32> to vector<4x64xf32>
    %cst_84 = arith.constant dense<0.000000e+00> : vector<128x64xf32>
    %49 = tpu.matmul %46, %48, %cst_84 {dimension_numbers = #tpu.dot_dimension_numbers<[1], [0], [0], [1], [0, 0, 1, 1], [], []>} : vector<128x4xf32>, vector<4x64xf32>, vector<128x64xf32> -> vector<128x64xf32>
    %50 = arith.addf %44, %49 : vector<128x64xf32>
    %c0_85 = arith.constant 0 : index
    %c2_86 = arith.constant 2 : index
    %c0_87 = arith.constant 0 : index
    %c0_88 = arith.constant 0 : index
    %51 = vector.load %arg8[%c0_85, %c2_86, %c0_87, %c0_88] : memref<2x10x10x4xf32, #tpu.memory_space<vmem>>, vector<2x8x8x4xf32>
    %52 = vector.shape_cast %51 : vector<2x8x8x4xf32> to vector<128x4xf32>
    %c6 = arith.constant 6 : index
    %c0_89 = arith.constant 0 : index
    %c0_90 = arith.constant 0 : index
    %53 = vector.load %arg1[%c6, %c0_89, %c0_90] : memref<9x4x64xf32, #tpu.memory_space<vmem>>, vector<1x4x64xf32>
    %54 = vector.shape_cast %53 : vector<1x4x64xf32> to vector<4x64xf32>
    %cst_91 = arith.constant dense<0.000000e+00> : vector<128x64xf32>
    %55 = tpu.matmul %52, %54, %cst_91 {dimension_numbers = #tpu.dot_dimension_numbers<[1], [0], [0], [1], [0, 0, 1, 1], [], []>} : vector<128x4xf32>, vector<4x64xf32>, vector<128x64xf32> -> vector<128x64xf32>
    %56 = arith.addf %50, %55 : vector<128x64xf32>
    %c0_92 = arith.constant 0 : index
    %c2_93 = arith.constant 2 : index
    %c1_94 = arith.constant 1 : index
    %c0_95 = arith.constant 0 : index
    %57 = vector.load %arg8[%c0_92, %c2_93, %c1_94, %c0_95] : memref<2x10x10x4xf32, #tpu.memory_space<vmem>>, vector<2x8x8x4xf32>
    %58 = vector.shape_cast %57 : vector<2x8x8x4xf32> to vector<128x4xf32>
    %c7 = arith.constant 7 : index
    %c0_96 = arith.constant 0 : index
    %c0_97 = arith.constant 0 : index
    %59 = vector.load %arg1[%c7, %c0_96, %c0_97] : memref<9x4x64xf32, #tpu.memory_space<vmem>>, vector<1x4x64xf32>
    %60 = vector.shape_cast %59 : vector<1x4x64xf32> to vector<4x64xf32>
    %cst_98 = arith.constant dense<0.000000e+00> : vector<128x64xf32>
    %61 = tpu.matmul %58, %60, %cst_98 {dimension_numbers = #tpu.dot_dimension_numbers<[1], [0], [0], [1], [0, 0, 1, 1], [], []>} : vector<128x4xf32>, vector<4x64xf32>, vector<128x64xf32> -> vector<128x64xf32>
    %62 = arith.addf %56, %61 : vector<128x64xf32>
    %c0_99 = arith.constant 0 : index
    %c2_100 = arith.constant 2 : index
    %c2_101 = arith.constant 2 : index
    %c0_102 = arith.constant 0 : index
    %63 = vector.load %arg8[%c0_99, %c2_100, %c2_101, %c0_102] : memref<2x10x10x4xf32, #tpu.memory_space<vmem>>, vector<2x8x8x4xf32>
    %64 = vector.shape_cast %63 : vector<2x8x8x4xf32> to vector<128x4xf32>
    %c8 = arith.constant 8 : index
    %c0_103 = arith.constant 0 : index
    %c0_104 = arith.constant 0 : index
    %65 = vector.load %arg1[%c8, %c0_103, %c0_104] : memref<9x4x64xf32, #tpu.memory_space<vmem>>, vector<1x4x64xf32>
    %66 = vector.shape_cast %65 : vector<1x4x64xf32> to vector<4x64xf32>
    %cst_105 = arith.constant dense<0.000000e+00> : vector<128x64xf32>
    %67 = tpu.matmul %64, %66, %cst_105 {dimension_numbers = #tpu.dot_dimension_numbers<[1], [0], [0], [1], [0, 0, 1, 1], [], []>} : vector<128x4xf32>, vector<4x64xf32>, vector<128x64xf32> -> vector<128x64xf32>
    %68 = arith.addf %62, %67 : vector<128x64xf32>
    %c0_106 = arith.constant 0 : index
    %c0_107 = arith.constant 0 : index
    %69 = vector.load %arg2[%c0_106, %c0_107] : memref<1x64xf32, #tpu.memory_space<vmem>>, vector<1x64xf32>
    %70 = vector.broadcast %69 : vector<1x64xf32> to vector<128x64xf32>
    %71 = arith.addf %68, %70 : vector<128x64xf32>
    %cst_108 = arith.constant 0.000000e+00 : f32
    %72 = vector.broadcast %cst_108 : f32 to vector<128x64xf32>
    %73 = arith.maximumf %71, %72 : vector<128x64xf32>
    %74 = vector.shape_cast %73 : vector<128x64xf32> to vector<2x8x8x64xf32>
    %c0_109 = arith.constant 0 : index
    %c1_110 = arith.constant 1 : index
    %c1_111 = arith.constant 1 : index
    %c0_112 = arith.constant 0 : index
    %75 = vector.load %arg9[%c0_109, %c1_110, %c1_111, %c0_112] : memref<2x10x10x64xf32, #tpu.memory_space<vmem>>, vector<2x8x8x64xf32>
    tpu.vector_store %arg9[%c0_109, %c1_110, %c1_111, %c0_112], %74 {strides = array<i32>} : memref<2x10x10x64xf32, #tpu.memory_space<vmem>>, vector<2x8x8x64xf32>,
    %cst_113 = arith.constant 0.000000e+00 : f32
    %76 = vector.broadcast %cst_113 : f32 to vector<128x64xf32>
    %c0_114 = arith.constant 0 : index
    %c0_115 = arith.constant 0 : index
    %c0_116 = arith.constant 0 : index
    %c0_117 = arith.constant 0 : index
    %77 = vector.load %arg9[%c0_114, %c0_115, %c0_116, %c0_117] : memref<2x10x10x64xf32, #tpu.memory_space<vmem>>, vector<2x8x8x64xf32>
    %78 = vector.shape_cast %77 : vector<2x8x8x64xf32> to vector<128x64xf32>
    %c0_118 = arith.constant 0 : index
    %c0_119 = arith.constant 0 : index
    %c0_120 = arith.constant 0 : index
    %79 = vector.load %arg3[%c0_118, %c0_119, %c0_120] : memref<9x64x64xf32, #tpu.memory_space<vmem>>, vector<1x64x64xf32>
    %80 = vector.shape_cast %79 : vector<1x64x64xf32> to vector<64x64xf32>
    %cst_121 = arith.constant dense<0.000000e+00> : vector<128x64xf32>
    %81 = tpu.matmul %78, %80, %cst_121 {dimension_numbers = #tpu.dot_dimension_numbers<[1], [0], [0], [1], [0, 0, 1, 1], [], []>} : vector<128x64xf32>, vector<64x64xf32>, vector<128x64xf32> -> vector<128x64xf32>
    %82 = arith.addf %76, %81 : vector<128x64xf32>
    %c0_122 = arith.constant 0 : index
    %c0_123 = arith.constant 0 : index
    %c1_124 = arith.constant 1 : index
    %c0_125 = arith.constant 0 : index
    %83 = vector.load %arg9[%c0_122, %c0_123, %c1_124, %c0_125] : memref<2x10x10x64xf32, #tpu.memory_space<vmem>>, vector<2x8x8x64xf32>
    %84 = vector.shape_cast %83 : vector<2x8x8x64xf32> to vector<128x64xf32>
    %c1_126 = arith.constant 1 : index
    %c0_127 = arith.constant 0 : index
    %c0_128 = arith.constant 0 : index
    %85 = vector.load %arg3[%c1_126, %c0_127, %c0_128] : memref<9x64x64xf32, #tpu.memory_space<vmem>>, vector<1x64x64xf32>
    %86 = vector.shape_cast %85 : vector<1x64x64xf32> to vector<64x64xf32>
    %cst_129 = arith.constant dense<0.000000e+00> : vector<128x64xf32>
    %87 = tpu.matmul %84, %86, %cst_129 {dimension_numbers = #tpu.dot_dimension_numbers<[1], [0], [0], [1], [0, 0, 1, 1], [], []>} : vector<128x64xf32>, vector<64x64xf32>, vector<128x64xf32> -> vector<128x64xf32>
    %88 = arith.addf %82, %87 : vector<128x64xf32>
    %c0_130 = arith.constant 0 : index
    %c0_131 = arith.constant 0 : index
    %c2_132 = arith.constant 2 : index
    %c0_133 = arith.constant 0 : index
    %89 = vector.load %arg9[%c0_130, %c0_131, %c2_132, %c0_133] : memref<2x10x10x64xf32, #tpu.memory_space<vmem>>, vector<2x8x8x64xf32>
    %90 = vector.shape_cast %89 : vector<2x8x8x64xf32> to vector<128x64xf32>
    %c2_134 = arith.constant 2 : index
    %c0_135 = arith.constant 0 : index
    %c0_136 = arith.constant 0 : index
    %91 = vector.load %arg3[%c2_134, %c0_135, %c0_136] : memref<9x64x64xf32, #tpu.memory_space<vmem>>, vector<1x64x64xf32>
    %92 = vector.shape_cast %91 : vector<1x64x64xf32> to vector<64x64xf32>
    %cst_137 = arith.constant dense<0.000000e+00> : vector<128x64xf32>
    %93 = tpu.matmul %90, %92, %cst_137 {dimension_numbers = #tpu.dot_dimension_numbers<[1], [0], [0], [1], [0, 0, 1, 1], [], []>} : vector<128x64xf32>, vector<64x64xf32>, vector<128x64xf32> -> vector<128x64xf32>
    %94 = arith.addf %88, %93 : vector<128x64xf32>
    %c0_138 = arith.constant 0 : index
    %c1_139 = arith.constant 1 : index
    %c0_140 = arith.constant 0 : index
    %c0_141 = arith.constant 0 : index
    %95 = vector.load %arg9[%c0_138, %c1_139, %c0_140, %c0_141] : memref<2x10x10x64xf32, #tpu.memory_space<vmem>>, vector<2x8x8x64xf32>
    %96 = vector.shape_cast %95 : vector<2x8x8x64xf32> to vector<128x64xf32>
    %c3_142 = arith.constant 3 : index
    %c0_143 = arith.constant 0 : index
    %c0_144 = arith.constant 0 : index
    %97 = vector.load %arg3[%c3_142, %c0_143, %c0_144] : memref<9x64x64xf32, #tpu.memory_space<vmem>>, vector<1x64x64xf32>
    %98 = vector.shape_cast %97 : vector<1x64x64xf32> to vector<64x64xf32>
    %cst_145 = arith.constant dense<0.000000e+00> : vector<128x64xf32>
    %99 = tpu.matmul %96, %98, %cst_145 {dimension_numbers = #tpu.dot_dimension_numbers<[1], [0], [0], [1], [0, 0, 1, 1], [], []>} : vector<128x64xf32>, vector<64x64xf32>, vector<128x64xf32> -> vector<128x64xf32>
    %100 = arith.addf %94, %99 : vector<128x64xf32>
    %c0_146 = arith.constant 0 : index
    %c1_147 = arith.constant 1 : index
    %c1_148 = arith.constant 1 : index
    %c0_149 = arith.constant 0 : index
    %101 = vector.load %arg9[%c0_146, %c1_147, %c1_148, %c0_149] : memref<2x10x10x64xf32, #tpu.memory_space<vmem>>, vector<2x8x8x64xf32>
    %102 = vector.shape_cast %101 : vector<2x8x8x64xf32> to vector<128x64xf32>
    %c4_150 = arith.constant 4 : index
    %c0_151 = arith.constant 0 : index
    %c0_152 = arith.constant 0 : index
    %103 = vector.load %arg3[%c4_150, %c0_151, %c0_152] : memref<9x64x64xf32, #tpu.memory_space<vmem>>, vector<1x64x64xf32>
    %104 = vector.shape_cast %103 : vector<1x64x64xf32> to vector<64x64xf32>
    %cst_153 = arith.constant dense<0.000000e+00> : vector<128x64xf32>
    %105 = tpu.matmul %102, %104, %cst_153 {dimension_numbers = #tpu.dot_dimension_numbers<[1], [0], [0], [1], [0, 0, 1, 1], [], []>} : vector<128x64xf32>, vector<64x64xf32>, vector<128x64xf32> -> vector<128x64xf32>
    %106 = arith.addf %100, %105 : vector<128x64xf32>
    %c0_154 = arith.constant 0 : index
    %c1_155 = arith.constant 1 : index
    %c2_156 = arith.constant 2 : index
    %c0_157 = arith.constant 0 : index
    %107 = vector.load %arg9[%c0_154, %c1_155, %c2_156, %c0_157] : memref<2x10x10x64xf32, #tpu.memory_space<vmem>>, vector<2x8x8x64xf32>
    %108 = vector.shape_cast %107 : vector<2x8x8x64xf32> to vector<128x64xf32>
    %c5_158 = arith.constant 5 : index
    %c0_159 = arith.constant 0 : index
    %c0_160 = arith.constant 0 : index
    %109 = vector.load %arg3[%c5_158, %c0_159, %c0_160] : memref<9x64x64xf32, #tpu.memory_space<vmem>>, vector<1x64x64xf32>
    %110 = vector.shape_cast %109 : vector<1x64x64xf32> to vector<64x64xf32>
    %cst_161 = arith.constant dense<0.000000e+00> : vector<128x64xf32>
    %111 = tpu.matmul %108, %110, %cst_161 {dimension_numbers = #tpu.dot_dimension_numbers<[1], [0], [0], [1], [0, 0, 1, 1], [], []>} : vector<128x64xf32>, vector<64x64xf32>, vector<128x64xf32> -> vector<128x64xf32>
    %112 = arith.addf %106, %111 : vector<128x64xf32>
    %c0_162 = arith.constant 0 : index
    %c2_163 = arith.constant 2 : index
    %c0_164 = arith.constant 0 : index
    %c0_165 = arith.constant 0 : index
    %113 = vector.load %arg9[%c0_162, %c2_163, %c0_164, %c0_165] : memref<2x10x10x64xf32, #tpu.memory_space<vmem>>, vector<2x8x8x64xf32>
    %114 = vector.shape_cast %113 : vector<2x8x8x64xf32> to vector<128x64xf32>
    %c6_166 = arith.constant 6 : index
    %c0_167 = arith.constant 0 : index
    %c0_168 = arith.constant 0 : index
    %115 = vector.load %arg3[%c6_166, %c0_167, %c0_168] : memref<9x64x64xf32, #tpu.memory_space<vmem>>, vector<1x64x64xf32>
    %116 = vector.shape_cast %115 : vector<1x64x64xf32> to vector<64x64xf32>
    %cst_169 = arith.constant dense<0.000000e+00> : vector<128x64xf32>
    %117 = tpu.matmul %114, %116, %cst_169 {dimension_numbers = #tpu.dot_dimension_numbers<[1], [0], [0], [1], [0, 0, 1, 1], [], []>} : vector<128x64xf32>, vector<64x64xf32>, vector<128x64xf32> -> vector<128x64xf32>
    %118 = arith.addf %112, %117 : vector<128x64xf32>
    %c0_170 = arith.constant 0 : index
    %c2_171 = arith.constant 2 : index
    %c1_172 = arith.constant 1 : index
    %c0_173 = arith.constant 0 : index
    %119 = vector.load %arg9[%c0_170, %c2_171, %c1_172, %c0_173] : memref<2x10x10x64xf32, #tpu.memory_space<vmem>>, vector<2x8x8x64xf32>
    %120 = vector.shape_cast %119 : vector<2x8x8x64xf32> to vector<128x64xf32>
    %c7_174 = arith.constant 7 : index
    %c0_175 = arith.constant 0 : index
    %c0_176 = arith.constant 0 : index
    %121 = vector.load %arg3[%c7_174, %c0_175, %c0_176] : memref<9x64x64xf32, #tpu.memory_space<vmem>>, vector<1x64x64xf32>
    %122 = vector.shape_cast %121 : vector<1x64x64xf32> to vector<64x64xf32>
    %cst_177 = arith.constant dense<0.000000e+00> : vector<128x64xf32>
    %123 = tpu.matmul %120, %122, %cst_177 {dimension_numbers = #tpu.dot_dimension_numbers<[1], [0], [0], [1], [0, 0, 1, 1], [], []>} : vector<128x64xf32>, vector<64x64xf32>, vector<128x64xf32> -> vector<128x64xf32>
    %124 = arith.addf %118, %123 : vector<128x64xf32>
    %c0_178 = arith.constant 0 : index
    %c2_179 = arith.constant 2 : index
    %c2_180 = arith.constant 2 : index
    %c0_181 = arith.constant 0 : index
    %125 = vector.load %arg9[%c0_178, %c2_179, %c2_180, %c0_181] : memref<2x10x10x64xf32, #tpu.memory_space<vmem>>, vector<2x8x8x64xf32>
    %126 = vector.shape_cast %125 : vector<2x8x8x64xf32> to vector<128x64xf32>
    %c8_182 = arith.constant 8 : index
    %c0_183 = arith.constant 0 : index
    %c0_184 = arith.constant 0 : index
    %127 = vector.load %arg3[%c8_182, %c0_183, %c0_184] : memref<9x64x64xf32, #tpu.memory_space<vmem>>, vector<1x64x64xf32>
    %128 = vector.shape_cast %127 : vector<1x64x64xf32> to vector<64x64xf32>
    %cst_185 = arith.constant dense<0.000000e+00> : vector<128x64xf32>
    %129 = tpu.matmul %126, %128, %cst_185 {dimension_numbers = #tpu.dot_dimension_numbers<[1], [0], [0], [1], [0, 0, 1, 1], [], []>} : vector<128x64xf32>, vector<64x64xf32>, vector<128x64xf32> -> vector<128x64xf32>
    %130 = arith.addf %124, %129 : vector<128x64xf32>
    %c0_186 = arith.constant 0 : index
    %c0_187 = arith.constant 0 : index
    %131 = vector.load %arg4[%c0_186, %c0_187] : memref<1x64xf32, #tpu.memory_space<vmem>>, vector<1x64xf32>
    %132 = vector.broadcast %131 : vector<1x64xf32> to vector<128x64xf32>
    %133 = arith.addf %130, %132 : vector<128x64xf32>
    %cst_188 = arith.constant 0.000000e+00 : f32
    %134 = vector.broadcast %cst_188 : f32 to vector<128x64xf32>
    %135 = arith.maximumf %133, %134 : vector<128x64xf32>
    %136 = vector.shape_cast %135 : vector<128x64xf32> to vector<2x8x8x64xf32>
    %c0_189 = arith.constant 0 : index
    %c1_190 = arith.constant 1 : index
    %c1_191 = arith.constant 1 : index
    %c0_192 = arith.constant 0 : index
    %137 = vector.load %arg9[%c0_189, %c1_190, %c1_191, %c0_192] : memref<2x10x10x64xf32, #tpu.memory_space<vmem>>, vector<2x8x8x64xf32>
    tpu.vector_store %arg9[%c0_189, %c1_190, %c1_191, %c0_192], %136 {strides = array<i32>} : memref<2x10x10x64xf32, #tpu.memory_space<vmem>>, vector<2x8x8x64xf32>,
    %cst_193 = arith.constant 0.000000e+00 : f32
    %138 = vector.broadcast %cst_193 : f32 to vector<128x64xf32>
    %c0_194 = arith.constant 0 : index
    %c0_195 = arith.constant 0 : index
    %c0_196 = arith.constant 0 : index
    %c0_197 = arith.constant 0 : index
    %139 = vector.load %arg9[%c0_194, %c0_195, %c0_196, %c0_197] : memref<2x10x10x64xf32, #tpu.memory_space<vmem>>, vector<2x8x8x64xf32>
    %140 = vector.shape_cast %139 : vector<2x8x8x64xf32> to vector<128x64xf32>
    %c0_198 = arith.constant 0 : index
    %c0_199 = arith.constant 0 : index
    %c0_200 = arith.constant 0 : index
    %141 = vector.load %arg5[%c0_198, %c0_199, %c0_200] : memref<9x64x64xf32, #tpu.memory_space<vmem>>, vector<1x64x64xf32>
    %142 = vector.shape_cast %141 : vector<1x64x64xf32> to vector<64x64xf32>
    %cst_201 = arith.constant dense<0.000000e+00> : vector<128x64xf32>
    %143 = tpu.matmul %140, %142, %cst_201 {dimension_numbers = #tpu.dot_dimension_numbers<[1], [0], [0], [1], [0, 0, 1, 1], [], []>} : vector<128x64xf32>, vector<64x64xf32>, vector<128x64xf32> -> vector<128x64xf32>
    %144 = arith.addf %138, %143 : vector<128x64xf32>
    %c0_202 = arith.constant 0 : index
    %c0_203 = arith.constant 0 : index
    %c1_204 = arith.constant 1 : index
    %c0_205 = arith.constant 0 : index
    %145 = vector.load %arg9[%c0_202, %c0_203, %c1_204, %c0_205] : memref<2x10x10x64xf32, #tpu.memory_space<vmem>>, vector<2x8x8x64xf32>
    %146 = vector.shape_cast %145 : vector<2x8x8x64xf32> to vector<128x64xf32>
    %c1_206 = arith.constant 1 : index
    %c0_207 = arith.constant 0 : index
    %c0_208 = arith.constant 0 : index
    %147 = vector.load %arg5[%c1_206, %c0_207, %c0_208] : memref<9x64x64xf32, #tpu.memory_space<vmem>>, vector<1x64x64xf32>
    %148 = vector.shape_cast %147 : vector<1x64x64xf32> to vector<64x64xf32>
    %cst_209 = arith.constant dense<0.000000e+00> : vector<128x64xf32>
    %149 = tpu.matmul %146, %148, %cst_209 {dimension_numbers = #tpu.dot_dimension_numbers<[1], [0], [0], [1], [0, 0, 1, 1], [], []>} : vector<128x64xf32>, vector<64x64xf32>, vector<128x64xf32> -> vector<128x64xf32>
    %150 = arith.addf %144, %149 : vector<128x64xf32>
    %c0_210 = arith.constant 0 : index
    %c0_211 = arith.constant 0 : index
    %c2_212 = arith.constant 2 : index
    %c0_213 = arith.constant 0 : index
    %151 = vector.load %arg9[%c0_210, %c0_211, %c2_212, %c0_213] : memref<2x10x10x64xf32, #tpu.memory_space<vmem>>, vector<2x8x8x64xf32>
    %152 = vector.shape_cast %151 : vector<2x8x8x64xf32> to vector<128x64xf32>
    %c2_214 = arith.constant 2 : index
    %c0_215 = arith.constant 0 : index
    %c0_216 = arith.constant 0 : index
    %153 = vector.load %arg5[%c2_214, %c0_215, %c0_216] : memref<9x64x64xf32, #tpu.memory_space<vmem>>, vector<1x64x64xf32>
    %154 = vector.shape_cast %153 : vector<1x64x64xf32> to vector<64x64xf32>
    %cst_217 = arith.constant dense<0.000000e+00> : vector<128x64xf32>
    %155 = tpu.matmul %152, %154, %cst_217 {dimension_numbers = #tpu.dot_dimension_numbers<[1], [0], [0], [1], [0, 0, 1, 1], [], []>} : vector<128x64xf32>, vector<64x64xf32>, vector<128x64xf32> -> vector<128x64xf32>
    %156 = arith.addf %150, %155 : vector<128x64xf32>
    %c0_218 = arith.constant 0 : index
    %c1_219 = arith.constant 1 : index
    %c0_220 = arith.constant 0 : index
    %c0_221 = arith.constant 0 : index
    %157 = vector.load %arg9[%c0_218, %c1_219, %c0_220, %c0_221] : memref<2x10x10x64xf32, #tpu.memory_space<vmem>>, vector<2x8x8x64xf32>
    %158 = vector.shape_cast %157 : vector<2x8x8x64xf32> to vector<128x64xf32>
    %c3_222 = arith.constant 3 : index
    %c0_223 = arith.constant 0 : index
    %c0_224 = arith.constant 0 : index
    %159 = vector.load %arg5[%c3_222, %c0_223, %c0_224] : memref<9x64x64xf32, #tpu.memory_space<vmem>>, vector<1x64x64xf32>
    %160 = vector.shape_cast %159 : vector<1x64x64xf32> to vector<64x64xf32>
    %cst_225 = arith.constant dense<0.000000e+00> : vector<128x64xf32>
    %161 = tpu.matmul %158, %160, %cst_225 {dimension_numbers = #tpu.dot_dimension_numbers<[1], [0], [0], [1], [0, 0, 1, 1], [], []>} : vector<128x64xf32>, vector<64x64xf32>, vector<128x64xf32> -> vector<128x64xf32>
    %162 = arith.addf %156, %161 : vector<128x64xf32>
    %c0_226 = arith.constant 0 : index
    %c1_227 = arith.constant 1 : index
    %c1_228 = arith.constant 1 : index
    %c0_229 = arith.constant 0 : index
    %163 = vector.load %arg9[%c0_226, %c1_227, %c1_228, %c0_229] : memref<2x10x10x64xf32, #tpu.memory_space<vmem>>, vector<2x8x8x64xf32>
    %164 = vector.shape_cast %163 : vector<2x8x8x64xf32> to vector<128x64xf32>
    %c4_230 = arith.constant 4 : index
    %c0_231 = arith.constant 0 : index
    %c0_232 = arith.constant 0 : index
    %165 = vector.load %arg5[%c4_230, %c0_231, %c0_232] : memref<9x64x64xf32, #tpu.memory_space<vmem>>, vector<1x64x64xf32>
    %166 = vector.shape_cast %165 : vector<1x64x64xf32> to vector<64x64xf32>
    %cst_233 = arith.constant dense<0.000000e+00> : vector<128x64xf32>
    %167 = tpu.matmul %164, %166, %cst_233 {dimension_numbers = #tpu.dot_dimension_numbers<[1], [0], [0], [1], [0, 0, 1, 1], [], []>} : vector<128x64xf32>, vector<64x64xf32>, vector<128x64xf32> -> vector<128x64xf32>
    %168 = arith.addf %162, %167 : vector<128x64xf32>
    %c0_234 = arith.constant 0 : index
    %c1_235 = arith.constant 1 : index
    %c2_236 = arith.constant 2 : index
    %c0_237 = arith.constant 0 : index
    %169 = vector.load %arg9[%c0_234, %c1_235, %c2_236, %c0_237] : memref<2x10x10x64xf32, #tpu.memory_space<vmem>>, vector<2x8x8x64xf32>
    %170 = vector.shape_cast %169 : vector<2x8x8x64xf32> to vector<128x64xf32>
    %c5_238 = arith.constant 5 : index
    %c0_239 = arith.constant 0 : index
    %c0_240 = arith.constant 0 : index
    %171 = vector.load %arg5[%c5_238, %c0_239, %c0_240] : memref<9x64x64xf32, #tpu.memory_space<vmem>>, vector<1x64x64xf32>
    %172 = vector.shape_cast %171 : vector<1x64x64xf32> to vector<64x64xf32>
    %cst_241 = arith.constant dense<0.000000e+00> : vector<128x64xf32>
    %173 = tpu.matmul %170, %172, %cst_241 {dimension_numbers = #tpu.dot_dimension_numbers<[1], [0], [0], [1], [0, 0, 1, 1], [], []>} : vector<128x64xf32>, vector<64x64xf32>, vector<128x64xf32> -> vector<128x64xf32>
    %174 = arith.addf %168, %173 : vector<128x64xf32>
    %c0_242 = arith.constant 0 : index
    %c2_243 = arith.constant 2 : index
    %c0_244 = arith.constant 0 : index
    %c0_245 = arith.constant 0 : index
    %175 = vector.load %arg9[%c0_242, %c2_243, %c0_244, %c0_245] : memref<2x10x10x64xf32, #tpu.memory_space<vmem>>, vector<2x8x8x64xf32>
    %176 = vector.shape_cast %175 : vector<2x8x8x64xf32> to vector<128x64xf32>
    %c6_246 = arith.constant 6 : index
    %c0_247 = arith.constant 0 : index
    %c0_248 = arith.constant 0 : index
    %177 = vector.load %arg5[%c6_246, %c0_247, %c0_248] : memref<9x64x64xf32, #tpu.memory_space<vmem>>, vector<1x64x64xf32>
    %178 = vector.shape_cast %177 : vector<1x64x64xf32> to vector<64x64xf32>
    %cst_249 = arith.constant dense<0.000000e+00> : vector<128x64xf32>
    %179 = tpu.matmul %176, %178, %cst_249 {dimension_numbers = #tpu.dot_dimension_numbers<[1], [0], [0], [1], [0, 0, 1, 1], [], []>} : vector<128x64xf32>, vector<64x64xf32>, vector<128x64xf32> -> vector<128x64xf32>
    %180 = arith.addf %174, %179 : vector<128x64xf32>
    %c0_250 = arith.constant 0 : index
    %c2_251 = arith.constant 2 : index
    %c1_252 = arith.constant 1 : index
    %c0_253 = arith.constant 0 : index
    %181 = vector.load %arg9[%c0_250, %c2_251, %c1_252, %c0_253] : memref<2x10x10x64xf32, #tpu.memory_space<vmem>>, vector<2x8x8x64xf32>
    %182 = vector.shape_cast %181 : vector<2x8x8x64xf32> to vector<128x64xf32>
    %c7_254 = arith.constant 7 : index
    %c0_255 = arith.constant 0 : index
    %c0_256 = arith.constant 0 : index
    %183 = vector.load %arg5[%c7_254, %c0_255, %c0_256] : memref<9x64x64xf32, #tpu.memory_space<vmem>>, vector<1x64x64xf32>
    %184 = vector.shape_cast %183 : vector<1x64x64xf32> to vector<64x64xf32>
    %cst_257 = arith.constant dense<0.000000e+00> : vector<128x64xf32>
    %185 = tpu.matmul %182, %184, %cst_257 {dimension_numbers = #tpu.dot_dimension_numbers<[1], [0], [0], [1], [0, 0, 1, 1], [], []>} : vector<128x64xf32>, vector<64x64xf32>, vector<128x64xf32> -> vector<128x64xf32>
    %186 = arith.addf %180, %185 : vector<128x64xf32>
    %c0_258 = arith.constant 0 : index
    %c2_259 = arith.constant 2 : index
    %c2_260 = arith.constant 2 : index
    %c0_261 = arith.constant 0 : index
    %187 = vector.load %arg9[%c0_258, %c2_259, %c2_260, %c0_261] : memref<2x10x10x64xf32, #tpu.memory_space<vmem>>, vector<2x8x8x64xf32>
    %188 = vector.shape_cast %187 : vector<2x8x8x64xf32> to vector<128x64xf32>
    %c8_262 = arith.constant 8 : index
    %c0_263 = arith.constant 0 : index
    %c0_264 = arith.constant 0 : index
    %189 = vector.load %arg5[%c8_262, %c0_263, %c0_264] : memref<9x64x64xf32, #tpu.memory_space<vmem>>, vector<1x64x64xf32>
    %190 = vector.shape_cast %189 : vector<1x64x64xf32> to vector<64x64xf32>
    %cst_265 = arith.constant dense<0.000000e+00> : vector<128x64xf32>
    %191 = tpu.matmul %188, %190, %cst_265 {dimension_numbers = #tpu.dot_dimension_numbers<[1], [0], [0], [1], [0, 0, 1, 1], [], []>} : vector<128x64xf32>, vector<64x64xf32>, vector<128x64xf32> -> vector<128x64xf32>
    %192 = arith.addf %186, %191 : vector<128x64xf32>
    %c0_266 = arith.constant 0 : index
    %c0_267 = arith.constant 0 : index
    %193 = vector.load %arg6[%c0_266, %c0_267] : memref<1x64xf32, #tpu.memory_space<vmem>>, vector<1x64xf32>
    %194 = vector.broadcast %193 : vector<1x64xf32> to vector<128x64xf32>
    %195 = arith.addf %192, %194 : vector<128x64xf32>
    %cst_268 = arith.constant 0.000000e+00 : f32
    %196 = vector.broadcast %cst_268 : f32 to vector<128x64xf32>
    %197 = arith.maximumf %195, %196 : vector<128x64xf32>
    %198 = vector.shape_cast %197 : vector<128x64xf32> to vector<2x64x64xf32>
    %199 = arith.truncf %198 : vector<2x64x64xf32> to vector<2x64x64xbf16>
    %c0_269 = arith.constant 0 : index
    %c0_270 = arith.constant 0 : index
    %c0_271 = arith.constant 0 : index
    %200 = vector.load %arg7[%c0_269, %c0_270, %c0_271] : memref<2x64x64xbf16, #tpu.memory_space<vmem>>, vector<2x64x64xbf16>
    tpu.vector_store %arg7[%c0_269, %c0_270, %c0_271], %199 {strides = array<i32>} : memref<2x64x64xbf16, #tpu.memory_space<vmem>>, vector<2x64x64xbf16>,
    return
  }
}

module attributes {stable_mosaic.version = 11 : i64} {
  func.func @fused_head_kernel(%arg0: i32, %arg1: memref<2x2048xbf16, #tpu.memory_space<vmem>>, %arg2: memref<2048x1024xbf16, #tpu.memory_space<vmem>>, %arg3: memref<1x1024xf32, #tpu.memory_space<vmem>>, %arg4: memref<512x1xf32, #tpu.memory_space<vmem>>, %arg5: memref<1x1xf32, #tpu.memory_space<vmem>>, %arg6: memref<512x64xf32, #tpu.memory_space<vmem>>, %arg7: memref<1x64xf32, #tpu.memory_space<vmem>>, %arg8: memref<2x64xf32, #tpu.memory_space<vmem>>, %arg9: memref<2x1xf32, #tpu.memory_space<vmem>>, %arg10: memref<2x1024xf32, #tpu.memory_space<vmem>>) attributes {dimension_semantics = [#tpu.dimension_semantics<arbitrary>], iteration_bounds = array<i64: 2>, scalar_prefetch = 0 : i64, scratch_operands = 1 : i64, tpu.core_type = #tpu.core_type<tc>, window_params = [{transform_indices = @transform_0, window_bounds = array<i64: 2, 2048>}, {transform_indices = @transform_1, window_bounds = array<i64: 2048, 1024>}, {pipeline_mode = #tpu.pipeline_mode<synchronous>, transform_indices = @transform_2, window_bounds = array<i64: 1, 1024>}, {pipeline_mode = #tpu.pipeline_mode<synchronous>, transform_indices = @transform_3, window_bounds = array<i64: 512, 1>}, {pipeline_mode = #tpu.pipeline_mode<synchronous>, transform_indices = @transform_4, window_bounds = array<i64: 1, 1>}, {pipeline_mode = #tpu.pipeline_mode<synchronous>, transform_indices = @transform_5, window_bounds = array<i64: 512, 64>}, {pipeline_mode = #tpu.pipeline_mode<synchronous>, transform_indices = @transform_6, window_bounds = array<i64: 1, 64>}, {pipeline_mode = #tpu.pipeline_mode<synchronous>, transform_indices = @transform_7, window_bounds = array<i64: 2, 64>}, {pipeline_mode = #tpu.pipeline_mode<synchronous>, transform_indices = @transform_8, window_bounds = array<i64: 2, 1>}]} {
    %c0_i32 = arith.constant 0 : i32
    %0 = arith.cmpi eq, %arg0, %c0_i32 : i32
    %1 = arith.extui %0 : i1 to i32
    %c0_i32_0 = arith.constant 0 : i32
    %2 = arith.cmpi ne, %1, %c0_i32_0 : i32
    scf.if %2 {
      %cst_9 = arith.constant 0.000000e+00 : f32
      %12 = vector.broadcast %cst_9 : f32 to vector<2x1024xf32>
      %c0_10 = arith.constant 0 : index
      %c0_11 = arith.constant 0 : index
      %13 = vector.load %arg10[%c0_10, %c0_11] : memref<2x1024xf32, #tpu.memory_space<vmem>>, vector<2x1024xf32>
      tpu.vector_store %arg10[%c0_10, %c0_11], %12 {strides = array<i32>} : memref<2x1024xf32, #tpu.memory_space<vmem>>, vector<2x1024xf32>,
    } else {
    }
    %c0 = arith.constant 0 : index
    %c0_1 = arith.constant 0 : index
    %3 = vector.load %arg10[%c0, %c0_1] : memref<2x1024xf32, #tpu.memory_space<vmem>>, vector<2x1024xf32>
    %c0_2 = arith.constant 0 : index
    %c0_3 = arith.constant 0 : index
    %4 = vector.load %arg1[%c0_2, %c0_3] : memref<2x2048xbf16, #tpu.memory_space<vmem>>, vector<2x2048xbf16>
    %c0_4 = arith.constant 0 : index
    %c0_5 = arith.constant 0 : index
    %5 = vector.load %arg2[%c0_4, %c0_5] : memref<2048x1024xbf16, #tpu.memory_space<vmem>>, vector<2048x1024xbf16>
    %cst = arith.constant dense<0.000000e+00> : vector<2x1024xf32>
    %6 = tpu.matmul %4, %5, %cst {dimension_numbers = #tpu.dot_dimension_numbers<[1], [0], [0], [1], [0, 0, 1, 1], [], []>} : vector<2x2048xbf16>, vector<2048x1024xbf16>, vector<2x1024xf32> -> vector<2x1024xf32>
    %7 = arith.addf %3, %6 : vector<2x1024xf32>
    %c0_6 = arith.constant 0 : index
    %c0_7 = arith.constant 0 : index
    %8 = vector.load %arg10[%c0_6, %c0_7] : memref<2x1024xf32, #tpu.memory_space<vmem>>, vector<2x1024xf32>
    tpu.vector_store %arg10[%c0_6, %c0_7], %7 {strides = array<i32>} : memref<2x1024xf32, #tpu.memory_space<vmem>>, vector<2x1024xf32>,
    %c1_i32 = arith.constant 1 : i32
    %9 = arith.cmpi eq, %arg0, %c1_i32 : i32
    %10 = arith.extui %9 : i1 to i32
    %c0_i32_8 = arith.constant 0 : i32
    %11 = arith.cmpi ne, %10, %c0_i32_8 : i32
    scf.if %11 {
      %c0_9 = arith.constant 0 : index
      %c0_10 = arith.constant 0 : index
      %12 = vector.load %arg10[%c0_9, %c0_10] : memref<2x1024xf32, #tpu.memory_space<vmem>>, vector<2x1024xf32>
      %c0_11 = arith.constant 0 : index
      %c0_12 = arith.constant 0 : index
      %13 = vector.load %arg3[%c0_11, %c0_12] : memref<1x1024xf32, #tpu.memory_space<vmem>>, vector<1x1024xf32>
      %14 = vector.broadcast %13 : vector<1x1024xf32> to vector<2x1024xf32>
      %15 = arith.addf %12, %14 : vector<2x1024xf32>
      %cst_13 = arith.constant 0.000000e+00 : f32
      %16 = vector.broadcast %cst_13 : f32 to vector<2x1024xf32>
      %17 = arith.maximumf %15, %16 : vector<2x1024xf32>
      %18 = vector.extract_strided_slice %17 {offsets = [0, 0], sizes = [2, 512], strides = [1, 1]} : vector<2x1024xf32> to vector<2x512xf32>
      %19 = vector.extract_strided_slice %17 {offsets = [0, 512], sizes = [2, 512], strides = [1, 1]} : vector<2x1024xf32> to vector<2x512xf32>
      %c0_14 = arith.constant 0 : index
      %c0_15 = arith.constant 0 : index
      %20 = vector.load %arg4[%c0_14, %c0_15] : memref<512x1xf32, #tpu.memory_space<vmem>>, vector<512x1xf32>
      %cst_16 = arith.constant dense<0.000000e+00> : vector<2x1xf32>
      %21 = tpu.matmul %18, %20, %cst_16 {dimension_numbers = #tpu.dot_dimension_numbers<[1], [0], [0], [1], [0, 0, 1, 1], [], []>} : vector<2x512xf32>, vector<512x1xf32>, vector<2x1xf32> -> vector<2x1xf32>
      %c0_17 = arith.constant 0 : index
      %c0_18 = arith.constant 0 : index
      %22 = vector.load %arg5[%c0_17, %c0_18] : memref<1x1xf32, #tpu.memory_space<vmem>>, vector<1x1xf32>
      %23 = vector.broadcast %22 : vector<1x1xf32> to vector<2x1xf32>
      %24 = arith.addf %21, %23 : vector<2x1xf32>
      %25 = math.tanh %24 : vector<2x1xf32>
      %c0_19 = arith.constant 0 : index
      %c0_20 = arith.constant 0 : index
      %26 = vector.load %arg9[%c0_19, %c0_20] : memref<2x1xf32, #tpu.memory_space<vmem>>, vector<2x1xf32>
      tpu.vector_store %arg9[%c0_19, %c0_20], %25 {strides = array<i32>} : memref<2x1xf32, #tpu.memory_space<vmem>>, vector<2x1xf32>,
      %c0_21 = arith.constant 0 : index
      %c0_22 = arith.constant 0 : index
      %27 = vector.load %arg6[%c0_21, %c0_22] : memref<512x64xf32, #tpu.memory_space<vmem>>, vector<512x64xf32>
      %cst_23 = arith.constant dense<0.000000e+00> : vector<2x64xf32>
      %28 = tpu.matmul %19, %27, %cst_23 {dimension_numbers = #tpu.dot_dimension_numbers<[1], [0], [0], [1], [0, 0, 1, 1], [], []>} : vector<2x512xf32>, vector<512x64xf32>, vector<2x64xf32> -> vector<2x64xf32>
      %c0_24 = arith.constant 0 : index
      %c0_25 = arith.constant 0 : index
      %29 = vector.load %arg7[%c0_24, %c0_25] : memref<1x64xf32, #tpu.memory_space<vmem>>, vector<1x64xf32>
      %30 = vector.broadcast %29 : vector<1x64xf32> to vector<2x64xf32>
      %31 = arith.addf %28, %30 : vector<2x64xf32>
      %cst_26 = arith.constant dense<0xFF800000> : vector<2xf32>
      %32 = vector.multi_reduction <maximumf>, %31, %cst_26 [1] : vector<2x64xf32> to vector<2xf32>
      %33 = vector.shape_cast %32 : vector<2xf32> to vector<2x1xf32>
      %34 = vector.broadcast %33 : vector<2x1xf32> to vector<2x64xf32>
      %35 = arith.subf %31, %34 : vector<2x64xf32>
      %36 = math.exp %35 : vector<2x64xf32>
      %cst_27 = arith.constant dense<0.000000e+00> : vector<2xf32>
      %37 = vector.multi_reduction <add>, %36, %cst_27 [1] : vector<2x64xf32> to vector<2xf32>
      %38 = vector.shape_cast %37 : vector<2xf32> to vector<2x1xf32>
      %39 = vector.broadcast %38 : vector<2x1xf32> to vector<2x64xf32>
      %40 = arith.divf %36, %39 : vector<2x64xf32>
      %c0_28 = arith.constant 0 : index
      %c0_29 = arith.constant 0 : index
      %41 = vector.load %arg8[%c0_28, %c0_29] : memref<2x64xf32, #tpu.memory_space<vmem>>, vector<2x64xf32>
      tpu.vector_store %arg8[%c0_28, %c0_29], %40 {strides = array<i32>} : memref<2x64xf32, #tpu.memory_space<vmem>>, vector<2x64xf32>,
    } else {
    }
    return
  }
  func.func @transform_0(%arg0: i32) -> (i32, i32) {
    %c0_i32 = arith.constant 0 : i32
    %c0_i32_0 = arith.constant 0 : i32
    return %c0_i32, %arg0 : i32, i32
  }
  func.func @transform_1(%arg0: i32) -> (i32, i32) {
    %c0_i32 = arith.constant 0 : i32
    %c0_i32_0 = arith.constant 0 : i32
    return %arg0, %c0_i32 : i32, i32
  }
  func.func @transform_2(%arg0: i32) -> (i32, i32) {
    %c0_i32 = arith.constant 0 : i32
    %c0_i32_0 = arith.constant 0 : i32
    %c0_i32_1 = arith.constant 0 : i32
    return %c0_i32, %c0_i32_0 : i32, i32
  }
  func.func @transform_3(%arg0: i32) -> (i32, i32) {
    %c0_i32 = arith.constant 0 : i32
    %c0_i32_0 = arith.constant 0 : i32
    %c0_i32_1 = arith.constant 0 : i32
    return %c0_i32, %c0_i32_0 : i32, i32
  }
  func.func @transform_4(%arg0: i32) -> (i32, i32) {
    %c0_i32 = arith.constant 0 : i32
    %c0_i32_0 = arith.constant 0 : i32
    %c0_i32_1 = arith.constant 0 : i32
    return %c0_i32, %c0_i32_0 : i32, i32
  }
  func.func @transform_5(%arg0: i32) -> (i32, i32) {
    %c0_i32 = arith.constant 0 : i32
    %c0_i32_0 = arith.constant 0 : i32
    %c0_i32_1 = arith.constant 0 : i32
    return %c0_i32, %c0_i32_0 : i32, i32
  }
  func.func @transform_6(%arg0: i32) -> (i32, i32) {
    %c0_i32 = arith.constant 0 : i32
    %c0_i32_0 = arith.constant 0 : i32
    %c0_i32_1 = arith.constant 0 : i32
    return %c0_i32, %c0_i32_0 : i32, i32
  }
  func.func @transform_7(%arg0: i32) -> (i32, i32) {
    %c0_i32 = arith.constant 0 : i32
    %c0_i32_0 = arith.constant 0 : i32
    %c0_i32_1 = arith.constant 0 : i32
    return %c0_i32, %c0_i32_0 : i32, i32
  }
  func.func @transform_8(%arg0: i32) -> (i32, i32) {
    %c0_i32 = arith.constant 0 : i32
    %c0_i32_0 = arith.constant 0 : i32
    %c0_i32_1 = arith.constant 0 : i32
    return %c0_i32, %c0_i32_0 : i32, i32
  }
}

</mosaic_0001>

<bundles_post_ra>
// kernel: simple5_forward.2
= control target key start
LH: loop header
LB: loop body
LE: loop exit
PB: predicated region body
PF: predicated region fallthrough
CT: control target
= control target key end

     0   :  { %12 = vsyncpa [#allocation5], 0  ;;  %s11163_s0 = inlined_call_operand.vmem [shape: f32[2,8,8,4], index: 0, kind: input, shape index: {}]   ;;  %s11164_s1 = inlined_call_operand.hbm [shape: f32[9,4,64], index: 1, kind: input, shape index: {}]   ;;  %s11165_s2 = inlined_call_operand.hbm [shape: f32[1,64], index: 2, kind: input, shape index: {}]   ;;  %s11166_s3 = inlined_call_operand.hbm [shape: f32[9,64,64], index: 3, kind: input, shape index: {}]   ;;  %s11167_s4 = inlined_call_operand.hbm [shape: f32[1,64], index: 4, kind: input, shape index: {}]   ;;  %s11168_s5 = inlined_call_operand.hbm [shape: f32[9,64,64], index: 5, kind: input, shape index: {}]   ;;  %s11169_s6 = inlined_call_operand.hbm [shape: f32[1,64], index: 6, kind: input, shape index: {}]   ;;  %s11170_s7 = inlined_call_operand.vmem [shape: bf16[2,64,64], index: 7, kind: output, shape index: {}]  }
   0x1   :  { %13 = vsyncpa [#allocation7], 0 }
   0x2   :  { %14 = vsyncpa [#allocation10], 0 }
   0x3   :  { %15 = vsyncpa [#allocation13], 0  ;;  %s9504_s24 = smov [#allocation6]   ;;  %s9505_s26 = smov [#allocation9]  }
   0x4   :  { %s36_s25 = sshll.u32 %s9504_s24, 4  ;;  %s58_s27 = sshll.u32 %s9505_s26, 4  ;;  %s37_s25 = int_to_ptr.vmem [resolvable:$true] %s36_s25  ;;  %s59_s27 = int_to_ptr.vmem [resolvable:$true] %s58_s27 }
   0x5   :  { %s9364_s30 = scalar_lea.hbm %s11165_s2, 16 }
   0x6   :  { %p9365_p0 = scmp.ne.s32.totalorder %s11165_s2, %s9364_s30  ;;  %p9368_p1 = scmp.lt.u32.totalorder %s9364_s30, %s11165_s2 }
   0x8   :  { %p9370_p2 = pnand %p9368_p1, %p9365_p0 }
   0xa   :  { %9373 = shalt.err (!%p9370_p2)
}
   0xb   :  { %s9374_s12 = scalar_lea.vmem %s37_s25, 16  ;;  %s9378_s13 = scalar_lea.vmem %s37_s25, 32 }
   0xc   :  { %p9375_p3 = scmp.ne.s32.totalorder %s37_s25, %s9374_s12  ;;  %p9379_p4 = scmp.lt.s32.totalorder %s37_s25, %s37_s25 }
   0xd   :  { %p9380_p5 = scmp.lt.s32.totalorder %s9378_s13, %s9374_s12 }
   0xf   :  { %p9381_p6 = por %p9380_p5, %p9379_p4 }
  0x11   :  { %p9382_p7 = pnand %p9381_p6, %p9375_p3 }
  0x13   :  { %9385 = shalt.err (!%p9382_p7)
}
  0x14   :  { %39 = dma.hbm_to_vmem [thread:$0]  %s11165_s2, 16, %s37_s25, [#allocation7]  }
  0x15   :  { %s9386_s18 = scalar_lea.hbm %s11167_s4, 16 }
  0x16   :  { %p9387_p8 = scmp.ne.s32.totalorder %s11167_s4, %s9386_s18  ;;  %p9390_p9 = scmp.lt.u32.totalorder %s9386_s18, %s11167_s4 }
  0x18   :  { %p9392_p10 = pnand %p9390_p9, %p9387_p8 }
  0x1a   :  { %9395 = shalt.err (!%p9392_p10)
}
  0x1b   :  { %s9396_s23 = scalar_lea.vmem %s59_s27, 16  ;;  %s9400_s24 = scalar_lea.vmem %s59_s27, 32 }
  0x1c   :  { %p9397_p11 = scmp.ne.s32.totalorder %s59_s27, %s9396_s23  ;;  %p9401_p12 = scmp.lt.s32.totalorder %s59_s27, %s59_s27 }
  0x1d   :  { %p9402_p13 = scmp.lt.s32.totalorder %s9400_s24, %s9396_s23 }
  0x1f   :  { %p9403_p0 = por %p9402_p13, %p9401_p12 }
  0x21   :  { %p9404_p1 = pnand %p9403_p0, %p9397_p11 }
  0x23   :  { %9407 = shalt.err (!%p9404_p1)
}
  0x24   :  { %61 = dma.hbm_to_vmem [thread:$0]  %s11167_s4, 16, %s59_s27, [#allocation10]  }
  0x25   :  { %s9506_s26 = smov [#allocation4]   ;;  %s9408_s8 = scalar_lea.hbm %s11164_s1, 576 }
  0x26   :  { %s23_s28 = sshll.u32 %s9506_s26, 4  ;;  %p9409_p2 = scmp.ne.s32.totalorder %s11164_s1, %s9408_s8  ;;  %s24_s28 = int_to_ptr.vmem [resolvable:$true] %s23_s28 }
  0x27   :  { %p9412_p3 = scmp.lt.u32.totalorder %s9408_s8, %s11164_s1 }
  0x29   :  { %p9414_p4 = pnand %p9412_p3, %p9409_p2 }
  0x2b   :  { %9417 = shalt.err (!%p9414_p4)
}
  0x2c   :  { %s9418_s13 = scalar_lea.vmem %s24_s28, 576  ;;  %p9423_p6 = scmp.lt.s32.totalorder %s24_s28, %s24_s28 }
  0x2d   :  { %p9419_p5 = scmp.ne.s32.totalorder %s24_s28, %s9418_s13  ;;  %p9424_p7 = scmp.lt.s32.totalorder %s9418_s13, %s9418_s13 }
  0x2f   :  { %p9425_p8 = por %p9424_p7, %p9423_p6 }
  0x31   :  { %p9426_p9 = pnand %p9425_p8, %p9419_p5 }
  0x33   :  { %9429 = shalt.err (!%p9426_p9)
}
  0x34   :  { %s9507_s4 = smov 64   ;;  %s9508_s27 = smov 4  }
  0x35   :  { %29 = dma.hbm_to_vmem [thread:$0]  %s11164_s1, 576, %s24_s28, [#allocation5], %s9507_s4, %s9507_s4, %s9508_s27  }
  0x36   :  { %s9509_s16 = smov [#allocation8]   ;;  %s9430_s20 = scalar_lea.hbm %s11166_s3, 9216 }
  0x37   :  { %s45_s17 = sshll.u32 %s9509_s16, 4  ;;  %p9431_p10 = scmp.ne.s32.totalorder %s11166_s3, %s9430_s20  ;;  %s46_s17 = int_to_ptr.vmem [resolvable:$true] %s45_s17 }
  0x38   :  { %p9434_p11 = scmp.lt.u32.totalorder %s9430_s20, %s11166_s3 }
  0x3a   :  { %p9436_p12 = pnand %p9434_p11, %p9431_p10 }
  0x3c   :  { %9439 = shalt.err (!%p9436_p12)
}
  0x3d   :  { %s9440_s2 = scalar_lea.vmem %s46_s17, 9216  ;;  %p9445_p0 = scmp.lt.s32.totalorder %s46_s17, %s46_s17 }
  0x3e   :  { %p9441_p13 = scmp.ne.s32.totalorder %s46_s17, %s9440_s2  ;;  %p9446_p1 = scmp.lt.s32.totalorder %s9440_s2, %s9440_s2 }
  0x40   :  { %p9447_p2 = por %p9446_p1, %p9445_p0 }
  0x42   :  { %p9448_p3 = pnand %p9447_p2, %p9441_p13 }
  0x44   :  { %9451 = shalt.err (!%p9448_p3)
}
  0x45   :  { %s9510_s1 = smov 128   ;;  %s9511_s25 = smov 8  }
  0x46   :  { %51 = dma.hbm_to_vmem [thread:$0]  %s11166_s3, 9216, %s46_s17, [#allocation7], %s9510_s1, %s9510_s1, %s9511_s25  }
  0x47   :  { %s9512_s29 = smov [#allocation11]   ;;  %s9513_s8 = smov [#allocation12]  }
  0x48   :  { %s67_s30 = sshll.u32 %s9512_s29, 4  ;;  %s80_s9 = sshll.u32 %s9513_s8, 4  ;;  %s68_s30 = int_to_ptr.vmem [resolvable:$true] %s67_s30  ;;  %s81_s9 = int_to_ptr.vmem [resolvable:$true] %s80_s9 }
  0x49   :  { %s9452_s12 = scalar_lea.hbm %s11168_s5, 9216 }
  0x4a   :  { %p9453_p4 = scmp.ne.s32.totalorder %s11168_s5, %s9452_s12  ;;  %p9456_p5 = scmp.lt.u32.totalorder %s9452_s12, %s11168_s5 }
  0x4c   :  { %p9458_p6 = pnand %p9456_p5, %p9453_p4 }
  0x4e   :  { %9461 = shalt.err (!%p9458_p6)
}
  0x4f   :  { %s9462_s3 = scalar_lea.vmem %s68_s30, 9216  ;;  %p9467_p8 = scmp.lt.s32.totalorder %s68_s30, %s68_s30 }
  0x50   :  { %p9463_p7 = scmp.ne.s32.totalorder %s68_s30, %s9462_s3  ;;  %p9468_p9 = scmp.lt.s32.totalorder %s9462_s3, %s9462_s3 }
  0x52   :  { %p9469_p10 = por %p9468_p9, %p9467_p8 }
  0x54   :  { %p9470_p11 = pnand %p9469_p10, %p9463_p7 }
  0x56   :  { %9473 = shalt.err (!%p9470_p11)
}
  0x57   :  { %73 = dma.hbm_to_vmem [thread:$0]  %s11168_s5, 9216, %s68_s30, [#allocation10], %s9510_s1, %s9510_s1, %s9511_s25  }
  0x58   :  { %s9474_s19 = scalar_lea.hbm %s11169_s6, 16 }
  0x59   :  { %p9475_p12 = scmp.ne.s32.totalorder %s11169_s6, %s9474_s19  ;;  %p9478_p13 = scmp.lt.u32.totalorder %s9474_s19, %s11169_s6 }
  0x5b   :  { %p9480_p0 = pnand %p9478_p13, %p9475_p12 }
  0x5d   :  { %9483 = shalt.err (!%p9480_p0)
}
  0x5e   :  { %s9484_s24 = scalar_lea.vmem %s81_s9, 16  ;;  %s9488_s2 = scalar_lea.vmem %s81_s9, 32 }
  0x5f   :  { %p9485_p1 = scmp.ne.s32.totalorder %s81_s9, %s9484_s24  ;;  %p9489_p2 = scmp.lt.s32.totalorder %s81_s9, %s81_s9 }
  0x60   :  { %p9490_p3 = scmp.lt.s32.totalorder %s9488_s2, %s9484_s24 }
  0x62   :  { %p9491_p4 = por %p9490_p3, %p9489_p2 }
  0x64   :  { %p9492_p5 = pnand %p9491_p4, %p9485_p1 }
  0x66   :  { %9495 = shalt.err (!%p9492_p5)
}
  0x67   :  { %83 = dma.hbm_to_vmem [thread:$0]  %s11169_s6, 16, %s81_s9, [#allocation13]  }
  0x68   :  { %9496 = dma.done.wait [#allocation5], 576  }
  0x69   :  { %9497 = vsyncadd [#allocation5], 4294966720 }
  0x6a   :  { %9498 = dma.done.wait [#allocation7], 9232  }
  0x6b   :  { %9499 = vsyncadd [#allocation7], 4294958064 }
  0x6c   :  { %9500 = dma.done.wait [#allocation10], 9232  }
  0x6d   :  { %9501 = vsyncadd [#allocation10], 4294958064 }
  0x6e   :  { %9502 = dma.done.wait [#allocation13], 16  }
  0x6f   :  { %9503 = vsyncadd [#allocation13], 4294967280  ;;  %vm102_vm0 = vcmask 31744   ;;  %vm104_vm1 = vcmask 25600   ;;  %v9514_v0 = vmov 0.0   ;;  %vm113_vm2 = vcmask 24576  }
  0x70   :  { %103 = vst.msk [vmem:[#allocation2] sm:$0xff] %vm102_vm0, %v9514_v0  ;;  %106 = vst.msk [vmem:[#allocation2 + $0xa0] sm:$0xff] %vm102_vm0, %v9514_v0  ;;  %vm322_vm3 = vcmask 1043456   ;;  %v273_v1 = vld [vmem:[#allocation4 + $0x4] sm:$0xf]  ;;  %v207_v7 = vld [vmem:[%s11163_s0 + $0x8] sm:$0xff] }
  0x71   :  { %105 = vst.msk [vmem:[#allocation2 + $0x8] sm:$0x3] %vm104_vm1, %v9514_v0  ;;  %107 = vst.msk [vmem:[#allocation2 + $0xa8] sm:$0x3] %vm104_vm1, %v9514_v0  ;;  %v9719_v2 = vld [vmem:[#allocation4 + $0x10] sm:$0xf]  ;;  %7725 = vmatprep.subr.msk.mxu1 %vm322_vm3, %v273_v1 }
  0x72   :  { %109 = vst.msk [vmem:[#allocation2 + $0x90] sm:$0xff] %vm102_vm0, %v9514_v0  ;;  %111 = vst.msk [vmem:[#allocation2 + $0x130] sm:$0xff] %vm102_vm0, %v9514_v0  ;;  %v206_v3 = vld [vmem:[%s11163_s0] sm:$0xff]  ;;  %7829 = vmatprep.subr.msk.mxu0 %vm322_vm3, %v9719_v2  ;;  %v1374_v6 = vld [vmem:[#allocation4 + $0x14] sm:$0xf]  ;;  %7726 = vmatpush3.msk.msra.mxu1 %vm322_vm3, %v273_v1  ;;  %vm154_vm4 = vcmask 523264  }
  0x73   :  { %110 = vst.msk [vmem:[#allocation2 + $0x98] sm:$0x3] %vm104_vm1, %v9514_v0  ;;  %112 = vst.msk [vmem:[#allocation2 + $0x138] sm:$0x3] %vm104_vm1, %v9514_v0  ;;  %v255_v5 = vld [vmem:[#allocation4] sm:$0xf]  ;;  %7830 = vmatpush3.msk.msra.mxu0 %vm322_vm3, %v9719_v2 }
  0x74   :  { %135 = vst.msk [vmem:[#allocation2 + $0x19] sm:$0x1] %vm113_vm2, %v9514_v0  ;;  %114 = vst.msk [vmem:[#allocation2] sm:$0x1] %vm113_vm2, %v9514_v0  ;;  %v208_v8 = vld [vmem:[%s11163_s0 + $0x10] sm:$0xff]  ;;  %v209_v9 = vld [vmem:[%s11163_s0 + $0x18] sm:$0xff]  ;;  %7751 = vmatprep.subr.msk.mxu1 %vm322_vm3, %v255_v5  ;;  %7855 = vmatprep.subr.msk.mxu0 %vm322_vm3, %v1374_v6 }
  0x75   :  { %115 = vst.msk [vmem:[#allocation2 + $0x10] sm:$0x1] %vm113_vm2, %v9514_v0  ;;  %116 = vst.msk [vmem:[#allocation2 + $0x20] sm:$0x1] %vm113_vm2, %v9514_v0  ;;  %v210_v10 = vld [vmem:[%s11163_s0 + $0x20] sm:$0xff]  ;;  %v211_v11 = vld [vmem:[%s11163_s0 + $0x28] sm:$0xff] }
  0x76   :  { %117 = vst.msk [vmem:[#allocation2 + $0x30] sm:$0x1] %vm113_vm2, %v9514_v0  ;;  %118 = vst.msk [vmem:[#allocation2 + $0x40] sm:$0x1] %vm113_vm2, %v9514_v0  ;;  %v212_v12 = vld [vmem:[%s11163_s0 + $0x30] sm:$0xff]  ;;  %v213_v13 = vld [vmem:[%s11163_s0 + $0x38] sm:$0xff] }
  0x77   :  { %119 = vst.msk [vmem:[#allocation2 + $0x50] sm:$0x1] %vm113_vm2, %v9514_v0  ;;  %120 = vst.msk [vmem:[#allocation2 + $0x60] sm:$0x1] %vm113_vm2, %v9514_v0  ;;  %v214_v14 = vld [vmem:[%s11163_s0 + $0x40] sm:$0xff]  ;;  %v215_v15 = vld [vmem:[%s11163_s0 + $0x48] sm:$0xff] }
  0x78   :  { %121 = vst.msk [vmem:[#allocation2 + $0x70] sm:$0x1] %vm113_vm2, %v9514_v0  ;;  %122 = vst.msk [vmem:[#allocation2 + $0x80] sm:$0x1] %vm113_vm2, %v9514_v0  ;;  %v256_v4 = vld [vmem:[#allocation2 + $0x1] sm:$0xff]  ;;  %v216_v16 = vld [vmem:[%s11163_s0 + $0x50] sm:$0xff] }
  0x79   :  { %123 = vst.msk [vmem:[#allocation2 + $0x90] sm:$0x1] %vm113_vm2, %v9514_v0  ;;  %124 = vst.msk [vmem:[#allocation2 + $0xa0] sm:$0x1] %vm113_vm2, %v9514_v0  ;;  %7727 = vmatprep.mubr.msk.f32.mxu1 %vm102_vm0, %v256_v4  ;;  %v217_v17 = vld [vmem:[%s11163_s0 + $0x58] sm:$0xff]  ;;  %v218_v18 = vld [vmem:[%s11163_s0 + $0x60] sm:$0xff] }
  0x7a   :  { %125 = vst.msk [vmem:[#allocation2 + $0xb0] sm:$0x1] %vm113_vm2, %v9514_v0  ;;  %126 = vst.msk [vmem:[#allocation2 + $0xc0] sm:$0x1] %vm113_vm2, %v9514_v0  ;;  %v219_v19 = vld [vmem:[%s11163_s0 + $0x68] sm:$0xff]  ;;  %v220_v20 = vld [vmem:[%s11163_s0 + $0x70] sm:$0xff] }
  0x7b   :  { %127 = vst.msk [vmem:[#allocation2 + $0xd0] sm:$0x1] %vm113_vm2, %v9514_v0  ;;  %128 = vst.msk [vmem:[#allocation2 + $0xe0] sm:$0x1] %vm113_vm2, %v9514_v0  ;;  %v221_v22 = vld [vmem:[%s11163_s0 + $0x78] sm:$0xff]  ;;  %v264_v31 = vld [vmem:[#allocation2 + $0xa1] sm:$0xff] }
  0x7c   :  { %129 = vst.msk [vmem:[#allocation2 + $0xf0] sm:$0x1] %vm113_vm2, %v9514_v0  ;;  %130 = vst.msk [vmem:[#allocation2 + $0x100] sm:$0x1] %vm113_vm2, %v9514_v0  ;;  %v1605_v25 = vld [vmem:[#allocation4 + $0x18] sm:$0xf] }
  0x7d   :  { %131 = vst.msk [vmem:[#allocation2 + $0x110] sm:$0x1] %vm113_vm2, %v9514_v0  ;;  %132 = vst.msk [vmem:[#allocation2 + $0x120] sm:$0x1] %vm113_vm2, %v9514_v0  ;;  %v9805_v26 = vld [vmem:[#allocation4 + $0x8] sm:$0xf] }
  0x7e   :  { %133 = vst.msk [vmem:[#allocation2 + $0x130] sm:$0x1] %vm113_vm2, %v9514_v0  ;;  %134 = vst.msk [vmem:[#allocation2 + $0x9] sm:$0x1] %vm113_vm2, %v9514_v0  ;;  %v9862_v39 = vld [vmem:[#allocation4 + $0x1c] sm:$0xf] }
  0x7f   :  { %136 = vst.msk [vmem:[#allocation2 + $0x29] sm:$0x1] %vm113_vm2, %v9514_v0  ;;  %137 = vst.msk [vmem:[#allocation2 + $0x39] sm:$0x1] %vm113_vm2, %v9514_v0  ;;  %v239_v48 = vld [vmem:[#allocation2] sm:$0xff]  ;;  %vm156_vm5 = vcmask 517120  }
  0x80   :  { %138 = vst.msk [vmem:[#allocation2 + $0x49] sm:$0x1] %vm113_vm2, %v9514_v0  ;;  %139 = vst.msk [vmem:[#allocation2 + $0x59] sm:$0x1] %vm113_vm2, %v9514_v0  ;;  %v914_v54 = vld [vmem:[#allocation4 + $0xc] sm:$0xf] }
  0x81   :  { %140 = vst.msk [vmem:[#allocation2 + $0x69] sm:$0x1] %vm113_vm2, %v9514_v0  ;;  %141 = vst.msk [vmem:[#allocation2 + $0x79] sm:$0x1] %vm113_vm2, %v9514_v0  ;;  %vm165_vm6 = vcmask 516096   ;;  %vm6639_vm7 = vcmask 519168  }
  0x82   :  { %142 = vst.msk [vmem:[#allocation2 + $0x89] sm:$0x1] %vm113_vm2, %v9514_v0  ;;  %143 = vst.msk [vmem:[#allocation2 + $0x99] sm:$0x1] %vm113_vm2, %v9514_v0 }
  0x83   :  { %144 = vst.msk [vmem:[#allocation2 + $0xa9] sm:$0x1] %vm113_vm2, %v9514_v0  ;;  %145 = vst.msk [vmem:[#allocation2 + $0xb9] sm:$0x1] %vm113_vm2, %v9514_v0 }
  0x84   :  { %146 = vst.msk [vmem:[#allocation2 + $0xc9] sm:$0x1] %vm113_vm2, %v9514_v0  ;;  %147 = vst.msk [vmem:[#allocation2 + $0xd9] sm:$0x1] %vm113_vm2, %v9514_v0 }
  0x85   :  { %148 = vst.msk [vmem:[#allocation2 + $0xe9] sm:$0x1] %vm113_vm2, %v9514_v0  ;;  %149 = vst.msk [vmem:[#allocation2 + $0xf9] sm:$0x1] %vm113_vm2, %v9514_v0 }
  0x86   :  { %150 = vst.msk [vmem:[#allocation2 + $0x109] sm:$0x1] %vm113_vm2, %v9514_v0  ;;  %151 = vst.msk [vmem:[#allocation2 + $0x119] sm:$0x1] %vm113_vm2, %v9514_v0 }
  0x87   :  { %152 = vst.msk [vmem:[#allocation2 + $0x129] sm:$0x1] %vm113_vm2, %v9514_v0  ;;  %153 = vst.msk [vmem:[#allocation2 + $0x139] sm:$0x1] %vm113_vm2, %v9514_v0 }
  0x88   :  { %223 = vst.msk [vmem:[#allocation2 + $0x11] sm:$0xff] %vm102_vm0, %v206_v3  ;;  %224 = vst.msk [vmem:[#allocation2 + $0x21] sm:$0xff] %vm102_vm0, %v207_v7  ;;  %v247_v3 = vld [vmem:[#allocation2 + $0xa0] sm:$0xff] }
  0x89   :  { %225 = vst.msk [vmem:[#allocation2 + $0x31] sm:$0xff] %vm102_vm0, %v208_v8  ;;  %226 = vst.msk [vmem:[#allocation2 + $0x41] sm:$0xff] %vm102_vm0, %v209_v9  ;;  %v2065_v8 = vld [vmem:[#allocation4 + $0x20] sm:$0xf] }
  0x8a   :  { %227 = vst.msk [vmem:[#allocation2 + $0x51] sm:$0xff] %vm102_vm0, %v210_v10  ;;  %228 = vst.msk [vmem:[#allocation2 + $0x61] sm:$0xff] %vm102_vm0, %v211_v11 }
  0x8b   :  { %229 = vst.msk [vmem:[#allocation2 + $0x71] sm:$0xff] %vm102_vm0, %v212_v12  ;;  %230 = vst.msk [vmem:[#allocation2 + $0x81] sm:$0xff] %vm102_vm0, %v213_v13 }
  0x8c   :  { %231 = vst.msk [vmem:[#allocation2 + $0xb1] sm:$0xff] %vm102_vm0, %v214_v14  ;;  %232 = vst.msk [vmem:[#allocation2 + $0xc1] sm:$0xff] %vm102_vm0, %v215_v15  ;;  %v667_v14 = vld [vmem:[#allocation2 + $0x2] sm:$0xff]  ;;  %v1595_v15 = vld [vmem:[#allocation2 + $0x90] sm:$0xff] }
  0x8d   :  { %233 = vst.msk [vmem:[#allocation2 + $0xd1] sm:$0xff] %vm102_vm0, %v216_v16  ;;  %234 = vst.msk [vmem:[#allocation2 + $0xe1] sm:$0xff] %vm102_vm0, %v217_v17  ;;  %v675_v17 = vld [vmem:[#allocation2 + $0xa2] sm:$0xff] }
  0x8e   :  { %235 = vst.msk [vmem:[#allocation2 + $0xf1] sm:$0xff] %vm102_vm0, %v218_v18  ;;  %236 = vst.msk [vmem:[#allocation2 + $0x101] sm:$0xff] %vm102_vm0, %v219_v19  ;;  %v1603_v18 = vld [vmem:[#allocation2 + $0x130] sm:$0xff] }
  0x8f   :  { %v257_v21 = vld [vmem:[#allocation2 + $0x11] sm:$0xff]  ;;  %237 = vst.msk [vmem:[#allocation2 + $0x111] sm:$0xff] %vm102_vm0, %v220_v20  ;;  %v9796_v23 = vld [vmem:[#allocation2 + $0x21] sm:$0xff]  ;;  %238 = vst.msk [vmem:[#allocation2 + $0x121] sm:$0xff] %vm102_vm0, %v221_v22 }
  0x90   :  { %7728 = vmatmul.mubr.msk.f32.vlgmr.msra.gmra.mrb[0].mxu1 %vm102_vm0, %v257_v21  ;;  %7831 = vmatprep.mubr.msk.f32.mxu0 %vm102_vm0, %v257_v21  ;;  %v9798_v24 = vld [vmem:[#allocation2 + $0x31] sm:$0xff]  ;;  %v9810_v27 = vld [vmem:[#allocation2 + $0x41] sm:$0xff]  ;;  %155 = vst.msk [vmem:[#allocation3] sm:$0xff] %vm154_vm4, %v9514_v0  ;;  %158 = vst.msk [vmem:[#allocation3 + $0xa0] sm:$0xff] %vm154_vm4, %v9514_v0 }
  0x91   :  { %7752 = vmatpush3.msk.msra.mxu1 %vm322_vm3, %v255_v5  ;;  %7832 = vmatmul.mubr.msk.f32.vlgmr.msra.gmra.mrb[0].mxu0 %vm102_vm0, %v9796_v23  ;;  %v9814_v28 = vld [vmem:[#allocation2 + $0x51] sm:$0xff]  ;;  %v9825_v29 = vld [vmem:[#allocation2 + $0x61] sm:$0xff]  ;;  %161 = vst.msk [vmem:[#allocation3 + $0x90] sm:$0xff] %vm154_vm4, %v9514_v0  ;;  %163 = vst.msk [vmem:[#allocation3 + $0x130] sm:$0xff] %vm154_vm4, %v9514_v0 }
  0x92   :  { %7730 = vmatprep.mubr.msk.f32.mxu1 %vm102_vm0, %v9796_v23  ;;  %7856 = vmatpush3.msk.msra.mxu0 %vm322_vm3, %v1374_v6  ;;  %v9829_v30 = vld [vmem:[#allocation2 + $0x71] sm:$0xff]  ;;  %v9837_v32 = vld [vmem:[#allocation2 + $0x81] sm:$0xff]  ;;  %157 = vst.msk [vmem:[#allocation3 + $0x8] sm:$0x3] %vm156_vm5, %v9514_v0  ;;  %159 = vst.msk [vmem:[#allocation3 + $0xa8] sm:$0x3] %vm156_vm5, %v9514_v0 }
  0x93   :  { %7834 = vmatprep.mubr.msk.f32.mxu0 %vm102_vm0, %v9798_v24  ;;  %7881 = vmatprep.subr.msk.mxu0 %vm322_vm3, %v1605_v25  ;;  %v9841_v33 = vld [vmem:[#allocation2 + $0x12] sm:$0xff]  ;;  %v9848_v35 = vld [vmem:[#allocation2 + $0xc1] sm:$0xff]  ;;  %162 = vst.msk [vmem:[#allocation3 + $0x98] sm:$0x3] %vm156_vm5, %v9514_v0  ;;  %164 = vst.msk [vmem:[#allocation3 + $0x138] sm:$0x3] %vm156_vm5, %v9514_v0 }
  0x94   :  { %7731 = vmatmul.mubr.msk.f32.gmra.mrb[2].mxu1 %vm102_vm0, %v9798_v24  ;;  %7777 = vmatprep.subr.msk.mxu1 %vm322_vm3, %v9805_v26  ;;  %v9844_v34 = vld [vmem:[#allocation2 + $0xb1] sm:$0xff]  ;;  %v9852_v36 = vld [vmem:[#allocation2 + $0x22] sm:$0xff]  ;;  %166 = vst.msk [vmem:[#allocation3] sm:$0x1] %vm165_vm6, %v9514_v0  ;;  %167 = vst.msk [vmem:[#allocation3 + $0x10] sm:$0x1] %vm165_vm6, %v9514_v0 }
  0x95   :  { %7733 = vmatprep.mubr.msk.f32.mxu1 %vm102_vm0, %v9810_v27  ;;  %7835 = vmatmul.mubr.msk.f32.gmra.mrb[2].mxu0 %vm102_vm0, %v9810_v27  ;;  %v9856_v37 = vld [vmem:[#allocation2 + $0x32] sm:$0xff]  ;;  %v9866_v40 = vld [vmem:[#allocation2 + $0xe1] sm:$0xff]  ;;  %168 = vst.msk [vmem:[#allocation3 + $0x20] sm:$0x1] %vm165_vm6, %v9514_v0  ;;  %169 = vst.msk [vmem:[#allocation3 + $0x30] sm:$0x1] %vm165_vm6, %v9514_v0 }
  0x96   :  { %7837 = vmatprep.mubr.msk.f32.mxu0 %vm102_vm0, %v9814_v28  ;;  %v9860_v38 = vld [vmem:[#allocation2 + $0xd1] sm:$0xff]  ;;  %v9871_v41 = vld [vmem:[#allocation2 + $0x42] sm:$0xff]  ;;  %170 = vst.msk [vmem:[#allocation3 + $0x40] sm:$0x1] %vm165_vm6, %v9514_v0  ;;  %171 = vst.msk [vmem:[#allocation3 + $0x50] sm:$0x1] %vm165_vm6, %v9514_v0 }
  0x97   :  { %v9875_v42 = vld [vmem:[#allocation2 + $0x52] sm:$0xff]  ;;  %v9885_v44 = vld [vmem:[#allocation2 + $0x101] sm:$0xff]  ;;  %172 = vst.msk [vmem:[#allocation3 + $0x60] sm:$0x1] %vm165_vm6, %v9514_v0  ;;  %173 = vst.msk [vmem:[#allocation3 + $0x70] sm:$0x1] %vm165_vm6, %v9514_v0 }
  0x98   :  { %7734 = vmatmul.mubr.msk.f32.gmra.mrb[4].mxu1 %vm102_vm0, %v9814_v28  ;;  %v9881_v43 = vld [vmem:[#allocation2 + $0xf1] sm:$0xff]  ;;  %v9889_v45 = vld [vmem:[#allocation2 + $0x62] sm:$0xff]  ;;  %174 = vst.msk [vmem:[#allocation3 + $0x80] sm:$0x1] %vm165_vm6, %v9514_v0  ;;  %175 = vst.msk [vmem:[#allocation3 + $0x90] sm:$0x1] %vm165_vm6, %v9514_v0 }
  0x99   :  { %7736 = vmatprep.mubr.msk.f32.mxu1 %vm102_vm0, %v9825_v29  ;;  %7838 = vmatmul.mubr.msk.f32.gmra.mrb[4].mxu0 %vm102_vm0, %v9825_v29  ;;  %v9893_v46 = vld [vmem:[#allocation2 + $0x72] sm:$0xff]  ;;  %v9903_v49 = vld [vmem:[#allocation2 + $0x82] sm:$0xff]  ;;  %176 = vst.msk [vmem:[#allocation3 + $0xa0] sm:$0x1] %vm165_vm6, %v9514_v0  ;;  %177 = vst.msk [vmem:[#allocation3 + $0xb0] sm:$0x1] %vm165_vm6, %v9514_v0 }
  0x9a   :  { %7840 = vmatprep.mubr.msk.f32.mxu0 %vm102_vm0, %v9829_v30  ;;  %v9897_v47 = vld [vmem:[#allocation2 + $0x111] sm:$0xff]  ;;  %v9914_v52 = vld [vmem:[#allocation2 + $0x20] sm:$0xff]  ;;  %178 = vst.msk [vmem:[#allocation3 + $0xc0] sm:$0x1] %vm165_vm6, %v9514_v0  ;;  %179 = vst.msk [vmem:[#allocation3 + $0xd0] sm:$0x1] %vm165_vm6, %v9514_v0 }
  0x9b   :  { %v9907_v50 = vld [vmem:[#allocation2 + $0xb2] sm:$0xff]  ;;  %v9918_v53 = vld [vmem:[#allocation2 + $0xc2] sm:$0xff]  ;;  %180 = vst.msk [vmem:[#allocation3 + $0xe0] sm:$0x1] %vm165_vm6, %v9514_v0  ;;  %181 = vst.msk [vmem:[#allocation3 + $0xf0] sm:$0x1] %vm165_vm6, %v9514_v0 }
  0x9c   :  { %7737 = vmatmul.mubr.msk.f32.gmra.mrb[6].mxu1 %vm102_vm0, %v9829_v30  ;;  %v9910_v51 = vld [vmem:[#allocation2 + $0x10] sm:$0xff]  ;;  %v9932_v57 = vld [vmem:[#allocation2 + $0x40] sm:$0xff]  ;;  %182 = vst.msk [vmem:[#allocation3 + $0x100] sm:$0x1] %vm165_vm6, %v9514_v0  ;;  %183 = vst.msk [vmem:[#allocation3 + $0x110] sm:$0x1] %vm165_vm6, %v9514_v0 }
  0x9d   :  { %7739 = vmatprep.mubr.msk.f32.mxu1 %vm102_vm0, %v264_v31  ;;  %7841 = vmatmul.mubr.msk.f32.gmra.mrb[6].mxu0 %vm102_vm0, %v9837_v32  ;;  %v9922_v55 = vld [vmem:[#allocation2 + $0xd2] sm:$0xff]  ;;  %v9937_v58 = vld [vmem:[#allocation2 + $0xe2] sm:$0xff]  ;;  %184 = vst.msk [vmem:[#allocation3 + $0x120] sm:$0x1] %vm165_vm6, %v9514_v0  ;;  %185 = vst.msk [vmem:[#allocation3 + $0x130] sm:$0x1] %vm165_vm6, %v9514_v0 }
  0x9e   :  { %7857 = vmatprep.mubr.msk.f32.mxu0 %vm102_vm0, %v9841_v33  ;;  %v9928_v56 = vld [vmem:[#allocation2 + $0x30] sm:$0xff]  ;;  %v9949_v61 = vld [vmem:[#allocation2 + $0x60] sm:$0xff]  ;;  %187 = vst.msk [vmem:[#allocation3 + $0x19] sm:$0x1] %vm165_vm6, %v9514_v0  ;;  %188 = vst.msk [vmem:[#allocation3 + $0x29] sm:$0x1] %vm165_vm6, %v9514_v0 }
  0x9f   :  { %v9941_v59 = vld [vmem:[#allocation2 + $0xf2] sm:$0xff]  ;;  %v9953_v62 = vld [vmem:[#allocation2 + $0x102] sm:$0xff]  ;;  %189 = vst.msk [vmem:[#allocation3 + $0x39] sm:$0x1] %vm165_vm6, %v9514_v0  ;;  %190 = vst.msk [vmem:[#allocation3 + $0x49] sm:$0x1] %vm165_vm6, %v9514_v0 }
  0xa0   :  { %7740 = vmatmul.mubr.msk.f32.gmra.mrb[8].mxu1 %vm102_vm0, %v9844_v34  ;;  %v9945_v60 = vld [vmem:[#allocation2 + $0x50] sm:$0xff]  ;;  %v9967_v4 = vld [vmem:[#allocation2 + $0x122] sm:$0xff]  ;;  %191 = vst.msk [vmem:[#allocation3 + $0x59] sm:$0x1] %vm165_vm6, %v9514_v0  ;;  %192 = vst.msk [vmem:[#allocation3 + $0x69] sm:$0x1] %vm165_vm6, %v9514_v0 }
  0xa1   :  { %7742 = vmatprep.mubr.msk.f32.mxu1 %vm102_vm0, %v9848_v35  ;;  %7858 = vmatmul.mubr.msk.f32.vlgmr.msra.gmra.mrb[0].mxu0 %vm102_vm0, %v9852_v36  ;;  %v9957_v63 = vld [vmem:[#allocation2 + $0x112] sm:$0xff]  ;;  %v9976_v6 = vld [vmem:[#allocation2 + $0xc0] sm:$0xff]  ;;  %193 = vst.msk [vmem:[#allocation3 + $0x79] sm:$0x1] %vm165_vm6, %v9514_v0  ;;  %194 = vst.msk [vmem:[#allocation3 + $0x89] sm:$0x1] %vm165_vm6, %v9514_v0 }
  0xa2   :  { %7882 = vmatpush3.msk.msra.mxu0 %vm322_vm3, %v1605_v25  ;;  %7860 = vmatprep.mubr.msk.f32.mxu0 %vm102_vm0, %v9856_v37  ;;  %v9961_v1 = vld [vmem:[#allocation2 + $0x70] sm:$0xff]  ;;  %v9988_v9 = vld [vmem:[#allocation2 + $0xe0] sm:$0xff]  ;;  %197 = vst.msk [vmem:[#allocation3 + $0xb9] sm:$0x1] %vm165_vm6, %v9514_v0  ;;  %198 = vst.msk [vmem:[#allocation3 + $0xc9] sm:$0x1] %vm165_vm6, %v9514_v0 }
  0xa3   :  { %7907 = vmatprep.subr.msk.mxu0 %vm322_vm3, %v9862_v39  ;;  %v9972_v5 = vld [vmem:[#allocation2 + $0xb0] sm:$0xff]  ;;  %v10003_v11 = vld [vmem:[#allocation2 + $0x100] sm:$0xff]  ;;  %199 = vst.msk [vmem:[#allocation3 + $0xd9] sm:$0x1] %vm165_vm6, %v9514_v0  ;;  %200 = vst.msk [vmem:[#allocation3 + $0xe9] sm:$0x1] %vm165_vm6, %v9514_v0 }
  0xa4   :  { %7743 = vmatmul.mubr.msk.f32.gmra.mrb[10].mxu1 %vm102_vm0, %v9860_v38  ;;  %v9984_v7 = vld [vmem:[#allocation2 + $0xd0] sm:$0xff]  ;;  %v10009_v12 = vld [vmem:[#allocation2 + $0x80] sm:$0xff]  ;;  %201 = vst.msk [vmem:[#allocation3 + $0xf9] sm:$0x1] %vm165_vm6, %v9514_v0  ;;  %202 = vst.msk [vmem:[#allocation3 + $0x109] sm:$0x1] %vm165_vm6, %v9514_v0 }
  0xa5   :  { %7745 = vmatprep.mubr.msk.f32.mxu1 %vm102_vm0, %v9866_v40  ;;  %7861 = vmatmul.mubr.msk.f32.gmra.mrb[2].mxu0 %vm102_vm0, %v9871_v41  ;;  %v9999_v10 = vld [vmem:[#allocation2 + $0xf0] sm:$0xff]  ;;  %v1602_v16 = vld [vmem:[#allocation2 + $0x120] sm:$0xff]  ;;  %203 = vst.msk [vmem:[#allocation3 + $0x119] sm:$0x1] %vm165_vm6, %v9514_v0  ;;  %204 = vst.msk [vmem:[#allocation3 + $0x129] sm:$0x1] %vm165_vm6, %v9514_v0 }
  0xa6   :  { %7863 = vmatprep.mubr.msk.f32.mxu0 %vm102_vm0, %v9875_v42  ;;  %v10013_v13 = vld [vmem:[#allocation2 + $0x110] sm:$0xff]  ;;  %186 = vst.msk [vmem:[#allocation3 + $0x9] sm:$0x1] %vm165_vm6, %v9514_v0  ;;  %195 = vst.msk [vmem:[#allocation3 + $0x99] sm:$0x1] %vm165_vm6, %v9514_v0 }
  0xa7   :  { %v1825_v19 = vld [vmem:[#allocation2 + $0x91] sm:$0xff]  ;;  %196 = vst.msk [vmem:[#allocation3 + $0xa9] sm:$0x1] %vm165_vm6, %v9514_v0  ;;  %205 = vst.msk [vmem:[#allocation3 + $0x139] sm:$0x1] %vm165_vm6, %v9514_v0 }
  0xa8   :  { %7746 = vmatmul.mubr.msk.f32.gmra.mrb[12].mxu1 %vm102_vm0, %v9881_v43  ;;  %v1833_v20 = vld [vmem:[#allocation2 + $0x131] sm:$0xff] }
  0xa9   :  { %7748 = vmatprep.mubr.msk.f32.mxu1 %vm102_vm0, %v9885_v44  ;;  %7864 = vmatmul.mubr.msk.f32.gmra.mrb[4].mxu0 %vm102_vm0, %v9889_v45  ;;  %v2055_v21 = vld [vmem:[#allocation2 + $0x92] sm:$0xff] }
  0xaa   :  { %7866 = vmatprep.mubr.msk.f32.mxu0 %vm102_vm0, %v9893_v46  ;;  %v2063_v22 = vld [vmem:[#allocation2 + $0x132] sm:$0xff] }
  0xac   :  { %7749 = vmatmul.mubr.msk.f32.gmra.mrb[14].mxu1 %vm102_vm0, %v9897_v47 }
  0xad   :  { %7753 = vmatprep.mubr.msk.f32.mxu1 %vm102_vm0, %v239_v48  ;;  %7867 = vmatmul.mubr.msk.f32.gmra.mrb[6].mxu0 %vm102_vm0, %v9903_v49 }
  0xae   :  { %7869 = vmatprep.mubr.msk.f32.mxu0 %vm102_vm0, %v9907_v50 }
  0xb0   :  { %7754 = vmatmul.mubr.msk.f32.vlgmr.msra.gmra.mrb[0].mxu1 %vm102_vm0, %v9910_v51 }
  0xb1   :  { %7778 = vmatpush3.msk.msra.mxu1 %vm322_vm3, %v9805_v26  ;;  %7756 = vmatprep.mubr.msk.f32.mxu1 %vm102_vm0, %v9914_v52  ;;  %v2377_v26 = vld [vmem:[#allocation8 + $0x50] sm:$0xff] }
  0xb2   :  { %7870 = vmatmul.mubr.msk.f32.gmra.mrb[8].mxu0 %vm102_vm0, %v9918_v53  ;;  %7803 = vmatprep.subr.msk.mxu1 %vm322_vm3, %v914_v54 }
  0xb3   :  { %7872 = vmatprep.mubr.msk.f32.mxu0 %vm102_vm0, %v9922_v55 }
  0xb4   :  { %7757 = vmatmul.mubr.msk.f32.gmra.mrb[2].mxu1 %vm102_vm0, %v9928_v56 }
  0xb5   :  { %7759 = vmatprep.mubr.msk.f32.mxu1 %vm102_vm0, %v9932_v57 }
  0xb6   :  { %7873 = vmatmul.mubr.msk.f32.gmra.mrb[10].mxu0 %vm102_vm0, %v9937_v58 }
  0xb7   :  { %7875 = vmatprep.mubr.msk.f32.mxu0 %vm102_vm0, %v9941_v59 }
  0xb8   :  { %7760 = vmatmul.mubr.msk.f32.gmra.mrb[4].mxu1 %vm102_vm0, %v9945_v60 }
  0xb9   :  { %7762 = vmatprep.mubr.msk.f32.mxu1 %vm102_vm0, %v9949_v61 }
  0xba   :  { %7876 = vmatmul.mubr.msk.f32.gmra.mrb[12].mxu0 %vm102_vm0, %v9953_v62 }
  0xbb   :  { %7878 = vmatprep.mubr.msk.f32.mxu0 %vm102_vm0, %v9957_v63 }
  0xbc   :  { %7763 = vmatmul.mubr.msk.f32.gmra.mrb[6].mxu1 %vm102_vm0, %v9961_v1 }
  0xbd   :  { %7765 = vmatprep.mubr.msk.f32.mxu1 %vm102_vm0, %v247_v3 }
  0xbe   :  { %7879 = vmatmul.mubr.msk.f32.gmra.mrb[14].mxu0 %vm102_vm0, %v9967_v4 }
  0xbf   :  { %7883 = vmatprep.mubr.msk.f32.mxu0 %vm102_vm0, %v9914_v52 }
  0xc0   :  { %7766 = vmatmul.mubr.msk.f32.gmra.mrb[8].mxu1 %vm102_vm0, %v9972_v5 }
  0xc1   :  { %7768 = vmatprep.mubr.msk.f32.mxu1 %vm102_vm0, %v9976_v6 }
  0xc2   :  { %7884 = vmatmul.mubr.msk.f32.vlgmr.msra.gmra.mrb[0].mxu0 %vm102_vm0, %v9928_v56 }
  0xc3   :  { %7908 = vmatpush3.msk.msra.mxu0 %vm322_vm3, %v9862_v39  ;;  %7886 = vmatprep.mubr.msk.f32.mxu0 %vm102_vm0, %v9932_v57 }
  0xc4   :  { %7769 = vmatmul.mubr.msk.f32.gmra.mrb[10].mxu1 %vm102_vm0, %v9984_v7  ;;  %7933 = vmatprep.subr.msk.mxu0 %vm322_vm3, %v2065_v8 }
  0xc5   :  { %7771 = vmatprep.mubr.msk.f32.mxu1 %vm102_vm0, %v9988_v9 }
  0xc6   :  { %7887 = vmatmul.mubr.msk.f32.gmra.mrb[2].mxu0 %vm102_vm0, %v9945_v60 }
  0xc7   :  { %7889 = vmatprep.mubr.msk.f32.mxu0 %vm102_vm0, %v9949_v61 }
  0xc8   :  { %7772 = vmatmul.mubr.msk.f32.gmra.mrb[12].mxu1 %vm102_vm0, %v9999_v10 }
  0xc9   :  { %7774 = vmatprep.mubr.msk.f32.mxu1 %vm102_vm0, %v10003_v11 }
  0xca   :  { %7890 = vmatmul.mubr.msk.f32.gmra.mrb[4].mxu0 %vm102_vm0, %v9961_v1 }
  0xcb   :  { %7892 = vmatprep.mubr.msk.f32.mxu0 %vm102_vm0, %v10009_v12 }
  0xcc   :  { %7775 = vmatmul.mubr.msk.f32.gmra.mrb[14].mxu1 %vm102_vm0, %v10013_v13 }
  0xcd   :  { %7779 = vmatprep.mubr.msk.f32.mxu1 %vm102_vm0, %v667_v14 }
  0xce   :  { %7893 = vmatmul.mubr.msk.f32.gmra.mrb[6].mxu0 %vm102_vm0, %v1595_v15 }
  0xcf   :  { %7895 = vmatprep.mubr.msk.f32.mxu0 %vm102_vm0, %v9976_v6 }
  0xd0   :  { %7780 = vmatmul.mubr.msk.f32.vlgmr.msra.gmra.mrb[0].mxu1 %vm102_vm0, %v9841_v33  ;;  %v2382_v33 = vld [vmem:[#allocation8 + $0x78] sm:$0xff] }
  0xd1   :  { %7804 = vmatpush3.msk.msra.mxu1 %vm322_vm3, %v914_v54  ;;  %7782 = vmatprep.mubr.msk.f32.mxu1 %vm102_vm0, %v9852_v36 }
  0xd2   :  { %7896 = vmatmul.mubr.msk.f32.gmra.mrb[8].mxu0 %vm102_vm0, %v9984_v7  ;;  %8967 = vmatprep.subr.msk.mxu1 %vm322_vm3, %v9719_v2 }
  0xd3   :  { %7898 = vmatprep.mubr.msk.f32.mxu0 %vm102_vm0, %v9988_v9 }
  0xd4   :  { %7783 = vmatmul.mubr.msk.f32.gmra.mrb[2].mxu1 %vm102_vm0, %v9856_v37 }
  0xd5   :  { %7785 = vmatprep.mubr.msk.f32.mxu1 %vm102_vm0, %v9871_v41 }
  0xd6   :  { %7899 = vmatmul.mubr.msk.f32.gmra.mrb[10].mxu0 %vm102_vm0, %v9999_v10 }
  0xd7   :  { %7901 = vmatprep.mubr.msk.f32.mxu0 %vm102_vm0, %v10003_v11 }
  0xd8   :  { %7786 = vmatmul.mubr.msk.f32.gmra.mrb[4].mxu1 %vm102_vm0, %v9875_v42 }
  0xd9   :  { %7788 = vmatprep.mubr.msk.f32.mxu1 %vm102_vm0, %v9889_v45 }
  0xda   :  { %7902 = vmatmul.mubr.msk.f32.gmra.mrb[12].mxu0 %vm102_vm0, %v10013_v13 }
  0xdb   :  { %7904 = vmatprep.mubr.msk.f32.mxu0 %vm102_vm0, %v1602_v16 }
  0xdc   :  { %7789 = vmatmul.mubr.msk.f32.gmra.mrb[6].mxu1 %vm102_vm0, %v9893_v46 }
  0xdd   :  { %7791 = vmatprep.mubr.msk.f32.mxu1 %vm102_vm0, %v675_v17 }
  0xde   :  { %7905 = vmatmul.mubr.msk.f32.gmra.mrb[14].mxu0 %vm102_vm0, %v1603_v18 }
  0xdf   :  { %7909 = vmatprep.mubr.msk.f32.mxu0 %vm102_vm0, %v9796_v23  ;;  %v2375_v23 = vld [vmem:[#allocation8 + $0x40] sm:$0xff] }
  0xe0   :  { %7792 = vmatmul.mubr.msk.f32.gmra.mrb[8].mxu1 %vm102_vm0, %v9907_v50 }
  0xe1   :  { %7794 = vmatprep.mubr.msk.f32.mxu1 %vm102_vm0, %v9918_v53 }
  0xe2   :  { %7910 = vmatmul.mubr.msk.f32.vlgmr.msra.gmra.mrb[0].mxu0 %vm102_vm0, %v9798_v24  ;;  %v2376_v24 = vld [vmem:[#allocation8 + $0x48] sm:$0xff] }
  0xe3   :  { %7934 = vmatpush3.msk.msra.mxu0 %vm322_vm3, %v2065_v8  ;;  %7912 = vmatprep.mubr.msk.f32.mxu0 %vm102_vm0, %v9810_v27  ;;  %v8679_v25 = vpack.c.bf16 %v2376_v24, %v2375_v23  ;;  %v2378_v27 = vld [vmem:[#allocation8 + $0x58] sm:$0xff] }
  0xe4   :  { %7795 = vmatmul.mubr.msk.f32.gmra.mrb[10].mxu1 %vm102_vm0, %v9922_v55 }
  0xe5   :  { %7797 = vmatprep.mubr.msk.f32.mxu1 %vm102_vm0, %v9937_v58 }
  0xe6   :  { %7913 = vmatmul.mubr.msk.f32.gmra.mrb[2].mxu0 %vm102_vm0, %v9814_v28  ;;  %v8683_v28 = vpack.c.bf16 %v2378_v27, %v2377_v26 }
  0xe7   :  { %7915 = vmatprep.mubr.msk.f32.mxu0 %vm102_vm0, %v9825_v29  ;;  %v2379_v29 = vld [vmem:[#allocation8 + $0x60] sm:$0xff] }
  0xe8   :  { %7798 = vmatmul.mubr.msk.f32.gmra.mrb[12].mxu1 %vm102_vm0, %v9941_v59 }
  0xe9   :  { %7800 = vmatprep.mubr.msk.f32.mxu1 %vm102_vm0, %v9953_v62 }
  0xea   :  { %7916 = vmatmul.mubr.msk.f32.gmra.mrb[4].mxu0 %vm102_vm0, %v9829_v30  ;;  %v2380_v30 = vld [vmem:[#allocation8 + $0x68] sm:$0xff] }
  0xeb   :  { %7918 = vmatprep.mubr.msk.f32.mxu0 %vm102_vm0, %v9837_v32  ;;  %v8687_v31 = vpack.c.bf16 %v2380_v30, %v2379_v29  ;;  %v2381_v32 = vld [vmem:[#allocation8 + $0x70] sm:$0xff] }
  0xec   :  { %7801 = vmatmul.mubr.msk.f32.gmra.mrb[14].mxu1 %vm102_vm0, %v9957_v63 }
  0xed   :  { %7805 = vmatprep.mubr.msk.f32.mxu1 %vm102_vm0, %v9910_v51 }
  0xee   :  { %7919 = vmatmul.mubr.msk.f32.gmra.mrb[6].mxu0 %vm102_vm0, %v1825_v19 }
  0xef   :  { %7921 = vmatprep.mubr.msk.f32.mxu0 %vm102_vm0, %v9848_v35 }
  0xf0   :  { %7806 = vmatmul.mubr.msk.f32.vlgmr.msra.gmra.mrb[0].mxu1 %vm102_vm0, %v9914_v52 }
  0xf1   :  { %8968 = vmatpush3.msk.msra.mxu1 %vm322_vm3, %v9719_v2  ;;  %7808 = vmatprep.mubr.msk.f32.mxu1 %vm102_vm0, %v9928_v56  ;;  %v1832_v2 = vld [vmem:[#allocation2 + $0x121] sm:$0xff] }
  0xf2   :  { %7922 = vmatmul.mubr.msk.f32.gmra.mrb[8].mxu0 %vm102_vm0, %v9860_v38  ;;  %8680 = vmatprep.subr.bf16.mxu1 %v8679_v25 }
  0xf3   :  { %7924 = vmatprep.mubr.msk.f32.mxu0 %vm102_vm0, %v9866_v40 }
  0xf4   :  { %7809 = vmatmul.mubr.msk.f32.gmra.mrb[2].mxu1 %vm102_vm0, %v9932_v57 }
  0xf5   :  { %7811 = vmatprep.mubr.msk.f32.mxu1 %vm102_vm0, %v9945_v60 }
  0xf6   :  { %7925 = vmatmul.mubr.msk.f32.gmra.mrb[10].mxu0 %vm102_vm0, %v9881_v43 }
  0xf7   :  { %7927 = vmatprep.mubr.msk.f32.mxu0 %vm102_vm0, %v9885_v44 }
  0xf8   :  { %7812 = vmatmul.mubr.msk.f32.gmra.mrb[4].mxu1 %vm102_vm0, %v9949_v61 }
  0xf9   :  { %7814 = vmatprep.mubr.msk.f32.mxu1 %vm102_vm0, %v9961_v1 }
  0xfa   :  { %7928 = vmatmul.mubr.msk.f32.gmra.mrb[12].mxu0 %vm102_vm0, %v9897_v47 }
  0xfb   :  { %7930 = vmatprep.mubr.msk.f32.mxu0 %vm102_vm0, %v1832_v2 }
  0xfc   :  { %7815 = vmatmul.mubr.msk.f32.gmra.mrb[6].mxu1 %vm102_vm0, %v10009_v12 }
  0xfd   :  { %7817 = vmatprep.mubr.msk.f32.mxu1 %vm102_vm0, %v9972_v5 }
  0xfe   :  { %7931 = vmatmul.mubr.msk.f32.gmra.mrb[14].mxu0 %vm102_vm0, %v1833_v20  ;;  %v2355_v20 = vld [vmem:[#allocation8 + $0x28] sm:$0xff] }
  0xff   :  { %7935 = vmatprep.mubr.msk.f32.mxu0 %vm102_vm0, %v9852_v36  ;;  %v2350_v36 = vld [vmem:[#allocation8] sm:$0xff] }
 0x100   :  { %7818 = vmatmul.mubr.msk.f32.gmra.mrb[8].mxu1 %vm102_vm0, %v9976_v6  ;;  %v2352_v6 = vld [vmem:[#allocation8 + $0x10] sm:$0xff] }
 0x101   :  { %7820 = vmatprep.mubr.msk.f32.mxu1 %vm102_vm0, %v9984_v7  ;;  %v2353_v7 = vld [vmem:[#allocation8 + $0x18] sm:$0xff] }
 0x102   :  { %7936 = vmatmul.mubr.msk.f32.vlgmr.msra.gmra.mrb[0].mxu0 %vm102_vm0, %v9856_v37  ;;  %v2351_v37 = vld [vmem:[#allocation8 + $0x8] sm:$0xff] }
 0x103   :  { %7938 = vmatprep.mubr.msk.f32.mxu0 %vm102_vm0, %v9871_v41 }
 0x104   :  { %7821 = vmatmul.mubr.msk.f32.gmra.mrb[10].mxu1 %vm102_vm0, %v9988_v9 }
 0x105   :  { %7823 = vmatprep.mubr.msk.f32.mxu1 %vm102_vm0, %v9999_v10 }
 0x106   :  { %7939 = vmatmul.mubr.msk.f32.gmra.mrb[2].mxu0 %vm102_vm0, %v9875_v42 }
 0x107   :  { %7941 = vmatprep.mubr.msk.f32.mxu0 %vm102_vm0, %v9889_v45 }
 0x108   :  { %7824 = vmatmul.mubr.msk.f32.gmra.mrb[12].mxu1 %vm102_vm0, %v10003_v11 }
 0x109   :  { %7826 = vmatprep.mubr.msk.f32.mxu1 %vm102_vm0, %v10013_v13 }
 0x10a   :  { %7942 = vmatmul.mubr.msk.f32.gmra.mrb[4].mxu0 %vm102_vm0, %v9893_v46 }
 0x10b   :  { %7944 = vmatprep.mubr.msk.f32.mxu0 %vm102_vm0, %v9903_v49 }
 0x10c   :  { %7827 = vmatmul.mubr.msk.f32.gmra.mrb[14].mxu1 %vm102_vm0, %v1602_v16  ;;  %v8699_v16 = vpack.c.bf16 %v2353_v7, %v2352_v6 }
 0x10d   :  { %7843 = vmatprep.mubr.msk.f32.mxu1 %vm102_vm0, %v9844_v34  ;;  %v8691_v34 = vpack.c.bf16 %v2382_v33, %v2381_v32 }
 0x10e   :  { %7945 = vmatmul.mubr.msk.f32.gmra.mrb[6].mxu0 %vm102_vm0, %v2055_v21 }
 0x10f   :  { %7947 = vmatprep.mubr.msk.f32.mxu0 %vm102_vm0, %v9918_v53 }
 0x110   :  { %7844 = vmatmul.mubr.msk.f32.vlgmr.msra.gmra.mrb[8].mxu1 %vm102_vm0, %v9848_v35  ;;  %v2358_v35 = vld [vmem:[#allocation3 + $0x1] sm:$0xff] }
 0x111   :  { %7846 = vmatprep.mubr.msk.f32.mxu1 %vm102_vm0, %v9860_v38  ;;  %8682 = vmatpush3.bf16.msra.mxu1 %v8679_v25  ;;  %v8695_v38 = vpack.c.bf16 %v2351_v37, %v2350_v36 }
 0x112   :  { %7948 = vmatmul.mubr.msk.f32.gmra.mrb[8].mxu0 %vm102_vm0, %v9922_v55  ;;  %8684 = vmatprep.subr.bf16.mxu1 %v8683_v28 }
 0x113   :  { %7950 = vmatprep.mubr.msk.f32.mxu0 %vm102_vm0, %v9937_v58 }
 0x114   :  { %7847 = vmatmul.mubr.msk.f32.gmra.mrb[10].mxu1 %vm102_vm0, %v9866_v40 }
 0x115   :  { %7849 = vmatprep.mubr.msk.f32.mxu1 %vm102_vm0, %v9881_v43  ;;  %8686 = vmatpush3.bf16.msra.mxu1 %v8683_v28 }
 0x116   :  { %7951 = vmatmul.mubr.msk.f32.gmra.mrb[10].mxu0 %vm102_vm0, %v9941_v59  ;;  %8688 = vmatprep.subr.bf16.mxu1 %v8687_v31 }
 0x117   :  { %7953 = vmatprep.mubr.msk.f32.mxu0 %vm102_vm0, %v9953_v62 }
 0x118   :  { %7850 = vmatmul.mubr.msk.f32.gmra.mrb[12].mxu1 %vm102_vm0, %v9885_v44 }
 0x119   :  { %7852 = vmatprep.mubr.msk.f32.mxu1 %vm102_vm0, %v9897_v47  ;;  %8690 = vmatpush3.bf16.msra.mxu1 %v8687_v31  ;;  %v10270_v47 = vld [vmem:[#allocation6] ss:$0 sm:$0xff] }
 0x11a   :  { %7954 = vmatmul.mubr.msk.f32.gmra.mrb[12].mxu0 %vm102_vm0, %v9957_v63  ;;  %8692 = vmatprep.subr.bf16.mxu1 %v8691_v34 }
 0x11b   :  { %7956 = vmatprep.mubr.msk.f32.mxu0 %vm102_vm0, %v9967_v4 }
 0x11c   :  { %7853 = vmatmul.mubr.msk.f32.gmra.mrb[14].mxu1 %vm102_vm0, %v1832_v2  ;;  %v2354_v2 = vld [vmem:[#allocation8 + $0x20] sm:$0xff] }
 0x11d   :  { %8694 = vmatpush3.bf16.msra.mxu1 %v8691_v34  ;;  %7975 = vmatprep.mubr.msk.f32.mxu1 %vm154_vm4, %v2358_v35  ;;  %v8703_v30 = vpack.c.bf16 %v2355_v20, %v2354_v2  ;;  %v2356_v34 = vld [vmem:[#allocation8 + $0x30] sm:$0xff]  ;;  %v2357_v35 = vld [vmem:[#allocation8 + $0x38] sm:$0xff] }
 0x11e   :  { %7957 = vmatmul.mubr.msk.f32.gmra.mrb[14].mxu0 %vm102_vm0, %v2063_v22  ;;  %8696 = vmatprep.subr.bf16.mxu1 %v8695_v38  ;;  %v2334_v2 = vld [vmem:[#allocation3] sm:$0xff] }
 0x1c3   :  { %v7807_v39 = vpop.f32.mrb[0].mxu1 }
 0x1c4   :  { %v1032_v40 = vpop.f32.mrb[1].mxu1 }
 0x1c7   :  { %v7810_v41 = vpop.f32.mrb[2].mxu1 }
 0x1c8   :  { %v1042_v42 = vpop.f32.mrb[3].mxu1 }
 0x1cb   :  { %v7813_v43 = vpop.f32.mrb[4].mxu1 }
 0x1cc   :  { %v1052_v44 = vpop.f32.mrb[5].mxu1 }
 0x1cf   :  { %v7816_v0 = vpop.f32.mrb[6].mxu1 }
 0x1d0   :  { %v1062_v45 = vpop.f32.mrb[7].mxu1 }
 0x1d5   :  { %v7937_v46 = vpop.f32.mrb[0].mxu0 }
 0x1d6   :  { %v8969_v48 = vadd.f32 %v7937_v46, %v7807_v39  ;;  %v2183_v49 = vpop.f32.mrb[1].mxu0 }
 0x1d7   :  { %v8970_v50 = vadd.f32 %v2183_v49, %v1032_v40  ;;  %v2786_v49 = vld [vmem:[#allocation8 + $0x80] sm:$0xff] }
 0x1d8   :  { %v2286_v51 = vadd.f32 %v8969_v48, %v10270_v47 }
 0x1d9   :  { %v2285_v52 = vadd.f32 %v8970_v50, %v10270_v47  ;;  %v7940_v53 = vpop.f32.mrb[2].mxu0  ;;  %v2787_v50 = vld [vmem:[#allocation8 + $0x88] sm:$0xff] }
 0x1da   :  { %v2302_v54 = vmax.f32 %v2286_v51, 0.0  ;;  %v8971_v55 = vadd.f32 %v7940_v53, %v7810_v41  ;;  %v2193_v56 = vpop.f32.mrb[3].mxu0 }
 0x1db   :  { %v2301_v57 = vmax.f32 %v2285_v52, 0.0  ;;  %v8972_v58 = vadd.f32 %v2193_v56, %v1042_v42 }
 0x1dc   :  { %2319 = vst.msk [vmem:[#allocation3 + $0x21] sm:$0xff] %vm154_vm4, %v2302_v54  ;;  %v2288_v59 = vadd.f32 %v8971_v55, %v10270_v47 }
 0x1dd   :  { %2318 = vst.msk [vmem:[#allocation3 + $0x11] sm:$0xff] %vm154_vm4, %v2301_v57  ;;  %v2287_v60 = vadd.f32 %v8972_v58, %v10270_v47  ;;  %v7943_v61 = vpop.f32.mrb[4].mxu0 }
 0x1de   :  { %v2304_v62 = vmax.f32 %v2288_v59, 0.0  ;;  %v8973_v63 = vadd.f32 %v7943_v61, %v7813_v43  ;;  %v2203_v1 = vpop.f32.mrb[5].mxu0  ;;  %v8711_v61 = vpack.c.bf16 %v2787_v50, %v2786_v49 }
 0x1df   :  { %v2303_v3 = vmax.f32 %v2287_v60, 0.0  ;;  %v8974_v4 = vadd.f32 %v2203_v1, %v1052_v44  ;;  %v2366_v60 = vld [vmem:[#allocation3 + $0xa1] sm:$0xff] }
 0x1e0   :  { %2321 = vst.msk [vmem:[#allocation3 + $0x41] sm:$0xff] %vm154_vm4, %v2304_v62  ;;  %v2290_v5 = vadd.f32 %v8973_v63, %v10270_v47 }
 0x1e1   :  { %2320 = vst.msk [vmem:[#allocation3 + $0x31] sm:$0xff] %vm154_vm4, %v2303_v3  ;;  %v2289_v8 = vadd.f32 %v8974_v4, %v10270_v47  ;;  %v7946_v9 = vpop.f32.mrb[6].mxu0 }
 0x1e2   :  { %v2306_v10 = vmax.f32 %v2290_v5, 0.0  ;;  %v8975_v11 = vadd.f32 %v7946_v9, %v7816_v0  ;;  %v2213_v12 = vpop.f32.mrb[7].mxu0  ;;  %v8707_v0 = vpack.c.bf16 %v2357_v35, %v2356_v34 }
 0x1e3   :  { %v2305_v13 = vmax.f32 %v2289_v8, 0.0  ;;  %v8976_v14 = vadd.f32 %v2213_v12, %v1062_v45  ;;  %v7845_v15 = vpop.f32.mrb[8].mxu1  ;;  %v10290_v23 = vld [vmem:[#allocation3 + $0x21] sm:$0xff] }
 0x1e4   :  { %2323 = vst.msk [vmem:[#allocation3 + $0x61] sm:$0xff] %vm154_vm4, %v2306_v10  ;;  %v2292_v17 = vadd.f32 %v8975_v11, %v10270_v47  ;;  %v1302_v18 = vpop.f32.mrb[9].mxu1  ;;  %v10284_v19 = vld [vmem:[#allocation3 + $0x11] sm:$0xff] }
 0x1e5   :  { %2322 = vst.msk [vmem:[#allocation3 + $0x51] sm:$0xff] %vm154_vm4, %v2305_v13  ;;  %v2291_v21 = vadd.f32 %v8976_v14, %v10270_v47  ;;  %v7949_v22 = vpop.f32.mrb[8].mxu0  ;;  %7976 = vmatmul.mubr.msk.f32.vlgmr.msra.gmra.mrb[16].mxu1 %vm154_vm4, %v10284_v19 }
 0x1e6   :  { %v2308_v24 = vmax.f32 %v2292_v17, 0.0  ;;  %v8977_v25 = vadd.f32 %v7949_v22, %v7845_v15  ;;  %8698 = vmatpush3.bf16.msra.mxu1 %v8695_v38  ;;  %v2223_v26 = vpop.f32.mrb[9].mxu0  ;;  %7978 = vmatprep.mubr.msk.f32.mxu1 %vm154_vm4, %v10290_v23  ;;  %v2789_v22 = vld [vmem:[#allocation8 + $0x98] sm:$0xff] }
 0x1e7   :  { %v2307_v27 = vmax.f32 %v2291_v21, 0.0  ;;  %v8978_v28 = vadd.f32 %v2223_v26, %v1302_v18  ;;  %v7848_v29 = vpop.f32.mrb[10].mxu1  ;;  %8700 = vmatprep.subr.bf16.mxu1 %v8699_v16  ;;  %v10302_v38 = vld [vmem:[#allocation3 + $0x41] sm:$0xff]  ;;  %v2788_v21 = vld [vmem:[#allocation8 + $0x90] sm:$0xff] }
 0x1e8   :  { %2325 = vst.msk [vmem:[#allocation3 + $0x81] sm:$0xff] %vm154_vm4, %v2308_v24  ;;  %v2294_v31 = vadd.f32 %v8977_v25, %v10270_v47  ;;  %v1312_v32 = vpop.f32.mrb[11].mxu1  ;;  %v10296_v33 = vld [vmem:[#allocation3 + $0x31] sm:$0xff]  ;;  %v8715_v24 = vpack.c.bf16 %v2789_v22, %v2788_v21  ;;  %v2790_v26 = vld [vmem:[#allocation8 + $0xa0] sm:$0xff] }
 0x1e9   :  { %2324 = vst.msk [vmem:[#allocation3 + $0x71] sm:$0xff] %vm154_vm4, %v2307_v27  ;;  %v2293_v36 = vadd.f32 %v8978_v28, %v10270_v47  ;;  %v7952_v37 = vpop.f32.mrb[10].mxu0  ;;  %7979 = vmatmul.mubr.msk.f32.gmra.mrb[18].mxu1 %vm154_vm4, %v10296_v33  ;;  %v10362_v25 = vld [vmem:[#allocation3 + $0x10] sm:$0xff]  ;;  %v10366_v28 = vld [vmem:[#allocation3 + $0x20] sm:$0xff] }
 0x1ea   :  { %v2310_v39 = vmax.f32 %v2294_v31, 0.0  ;;  %v8979_v40 = vadd.f32 %v7952_v37, %v7848_v29  ;;  %v2233_v41 = vpop.f32.mrb[11].mxu0  ;;  %7981 = vmatprep.mubr.msk.f32.mxu1 %vm154_vm4, %v10302_v38  ;;  %8702 = vmatpush3.bf16.msra.mxu1 %v8699_v16  ;;  %v2791_v27 = vld [vmem:[#allocation8 + $0xa8] sm:$0xff]  ;;  %v2792_v31 = vld [vmem:[#allocation8 + $0xb0] sm:$0xff]  ;;  %v10374_v34 = vld [vmem:[#allocation3 + $0x40] sm:$0xff] }
 0x1eb   :  { %v2309_v42 = vmax.f32 %v2293_v36, 0.0  ;;  %v8980_v43 = vadd.f32 %v2233_v41, %v1312_v32  ;;  %v7851_v44 = vpop.f32.mrb[12].mxu1  ;;  %8704 = vmatprep.subr.bf16.mxu1 %v8703_v30  ;;  %v10314_v53 = vld [vmem:[#allocation3 + $0x61] sm:$0xff]  ;;  %v8719_v29 = vpack.c.bf16 %v2791_v27, %v2790_v26 }
 0x1ec   :  { %2327 = vst.msk [vmem:[#allocation3 + $0xc1] sm:$0xff] %vm154_vm4, %v2310_v39  ;;  %v2296_v45 = vadd.f32 %v8979_v40, %v10270_v47  ;;  %v1322_v46 = vpop.f32.mrb[13].mxu1  ;;  %v10308_v48 = vld [vmem:[#allocation3 + $0x51] sm:$0xff]  ;;  %v2793_v32 = vld [vmem:[#allocation8 + $0xb8] sm:$0xff]  ;;  %v3020_v37 = vld [vmem:[#allocation8 + $0xc0] sm:$0xff] }
 0x1ed   :  { %2326 = vst.msk [vmem:[#allocation3 + $0xb1] sm:$0xff] %vm154_vm4, %v2309_v42  ;;  %v2295_v51 = vadd.f32 %v8980_v43, %v10270_v47  ;;  %v7955_v52 = vpop.f32.mrb[12].mxu0  ;;  %7982 = vmatmul.mubr.msk.f32.gmra.mrb[20].mxu1 %vm154_vm4, %v10308_v48  ;;  %v8723_v35 = vpack.c.bf16 %v2793_v32, %v2792_v31  ;;  %v10378_v36 = vld [vmem:[#allocation3 + $0x50] sm:$0xff]  ;;  %v10382_v40 = vld [vmem:[#allocation3 + $0x60] sm:$0xff] }
 0x1ee   :  { %v2312_v54 = vmax.f32 %v2296_v45, 0.0  ;;  %v8981_v55 = vadd.f32 %v7955_v52, %v7851_v44  ;;  %v2243_v56 = vpop.f32.mrb[13].mxu0  ;;  %7984 = vmatprep.mubr.msk.f32.mxu1 %vm154_vm4, %v10314_v53  ;;  %8706 = vmatpush3.bf16.msra.mxu1 %v8703_v30  ;;  %v10370_v30 = vld [vmem:[#allocation3 + $0x30] sm:$0xff]  ;;  %v2342_v41 = vld [vmem:[#allocation3 + $0xa0] sm:$0xff] }
 0x1ef   :  { %v2311_v57 = vmax.f32 %v2295_v51, 0.0  ;;  %v8982_v58 = vadd.f32 %v2243_v56, %v1322_v46  ;;  %v7854_v59 = vpop.f32.mrb[14].mxu1  ;;  %8708 = vmatprep.subr.bf16.mxu1 %v8707_v0  ;;  %v3021_v39 = vld [vmem:[#allocation8 + $0xc8] sm:$0xff]  ;;  %v2769_v51 = vld [vmem:[#allocation3 + $0x2] sm:$0xff] }
 0x1f0   :  { %2329 = vst.msk [vmem:[#allocation3 + $0xe1] sm:$0xff] %vm154_vm4, %v2312_v54  ;;  %v2298_v62 = vadd.f32 %v8981_v55, %v10270_v47  ;;  %v1332_v63 = vpop.f32.mrb[15].mxu1  ;;  %v10320_v1 = vld [vmem:[#allocation3 + $0x71] sm:$0xff]  ;;  %v8727_v42 = vpack.c.bf16 %v3021_v39, %v3020_v37  ;;  %v3023_v55 = vld [vmem:[#allocation8 + $0xd8] sm:$0xff] }
 0x1f1   :  { %2328 = vst.msk [vmem:[#allocation3 + $0xd1] sm:$0xff] %vm154_vm4, %v2311_v57  ;;  %v2297_v3 = vadd.f32 %v8982_v58, %v10270_v47  ;;  %v7958_v4 = vpop.f32.mrb[14].mxu0  ;;  %7985 = vmatmul.mubr.msk.f32.gmra.mrb[22].mxu1 %vm154_vm4, %v10320_v1  ;;  %v10386_v43 = vld [vmem:[#allocation3 + $0x70] sm:$0xff]  ;;  %v3024_v58 = vld [vmem:[#allocation8 + $0xe0] sm:$0xff]  ;;  %v3257_v31 = vld [vmem:[#allocation8 + $0x118] sm:$0xff] }
 0x1f2   :  { %v2314_v5 = vmax.f32 %v2298_v62, 0.0  ;;  %v8983_v6 = vadd.f32 %v7958_v4, %v7854_v59  ;;  %v2253_v7 = vpop.f32.mrb[15].mxu0  ;;  %7987 = vmatprep.mubr.msk.f32.mxu1 %vm154_vm4, %v2366_v60  ;;  %8710 = vmatpush3.bf16.msra.mxu1 %v8707_v0  ;;  %v3022_v54 = vld [vmem:[#allocation8 + $0xd0] sm:$0xff]  ;;  %v3025_v59 = vld [vmem:[#allocation8 + $0xe8] sm:$0xff]  ;;  %v10424_v60 = vld [vmem:[#allocation3 + $0x22] sm:$0xff] }
 0x1f3   :  { %v2313_v8 = vmax.f32 %v2297_v3, 0.0  ;;  %v8984_v9 = vadd.f32 %v2253_v7, %v1332_v63  ;;  %8712 = vmatprep.subr.bf16.mxu1 %v8711_v61  ;;  %v10335_v13 = vld [vmem:[#allocation3 + $0xc1] sm:$0xff]  ;;  %v8731_v56 = vpack.c.bf16 %v3023_v55, %v3022_v54  ;;  %v10420_v57 = vld [vmem:[#allocation3 + $0x12] sm:$0xff] }
 0x1f4   :  { %2331 = vst.msk [vmem:[#allocation3 + $0x101] sm:$0xff] %vm154_vm4, %v2314_v5  ;;  %v2300_v10 = vadd.f32 %v8983_v6, %v10270_v47  ;;  %v10329_v11 = vld [vmem:[#allocation3 + $0xb1] sm:$0xff]  ;;  %v10395_v0 = vld [vmem:[#allocation3 + $0xc0] sm:$0xff] }
 0x1f5   :  { %2330 = vst.msk [vmem:[#allocation3 + $0xf1] sm:$0xff] %vm154_vm4, %v2313_v8  ;;  %v2299_v12 = vadd.f32 %v8984_v9, %v10270_v47  ;;  %7988 = vmatmul.mubr.msk.f32.gmra.mrb[24].mxu1 %vm154_vm4, %v10329_v11  ;;  %v10391_v44 = vld [vmem:[#allocation3 + $0xb0] sm:$0xff]  ;;  %v3027_v3 = vld [vmem:[#allocation8 + $0xf8] sm:$0xff]  ;;  %v3254_v7 = vld [vmem:[#allocation8 + $0x100] sm:$0xff] }
 0x1f6   :  { %v2316_v14 = vmax.f32 %v2300_v10, 0.0  ;;  %7990 = vmatprep.mubr.msk.f32.mxu1 %vm154_vm4, %v10335_v13  ;;  %v10428_v62 = vld [vmem:[#allocation3 + $0x32] sm:$0xff]  ;;  %v10432_v4 = vld [vmem:[#allocation3 + $0x42] sm:$0xff] }
 0x1f7   :  { %v2315_v15 = vmax.f32 %v2299_v12, 0.0  ;;  %v10345_v47 = vld [vmem:[#allocation3 + $0xe1] sm:$0xff]  ;;  %v3026_v63 = vld [vmem:[#allocation8 + $0xf0] sm:$0xff]  ;;  %v3255_v8 = vld [vmem:[#allocation8 + $0x108] sm:$0xff] }
 0x1f8   :  { %2333 = vst.msk [vmem:[#allocation3 + $0x121] sm:$0xff] %vm154_vm4, %v2316_v14  ;;  %v10340_v16 = vld [vmem:[#allocation3 + $0xd1] sm:$0xff]  ;;  %v10403_v46 = vld [vmem:[#allocation3 + $0xe0] sm:$0xff]  ;;  %v8739_v5 = vpack.c.bf16 %v3027_v3, %v3026_v63  ;;  %v8743_v12 = vpack.c.bf16 %v3255_v8, %v3254_v7 }
 0x1f9   :  { %2332 = vst.msk [vmem:[#allocation3 + $0x111] sm:$0xff] %vm154_vm4, %v2315_v15  ;;  %7991 = vmatmul.mubr.msk.f32.gmra.mrb[26].mxu1 %vm154_vm4, %v10340_v16  ;;  %v10399_v45 = vld [vmem:[#allocation3 + $0xd0] sm:$0xff]  ;;  %v10440_v9 = vld [vmem:[#allocation3 + $0x62] sm:$0xff] }
 0x1fa   :  { %7993 = vmatprep.mubr.msk.f32.mxu1 %vm154_vm4, %v10345_v47  ;;  %v10436_v6 = vld [vmem:[#allocation3 + $0x52] sm:$0xff]  ;;  %v2777_v10 = vld [vmem:[#allocation3 + $0xa2] sm:$0xff] }
 0x1fb   :  { %v10353_v18 = vld [vmem:[#allocation3 + $0x101] sm:$0xff]  ;;  %v10444_v14 = vld [vmem:[#allocation3 + $0x72] sm:$0xff] }
 0x1fc   :  { %v10349_v17 = vld [vmem:[#allocation3 + $0xf1] sm:$0xff]  ;;  %v10411_v50 = vld [vmem:[#allocation3 + $0x100] sm:$0xff] }
 0x1fd   :  { %7994 = vmatmul.mubr.msk.f32.gmra.mrb[28].mxu1 %vm154_vm4, %v10349_v17  ;;  %v10407_v49 = vld [vmem:[#allocation3 + $0xf0] sm:$0xff]  ;;  %v10461_v22 = vld [vmem:[#allocation3 + $0xe2] sm:$0xff] }
 0x1fe   :  { %7996 = vmatprep.mubr.msk.f32.mxu1 %vm154_vm4, %v10353_v18  ;;  %v10449_v15 = vld [vmem:[#allocation3 + $0xb2] sm:$0xff]  ;;  %v10469_v26 = vld [vmem:[#allocation3 + $0x102] sm:$0xff] }
 0x1ff   :  { %v10457_v21 = vld [vmem:[#allocation3 + $0xd2] sm:$0xff]  ;;  %v3492_v63 = vld [vmem:[#allocation8 + $0x160] sm:$0xff]  ;;  %v3495_v8 = vld [vmem:[#allocation8 + $0x178] sm:$0xff] }
 0x200   :  { %v10357_v20 = vld [vmem:[#allocation3 + $0x111] sm:$0xff] }
 0x201   :  { %7997 = vmatmul.mubr.msk.f32.gmra.mrb[30].mxu1 %vm154_vm4, %v10357_v20  ;;  %v10415_v52 = vld [vmem:[#allocation3 + $0x110] sm:$0xff] }
 0x202   :  { %8015 = vmatprep.mubr.msk.f32.mxu1 %vm154_vm4, %v2334_v2  ;;  %v10453_v2 = vld [vmem:[#allocation3 + $0xc2] sm:$0xff]  ;;  %v10473_v27 = vld [vmem:[#allocation3 + $0x112] sm:$0xff] }
 0x203   :  { %v3259_v37 = vld [vmem:[#allocation8 + $0x128] sm:$0xff]  ;;  %v3494_v7 = vld [vmem:[#allocation8 + $0x170] sm:$0xff] }
 0x204   :  { %v3489_v54 = vld [vmem:[#allocation8 + $0x148] sm:$0xff] }
 0x205   :  { %8016 = vmatmul.mubr.msk.f32.vlgmr.msra.gmra.mrb[16].mxu1 %vm154_vm4, %v10362_v25  ;;  %v3493_v3 = vld [vmem:[#allocation8 + $0x168] sm:$0xff] }
 0x206   :  { %8714 = vmatpush3.bf16.msra.mxu1 %v8711_v61  ;;  %8018 = vmatprep.mubr.msk.f32.mxu1 %vm154_vm4, %v10366_v28  ;;  %v8735_v61 = vpack.c.bf16 %v3025_v59, %v3024_v58  ;;  %v3490_v58 = vld [vmem:[#allocation8 + $0x150] sm:$0xff]  ;;  %v3491_v59 = vld [vmem:[#allocation8 + $0x158] sm:$0xff] }
 0x207   :  { %8716 = vmatprep.subr.bf16.mxu1 %v8715_v24 }
 0x209   :  { %8019 = vmatmul.mubr.msk.f32.gmra.mrb[18].mxu1 %vm154_vm4, %v10370_v30 }
 0x20a   :  { %8021 = vmatprep.mubr.msk.f32.mxu1 %vm154_vm4, %v10374_v34  ;;  %8718 = vmatpush3.bf16.msra.mxu1 %v8715_v24  ;;  %v10465_v24 = vld [vmem:[#allocation3 + $0xf2] sm:$0xff] }
 0x20b   :  { %8720 = vmatprep.subr.bf16.mxu1 %v8719_v29 }
 0x20d   :  { %8022 = vmatmul.mubr.msk.f32.gmra.mrb[20].mxu1 %vm154_vm4, %v10378_v36 }
 0x20e   :  { %8024 = vmatprep.mubr.msk.f32.mxu1 %vm154_vm4, %v10382_v40  ;;  %8722 = vmatpush3.bf16.msra.mxu1 %v8719_v29  ;;  %v3256_v29 = vld [vmem:[#allocation8 + $0x110] sm:$0xff] }
 0x20f   :  { %8724 = vmatprep.subr.bf16.mxu1 %v8723_v35  ;;  %v8747_v32 = vpack.c.bf16 %v3257_v31, %v3256_v29  ;;  %v10527_v31 = vld [vmem:[#allocation3 + $0x81] sm:$0xff] }
 0x211   :  { %8025 = vmatmul.mubr.msk.f32.gmra.mrb[22].mxu1 %vm154_vm4, %v10386_v43 }
 0x212   :  { %8027 = vmatprep.mubr.msk.f32.mxu1 %vm154_vm4, %v2342_v41  ;;  %8726 = vmatpush3.bf16.msra.mxu1 %v8723_v35  ;;  %v3258_v35 = vld [vmem:[#allocation8 + $0x120] sm:$0xff]  ;;  %v3260_v41 = vld [vmem:[#allocation8 + $0x130] sm:$0xff] }
 0x213   :  { %8728 = vmatprep.subr.bf16.mxu1 %v8727_v42  ;;  %v8751_v39 = vpack.c.bf16 %v3259_v37, %v3258_v35  ;;  %v3726_v35 = vld [vmem:[#allocation8 + $0x198] sm:$0xff]  ;;  %v4504_v37 = vld [vmem:[#allocation11 + $0x40] sm:$0xff] }
 0x215   :  { %8028 = vmatmul.mubr.msk.f32.gmra.mrb[24].mxu1 %vm154_vm4, %v10391_v44 }
 0x216   :  { %8030 = vmatprep.mubr.msk.f32.mxu1 %vm154_vm4, %v10395_v0 }
 0x219   :  { %8031 = vmatmul.mubr.msk.f32.gmra.mrb[26].mxu1 %vm154_vm4, %v10399_v45 }
 0x21a   :  { %8033 = vmatprep.mubr.msk.f32.mxu1 %vm154_vm4, %v10403_v46 }
 0x21d   :  { %8034 = vmatmul.mubr.msk.f32.gmra.mrb[28].mxu1 %vm154_vm4, %v10407_v49 }
 0x21e   :  { %8036 = vmatprep.mubr.msk.f32.mxu1 %vm154_vm4, %v10411_v50 }
 0x221   :  { %8037 = vmatmul.mubr.msk.f32.gmra.mrb[30].mxu1 %vm154_vm4, %v10415_v52 }
 0x222   :  { %8055 = vmatprep.mubr.msk.f32.mxu1 %vm154_vm4, %v2769_v51  ;;  %v3488_v51 = vld [vmem:[#allocation8 + $0x140] sm:$0xff] }
 0x223   :  { %v8759_v55 = vpack.c.bf16 %v3489_v54, %v3488_v51  ;;  %v3727_v54 = vld [vmem:[#allocation8 + $0x1a0] sm:$0xff] }
 0x225   :  { %8056 = vmatmul.mubr.msk.f32.vlgmr.msra.gmra.mrb[16].mxu1 %vm154_vm4, %v10420_v57 }
 0x226   :  { %8730 = vmatpush3.bf16.msra.mxu1 %v8727_v42  ;;  %8058 = vmatprep.mubr.msk.f32.mxu1 %vm154_vm4, %v10424_v60  ;;  %v3261_v42 = vld [vmem:[#allocation8 + $0x138] sm:$0xff] }
 0x227   :  { %8732 = vmatprep.subr.bf16.mxu1 %v8731_v56 }
 0x229   :  { %8059 = vmatmul.mubr.msk.f32.gmra.mrb[18].mxu1 %vm154_vm4, %v10428_v62 }
 0x22a   :  { %8061 = vmatprep.mubr.msk.f32.mxu1 %vm154_vm4, %v10432_v4  ;;  %8734 = vmatpush3.bf16.msra.mxu1 %v8731_v56  ;;  %v10491_v56 = vld [vmem:[#allocation3 + $0x80] sm:$0xff] }
 0x22b   :  { %8736 = vmatprep.subr.bf16.mxu1 %v8735_v61 }
 0x22d   :  { %8062 = vmatmul.mubr.msk.f32.gmra.mrb[20].mxu1 %vm154_vm4, %v10436_v6 }
 0x22e   :  { %8064 = vmatprep.mubr.msk.f32.mxu1 %vm154_vm4, %v10440_v9  ;;  %8738 = vmatpush3.bf16.msra.mxu1 %v8735_v61  ;;  %v8763_v61 = vpack.c.bf16 %v3491_v59, %v3490_v58  ;;  %v3728_v58 = vld [vmem:[#allocation8 + $0x1a8] sm:$0xff] }
 0x22f   :  { %8740 = vmatprep.subr.bf16.mxu1 %v8739_v5  ;;  %v4508_v59 = vld [vmem:[#allocation11 + $0x60] sm:$0xff] }
 0x231   :  { %8065 = vmatmul.mubr.msk.f32.gmra.mrb[22].mxu1 %vm154_vm4, %v10444_v14 }
 0x232   :  { %8067 = vmatprep.mubr.msk.f32.mxu1 %vm154_vm4, %v2777_v10  ;;  %8742 = vmatpush3.bf16.msra.mxu1 %v8739_v5  ;;  %v8767_v5 = vpack.c.bf16 %v3493_v3, %v3492_v63  ;;  %v3723_v10 = vld [vmem:[#allocation8 + $0x180] sm:$0xff]  ;;  %v8783_v63 = vpack.c.bf16 %v3728_v58, %v3727_v54  ;;  %v3729_v3 = vld [vmem:[#allocation8 + $0x1b0] sm:$0xff]  ;;  %v4192_v54 = vld [vmem:[#allocation8 + $0x208] sm:$0xff] }
 0x233   :  { %8744 = vmatprep.subr.bf16.mxu1 %v8743_v12  ;;  %v4482_v58 = vld [vmem:[#allocation11 + $0x18] sm:$0xff] }
 0x235   :  { %8068 = vmatmul.mubr.msk.f32.gmra.mrb[24].mxu1 %vm154_vm4, %v10449_v15 }
 0x236   :  { %8070 = vmatprep.mubr.msk.f32.mxu1 %vm154_vm4, %v10453_v2 }
 0x239   :  { %8071 = vmatmul.mubr.msk.f32.gmra.mrb[26].mxu1 %vm154_vm4, %v10457_v21 }
 0x23a   :  { %8073 = vmatprep.mubr.msk.f32.mxu1 %vm154_vm4, %v10461_v22 }
 0x23d   :  { %8074 = vmatmul.mubr.msk.f32.gmra.mrb[28].mxu1 %vm154_vm4, %v10465_v24 }
 0x23e   :  { %8076 = vmatprep.mubr.msk.f32.mxu1 %vm154_vm4, %v10469_v26 }
 0x241   :  { %8077 = vmatmul.mubr.msk.f32.gmra.mrb[30].mxu1 %vm154_vm4, %v10473_v27 }
 0x242   :  { %8095 = vmatprep.mubr.msk.f32.mxu1 %vm154_vm4, %v10362_v25  ;;  %v8755_v25 = vpack.c.bf16 %v3261_v42, %v3260_v41  ;;  %v4506_v41 = vld [vmem:[#allocation11 + $0x50] sm:$0xff] }
 0x245   :  { %8096 = vmatmul.mubr.msk.f32.vlgmr.msra.gmra.mrb[16].mxu1 %vm154_vm4, %v10366_v28 }
 0x246   :  { %8746 = vmatpush3.bf16.msra.mxu1 %v8743_v12  ;;  %8098 = vmatprep.mubr.msk.f32.mxu1 %vm154_vm4, %v10370_v30  ;;  %v3724_v12 = vld [vmem:[#allocation8 + $0x188] sm:$0xff] }
 0x247   :  { %8748 = vmatprep.subr.bf16.mxu1 %v8747_v32  ;;  %v8775_v29 = vpack.c.bf16 %v3724_v12, %v3723_v10  ;;  %v10563_v12 = vld [vmem:[#allocation3 + $0x82] sm:$0xff] }
 0x249   :  { %8099 = vmatmul.mubr.msk.f32.gmra.mrb[18].mxu1 %vm154_vm4, %v10374_v34 }
 0x24a   :  { %8101 = vmatprep.mubr.msk.f32.mxu1 %vm154_vm4, %v10378_v36  ;;  %8750 = vmatpush3.bf16.msra.mxu1 %v8747_v32  ;;  %v3725_v32 = vld [vmem:[#allocation8 + $0x190] sm:$0xff] }
 0x24b   :  { %8752 = vmatprep.subr.bf16.mxu1 %v8751_v39  ;;  %v8779_v51 = vpack.c.bf16 %v3726_v35, %v3725_v32  ;;  %v3960_v32 = vld [vmem:[#allocation8 + $0x1d8] sm:$0xff] }
 0x24d   :  { %8102 = vmatmul.mubr.msk.f32.gmra.mrb[20].mxu1 %vm154_vm4, %v10382_v40 }
 0x24e   :  { %8104 = vmatprep.mubr.msk.f32.mxu1 %vm154_vm4, %v10386_v43  ;;  %8754 = vmatpush3.bf16.msra.mxu1 %v8751_v39  ;;  %v4505_v39 = vld [vmem:[#allocation11 + $0x48] sm:$0xff] }
 0x24f   :  { %8756 = vmatprep.subr.bf16.mxu1 %v8755_v25  ;;  %v8823_v42 = vpack.c.bf16 %v4505_v39, %v4504_v37  ;;  %v3961_v37 = vld [vmem:[#allocation8 + $0x1e0] sm:$0xff]  ;;  %v3962_v39 = vld [vmem:[#allocation8 + $0x1e8] sm:$0xff] }
 0x251   :  { %8105 = vmatmul.mubr.msk.f32.gmra.mrb[22].mxu1 %vm154_vm4, %v10491_v56  ;;  %8824 = vmatprep.subr.bf16.mxu0 %v8823_v42 }
 0x252   :  { %8107 = vmatprep.mubr.msk.f32.mxu1 %vm154_vm4, %v10391_v44  ;;  %8758 = vmatpush3.bf16.msra.mxu1 %v8755_v25  ;;  %v10509_v44 = vld [vmem:[#allocation3 + $0x120] sm:$0xff] }
 0x253   :  { %8760 = vmatprep.subr.bf16.mxu1 %v8759_v55  ;;  %v4507_v25 = vld [vmem:[#allocation11 + $0x58] sm:$0xff]  ;;  %8826 = vmatpush3.bf16.msra.mxu0 %v8823_v42  ;;  %v3963_v42 = vld [vmem:[#allocation8 + $0x1f0] sm:$0xff] }
 0x255   :  { %8108 = vmatmul.mubr.msk.f32.gmra.mrb[24].mxu1 %vm154_vm4, %v10395_v0 }
 0x256   :  { %8110 = vmatprep.mubr.msk.f32.mxu1 %vm154_vm4, %v10399_v45 }
 0x259   :  { %8111 = vmatmul.mubr.msk.f32.gmra.mrb[26].mxu1 %vm154_vm4, %v10403_v46 }
 0x25a   :  { %8113 = vmatprep.mubr.msk.f32.mxu1 %vm154_vm4, %v10407_v49 }
 0x25d   :  { %8114 = vmatmul.mubr.msk.f32.gmra.mrb[28].mxu1 %vm154_vm4, %v10411_v50 }
 0x25e   :  { %8116 = vmatprep.mubr.msk.f32.mxu1 %vm154_vm4, %v10415_v52 }
 0x261   :  { %8117 = vmatmul.mubr.msk.f32.gmra.mrb[30].mxu1 %vm154_vm4, %v10509_v44 }
 0x262   :  { %8135 = vmatprep.mubr.msk.f32.mxu1 %vm154_vm4, %v10284_v19  ;;  %v8771_v19 = vpack.c.bf16 %v3495_v8, %v3494_v7  ;;  %v3957_v8 = vld [vmem:[#allocation8 + $0x1c0] sm:$0xff] }
 0x265   :  { %8136 = vmatmul.mubr.msk.f32.vlgmr.msra.gmra.mrb[16].mxu1 %vm154_vm4, %v10290_v23 }
 0x266   :  { %8762 = vmatpush3.bf16.msra.mxu1 %v8759_v55  ;;  %8138 = vmatprep.mubr.msk.f32.mxu1 %vm154_vm4, %v10296_v33  ;;  %v8827_v55 = vpack.c.bf16 %v4507_v25, %v4506_v41  ;;  %v8799_v41 = vpack.c.bf16 %v3962_v39, %v3961_v37  ;;  %v3964_v25 = vld [vmem:[#allocation8 + $0x1f8] sm:$0xff] }
 0x267   :  { %8764 = vmatprep.subr.bf16.mxu1 %v8763_v61 }
 0x268   :  { %8828 = vmatprep.subr.bf16.mxu0 %v8827_v55 }
 0x269   :  { %8139 = vmatmul.mubr.msk.f32.gmra.mrb[18].mxu1 %vm154_vm4, %v10302_v38  ;;  %8830 = vmatpush3.bf16.msra.mxu0 %v8827_v55  ;;  %v4481_v55 = vld [vmem:[#allocation11 + $0x10] sm:$0xff] }
 0x26a   :  { %8141 = vmatprep.mubr.msk.f32.mxu1 %vm154_vm4, %v10308_v48  ;;  %8766 = vmatpush3.bf16.msra.mxu1 %v8763_v61  ;;  %v4509_v61 = vld [vmem:[#allocation11 + $0x68] sm:$0xff] }
 0x26b   :  { %8768 = vmatprep.subr.bf16.mxu1 %v8767_v5 }
 0x26d   :  { %8142 = vmatmul.mubr.msk.f32.gmra.mrb[20].mxu1 %vm154_vm4, %v10314_v53 }
 0x26e   :  { %8144 = vmatprep.mubr.msk.f32.mxu1 %vm154_vm4, %v10320_v1  ;;  %8770 = vmatpush3.bf16.msra.mxu1 %v8767_v5  ;;  %v3730_v5 = vld [vmem:[#allocation8 + $0x1b8] sm:$0xff] }
 0x26f   :  { %8772 = vmatprep.subr.bf16.mxu1 %v8771_v19  ;;  %v8787_v7 = vpack.c.bf16 %v3730_v5, %v3729_v3  ;;  %v8843_v3 = vpack.c.bf16 %v4482_v58, %v4481_v55  ;;  %v4919_v58 = vld [vmem:[#allocation11 + $0xa0] sm:$0xff] }
 0x271   :  { %8145 = vmatmul.mubr.msk.f32.gmra.mrb[22].mxu1 %vm154_vm4, %v10527_v31 }
 0x272   :  { %8147 = vmatprep.mubr.msk.f32.mxu1 %vm154_vm4, %v10329_v11  ;;  %8774 = vmatpush3.bf16.msra.mxu1 %v8771_v19  ;;  %v10545_v11 = vld [vmem:[#allocation3 + $0x121] sm:$0xff]  ;;  %v3958_v19 = vld [vmem:[#allocation8 + $0x1c8] sm:$0xff] }
 0x273   :  { %8776 = vmatprep.subr.bf16.mxu1 %v8775_v29  ;;  %v8791_v10 = vpack.c.bf16 %v3958_v19, %v3957_v8  ;;  %v4483_v19 = vld [vmem:[#allocation11 + $0x20] sm:$0xff] }
 0x275   :  { %8148 = vmatmul.mubr.msk.f32.gmra.mrb[24].mxu1 %vm154_vm4, %v10335_v13 }
 0x276   :  { %8150 = vmatprep.mubr.msk.f32.mxu1 %vm154_vm4, %v10340_v16 }
 0x279   :  { %8151 = vmatmul.mubr.msk.f32.gmra.mrb[26].mxu1 %vm154_vm4, %v10345_v47 }
 0x27a   :  { %8153 = vmatprep.mubr.msk.f32.mxu1 %vm154_vm4, %v10349_v17 }
 0x27d   :  { %8154 = vmatmul.mubr.msk.f32.gmra.mrb[28].mxu1 %vm154_vm4, %v10353_v18 }
 0x27e   :  { %8156 = vmatprep.mubr.msk.f32.mxu1 %vm154_vm4, %v10357_v20 }
 0x281   :  { %8157 = vmatmul.mubr.msk.f32.gmra.mrb[30].mxu1 %vm154_vm4, %v10545_v11 }
 0x282   :  { %8175 = vmatprep.mubr.msk.f32.mxu1 %vm154_vm4, %v10420_v57  ;;  %v8831_v57 = vpack.c.bf16 %v4509_v61, %v4508_v59 }
 0x284   :  { %8832 = vmatprep.subr.bf16.mxu0 %v8831_v57 }
 0x285   :  { %8176 = vmatmul.mubr.msk.f32.vlgmr.msra.gmra.mrb[16].mxu1 %vm154_vm4, %v10424_v60  ;;  %8834 = vmatpush3.bf16.msra.mxu0 %v8831_v57 }
 0x286   :  { %8778 = vmatpush3.bf16.msra.mxu1 %v8775_v29  ;;  %8178 = vmatprep.mubr.msk.f32.mxu1 %vm154_vm4, %v10428_v62  ;;  %v3959_v29 = vld [vmem:[#allocation8 + $0x1d0] sm:$0xff] }
 0x287   :  { %8780 = vmatprep.subr.bf16.mxu1 %v8779_v51  ;;  %v8795_v35 = vpack.c.bf16 %v3960_v32, %v3959_v29 }
 0x289   :  { %8179 = vmatmul.mubr.msk.f32.gmra.mrb[18].mxu1 %vm154_vm4, %v10432_v4 }
 0x28a   :  { %8181 = vmatprep.mubr.msk.f32.mxu1 %vm154_vm4, %v10436_v6  ;;  %8782 = vmatpush3.bf16.msra.mxu1 %v8779_v51  ;;  %v4191_v51 = vld [vmem:[#allocation8 + $0x200] sm:$0xff] }
 0x28b   :  { %8784 = vmatprep.subr.bf16.mxu1 %v8783_v63 }
 0x28d   :  { %8182 = vmatmul.mubr.msk.f32.gmra.mrb[20].mxu1 %vm154_vm4, %v10440_v9 }
 0x28e   :  { %8184 = vmatprep.mubr.msk.f32.mxu1 %vm154_vm4, %v10444_v14  ;;  %8786 = vmatpush3.bf16.msra.mxu1 %v8783_v63 }
 0x28f   :  { %8788 = vmatprep.subr.bf16.mxu1 %v8787_v7 }
 0x291   :  { %8185 = vmatmul.mubr.msk.f32.gmra.mrb[22].mxu1 %vm154_vm4, %v10563_v12 }
 0x292   :  { %8187 = vmatprep.mubr.msk.f32.mxu1 %vm154_vm4, %v10449_v15  ;;  %8790 = vmatpush3.bf16.msra.mxu1 %v8787_v7  ;;  %v10581_v15 = vld [vmem:[#allocation3 + $0x122] sm:$0xff] }
 0x293   :  { %8792 = vmatprep.subr.bf16.mxu1 %v8791_v10 }
 0x295   :  { %8188 = vmatmul.mubr.msk.f32.gmra.mrb[24].mxu1 %vm154_vm4, %v10453_v2 }
 0x296   :  { %8190 = vmatprep.mubr.msk.f32.mxu1 %vm154_vm4, %v10457_v21 }
 0x299   :  { %8191 = vmatmul.mubr.msk.f32.gmra.mrb[26].mxu1 %vm154_vm4, %v10461_v22 }
 0x29a   :  { %8193 = vmatprep.mubr.msk.f32.mxu1 %vm154_vm4, %v10465_v24 }
 0x29d   :  { %8194 = vmatmul.mubr.msk.f32.gmra.mrb[28].mxu1 %vm154_vm4, %v10469_v26 }
 0x29e   :  { %8196 = vmatprep.mubr.msk.f32.mxu1 %vm154_vm4, %v10473_v27 }
 0x2a1   :  { %8197 = vmatmul.mubr.msk.f32.gmra.mrb[30].mxu1 %vm154_vm4, %v10581_v15 }
 0x2a2   :  { %8215 = vmatprep.mubr.msk.f32.mxu1 %vm154_vm4, %v10366_v28  ;;  %v8803_v28 = vpack.c.bf16 %v3964_v25, %v3963_v42  ;;  %v4485_v25 = vld [vmem:[#allocation11 + $0x30] sm:$0xff] }
 0x2a5   :  { %8216 = vmatmul.mubr.msk.f32.vlgmr.msra.gmra.mrb[16].mxu1 %vm154_vm4, %v10370_v30  ;;  %v3713_v30 = vld [vmem:[#allocation3 + $0x90] sm:$0xff] }
 0x2a6   :  { %8794 = vmatpush3.bf16.msra.mxu1 %v8791_v10  ;;  %8218 = vmatprep.mubr.msk.f32.mxu1 %vm154_vm4, %v10374_v34  ;;  %v8807_v34 = vpack.c.bf16 %v4192_v54, %v4191_v51  ;;  %v4484_v10 = vld [vmem:[#allocation11 + $0x28] sm:$0xff] }
 0x2a7   :  { %8796 = vmatprep.subr.bf16.mxu1 %v8795_v35  ;;  %v8847_v37 = vpack.c.bf16 %v4484_v10, %v4483_v19 }
 0x2a9   :  { %8219 = vmatmul.mubr.msk.f32.gmra.mrb[18].mxu1 %vm154_vm4, %v10378_v36  ;;  %v3721_v36 = vld [vmem:[#allocation3 + $0x130] sm:$0xff] }
 0x2aa   :  { %8221 = vmatprep.mubr.msk.f32.mxu1 %vm154_vm4, %v10382_v40  ;;  %8798 = vmatpush3.bf16.msra.mxu1 %v8795_v35  ;;  %v4193_v40 = vld [vmem:[#allocation8 + $0x210] sm:$0xff] }
 0x2ab   :  { %8800 = vmatprep.subr.bf16.mxu1 %v8799_v41 }
 0x2ad   :  { %8222 = vmatmul.mubr.msk.f32.gmra.mrb[20].mxu1 %vm154_vm4, %v10386_v43  ;;  %v4194_v43 = vld [vmem:[#allocation8 + $0x218] sm:$0xff] }
 0x2ae   :  { %8224 = vmatprep.mubr.msk.f32.mxu1 %vm154_vm4, %v10491_v56  ;;  %8802 = vmatpush3.bf16.msra.mxu1 %v8799_v41 }
 0x2af   :  { %8804 = vmatprep.subr.bf16.mxu1 %v8803_v28 }
 0x2b1   :  { %8225 = vmatmul.mubr.msk.f32.gmra.mrb[22].mxu1 %vm154_vm4, %v3713_v30 }
 0x2b2   :  { %8227 = vmatprep.mubr.msk.f32.mxu1 %vm154_vm4, %v10395_v0  ;;  %8806 = vmatpush3.bf16.msra.mxu1 %v8803_v28  ;;  %v8811_v0 = vpack.c.bf16 %v4194_v43, %v4193_v40  ;;  %v4486_v28 = vld [vmem:[#allocation11 + $0x38] sm:$0xff] }
 0x2b3   :  { %8808 = vmatprep.subr.bf16.mxu1 %v8807_v34  ;;  %v8851_v40 = vpack.c.bf16 %v4486_v28, %v4485_v25 }
 0x2b5   :  { %8228 = vmatmul.mubr.msk.f32.gmra.mrb[24].mxu1 %vm154_vm4, %v10399_v45  ;;  %v4195_v45 = vld [vmem:[#allocation8 + $0x220] sm:$0xff] }
 0x2b6   :  { %8230 = vmatprep.mubr.msk.f32.mxu1 %vm154_vm4, %v10403_v46  ;;  %v4196_v46 = vld [vmem:[#allocation8 + $0x228] sm:$0xff] }
 0x2b9   :  { %8231 = vmatmul.mubr.msk.f32.gmra.mrb[26].mxu1 %vm154_vm4, %v10407_v49  ;;  %v8815_v49 = vpack.c.bf16 %v4196_v46, %v4195_v45  ;;  %v4915_v46 = vld [vmem:[#allocation11 + $0x80] sm:$0xff] }
 0x2ba   :  { %8233 = vmatprep.mubr.msk.f32.mxu1 %vm154_vm4, %v10411_v50  ;;  %v4197_v50 = vld [vmem:[#allocation8 + $0x230] sm:$0xff] }
 0x2bd   :  { %8234 = vmatmul.mubr.msk.f32.gmra.mrb[28].mxu1 %vm154_vm4, %v10415_v52  ;;  %v4198_v52 = vld [vmem:[#allocation8 + $0x238] sm:$0xff] }
 0x2be   :  { %8236 = vmatprep.mubr.msk.f32.mxu1 %vm154_vm4, %v10509_v44 }
 0x2c1   :  { %8237 = vmatmul.mubr.msk.f32.gmra.mrb[30].mxu1 %vm154_vm4, %v3721_v36 }
 0x2c2   :  { %8255 = vmatprep.mubr.msk.f32.mxu1 %vm154_vm4, %v10290_v23  ;;  %v8819_v23 = vpack.c.bf16 %v4198_v52, %v4197_v50 }
 0x2c5   :  { %8256 = vmatmul.mubr.msk.f32.vlgmr.msra.gmra.mrb[16].mxu1 %vm154_vm4, %v10296_v33  ;;  %v3947_v33 = vld [vmem:[#allocation3 + $0x91] sm:$0xff] }
 0x2c6   :  { %8810 = vmatpush3.bf16.msra.mxu1 %v8807_v34  ;;  %8258 = vmatprep.mubr.msk.f32.mxu1 %vm154_vm4, %v10302_v38  ;;  %v3955_v38 = vld [vmem:[#allocation3 + $0x131] sm:$0xff] }
 0x2c7   :  { %8812 = vmatprep.subr.bf16.mxu1 %v8811_v0 }
 0x2c9   :  { %8259 = vmatmul.mubr.msk.f32.gmra.mrb[18].mxu1 %vm154_vm4, %v10308_v48  ;;  %v4181_v48 = vld [vmem:[#allocation3 + $0x92] sm:$0xff] }
 0x2ca   :  { %8261 = vmatprep.mubr.msk.f32.mxu1 %vm154_vm4, %v10314_v53  ;;  %8814 = vmatpush3.bf16.msra.mxu1 %v8811_v0  ;;  %v4189_v53 = vld [vmem:[#allocation3 + $0x132] sm:$0xff] }
 0x2cb   :  { %8816 = vmatprep.subr.bf16.mxu1 %v8815_v49 }
 0x2cd   :  { %8262 = vmatmul.mubr.msk.f32.gmra.mrb[20].mxu1 %vm154_vm4, %v10320_v1  ;;  %v4510_v1 = vld [vmem:[#allocation11 + $0x70] sm:$0xff] }
 0x2ce   :  { %8264 = vmatprep.mubr.msk.f32.mxu1 %vm154_vm4, %v10527_v31  ;;  %8818 = vmatpush3.bf16.msra.mxu1 %v8815_v49  ;;  %v4916_v49 = vld [vmem:[#allocation11 + $0x88] sm:$0xff] }
 0x2cf   :  { %8820 = vmatprep.subr.bf16.mxu1 %v8819_v23 }
 0x2d1   :  { %8265 = vmatmul.mubr.msk.f32.gmra.mrb[22].mxu1 %vm154_vm4, %v3947_v33 }
 0x2d2   :  { %8267 = vmatprep.mubr.msk.f32.mxu1 %vm154_vm4, %v10335_v13  ;;  %8822 = vmatpush3.bf16.msra.mxu1 %v8819_v23  ;;  %v4511_v13 = vld [vmem:[#allocation11 + $0x78] sm:$0xff] }
 0x2d5   :  { %8268 = vmatmul.mubr.msk.f32.gmra.mrb[24].mxu1 %vm154_vm4, %v10340_v16  ;;  %v8835_v16 = vpack.c.bf16 %v4511_v13, %v4510_v1 }
 0x2d6   :  { %8270 = vmatprep.mubr.msk.f32.mxu1 %vm154_vm4, %v10345_v47  ;;  %v4487_v47 = vld [vmem:[#allocation3 + $0x1] sm:$0xff] }
 0x2d7   :  { %8836 = vmatprep.subr.bf16.mxu0 %v8835_v16  ;;  %8335 = vmatprep.mubr.msk.f32.mxu0 %vm154_vm4, %v4487_v47 }
 0x2d8   :  { %8838 = vmatpush3.bf16.msra.mxu0 %v8835_v16 }
 0x2d9   :  { %8271 = vmatmul.mubr.msk.f32.gmra.mrb[26].mxu1 %vm154_vm4, %v10349_v17  ;;  %v4479_v17 = vld [vmem:[#allocation11] sm:$0xff] }
 0x2da   :  { %8273 = vmatprep.mubr.msk.f32.mxu1 %vm154_vm4, %v10353_v18  ;;  %v4480_v18 = vld [vmem:[#allocation11 + $0x8] sm:$0xff] }
 0x2dd   :  { %8274 = vmatmul.mubr.msk.f32.gmra.mrb[28].mxu1 %vm154_vm4, %v10357_v20  ;;  %v8839_v20 = vpack.c.bf16 %v4480_v18, %v4479_v17 }
 0x2de   :  { %8276 = vmatprep.mubr.msk.f32.mxu1 %vm154_vm4, %v10545_v11 }
 0x2df   :  { %8840 = vmatprep.subr.bf16.mxu0 %v8839_v20 }
 0x2e1   :  { %8277 = vmatmul.mubr.msk.f32.gmra.mrb[30].mxu1 %vm154_vm4, %v3955_v38 }
 0x2e2   :  { %8295 = vmatprep.mubr.msk.f32.mxu1 %vm154_vm4, %v10424_v60  ;;  %v10676_v60 = vld [vmem:[#allocation9] ss:$0 sm:$0xff] }
 0x2e5   :  { %8296 = vmatmul.mubr.msk.f32.vlgmr.msra.gmra.mrb[16].mxu1 %vm154_vm4, %v10428_v62 }
 0x2e6   :  { %8298 = vmatprep.mubr.msk.f32.mxu1 %vm154_vm4, %v10432_v4 }
 0x2e9   :  { %8299 = vmatmul.mubr.msk.f32.gmra.mrb[18].mxu1 %vm154_vm4, %v10436_v6 }
 0x2ea   :  { %8301 = vmatprep.mubr.msk.f32.mxu1 %vm154_vm4, %v10440_v9 }
 0x2ed   :  { %8302 = vmatmul.mubr.msk.f32.gmra.mrb[20].mxu1 %vm154_vm4, %v10444_v14 }
 0x2ee   :  { %8304 = vmatprep.mubr.msk.f32.mxu1 %vm154_vm4, %v10563_v12 }
 0x2f1   :  { %8305 = vmatmul.mubr.msk.f32.gmra.mrb[22].mxu1 %vm154_vm4, %v4181_v48  ;;  %v4495_v48 = vld [vmem:[#allocation3 + $0xa1] sm:$0xff] }
 0x2f2   :  { %8307 = vmatprep.mubr.msk.f32.mxu1 %vm154_vm4, %v10453_v2 }
 0x2f5   :  { %8308 = vmatmul.mubr.msk.f32.gmra.mrb[24].mxu1 %vm154_vm4, %v10457_v21 }
 0x2f6   :  { %8310 = vmatprep.mubr.msk.f32.mxu1 %vm154_vm4, %v10461_v22 }
 0x2f9   :  { %8311 = vmatmul.mubr.msk.f32.gmra.mrb[26].mxu1 %vm154_vm4, %v10465_v24 }
 0x2fa   :  { %8313 = vmatprep.mubr.msk.f32.mxu1 %vm154_vm4, %v10469_v26 }
 0x2fd   :  { %8314 = vmatmul.mubr.msk.f32.gmra.mrb[28].mxu1 %vm154_vm4, %v10473_v27 }
 0x2fe   :  { %8316 = vmatprep.mubr.msk.f32.mxu1 %vm154_vm4, %v10581_v15 }
 0x301   :  { %8317 = vmatmul.mubr.msk.f32.gmra.mrb[30].mxu1 %vm154_vm4, %v4189_v53  ;;  %v8855_v53 = vpack.c.bf16 %v4916_v49, %v4915_v46 }
 0x3b8   :  { %v8297_v62 = vpop.f32.mrb[16].mxu1 }
 0x3b9   :  { %v4416_v4 = vadd.f32 %v8297_v62, %v10676_v60  ;;  %v4313_v6 = vpop.f32.mrb[17].mxu1 }
 0x3ba   :  { %v4415_v9 = vadd.f32 %v10676_v60, %v4313_v6 }
 0x3bb   :  { %v4432_v14 = vmax.f32 %v4416_v4, 0.0 }
 0x3bc   :  { %v4431_v2 = vmax.f32 %v4415_v9, 0.0  ;;  %v8300_v21 = vpop.f32.mrb[18].mxu1 }
 0x3bd   :  { %4448 = vst.msk [vmem:[#allocation3 + $0x21] sm:$0xff] %vm154_vm4, %v4432_v14  ;;  %v4418_v22 = vadd.f32 %v8300_v21, %v10676_v60  ;;  %v4323_v24 = vpop.f32.mrb[19].mxu1 }
 0x3be   :  { %4447 = vst.msk [vmem:[#allocation3 + $0x11] sm:$0xff] %vm154_vm4, %v4431_v2  ;;  %v4417_v26 = vadd.f32 %v10676_v60, %v4323_v24 }
 0x3bf   :  { %v4434_v27 = vmax.f32 %v4418_v22, 0.0 }
 0x3c0   :  { %v4433_v56 = vmax.f32 %v4417_v26, 0.0  ;;  %v8303_v44 = vpop.f32.mrb[20].mxu1 }
 0x3c1   :  { %4450 = vst.msk [vmem:[#allocation3 + $0x41] sm:$0xff] %vm154_vm4, %v4434_v27  ;;  %v4420_v31 = vadd.f32 %v8303_v44, %v10676_v60  ;;  %v4333_v11 = vpop.f32.mrb[21].mxu1  ;;  %v4463_v27 = vld [vmem:[#allocation3] sm:$0xff]  ;;  %v4917_v44 = vld [vmem:[#allocation11 + $0x90] sm:$0xff] }
 0x3c2   :  { %4449 = vst.msk [vmem:[#allocation3 + $0x31] sm:$0xff] %vm154_vm4, %v4433_v56  ;;  %v4419_v59 = vadd.f32 %v10676_v60, %v4333_v11 }
 0x3c3   :  { %v4436_v61 = vmax.f32 %v4420_v31, 0.0  ;;  %v4918_v31 = vld [vmem:[#allocation11 + $0x98] sm:$0xff] }
 0x3c4   :  { %v4435_v63 = vmax.f32 %v4419_v59, 0.0  ;;  %v8306_v57 = vpop.f32.mrb[22].mxu1  ;;  %v10696_v15 = vld [vmem:[#allocation3 + $0x21] sm:$0xff]  ;;  %v8859_v11 = vpack.c.bf16 %v4918_v31, %v4917_v44  ;;  %v4920_v59 = vld [vmem:[#allocation11 + $0xa8] sm:$0xff] }
 0x3c5   :  { %4452 = vst.msk [vmem:[#allocation3 + $0x61] sm:$0xff] %vm154_vm4, %v4436_v61  ;;  %v4422_v5 = vadd.f32 %v8306_v57, %v10676_v60  ;;  %v4343_v7 = vpop.f32.mrb[23].mxu1  ;;  %v10690_v8 = vld [vmem:[#allocation3 + $0x11] sm:$0xff]  ;;  %v10772_v61 = vld [vmem:[#allocation3 + $0x20] sm:$0xff] }
 0x3c6   :  { %4451 = vst.msk [vmem:[#allocation3 + $0x51] sm:$0xff] %vm154_vm4, %v4435_v63  ;;  %v4421_v12 = vadd.f32 %v10676_v60, %v4343_v7  ;;  %8336 = vmatmul.mubr.msk.f32.vlgmr.msra.gmra.mrb[16].mxu0 %vm154_vm4, %v10690_v8  ;;  %v10768_v55 = vld [vmem:[#allocation3 + $0x10] sm:$0xff]  ;;  %v8863_v63 = vpack.c.bf16 %v4920_v59, %v4919_v58 }
 0x3c7   :  { %v4438_v29 = vmax.f32 %v4422_v5, 0.0  ;;  %8842 = vmatpush3.bf16.msra.mxu0 %v8839_v20  ;;  %8338 = vmatprep.mubr.msk.f32.mxu0 %vm154_vm4, %v10696_v15  ;;  %v4922_v5 = vld [vmem:[#allocation11 + $0xb8] sm:$0xff]  ;;  %v10826_v49 = vld [vmem:[#allocation3 + $0x12] sm:$0xff] }
 0x3c8   :  { %v4437_v32 = vmax.f32 %v4421_v12, 0.0  ;;  %v8309_v35 = vpop.f32.mrb[24].mxu1  ;;  %8844 = vmatprep.subr.bf16.mxu0 %v8843_v3  ;;  %v10708_v54 = vld [vmem:[#allocation3 + $0x41] sm:$0xff] }
 0x3c9   :  { %4454 = vst.msk [vmem:[#allocation3 + $0x81] sm:$0xff] %vm154_vm4, %v4438_v29  ;;  %v4424_v39 = vadd.f32 %v8309_v35, %v10676_v60  ;;  %v4353_v41 = vpop.f32.mrb[25].mxu1  ;;  %v10702_v42 = vld [vmem:[#allocation3 + $0x31] sm:$0xff]  ;;  %v10780_v7 = vld [vmem:[#allocation3 + $0x40] sm:$0xff]  ;;  %v5149_v12 = vld [vmem:[#allocation11 + $0xc0] sm:$0xff] }
 0x3ca   :  { %4453 = vst.msk [vmem:[#allocation3 + $0x71] sm:$0xff] %vm154_vm4, %v4437_v32  ;;  %v4423_v51 = vadd.f32 %v10676_v60, %v4353_v41  ;;  %8339 = vmatmul.mubr.msk.f32.gmra.mrb[18].mxu0 %vm154_vm4, %v10702_v42  ;;  %v10776_v57 = vld [vmem:[#allocation3 + $0x30] sm:$0xff]  ;;  %v4471_v35 = vld [vmem:[#allocation3 + $0xa0] sm:$0xff] }
 0x3cb   :  { %v4440_v30 = vmax.f32 %v4424_v39, 0.0  ;;  %8341 = vmatprep.mubr.msk.f32.mxu0 %vm154_vm4, %v10708_v54  ;;  %8846 = vmatpush3.bf16.msra.mxu0 %v8843_v3  ;;  %v4921_v3 = vld [vmem:[#allocation11 + $0xb0] sm:$0xff]  ;;  %v5150_v29 = vld [vmem:[#allocation11 + $0xc8] sm:$0xff] }
 0x3cc   :  { %v4439_v34 = vmax.f32 %v4423_v51, 0.0  ;;  %v8312_v36 = vpop.f32.mrb[26].mxu1  ;;  %8848 = vmatprep.subr.bf16.mxu0 %v8847_v37  ;;  %v10720_v52 = vld [vmem:[#allocation3 + $0x61] sm:$0xff]  ;;  %v8867_v19 = vpack.c.bf16 %v4922_v5, %v4921_v3 }
 0x3cd   :  { %4456 = vst.msk [vmem:[#allocation3 + $0xc1] sm:$0xff] %vm154_vm4, %v4440_v30  ;;  %v4426_v43 = vadd.f32 %v8312_v36, %v10676_v60  ;;  %v4363_v0 = vpop.f32.mrb[27].mxu1  ;;  %v10714_v45 = vld [vmem:[#allocation3 + $0x51] sm:$0xff]  ;;  %v10788_v32 = vld [vmem:[#allocation3 + $0x60] sm:$0xff] }
 0x3ce   :  { %4455 = vst.msk [vmem:[#allocation3 + $0xb1] sm:$0xff] %vm154_vm4, %v4439_v34  ;;  %v4425_v50 = vadd.f32 %v10676_v60, %v4363_v0  ;;  %8342 = vmatmul.mubr.msk.f32.gmra.mrb[20].mxu0 %vm154_vm4, %v10714_v45  ;;  %v10784_v10 = vld [vmem:[#allocation3 + $0x50] sm:$0xff]  ;;  %v4898_v36 = vld [vmem:[#allocation3 + $0x2] sm:$0xff] }
 0x3cf   :  { %v4442_v23 = vmax.f32 %v4426_v43, 0.0  ;;  %8344 = vmatprep.mubr.msk.f32.mxu0 %vm154_vm4, %v10720_v52  ;;  %8850 = vmatpush3.bf16.msra.mxu0 %v8847_v37  ;;  %v8871_v37 = vpack.c.bf16 %v5150_v29, %v5149_v12  ;;  %v5151_v43 = vld [vmem:[#allocation11 + $0xd0] sm:$0xff]  ;;  %v5152_v0 = vld [vmem:[#allocation11 + $0xd8] sm:$0xff]  ;;  %v5388_v12 = vld [vmem:[#allocation11 + $0x128] sm:$0xff] }
 0x3d0   :  { %v4441_v33 = vmax.f32 %v4425_v50, 0.0  ;;  %v8315_v38 = vpop.f32.mrb[28].mxu1  ;;  %8852 = vmatprep.subr.bf16.mxu0 %v8851_v40  ;;  %v8875_v46 = vpack.c.bf16 %v5152_v0, %v5151_v43  ;;  %v5153_v50 = vld [vmem:[#allocation11 + $0xe0] sm:$0xff]  ;;  %v5386_v3 = vld [vmem:[#allocation11 + $0x118] sm:$0xff]  ;;  %v5618_v43 = vld [vmem:[#allocation11 + $0x148] sm:$0xff] }
 0x3d1   :  { %4458 = vst.msk [vmem:[#allocation3 + $0xe1] sm:$0xff] %vm154_vm4, %v4442_v23  ;;  %v4428_v1 = vadd.f32 %v8315_v38, %v10676_v60  ;;  %v4373_v13 = vpop.f32.mrb[29].mxu1  ;;  %v10726_v16 = vld [vmem:[#allocation3 + $0x71] sm:$0xff] }
 0x3d2   :  { %4457 = vst.msk [vmem:[#allocation3 + $0xd1] sm:$0xff] %vm154_vm4, %v4441_v33  ;;  %v4427_v47 = vadd.f32 %v10676_v60, %v4373_v13  ;;  %8345 = vmatmul.mubr.msk.f32.gmra.mrb[22].mxu0 %vm154_vm4, %v10726_v16  ;;  %v10792_v39 = vld [vmem:[#allocation3 + $0x70] sm:$0xff]  ;;  %v10830_v33 = vld [vmem:[#allocation3 + $0x22] sm:$0xff] }
 0x3d3   :  { %v4444_v17 = vmax.f32 %v4428_v1, 0.0  ;;  %8347 = vmatprep.mubr.msk.f32.mxu0 %vm154_vm4, %v4495_v48  ;;  %8854 = vmatpush3.bf16.msra.mxu0 %v8851_v40  ;;  %v5154_v23 = vld [vmem:[#allocation11 + $0xe8] sm:$0xff]  ;;  %v5156_v1 = vld [vmem:[#allocation11 + $0xf8] sm:$0xff] }
 0x3d4   :  { %v4443_v18 = vmax.f32 %v4427_v47, 0.0  ;;  %v8318_v20 = vpop.f32.mrb[30].mxu1  ;;  %8856 = vmatprep.subr.bf16.mxu0 %v8855_v53  ;;  %v10741_v14 = vld [vmem:[#allocation3 + $0xc1] sm:$0xff]  ;;  %v8879_v38 = vpack.c.bf16 %v5154_v23, %v5153_v50  ;;  %v10834_v48 = vld [vmem:[#allocation3 + $0x32] sm:$0xff] }
 0x3d5   :  { %4460 = vst.msk [vmem:[#allocation3 + $0x101] sm:$0xff] %vm154_vm4, %v4444_v17  ;;  %v4430_v62 = vadd.f32 %v8318_v20, %v10676_v60  ;;  %v4383_v4 = vpop.f32.mrb[31].mxu1  ;;  %v10735_v6 = vld [vmem:[#allocation3 + $0xb1] sm:$0xff]  ;;  %v10801_v25 = vld [vmem:[#allocation3 + $0xc0] sm:$0xff] }
 0x3d6   :  { %4459 = vst.msk [vmem:[#allocation3 + $0xf1] sm:$0xff] %vm154_vm4, %v4443_v18  ;;  %v4429_v9 = vadd.f32 %v10676_v60, %v4383_v4  ;;  %8348 = vmatmul.mubr.msk.f32.gmra.mrb[24].mxu0 %vm154_vm4, %v10735_v6  ;;  %v10797_v41 = vld [vmem:[#allocation3 + $0xb0] sm:$0xff]  ;;  %v10838_v13 = vld [vmem:[#allocation3 + $0x42] sm:$0xff]  ;;  %v5619_v50 = vld [vmem:[#allocation11 + $0x150] sm:$0xff] }
 0x3d7   :  { %v4446_v2 = vmax.f32 %v4430_v62, 0.0  ;;  %8350 = vmatprep.mubr.msk.f32.mxu0 %vm154_vm4, %v10741_v14  ;;  %v10842_v17 = vld [vmem:[#allocation3 + $0x52] sm:$0xff]  ;;  %v5383_v18 = vld [vmem:[#allocation11 + $0x100] sm:$0xff]  ;;  %v5620_v23 = vld [vmem:[#allocation11 + $0x158] sm:$0xff] }
 0x3d8   :  { %v4445_v21 = vmax.f32 %v4429_v9, 0.0  ;;  %v10751_v60 = vld [vmem:[#allocation3 + $0xe1] sm:$0xff]  ;;  %v5384_v20 = vld [vmem:[#allocation11 + $0x108] sm:$0xff] }
 0x3d9   :  { %4462 = vst.msk [vmem:[#allocation3 + $0x121] sm:$0xff] %vm154_vm4, %v4446_v2  ;;  %v10746_v22 = vld [vmem:[#allocation3 + $0xd1] sm:$0xff]  ;;  %v10809_v51 = vld [vmem:[#allocation3 + $0xe0] sm:$0xff]  ;;  %v8887_v9 = vpack.c.bf16 %v5384_v20, %v5383_v18 }
 0x3da   :  { %4461 = vst.msk [vmem:[#allocation3 + $0x111] sm:$0xff] %vm154_vm4, %v4445_v21  ;;  %8351 = vmatmul.mubr.msk.f32.gmra.mrb[26].mxu0 %vm154_vm4, %v10746_v22  ;;  %v10805_v28 = vld [vmem:[#allocation3 + $0xd0] sm:$0xff]  ;;  %v10846_v62 = vld [vmem:[#allocation3 + $0x62] sm:$0xff]  ;;  %v5623_v18 = vld [vmem:[#allocation11 + $0x170] sm:$0xff] }
 0x3db   :  { %8353 = vmatprep.mubr.msk.f32.mxu0 %vm154_vm4, %v10751_v60  ;;  %v4906_v4 = vld [vmem:[#allocation3 + $0xa2] sm:$0xff]  ;;  %v10850_v2 = vld [vmem:[#allocation3 + $0x72] sm:$0xff] }
 0x3dc   :  { %v10759_v26 = vld [vmem:[#allocation3 + $0x101] sm:$0xff]  ;;  %v10855_v21 = vld [vmem:[#allocation3 + $0xb2] sm:$0xff] }
 0x3dd   :  { %v10755_v24 = vld [vmem:[#allocation3 + $0xf1] sm:$0xff]  ;;  %v10817_v34 = vld [vmem:[#allocation3 + $0x100] sm:$0xff] }
 0x3de   :  { %8354 = vmatmul.mubr.msk.f32.gmra.mrb[28].mxu0 %vm154_vm4, %v10755_v24  ;;  %v10813_v30 = vld [vmem:[#allocation3 + $0xf0] sm:$0xff]  ;;  %v10867_v31 = vld [vmem:[#allocation3 + $0xe2] sm:$0xff] }
 0x3df   :  { %8356 = vmatprep.mubr.msk.f32.mxu0 %vm154_vm4, %v10759_v26  ;;  %v10863_v44 = vld [vmem:[#allocation3 + $0xd2] sm:$0xff]  ;;  %v10875_v58 = vld [vmem:[#allocation3 + $0x102] sm:$0xff] }
 0x3e0   :  { %v5624_v20 = vld [vmem:[#allocation11 + $0x178] sm:$0xff] }
 0x3e1   :  { %v10763_v56 = vld [vmem:[#allocation3 + $0x111] sm:$0xff] }
 0x3e2   :  { %8357 = vmatmul.mubr.msk.f32.gmra.mrb[30].mxu0 %vm154_vm4, %v10763_v56  ;;  %v10821_v40 = vld [vmem:[#allocation3 + $0x110] sm:$0xff] }
 0x3e3   :  { %8375 = vmatprep.mubr.msk.f32.mxu0 %vm154_vm4, %v4463_v27  ;;  %v10859_v27 = vld [vmem:[#allocation3 + $0xc2] sm:$0xff]  ;;  %v10879_v59 = vld [vmem:[#allocation3 + $0x112] sm:$0xff] }
 0x3e6   :  { %8376 = vmatmul.mubr.msk.f32.vlgmr.msra.gmra.mrb[16].mxu0 %vm154_vm4, %v10768_v55 }
 0x3e7   :  { %8858 = vmatpush3.bf16.msra.mxu0 %v8855_v53  ;;  %8378 = vmatprep.mubr.msk.f32.mxu0 %vm154_vm4, %v10772_v61  ;;  %v5155_v53 = vld [vmem:[#allocation11 + $0xf0] sm:$0xff] }
 0x3e8   :  { %8860 = vmatprep.subr.bf16.mxu0 %v8859_v11  ;;  %v8883_v47 = vpack.c.bf16 %v5156_v1, %v5155_v53  ;;  %v5621_v53 = vld [vmem:[#allocation11 + $0x160] sm:$0xff]  ;;  %v5622_v1 = vld [vmem:[#allocation11 + $0x168] sm:$0xff] }
 0x3ea   :  { %8379 = vmatmul.mubr.msk.f32.gmra.mrb[18].mxu0 %vm154_vm4, %v10776_v57 }
 0x3eb   :  { %8381 = vmatprep.mubr.msk.f32.mxu0 %vm154_vm4, %v10780_v7  ;;  %8862 = vmatpush3.bf16.msra.mxu0 %v8859_v11  ;;  %v10871_v11 = vld [vmem:[#allocation3 + $0xf2] sm:$0xff] }
 0x3ec   :  { %8864 = vmatprep.subr.bf16.mxu0 %v8863_v63 }
 0x3ee   :  { %8382 = vmatmul.mubr.msk.f32.gmra.mrb[20].mxu0 %vm154_vm4, %v10784_v10 }
 0x3ef   :  { %8384 = vmatprep.mubr.msk.f32.mxu0 %vm154_vm4, %v10788_v32  ;;  %8866 = vmatpush3.bf16.msra.mxu0 %v8863_v63  ;;  %v5385_v63 = vld [vmem:[#allocation11 + $0x110] sm:$0xff] }
 0x3f0   :  { %8868 = vmatprep.subr.bf16.mxu0 %v8867_v19  ;;  %v8891_v5 = vpack.c.bf16 %v5386_v3, %v5385_v63  ;;  %v10933_v3 = vld [vmem:[#allocation3 + $0x81] sm:$0xff] }
 0x3f2   :  { %8385 = vmatmul.mubr.msk.f32.gmra.mrb[22].mxu0 %vm154_vm4, %v10792_v39 }
 0x3f3   :  { %8387 = vmatprep.mubr.msk.f32.mxu0 %vm154_vm4, %v4471_v35  ;;  %8870 = vmatpush3.bf16.msra.mxu0 %v8867_v19  ;;  %v5387_v19 = vld [vmem:[#allocation11 + $0x120] sm:$0xff]  ;;  %v5389_v35 = vld [vmem:[#allocation11 + $0x130] sm:$0xff] }
 0x3f4   :  { %8872 = vmatprep.subr.bf16.mxu0 %v8871_v37  ;;  %v8895_v29 = vpack.c.bf16 %v5388_v12, %v5387_v19  ;;  %v5854_v19 = vld [vmem:[#allocation11 + $0x198] sm:$0xff] }
 0x3f6   :  { %8388 = vmatmul.mubr.msk.f32.gmra.mrb[24].mxu0 %vm154_vm4, %v10797_v41 }
 0x3f7   :  { %8390 = vmatprep.mubr.msk.f32.mxu0 %vm154_vm4, %v10801_v25 }
 0x3fa   :  { %8391 = vmatmul.mubr.msk.f32.gmra.mrb[26].mxu0 %vm154_vm4, %v10805_v28 }
 0x3fb   :  { %8393 = vmatprep.mubr.msk.f32.mxu0 %vm154_vm4, %v10809_v51 }
 0x3fe   :  { %8394 = vmatmul.mubr.msk.f32.gmra.mrb[28].mxu0 %vm154_vm4, %v10813_v30 }
 0x3ff   :  { %8396 = vmatprep.mubr.msk.f32.mxu0 %vm154_vm4, %v10817_v34 }
 0x402   :  { %8397 = vmatmul.mubr.msk.f32.gmra.mrb[30].mxu0 %vm154_vm4, %v10821_v40 }
 0x403   :  { %8415 = vmatprep.mubr.msk.f32.mxu0 %vm154_vm4, %v4898_v36  ;;  %v5617_v36 = vld [vmem:[#allocation11 + $0x140] sm:$0xff] }
 0x404   :  { %v8903_v0 = vpack.c.bf16 %v5618_v43, %v5617_v36  ;;  %v5858_v36 = vld [vmem:[#allocation11 + $0x1b8] sm:$0xff]  ;;  %v6085_v43 = vld [vmem:[#allocation11 + $0x1c0] sm:$0xff] }
 0x406   :  { %8416 = vmatmul.mubr.msk.f32.vlgmr.msra.gmra.mrb[16].mxu0 %vm154_vm4, %v10826_v49 }
 0x407   :  { %8874 = vmatpush3.bf16.msra.mxu0 %v8871_v37  ;;  %8418 = vmatprep.mubr.msk.f32.mxu0 %vm154_vm4, %v10830_v33  ;;  %v5390_v37 = vld [vmem:[#allocation11 + $0x138] sm:$0xff] }
 0x408   :  { %8876 = vmatprep.subr.bf16.mxu0 %v8875_v46 }
 0x40a   :  { %8419 = vmatmul.mubr.msk.f32.gmra.mrb[18].mxu0 %vm154_vm4, %v10834_v48 }
 0x40b   :  { %8421 = vmatprep.mubr.msk.f32.mxu0 %vm154_vm4, %v10838_v13  ;;  %8878 = vmatpush3.bf16.msra.mxu0 %v8875_v46  ;;  %v10897_v46 = vld [vmem:[#allocation3 + $0x80] sm:$0xff] }
 0x40c   :  { %8880 = vmatprep.subr.bf16.mxu0 %v8879_v38 }
 0x40e   :  { %8422 = vmatmul.mubr.msk.f32.gmra.mrb[20].mxu0 %vm154_vm4, %v10842_v17 }
 0x40f   :  { %8424 = vmatprep.mubr.msk.f32.mxu0 %vm154_vm4, %v10846_v62  ;;  %8882 = vmatpush3.bf16.msra.mxu0 %v8879_v38  ;;  %v8907_v38 = vpack.c.bf16 %v5620_v23, %v5619_v50  ;;  %v10969_v23 = vld [vmem:[#allocation3 + $0x82] sm:$0xff] }
 0x410   :  { %8884 = vmatprep.subr.bf16.mxu0 %v8883_v47 }
 0x412   :  { %8425 = vmatmul.mubr.msk.f32.gmra.mrb[22].mxu0 %vm154_vm4, %v10850_v2 }
 0x413   :  { %8427 = vmatprep.mubr.msk.f32.mxu0 %vm154_vm4, %v4906_v4  ;;  %8886 = vmatpush3.bf16.msra.mxu0 %v8883_v47  ;;  %v8911_v47 = vpack.c.bf16 %v5622_v1, %v5621_v53  ;;  %v5851_v4 = vld [vmem:[#allocation11 + $0x180] sm:$0xff]  ;;  %v6088_v53 = vld [vmem:[#allocation11 + $0x1d8] sm:$0xff] }
 0x414   :  { %8888 = vmatprep.subr.bf16.mxu0 %v8887_v9 }
 0x416   :  { %8428 = vmatmul.mubr.msk.f32.gmra.mrb[24].mxu0 %vm154_vm4, %v10855_v21 }
 0x417   :  { %8430 = vmatprep.mubr.msk.f32.mxu0 %vm154_vm4, %v10859_v27 }
 0x41a   :  { %8431 = vmatmul.mubr.msk.f32.gmra.mrb[26].mxu0 %vm154_vm4, %v10863_v44 }
 0x41b   :  { %8433 = vmatprep.mubr.msk.f32.mxu0 %vm154_vm4, %v10867_v31 }
 0x41e   :  { %8434 = vmatmul.mubr.msk.f32.gmra.mrb[28].mxu0 %vm154_vm4, %v10871_v11 }
 0x41f   :  { %8436 = vmatprep.mubr.msk.f32.mxu0 %vm154_vm4, %v10875_v58 }
 0x422   :  { %8437 = vmatmul.mubr.msk.f32.gmra.mrb[30].mxu0 %vm154_vm4, %v10879_v59 }
 0x423   :  { %8455 = vmatprep.mubr.msk.f32.mxu0 %vm154_vm4, %v10768_v55  ;;  %v8899_v55 = vpack.c.bf16 %v5390_v37, %v5389_v35  ;;  %v5856_v35 = vld [vmem:[#allocation11 + $0x1a8] sm:$0xff] }
 0x426   :  { %8456 = vmatmul.mubr.msk.f32.vlgmr.msra.gmra.mrb[16].mxu0 %vm154_vm4, %v10772_v61 }
 0x427   :  { %8890 = vmatpush3.bf16.msra.mxu0 %v8887_v9  ;;  %8458 = vmatprep.mubr.msk.f32.mxu0 %vm154_vm4, %v10776_v57  ;;  %v5852_v9 = vld [vmem:[#allocation11 + $0x188] sm:$0xff] }
 0x428   :  { %8892 = vmatprep.subr.bf16.mxu0 %v8891_v5  ;;  %v8919_v63 = vpack.c.bf16 %v5852_v9, %v5851_v4  ;;  %v6092_v4 = vld [vmem:[#allocation11 + $0x1f8] sm:$0xff]  ;;  %v6319_v9 = vld [vmem:[#allocation11 + $0x200] sm:$0xff] }
 0x42a   :  { %8459 = vmatmul.mubr.msk.f32.gmra.mrb[18].mxu0 %vm154_vm4, %v10780_v7 }
 0x42b   :  { %8461 = vmatprep.mubr.msk.f32.mxu0 %vm154_vm4, %v10784_v10  ;;  %8894 = vmatpush3.bf16.msra.mxu0 %v8891_v5  ;;  %v5853_v5 = vld [vmem:[#allocation11 + $0x190] sm:$0xff] }
 0x42c   :  { %8896 = vmatprep.subr.bf16.mxu0 %v8895_v29  ;;  %v8923_v12 = vpack.c.bf16 %v5854_v19, %v5853_v5 }
 0x42e   :  { %8462 = vmatmul.mubr.msk.f32.gmra.mrb[20].mxu0 %vm154_vm4, %v10788_v32 }
 0x42f   :  { %8464 = vmatprep.mubr.msk.f32.mxu0 %vm154_vm4, %v10792_v39  ;;  %8898 = vmatpush3.bf16.msra.mxu0 %v8895_v29  ;;  %v5855_v29 = vld [vmem:[#allocation11 + $0x1a0] sm:$0xff] }
 0x430   :  { %8900 = vmatprep.subr.bf16.mxu0 %v8899_v55  ;;  %v8927_v37 = vpack.c.bf16 %v5856_v35, %v5855_v29 }
 0x432   :  { %8465 = vmatmul.mubr.msk.f32.gmra.mrb[22].mxu0 %vm154_vm4, %v10897_v46 }
 0x433   :  { %8467 = vmatprep.mubr.msk.f32.mxu0 %vm154_vm4, %v10797_v41  ;;  %8902 = vmatpush3.bf16.msra.mxu0 %v8899_v55  ;;  %v10915_v41 = vld [vmem:[#allocation3 + $0x120] sm:$0xff]  ;;  %v5857_v55 = vld [vmem:[#allocation11 + $0x1b0] sm:$0xff] }
 0x434   :  { %8904 = vmatprep.subr.bf16.mxu0 %v8903_v0 }
 0x436   :  { %8468 = vmatmul.mubr.msk.f32.gmra.mrb[24].mxu0 %vm154_vm4, %v10801_v25 }
 0x437   :  { %8470 = vmatprep.mubr.msk.f32.mxu0 %vm154_vm4, %v10805_v28 }
 0x43a   :  { %8471 = vmatmul.mubr.msk.f32.gmra.mrb[26].mxu0 %vm154_vm4, %v10809_v51 }
 0x43b   :  { %8473 = vmatprep.mubr.msk.f32.mxu0 %vm154_vm4, %v10813_v30 }
 0x43e   :  { %8474 = vmatmul.mubr.msk.f32.gmra.mrb[28].mxu0 %vm154_vm4, %v10817_v34 }
 0x43f   :  { %8476 = vmatprep.mubr.msk.f32.mxu0 %vm154_vm4, %v10821_v40 }
 0x442   :  { %8477 = vmatmul.mubr.msk.f32.gmra.mrb[30].mxu0 %vm154_vm4, %v10915_v41 }
 0x443   :  { %8495 = vmatprep.mubr.msk.f32.mxu0 %vm154_vm4, %v10690_v8  ;;  %v8915_v8 = vpack.c.bf16 %v5624_v20, %v5623_v18  ;;  %v6090_v18 = vld [vmem:[#allocation11 + $0x1e8] sm:$0xff] }
 0x446   :  { %8496 = vmatmul.mubr.msk.f32.vlgmr.msra.gmra.mrb[16].mxu0 %vm154_vm4, %v10696_v15 }
 0x447   :  { %8906 = vmatpush3.bf16.msra.mxu0 %v8903_v0  ;;  %8498 = vmatprep.mubr.msk.f32.mxu0 %vm154_vm4, %v10702_v42  ;;  %v6086_v0 = vld [vmem:[#allocation11 + $0x1c8] sm:$0xff] }
 0x448   :  { %8908 = vmatprep.subr.bf16.mxu0 %v8907_v38  ;;  %v8935_v50 = vpack.c.bf16 %v6086_v0, %v6085_v43 }
 0x44a   :  { %8499 = vmatmul.mubr.msk.f32.gmra.mrb[18].mxu0 %vm154_vm4, %v10708_v54 }
 0x44b   :  { %8501 = vmatprep.mubr.msk.f32.mxu0 %vm154_vm4, %v10714_v45  ;;  %8910 = vmatpush3.bf16.msra.mxu0 %v8907_v38  ;;  %v6087_v38 = vld [vmem:[#allocation11 + $0x1d0] sm:$0xff] }
 0x44c   :  { %8912 = vmatprep.subr.bf16.mxu0 %v8911_v47  ;;  %v8939_v1 = vpack.c.bf16 %v6088_v53, %v6087_v38 }
 0x44e   :  { %8502 = vmatmul.mubr.msk.f32.gmra.mrb[20].mxu0 %vm154_vm4, %v10720_v52 }
 0x44f   :  { %8504 = vmatprep.mubr.msk.f32.mxu0 %vm154_vm4, %v10726_v16  ;;  %8914 = vmatpush3.bf16.msra.mxu0 %v8911_v47  ;;  %v6089_v47 = vld [vmem:[#allocation11 + $0x1e0] sm:$0xff] }
 0x450   :  { %8916 = vmatprep.subr.bf16.mxu0 %v8915_v8  ;;  %v8943_v20 = vpack.c.bf16 %v6090_v18, %v6089_v47 }
 0x452   :  { %8505 = vmatmul.mubr.msk.f32.gmra.mrb[22].mxu0 %vm154_vm4, %v10933_v3 }
 0x453   :  { %8507 = vmatprep.mubr.msk.f32.mxu0 %vm154_vm4, %v10735_v6  ;;  %8918 = vmatpush3.bf16.msra.mxu0 %v8915_v8  ;;  %v10951_v6 = vld [vmem:[#allocation3 + $0x121] sm:$0xff]  ;;  %v6091_v8 = vld [vmem:[#allocation11 + $0x1f0] sm:$0xff] }
 0x454   :  { %8920 = vmatprep.subr.bf16.mxu0 %v8919_v63 }
 0x456   :  { %8508 = vmatmul.mubr.msk.f32.gmra.mrb[24].mxu0 %vm154_vm4, %v10741_v14 }
 0x457   :  { %8510 = vmatprep.mubr.msk.f32.mxu0 %vm154_vm4, %v10746_v22 }
 0x45a   :  { %8511 = vmatmul.mubr.msk.f32.gmra.mrb[26].mxu0 %vm154_vm4, %v10751_v60 }
 0x45b   :  { %8513 = vmatprep.mubr.msk.f32.mxu0 %vm154_vm4, %v10755_v24 }
 0x45e   :  { %8514 = vmatmul.mubr.msk.f32.gmra.mrb[28].mxu0 %vm154_vm4, %v10759_v26 }
 0x45f   :  { %8516 = vmatprep.mubr.msk.f32.mxu0 %vm154_vm4, %v10763_v56 }
 0x462   :  { %8517 = vmatmul.mubr.msk.f32.gmra.mrb[30].mxu0 %vm154_vm4, %v10951_v6 }
 0x463   :  { %8535 = vmatprep.mubr.msk.f32.mxu0 %vm154_vm4, %v10826_v49  ;;  %v8931_v49 = vpack.c.bf16 %v5858_v36, %v5857_v55 }
 0x466   :  { %8536 = vmatmul.mubr.msk.f32.vlgmr.msra.gmra.mrb[16].mxu0 %vm154_vm4, %v10830_v33 }
 0x467   :  { %8922 = vmatpush3.bf16.msra.mxu0 %v8919_v63  ;;  %8538 = vmatprep.mubr.msk.f32.mxu0 %vm154_vm4, %v10834_v48  ;;  %v6320_v63 = vld [vmem:[#allocation11 + $0x208] sm:$0xff] }
 0x468   :  { %8924 = vmatprep.subr.bf16.mxu0 %v8923_v12 }
 0x46a   :  { %8539 = vmatmul.mubr.msk.f32.gmra.mrb[18].mxu0 %vm154_vm4, %v10838_v13 }
 0x46b   :  { %8541 = vmatprep.mubr.msk.f32.mxu0 %vm154_vm4, %v10842_v17  ;;  %8926 = vmatpush3.bf16.msra.mxu0 %v8923_v12 }
 0x46c   :  { %8928 = vmatprep.subr.bf16.mxu0 %v8927_v37 }
 0x46e   :  { %8542 = vmatmul.mubr.msk.f32.gmra.mrb[20].mxu0 %vm154_vm4, %v10846_v62 }
 0x46f   :  { %8544 = vmatprep.mubr.msk.f32.mxu0 %vm154_vm4, %v10850_v2  ;;  %8930 = vmatpush3.bf16.msra.mxu0 %v8927_v37 }
 0x470   :  { %8932 = vmatprep.subr.bf16.mxu0 %v8931_v49 }
 0x472   :  { %8545 = vmatmul.mubr.msk.f32.gmra.mrb[22].mxu0 %vm154_vm4, %v10969_v23 }
 0x473   :  { %8547 = vmatprep.mubr.msk.f32.mxu0 %vm154_vm4, %v10855_v21  ;;  %8934 = vmatpush3.bf16.msra.mxu0 %v8931_v49  ;;  %v10987_v21 = vld [vmem:[#allocation3 + $0x122] sm:$0xff] }
 0x474   :  { %8936 = vmatprep.subr.bf16.mxu0 %v8935_v50 }
 0x476   :  { %8548 = vmatmul.mubr.msk.f32.gmra.mrb[24].mxu0 %vm154_vm4, %v10859_v27 }
 0x477   :  { %8550 = vmatprep.mubr.msk.f32.mxu0 %vm154_vm4, %v10863_v44 }
 0x47a   :  { %8551 = vmatmul.mubr.msk.f32.gmra.mrb[26].mxu0 %vm154_vm4, %v10867_v31 }
 0x47b   :  { %8553 = vmatprep.mubr.msk.f32.mxu0 %vm154_vm4, %v10871_v11 }
 0x47e   :  { %8554 = vmatmul.mubr.msk.f32.gmra.mrb[28].mxu0 %vm154_vm4, %v10875_v58 }
 0x47f   :  { %8556 = vmatprep.mubr.msk.f32.mxu0 %vm154_vm4, %v10879_v59 }
 0x482   :  { %8557 = vmatmul.mubr.msk.f32.gmra.mrb[30].mxu0 %vm154_vm4, %v10987_v21 }
 0x483   :  { %8575 = vmatprep.mubr.msk.f32.mxu0 %vm154_vm4, %v10772_v61  ;;  %v8947_v61 = vpack.c.bf16 %v6092_v4, %v6091_v8 }
 0x486   :  { %8576 = vmatmul.mubr.msk.f32.vlgmr.msra.gmra.mrb[16].mxu0 %vm154_vm4, %v10776_v57  ;;  %v5841_v57 = vld [vmem:[#allocation3 + $0x90] sm:$0xff] }
 0x487   :  { %8938 = vmatpush3.bf16.msra.mxu0 %v8935_v50  ;;  %8578 = vmatprep.mubr.msk.f32.mxu0 %vm154_vm4, %v10780_v7  ;;  %v8951_v7 = vpack.c.bf16 %v6320_v63, %v6319_v9 }
 0x488   :  { %8940 = vmatprep.subr.bf16.mxu0 %v8939_v1 }
 0x48a   :  { %8579 = vmatmul.mubr.msk.f32.gmra.mrb[18].mxu0 %vm154_vm4, %v10784_v10  ;;  %v5849_v10 = vld [vmem:[#allocation3 + $0x130] sm:$0xff] }
 0x48b   :  { %8581 = vmatprep.mubr.msk.f32.mxu0 %vm154_vm4, %v10788_v32  ;;  %8942 = vmatpush3.bf16.msra.mxu0 %v8939_v1  ;;  %v6321_v32 = vld [vmem:[#allocation11 + $0x210] sm:$0xff] }
 0x48c   :  { %8944 = vmatprep.subr.bf16.mxu0 %v8943_v20 }
 0x48e   :  { %8582 = vmatmul.mubr.msk.f32.gmra.mrb[20].mxu0 %vm154_vm4, %v10792_v39  ;;  %v6322_v39 = vld [vmem:[#allocation11 + $0x218] sm:$0xff] }
 0x48f   :  { %8584 = vmatprep.mubr.msk.f32.mxu0 %vm154_vm4, %v10897_v46  ;;  %8946 = vmatpush3.bf16.msra.mxu0 %v8943_v20 }
 0x490   :  { %8948 = vmatprep.subr.bf16.mxu0 %v8947_v61 }
 0x492   :  { %8585 = vmatmul.mubr.msk.f32.gmra.mrb[22].mxu0 %vm154_vm4, %v5841_v57 }
 0x493   :  { %8587 = vmatprep.mubr.msk.f32.mxu0 %vm154_vm4, %v10801_v25  ;;  %8950 = vmatpush3.bf16.msra.mxu0 %v8947_v61  ;;  %v8955_v25 = vpack.c.bf16 %v6322_v39, %v6321_v32 }
 0x494   :  { %8952 = vmatprep.subr.bf16.mxu0 %v8951_v7 }
 0x496   :  { %8588 = vmatmul.mubr.msk.f32.gmra.mrb[24].mxu0 %vm154_vm4, %v10805_v28  ;;  %v6323_v28 = vld [vmem:[#allocation11 + $0x220] sm:$0xff] }
 0x497   :  { %8590 = vmatprep.mubr.msk.f32.mxu0 %vm154_vm4, %v10809_v51  ;;  %v6324_v51 = vld [vmem:[#allocation11 + $0x228] sm:$0xff] }
 0x49a   :  { %8591 = vmatmul.mubr.msk.f32.gmra.mrb[26].mxu0 %vm154_vm4, %v10813_v30  ;;  %v8959_v30 = vpack.c.bf16 %v6324_v51, %v6323_v28 }
 0x49b   :  { %8593 = vmatprep.mubr.msk.f32.mxu0 %vm154_vm4, %v10817_v34  ;;  %v6325_v34 = vld [vmem:[#allocation11 + $0x230] sm:$0xff] }
 0x49e   :  { %8594 = vmatmul.mubr.msk.f32.gmra.mrb[28].mxu0 %vm154_vm4, %v10821_v40  ;;  %v6326_v40 = vld [vmem:[#allocation11 + $0x238] sm:$0xff] }
 0x49f   :  { %8596 = vmatprep.mubr.msk.f32.mxu0 %vm154_vm4, %v10915_v41 }
 0x4a2   :  { %8597 = vmatmul.mubr.msk.f32.gmra.mrb[30].mxu0 %vm154_vm4, %v5849_v10 }
 0x4a3   :  { %8615 = vmatprep.mubr.msk.f32.mxu0 %vm154_vm4, %v10696_v15  ;;  %v8963_v15 = vpack.c.bf16 %v6326_v40, %v6325_v34 }
 0x4a6   :  { %8616 = vmatmul.mubr.msk.f32.vlgmr.msra.gmra.mrb[16].mxu0 %vm154_vm4, %v10702_v42  ;;  %v6075_v42 = vld [vmem:[#allocation3 + $0x91] sm:$0xff] }
 0x4a7   :  { %8954 = vmatpush3.bf16.msra.mxu0 %v8951_v7  ;;  %8618 = vmatprep.mubr.msk.f32.mxu0 %vm154_vm4, %v10708_v54  ;;  %v6083_v54 = vld [vmem:[#allocation3 + $0x131] sm:$0xff] }
 0x4a8   :  { %8956 = vmatprep.subr.bf16.mxu0 %v8955_v25 }
 0x4aa   :  { %8619 = vmatmul.mubr.msk.f32.gmra.mrb[18].mxu0 %vm154_vm4, %v10714_v45  ;;  %v6309_v45 = vld [vmem:[#allocation3 + $0x92] sm:$0xff] }
 0x4ab   :  { %8621 = vmatprep.mubr.msk.f32.mxu0 %vm154_vm4, %v10720_v52  ;;  %8958 = vmatpush3.bf16.msra.mxu0 %v8955_v25  ;;  %v6317_v52 = vld [vmem:[#allocation3 + $0x132] sm:$0xff] }
 0x4ac   :  { %8960 = vmatprep.subr.bf16.mxu0 %v8959_v30 }
 0x4ae   :  { %8622 = vmatmul.mubr.msk.f32.gmra.mrb[20].mxu0 %vm154_vm4, %v10726_v16  ;;  %v11081_v16 = vld [vmem:[#allocation12] ss:$0 sm:$0xff] }
 0x4af   :  { %8624 = vmatprep.mubr.msk.f32.mxu0 %vm154_vm4, %v10933_v3  ;;  %8962 = vmatpush3.bf16.msra.mxu0 %v8959_v30 }
 0x4b0   :  { %8964 = vmatprep.subr.bf16.mxu0 %v8963_v15 }
 0x4b2   :  { %8625 = vmatmul.mubr.msk.f32.gmra.mrb[22].mxu0 %vm154_vm4, %v6075_v42 }
 0x4b3   :  { %8627 = vmatprep.mubr.msk.f32.mxu0 %vm154_vm4, %v10741_v14  ;;  %8966 = vmatpush3.bf16.msra.mxu0 %v8963_v15 }
 0x4b6   :  { %8628 = vmatmul.mubr.msk.f32.gmra.mrb[24].mxu0 %vm154_vm4, %v10746_v22 }
 0x4b7   :  { %8630 = vmatprep.mubr.msk.f32.mxu0 %vm154_vm4, %v10751_v60 }
 0x4ba   :  { %8631 = vmatmul.mubr.msk.f32.gmra.mrb[26].mxu0 %vm154_vm4, %v10755_v24 }
 0x4bb   :  { %8633 = vmatprep.mubr.msk.f32.mxu0 %vm154_vm4, %v10759_v26 }
 0x4be   :  { %8634 = vmatmul.mubr.msk.f32.gmra.mrb[28].mxu0 %vm154_vm4, %v10763_v56 }
 0x4bf   :  { %8636 = vmatprep.mubr.msk.f32.mxu0 %vm154_vm4, %v10951_v6 }
 0x4c2   :  { %8637 = vmatmul.mubr.msk.f32.gmra.mrb[30].mxu0 %vm154_vm4, %v6083_v54 }
 0x4c3   :  { %8655 = vmatprep.mubr.msk.f32.mxu0 %vm154_vm4, %v10830_v33 }
 0x4c6   :  { %8656 = vmatmul.mubr.msk.f32.vlgmr.msra.gmra.mrb[16].mxu0 %vm154_vm4, %v10834_v48 }
 0x4c7   :  { %8658 = vmatprep.mubr.msk.f32.mxu0 %vm154_vm4, %v10838_v13 }
 0x4ca   :  { %8659 = vmatmul.mubr.msk.f32.gmra.mrb[18].mxu0 %vm154_vm4, %v10842_v17 }
 0x4cb   :  { %8661 = vmatprep.mubr.msk.f32.mxu0 %vm154_vm4, %v10846_v62 }
 0x4ce   :  { %8662 = vmatmul.mubr.msk.f32.gmra.mrb[20].mxu0 %vm154_vm4, %v10850_v2 }
 0x4cf   :  { %8664 = vmatprep.mubr.msk.f32.mxu0 %vm154_vm4, %v10969_v23 }
 0x4d2   :  { %8665 = vmatmul.mubr.msk.f32.gmra.mrb[22].mxu0 %vm154_vm4, %v6309_v45 }
 0x4d3   :  { %8667 = vmatprep.mubr.msk.f32.mxu0 %vm154_vm4, %v10859_v27 }
 0x4d6   :  { %8668 = vmatmul.mubr.msk.f32.gmra.mrb[24].mxu0 %vm154_vm4, %v10863_v44 }
 0x4d7   :  { %8670 = vmatprep.mubr.msk.f32.mxu0 %vm154_vm4, %v10867_v31 }
 0x4da   :  { %8671 = vmatmul.mubr.msk.f32.gmra.mrb[26].mxu0 %vm154_vm4, %v10871_v11 }
 0x4db   :  { %8673 = vmatprep.mubr.msk.f32.mxu0 %vm154_vm4, %v10875_v58 }
 0x4de   :  { %8674 = vmatmul.mubr.msk.f32.gmra.mrb[28].mxu0 %vm154_vm4, %v10879_v59 }
 0x4df   :  { %8676 = vmatprep.mubr.msk.f32.mxu0 %vm154_vm4, %v10987_v21 }
 0x4e2   :  { %8677 = vmatmul.mubr.msk.f32.gmra.mrb[30].mxu0 %vm154_vm4, %v6317_v52 }
 0x599   :  { %v8657_v14 = vpop.f32.mrb[16].mxu0 }
 0x59a   :  { %v6544_v22 = vadd.f32 %v8657_v14, %v11081_v16  ;;  %v6441_v60 = vpop.f32.mrb[17].mxu0 }
 0x59b   :  { %v6543_v24 = vadd.f32 %v11081_v16, %v6441_v60 }
 0x59c   :  { %v6560_v26 = vmax.f32 %v6544_v22, 0.0 }
 0x59d   :  { %v6559_v56 = vmax.f32 %v6543_v24, 0.0  ;;  %v8660_v33 = vpop.f32.mrb[18].mxu0 }
 0x59e   :  { %v7125_v48 = vpack.c.bf16 %v6560_v26, %v6560_v26  ;;  %v6546_v13 = vadd.f32 %v8660_v33, %v11081_v16  ;;  %v6451_v17 = vpop.f32.mrb[19].mxu0 }
 0x59f   :  { %v7124_v62 = vpack.c.bf16 %v6559_v56, %v6559_v56  ;;  %v6545_v2 = vadd.f32 %v11081_v16, %v6451_v17 }
 0x5a0   :  { %6641 = vst.msk [vmem:[%s11170_s7 + $0x4] sm:$0xf] %vm6639_vm7, %v7125_v48  ;;  %v6562_v27 = vmax.f32 %v6546_v13, 0.0 }
 0x5a1   :  { %6640 = vst.msk [vmem:[%s11170_s7] sm:$0xf] %vm6639_vm7, %v7124_v62  ;;  %v6561_v44 = vmax.f32 %v6545_v2, 0.0  ;;  %v8663_v31 = vpop.f32.mrb[20].mxu0 }
 0x5a2   :  { %v7127_v11 = vpack.c.bf16 %v6562_v27, %v6562_v27  ;;  %v6548_v58 = vadd.f32 %v8663_v31, %v11081_v16  ;;  %v6461_v59 = vpop.f32.mrb[21].mxu0 }
 0x5a3   :  { %v7126_v46 = vpack.c.bf16 %v6561_v44, %v6561_v44  ;;  %v6547_v41 = vadd.f32 %v11081_v16, %v6461_v59 }
 0x5a4   :  { %6643 = vst.msk [vmem:[%s11170_s7 + $0xc] sm:$0xf] %vm6639_vm7, %v7127_v11  ;;  %v6564_v3 = vmax.f32 %v6548_v58, 0.0 }
 0x5a5   :  { %6642 = vst.msk [vmem:[%s11170_s7 + $0x8] sm:$0xf] %vm6639_vm7, %v7126_v46  ;;  %v6563_v6 = vmax.f32 %v6547_v41, 0.0  ;;  %v8666_v5 = vpop.f32.mrb[22].mxu0 }
 0x5a6   :  { %v7129_v19 = vpack.c.bf16 %v6564_v3, %v6564_v3  ;;  %v6550_v12 = vadd.f32 %v8666_v5, %v11081_v16  ;;  %v6471_v29 = vpop.f32.mrb[23].mxu0 }
 0x5a7   :  { %v7128_v35 = vpack.c.bf16 %v6563_v6, %v6563_v6  ;;  %v6549_v37 = vadd.f32 %v11081_v16, %v6471_v29 }
 0x5a8   :  { %6645 = vst.msk [vmem:[%s11170_s7 + $0x14] sm:$0xf] %vm6639_vm7, %v7129_v19  ;;  %v6566_v55 = vmax.f32 %v6550_v12, 0.0 }
 0x5a9   :  { %6644 = vst.msk [vmem:[%s11170_s7 + $0x10] sm:$0xf] %vm6639_vm7, %v7128_v35  ;;  %v6565_v36 = vmax.f32 %v6549_v37, 0.0  ;;  %v8669_v49 = vpop.f32.mrb[24].mxu0 }
 0x5aa   :  { %v7131_v43 = vpack.c.bf16 %v6566_v55, %v6566_v55  ;;  %v6552_v0 = vadd.f32 %v8669_v49, %v11081_v16  ;;  %v6481_v50 = vpop.f32.mrb[25].mxu0 }
 0x5ab   :  { %v7130_v23 = vpack.c.bf16 %v6565_v36, %v6565_v36  ;;  %v6551_v21 = vadd.f32 %v11081_v16, %v6481_v50 }
 0x5ac   :  { %6647 = vst.msk [vmem:[%s11170_s7 + $0x1c] sm:$0xf] %vm6639_vm7, %v7131_v43  ;;  %v6568_v38 = vmax.f32 %v6552_v0, 0.0 }
 0x5ad   :  { %6646 = vst.msk [vmem:[%s11170_s7 + $0x18] sm:$0xf] %vm6639_vm7, %v7130_v23  ;;  %v6567_v53 = vmax.f32 %v6551_v21, 0.0  ;;  %v8672_v1 = vpop.f32.mrb[26].mxu0 }
 0x5ae   :  { %v7133_v47 = vpack.c.bf16 %v6568_v38, %v6568_v38  ;;  %v6554_v18 = vadd.f32 %v8672_v1, %v11081_v16  ;;  %v6491_v20 = vpop.f32.mrb[27].mxu0 }
 0x5af   :  { %v7132_v8 = vpack.c.bf16 %v6567_v53, %v6567_v53  ;;  %v6553_v4 = vadd.f32 %v11081_v16, %v6491_v20 }
 0x5b0   :  { %6649 = vst.msk [vmem:[%s11170_s7 + $0x24] sm:$0xf] %vm6639_vm7, %v7133_v47  ;;  %v6570_v61 = vmax.f32 %v6554_v18, 0.0 }
 0x5b1   :  { %6648 = vst.msk [vmem:[%s11170_s7 + $0x20] sm:$0xf] %vm6639_vm7, %v7132_v8  ;;  %v6569_v9 = vmax.f32 %v6553_v4, 0.0  ;;  %v8675_v63 = vpop.f32.mrb[28].mxu0 }
 0x5b2   :  { %v7135_v57 = vpack.c.bf16 %v6570_v61, %v6570_v61  ;;  %v6556_v7 = vadd.f32 %v8675_v63, %v11081_v16  ;;  %v6501_v10 = vpop.f32.mrb[29].mxu0 }
 0x5b3   :  { %v7134_v32 = vpack.c.bf16 %v6569_v9, %v6569_v9  ;;  %v6555_v39 = vadd.f32 %v11081_v16, %v6501_v10 }
 0x5b4   :  { %6651 = vst.msk [vmem:[%s11170_s7 + $0x2c] sm:$0xf] %vm6639_vm7, %v7135_v57  ;;  %v6572_v25 = vmax.f32 %v6556_v7, 0.0 }
 0x5b5   :  { %6650 = vst.msk [vmem:[%s11170_s7 + $0x28] sm:$0xf] %vm6639_vm7, %v7134_v32  ;;  %v6571_v28 = vmax.f32 %v6555_v39, 0.0  ;;  %v8678_v51 = vpop.f32.mrb[30].mxu0 }
 0x5b6   :  { %v7137_v30 = vpack.c.bf16 %v6572_v25, %v6572_v25  ;;  %v6558_v34 = vadd.f32 %v8678_v51, %v11081_v16  ;;  %v6511_v40 = vpop.f32.mrb[31].mxu0 }
 0x5b7   :  { %v7136_v15 = vpack.c.bf16 %v6571_v28, %v6571_v28  ;;  %v6557_v42 = vadd.f32 %v11081_v16, %v6511_v40 }
 0x5b8   :  { %6653 = vst.msk [vmem:[%s11170_s7 + $0x34] sm:$0xf] %vm6639_vm7, %v7137_v30  ;;  %v6574_v54 = vmax.f32 %v6558_v34, 0.0 }
 0x5b9   :  { %6652 = vst.msk [vmem:[%s11170_s7 + $0x30] sm:$0xf] %vm6639_vm7, %v7136_v15  ;;  %v6573_v45 = vmax.f32 %v6557_v42, 0.0 }
 0x5ba   :  { %v7139_v52 = vpack.c.bf16 %v6574_v54, %v6574_v54 }
 0x5bb   :  { %v7138_v14 = vpack.c.bf16 %v6573_v45, %v6573_v45 }
 0x5bc   :  { %6655 = vst.msk [vmem:[%s11170_s7 + $0x3c] sm:$0xf] %vm6639_vm7, %v7139_v52 }
 0x5bd   :  { %6654 = vst.msk [vmem:[%s11170_s7 + $0x38] sm:$0xf] %vm6639_vm7, %v7138_v14 }
 0x5be   :  { %6660 = vsyncpa [#allocation5], 1 }
 0x5bf   :  { %6661 = vsyncpa [#allocation7], 1 }
 0x5c0   :  { %6662 = vsyncpa [#allocation10], 1 }
 0x5c1   :  { %6663 = vsyncpa [#allocation13], 1 }

// kernel: simple5_forward.3
= control target key start
LH: loop header
LB: loop body
LE: loop exit
PB: predicated region body
PF: predicated region fallthrough
CT: control target
= control target key end

     0   :  { %s12183_s0 = inlined_call_operand.vmem [shape: bf16[2,4096], index: 0, kind: input, shape index: {}]   ;;  %s12184_s1 = inlined_call_operand.hbm [shape: bf16[4096,1024], index: 1, kind: input, shape index: {}]   ;;  %s12185_s2 = inlined_call_operand.hbm [shape: f32[1,1024], index: 2, kind: input, shape index: {}]   ;;  %s12186_s3 = inlined_call_operand.vmem [shape: f32[512,1], index: 3, kind: input, shape index: {}]   ;;  %s12187_s4 = inlined_call_operand.<no memory space> [shape: f32[1,1], index: 4, kind: input, shape index: {}]   ;;  %s12188_s5 = inlined_call_operand.vmem [shape: f32[512,64], index: 5, kind: input, shape index: {}]   ;;  %s12189_s6 = inlined_call_operand.hbm [shape: f32[1,64], index: 6, kind: input, shape index: {}]   ;;  %s12190_s7 = inlined_call_operand.hbm [shape: f32[2,64], index: 7, kind: output, shape index: {0}]   ;;  %s12191_s8 = inlined_call_operand.vmem [shape: f32[2,1], index: 8, kind: output, shape index: {1}]  }
   0x1   :  { %v14_v0 = vstv %s12187_s4 }
   0x2   :  { %15 = vst [vmem:[#allocation3] sm:$0x1] %v14_v0 }
   0x3   :  { %16 = vsyncpa [#allocation5], 0 }
   0x4   :  { %18 = vsyncpa [#allocation5 + $0x1], 0 }
   0x5   :  { %19 = vsyncpa [#allocation8], 0 }
   0x6   :  { %20 = vsyncpa [#allocation6], 0  ;;  %s10362_s29 = smov 0   ;;  %s10364_s30 = smov 0  }
   0x7   :  { %s10366_s9 = smov 0   ;;  %s10368_s10 = smov 0  }
   0x8 LB: > { %s10381_s4 = sadd.s32 4294967295, %s10303_s10   ;;  %s10384_s11 = sadd.s32 1, %s10303_s10   ;;  %s10303_s10 = sphi %s10368_s10, %s12210_s10   ;;  %s10299_s9 = sphi %s10366_s9, %s12209_s9   ;;  %s10295_s30 = sphi %s10364_s30, %s12208_s30   ;;  %s10291_s29 = sphi %s10362_s29, %s12207_s29  }
   0x9   : > { %s56_s12 = ssub.s32 %s10303_s10, %s10384_s11  ;;  %s59_s13 = sadd.s32 1, %s10299_s9 }
   0xa   : > { %p57_p0 = scmp.eq.s32.totalorder %s56_s12, 0  ;;  %p66_p1 = scmp.ne.s32.totalorder %s10299_s9, %s10295_s30 }
   0xb   : > { %p67_p2 = scmp.eq.s32.totalorder %s10303_s10, 0  ;;  %p72_p3 = scmp.ne.s32.totalorder %s10295_s30, %s10291_s29 }
   0xc   : > { %s10394_s14 = scalar_select %p57_p0, %s10299_s9, %s59_s13  }
   0xd   : > { %p10396_p4 = por %p67_p2, %p66_p1  ;;  %p12192_p5 = scmp.eq.s32.totalorder %s10381_s4, 0 }
   0xe   : > { %p8642_p6 = scmp.ge.s32.totalorder %s10303_s10, 1  ;;  %p230_p7 = scmp.lt.s32.totalorder %s10303_s10, 3 }
   0xf   : > { %p10405_p8 = por %p12192_p5, %p72_p3  ;;  %s10305_s18 = smov [#allocation7]  }
  0x10   : > { %p10410_p10 = pnand %p8642_p6, %p230_p7  ;;  %s243_s19 = sshll.u32 %s10305_s18, 4  ;;  %s244_s19 = int_to_ptr.vmem [resolvable:$true] %s243_s19 }
  0x11   : > { %s12197_s16 = scalar_select %p10405_p8, 1, 0 }
  0x12   : > { %s12198_s17 = scalar_select %p10410_p10, 1, 0 }
  0x13   : > { %p10083_p11 = pneg %p10410_p10  ;;  %p10096_p12 = scmp.lt.s32.totalorder %s10303_s10, 2 }
  0x14   : > { %s10306_s21 = smov [#allocation9]   ;;  %s282_s24 = sand.u32 1, %s10299_s9  }
  0x15   : > { %p10419_p13 = pnand %p10083_p11, %p12192_p5  ;;  %s263_s22 = sshll.u32 %s10306_s21, 4  ;;  %s10429_s22 = int_to_ptr.vmem [resolvable:$true] %s263_s22 }
  0x16   : > { %p10425_p0 = pnand %p10096_p12, %p10396_p4  ;;  %s10149_s27 = scalar_lea.hbm %s12185_s2, 128 }
  0x17   : > { %p10150_p1 = scmp.ne.s32.totalorder %s12185_s2, %s10149_s27  ;;  %p10151_p2 = pneg %p10419_p13 }
  0x18   : > { %s12200_s23 = scalar_select %p10425_p0, 1, 0 }
  0x19   : > { %p10152_p3 = pnand %p10151_p2, %p10150_p1  ;;  %p10156_p6 = scmp.lt.u32.totalorder %s10149_s27, %s12185_s2 }
  0x1b   : > { %p10153_p4 = pneg %p10152_p3 }
  0x1d   : > { %p10158_p7 = pnand %p10156_p6, %p10153_p4 }
  0x1f   : > { %10161 = shalt.err (!%p10158_p7)
}
  0x20   : > { %s10162_s15 = scalar_lea.vmem %s244_s19, 128  ;;  %p10170_p5 = scmp.lt.s32.totalorder %s244_s19, %s244_s19 }
  0x21   : > { %p10163_p11 = scmp.ne.s32.totalorder %s244_s19, %s10162_s15  ;;  %p10171_p8 = scmp.lt.s32.totalorder %s10162_s15, %s10162_s15 }
  0x23   : > { %p10165_p12 = pnand %p10163_p11, %p10151_p2  ;;  %p10172_p10 = por %p10171_p8, %p10170_p5 }
  0x25   : > { %p10166_p9 = pneg %p10165_p12 }
  0x27   : > { %p10173_p0 = pnand %p10172_p10, %p10166_p9 }
  0x29   : > { %10176 = shalt.err (!%p10173_p0)
}
  0x2a   : > { %10086 = dma.hbm_to_vmem [thread:$0]  (!%p10419_p13), %s12185_s2, 128, %s244_s19, [#allocation8]  }
  0x2b   : > { %s10177_s27 = scalar_lea.hbm %s12189_s6, 16 }
  0x2c   : > { %p10178_p1 = scmp.ne.s32.totalorder %s12189_s6, %s10177_s27  ;;  %p10184_p9 = scmp.lt.u32.totalorder %s10177_s27, %s12189_s6 }
  0x2e   : > { %p10180_p5 = pnand %p10178_p1, %p10151_p2 }
  0x30   : > { %p10181_p8 = pneg %p10180_p5 }
  0x32   : > { %p10186_p10 = pnand %p10184_p9, %p10181_p8 }
  0x34   : > { %10189 = shalt.err (!%p10186_p10)
}
  0x35   : > { %s10190_s19 = scalar_lea.vmem %s10429_s22, 16  ;;  %s10197_s15 = scalar_lea.vmem %s10429_s22, 32 }
  0x36   : > { %p10191_p0 = scmp.ne.s32.totalorder %s10429_s22, %s10190_s19  ;;  %p10198_p6 = scmp.lt.s32.totalorder %s10429_s22, %s10429_s22 }
  0x37   : > { %p10199_p7 = scmp.lt.s32.totalorder %s10197_s15, %s10190_s19 }
  0x38   : > { %p10193_p3 = pnand %p10191_p0, %p10151_p2 }
  0x39   : > { %p10200_p11 = por %p10199_p7, %p10198_p6 }
  0x3a   : > { %p10194_p4 = pneg %p10193_p3 }
  0x3c   : > { %p10201_p12 = pnand %p10200_p11, %p10194_p4 }
  0x3e   : > { %10204 = shalt.err (!%p10201_p12)
}
  0x3f   : > { %10089 = dma.hbm_to_vmem [thread:$0]  (!%p10419_p13), %s12189_s6, 16, %s10429_s22, [#allocation8]  }
  0x40   : > { %s8646_s25 = sshll.u32 %s282_s24, 13  ;;  %s9688_s26 = sshll.u32 %s10303_s10, 17 }
  0x41   : > { %s10486_s29 = scalar_lea.hbm %s12184_s1, %s9688_s26  ;;  %s286_s20 = scalar_lea.vmem [#allocation4], %s8646_s25 }
  0x42   : > { %s294_s12 = sshll.u32 %s286_s20, 4  ;;  %s10492_s13 = scalar_lea.sflag [#allocation5], %s282_s24  ;;  %s10488_s12 = int_to_ptr.vmem [resolvable:$true] %s294_s12 }
  0x43   : > { %s10205_s22 = scalar_lea.hbm %s10486_s29, 131072  ;;  %p12201_p2 = scmp.ne.s32.totalorder %s12200_s23, 0 }
  0x44   : > { %p10206_p13 = scmp.ne.s32.totalorder %s10486_s29, %s10205_s22  ;;  %s10210_s15 = scalar_lea.hbm %s12184_s1, 262144 }
  0x45   : > { %p10207_p1 = pneg %p12201_p2  ;;  %p10211_p9 = scmp.lt.u32.totalorder %s10486_s29, %s12184_s1 }
  0x46   : > { %p10212_p10 = scmp.lt.u32.totalorder %s10210_s15, %s10205_s22  ;;  %p10214_p3 = scmp.lt.u32.totalorder %s10205_s22, %s10486_s29 }
  0x47   : > { %p10208_p5 = pnand %p10207_p1, %p10206_p13 }
  0x48   : > { %p10213_p0 = por %p10212_p10, %p10211_p9 }
  0x49   : > { %p10209_p8 = pneg %p10208_p5 }
  0x4a   : > { %p10215_p4 = por %p10214_p3, %p10213_p0 }
  0x4c   : > { %p10216_p6 = pnand %p10215_p4, %p10209_p8 }
  0x4e   : > { %10219 = shalt.err (!%p10216_p6)
}
  0x4f   : > { %s10220_s24 = scalar_lea.vmem %s10488_s12, 131072  ;;  %s10307_s25 = smov [#allocation4]  }
  0x50   : > { %p10221_p7 = scmp.ne.s32.totalorder %s10488_s12, %s10220_s24  ;;  %s10225_s26 = sshll.u32 %s10307_s25, 4  ;;  %s10226_s26 = int_to_ptr.vmem [resolvable:$false] %s10225_s26 }
  0x51   : > { %s10227_s27 = scalar_lea.vmem %s10226_s26, 262144  ;;  %p10228_p13 = scmp.lt.s32.totalorder %s10488_s12, %s10226_s26 }
  0x52   : > { %p10223_p11 = pnand %p10221_p7, %p10207_p1  ;;  %p10229_p5 = scmp.lt.s32.totalorder %s10227_s27, %s10220_s24 }
  0x54   : > { %p10224_p12 = pneg %p10223_p11  ;;  %p10230_p9 = por %p10229_p5, %p10228_p13 }
  0x56   : > { %p10231_p10 = pnand %p10230_p9, %p10224_p12 }
  0x58   : > { %10234 = shalt.err (!%p10231_p10)
}
  0x59   : > { %s10308_s28 = smov 512   ;;  %s10309_s20 = smov 32  }
  0x5a   : > { %10093 = dma.hbm_to_vmem [thread:$0]  (!%p12201_p2), %s10486_s29, 131072, %s10488_s12, %s10492_s13, %s10308_s28, %s10308_s28, %s10309_s20  }
  0x5b   : > { %p12202_p1 = scmp.ne.s32.totalorder %s12198_s17, 0 }
  0x5c   : > { %s308_s22 = sand.u32 (!%p12202_p1), 1, %s10295_s30   ;;  %p12203_p8 = scmp.ne.s32.totalorder (!%p12202_p1), %s12197_s16, 0 }
  0x5d   : > { %306 = sbr.rel (%p12202_p1) target bundleno = 1966 (0x7ae), region = 48  ;;  %s8651_s10 = sshll.u32 (!%p12202_p1), %s308_s22, 13 }
  0x5e   : > { %s309_s19 = scalar_lea.sflag (!%p12202_p1), [#allocation5], %s308_s22  ;;  %s10523_s15 = scalar_lea.vmem (!%p12202_p1), [#allocation4], %s8651_s10 }
  0x64   : > { %10278 = dma.done.wait (%p12203_p8), %s309_s19, 131072  }
  0x65   : > { %10280 = vsyncadd (%p12203_p8), %s309_s19, 4294836224  ;;  %p12204_p0 = scmp.eq.s32.totalorder %s10381_s4, 0 }
  0x67   : > { %10282 = dma.done.wait (%p12204_p0), [#allocation8], 144   ;;  %p12205_p2 = pmov %p12204_p0 }
  0x68   : > { %s8654_s17 = sshll.u32 %s10381_s4, 4  ;;  %p12206_p4 = scmp.ne.s32.totalorder %s10381_s4, 0 }
  0x69   : > { %10284 = vsyncadd (%p12205_p2), [#allocation8], 4294967152  ;;  %p353_p3 = scmp.lt.s32.totalorder %s8654_s17, 31  ;;  %v10310_v1 = vmov (!%p12206_p4), 0.0  }
  0x6a   : > { %361 = sbr.rel (%p12206_p4) target bundleno = 113 (0x71), region = 64  ;;  %362 = vst [vmem:[#allocation2] sm:$0xff] (!%p12206_p4), %v10310_v1  ;;  %363 = vst [vmem:[#allocation2 + $0x8] sm:$0xff] (!%p12206_p4), %v10310_v1 }
  0x6b   : > { %s12212_s17 = smov (!%p353_p3, %s8654_s17), 31 }
  0x6c   : > { %s10537_s12 = scalar_lea.vmem %s12183_s0, %s12212_s17 }
  0x71 PF: > { %v368_v2 = vld [vmem:[%s10523_s15] sm:$0xff]  ;;  %v369_v4 = vld [vmem:[%s10523_s15 + $0x8] sm:$0xff]  ;;  %v10311_v34 = vmov 1966171168   ;;  %v1398_v36 = vlaneseq  ;;  %p9680_p6 = scmp.ne.s32.totalorder %s10381_s4, 1 }
  0x72   : > { %v372_v3 = vld [vmem:[%s10523_s15 + $0x20] sm:$0xff]  ;;  %v373_v6 = vld [vmem:[%s10523_s15 + $0x28] sm:$0xff]  ;;  %v1396_v35 = vunpack.c.l.s4 %v10311_v34  ;;  %vm8302_vm0 = vcmask (!%p9680_p6), 1024   ;;  %vm8537_vm1 = vcmask (!%p9680_p6), 517120  }
  0x73   : > { %v8657_v5 = vcombine.high %v368_v2, %v372_v3  ;;  %v8656_v7 = vcombine.low %v368_v2, %v372_v3  ;;  %v376_v8 = vld [vmem:[%s10523_s15 + $0x40] sm:$0xff]  ;;  %v8659_v10 = vcombine.high %v369_v4, %v373_v6  ;;  %v8658_v11 = vcombine.low %v369_v4, %v373_v6  ;;  %v377_v13 = vld [vmem:[%s10523_s15 + $0x48] sm:$0xff] }
  0x74   : > { %v380_v9 = vld [vmem:[%s10523_s15 + $0x60] sm:$0xff]  ;;  %v381_v14 = vld [vmem:[%s10523_s15 + $0x68] sm:$0xff]  ;;  %v1397_v45 = vunpack.c.0.s8 %v1396_v35  ;;  %v10563_v46 = vshrl.u32 %v1398_v36, 7 }
  0x75   : > { %v8665_v12 = vcombine.high %v376_v8, %v380_v9  ;;  %v384_v15 = vld [vmem:[%s10523_s15 + $0x80] sm:$0xff]  ;;  %6628 = vmatprep.subr.bf16.mxu0 %v8657_v5  ;;  %v8667_v16 = vcombine.high %v377_v13, %v381_v14  ;;  %v385_v18 = vld [vmem:[%s10523_s15 + $0x88] sm:$0xff]  ;;  %6956 = vmatprep.subr.bf16.mxu1 %v8659_v10  ;;  %v8664_v20 = vcombine.low %v376_v8, %v380_v9 }
  0x76   : > { %v388_v17 = vld [vmem:[%s10523_s15 + $0xa0] sm:$0xff]  ;;  %v389_v19 = vld [vmem:[%s10523_s15 + $0xa8] sm:$0xff]  ;;  %6629 = vmatpush1.bf16.msra.mxu0 %v8656_v7  ;;  %6957 = vmatpush1.bf16.msra.mxu1 %v8658_v11  ;;  %v8666_v21 = vcombine.low %v377_v13, %v381_v14  ;;  %v10570_v55 = vsub.s32 %v1397_v45, %v10563_v46 }
  0x77   : > { %6630 = vmatprep.subr.bf16.mxu0 %v8665_v12  ;;  %v8673_v22 = vcombine.high %v384_v15, %v388_v17  ;;  %6958 = vmatprep.subr.bf16.mxu1 %v8667_v16  ;;  %v8675_v23 = vcombine.high %v385_v18, %v389_v19  ;;  %v392_v24 = vld [vmem:[%s10523_s15 + $0xc0] sm:$0xff]  ;;  %v393_v26 = vld [vmem:[%s10523_s15 + $0xc8] sm:$0xff]  ;;  %v8672_v28 = vcombine.low %v384_v15, %v388_v17 }
  0x78   : > { %v396_v25 = vld [vmem:[%s10523_s15 + $0xe0] sm:$0xff]  ;;  %v397_v27 = vld [vmem:[%s10523_s15 + $0xe8] sm:$0xff]  ;;  %v8674_v29 = vcombine.low %v385_v18, %v389_v19 }
  0x79   : > { %v8681_v30 = vcombine.high %v392_v24, %v396_v25  ;;  %v8683_v31 = vcombine.high %v393_v26, %v397_v27  ;;  %v400_v32 = vld [vmem:[%s10523_s15 + $0x100] sm:$0xff]  ;;  %v401_v37 = vld [vmem:[%s10523_s15 + $0x108] sm:$0xff]  ;;  %v8680_v39 = vcombine.low %v392_v24, %v396_v25  ;;  %v8682_v40 = vcombine.low %v393_v26, %v397_v27 }
  0x7a   : > { %6631 = vmatpush1.bf16.msra.mxu0 %v8664_v20  ;;  %6959 = vmatpush1.bf16.msra.mxu1 %v8666_v21  ;;  %v404_v33 = vld [vmem:[%s10523_s15 + $0x120] sm:$0xff]  ;;  %v405_v38 = vld [vmem:[%s10523_s15 + $0x128] sm:$0xff] }
  0x7b   : > { %6632 = vmatprep.subr.bf16.mxu0 %v8673_v22  ;;  %6960 = vmatprep.subr.bf16.mxu1 %v8675_v23  ;;  %v8689_v41 = vcombine.high %v400_v32, %v404_v33  ;;  %v8691_v42 = vcombine.high %v401_v37, %v405_v38  ;;  %v408_v43 = vld [vmem:[%s10523_s15 + $0x140] sm:$0xff]  ;;  %v409_v47 = vld [vmem:[%s10523_s15 + $0x148] sm:$0xff]  ;;  %v8688_v49 = vcombine.low %v400_v32, %v404_v33 }
  0x7c   : > { %v412_v44 = vld [vmem:[%s10523_s15 + $0x160] sm:$0xff]  ;;  %v413_v48 = vld [vmem:[%s10523_s15 + $0x168] sm:$0xff]  ;;  %v8690_v50 = vcombine.low %v401_v37, %v405_v38 }
  0x7d   : > { %v8697_v51 = vcombine.high %v408_v43, %v412_v44  ;;  %v8699_v52 = vcombine.high %v409_v47, %v413_v48  ;;  %v416_v53 = vld [vmem:[%s10523_s15 + $0x180] sm:$0xff]  ;;  %v417_v56 = vld [vmem:[%s10523_s15 + $0x188] sm:$0xff]  ;;  %v8696_v58 = vcombine.low %v408_v43, %v412_v44  ;;  %v8698_v59 = vcombine.low %v409_v47, %v413_v48 }
  0x7e   : > { %6633 = vmatpush1.bf16.msra.mxu0 %v8672_v28  ;;  %6961 = vmatpush1.bf16.msra.mxu1 %v8674_v29  ;;  %v420_v54 = vld [vmem:[%s10523_s15 + $0x1a0] sm:$0xff]  ;;  %v421_v57 = vld [vmem:[%s10523_s15 + $0x1a8] sm:$0xff] }
  0x7f   : > { %6634 = vmatprep.subr.bf16.mxu0 %v8681_v30  ;;  %6962 = vmatprep.subr.bf16.mxu1 %v8683_v31  ;;  %v8705_v60 = vcombine.high %v416_v53, %v420_v54  ;;  %v10575_v61 = vld [vmem:[%s10537_s12] sm:$0xff]  ;;  %v8707_v62 = vcombine.high %v417_v56, %v421_v57  ;;  %v424_v63 = vld [vmem:[%s10523_s15 + $0x1c0] sm:$0xff]  ;;  %v8704_v4 = vcombine.low %v416_v53, %v420_v54 }
  0x80   : > { %v428_v0 = vld [vmem:[%s10523_s15 + $0x1e0] sm:$0xff]  ;;  %v10581_v1 = vrot.slane %v10575_v61, %v10570_v55  ;;  %v425_v2 = vld [vmem:[%s10523_s15 + $0x1c8] sm:$0xff]  ;;  %v8706_v6 = vcombine.low %v417_v56, %v421_v57 }
  0x81   : > { %v429_v3 = vld [vmem:[%s10523_s15 + $0x1e8] sm:$0xff]  ;;  %v8713_v7 = vcombine.high %v424_v63, %v428_v0  ;;  %v432_v9 = vld [vmem:[%s10523_s15 + $0x200] sm:$0xff]  ;;  %v8712_v14 = vcombine.low %v424_v63, %v428_v0 }
  0x82   : > { %6635 = vmatpush1.bf16.msra.mxu0 %v8680_v39  ;;  %6963 = vmatpush1.bf16.msra.mxu1 %v8682_v40  ;;  %v1409_v5 = vcombine.high %v10581_v1, %v10581_v1  ;;  %v8715_v8 = vcombine.high %v425_v2, %v429_v3  ;;  %v436_v10 = vld [vmem:[%s10523_s15 + $0x220] sm:$0xff]  ;;  %v433_v12 = vld [vmem:[%s10523_s15 + $0x208] sm:$0xff]  ;;  %v8714_v15 = vcombine.low %v425_v2, %v429_v3 }
  0x83   : > { %6636 = vmatprep.subr.bf16.mxu0 %v8689_v41  ;;  %6964 = vmatprep.subr.bf16.mxu1 %v8691_v42  ;;  %v437_v13 = vld [vmem:[%s10523_s15 + $0x228] sm:$0xff]  ;;  %v8721_v16 = vcombine.high %v432_v9, %v436_v10  ;;  %v440_v18 = vld [vmem:[%s10523_s15 + $0x240] sm:$0xff]  ;;  %v8720_v22 = vcombine.low %v432_v9, %v436_v10 }
  0x84   : > { %v10590_v11 = vrot.slane %v1409_v5, %v10570_v55  ;;  %v8723_v17 = vcombine.high %v433_v12, %v437_v13  ;;  %v444_v19 = vld [vmem:[%s10523_s15 + $0x260] sm:$0xff]  ;;  %v441_v20 = vld [vmem:[%s10523_s15 + $0x248] sm:$0xff]  ;;  %v8722_v23 = vcombine.low %v433_v12, %v437_v13 }
  0x85   : > { %v445_v21 = vld [vmem:[%s10523_s15 + $0x268] sm:$0xff]  ;;  %v8729_v24 = vcombine.high %v440_v18, %v444_v19  ;;  %v448_v26 = vld [vmem:[%s10523_s15 + $0x280] sm:$0xff]  ;;  %v8728_v30 = vcombine.low %v440_v18, %v444_v19 }
  0x86   : > { %6637 = vmatpush1.bf16.msra.mxu0 %v8688_v49  ;;  %6965 = vmatpush1.bf16.msra.mxu1 %v8690_v50  ;;  %v8731_v25 = vcombine.high %v441_v20, %v445_v21  ;;  %v452_v27 = vld [vmem:[%s10523_s15 + $0x2a0] sm:$0xff]  ;;  %v449_v28 = vld [vmem:[%s10523_s15 + $0x288] sm:$0xff]  ;;  %v8730_v31 = vcombine.low %v441_v20, %v445_v21 }
  0x87   : > { %6638 = vmatprep.subr.bf16.mxu0 %v8697_v51  ;;  %6966 = vmatprep.subr.bf16.mxu1 %v8699_v52  ;;  %v453_v29 = vld [vmem:[%s10523_s15 + $0x2a8] sm:$0xff]  ;;  %v8737_v32 = vcombine.high %v448_v26, %v452_v27  ;;  %v456_v34 = vld [vmem:[%s10523_s15 + $0x2c0] sm:$0xff]  ;;  %v8736_v38 = vcombine.low %v448_v26, %v452_v27 }
  0x88   : > { %6660 = vmatprep.mubr.bf16.mxu0 %v10590_v11  ;;  %6988 = vmatprep.mubr.bf16.mxu1 %v10590_v11  ;;  %v8739_v33 = vcombine.high %v449_v28, %v453_v29  ;;  %v460_v35 = vld [vmem:[%s10523_s15 + $0x2e0] sm:$0xff]  ;;  %v457_v36 = vld [vmem:[%s10523_s15 + $0x2c8] sm:$0xff]  ;;  %v8738_v39 = vcombine.low %v449_v28, %v453_v29 }
  0x89   : > { %v461_v37 = vld [vmem:[%s10523_s15 + $0x2e8] sm:$0xff]  ;;  %v8745_v40 = vcombine.high %v456_v34, %v460_v35  ;;  %v464_v42 = vld [vmem:[%s10523_s15 + $0x300] sm:$0xff]  ;;  %v8744_v47 = vcombine.low %v456_v34, %v460_v35  ;;  %v10640_v34 = vcombine.high %v10590_v11, %v10590_v11 }
  0x8a   : > { %6639 = vmatpush1.bf16.msra.mxu0 %v8696_v58  ;;  %6967 = vmatpush1.bf16.msra.mxu1 %v8698_v59  ;;  %v8747_v41 = vcombine.high %v457_v36, %v461_v37  ;;  %v468_v43 = vld [vmem:[%s10523_s15 + $0x320] sm:$0xff]  ;;  %v465_v44 = vld [vmem:[%s10523_s15 + $0x308] sm:$0xff]  ;;  %v8746_v48 = vcombine.low %v457_v36, %v461_v37 }
  0x8b   : > { %6640 = vmatprep.subr.bf16.mxu0 %v8705_v60  ;;  %6968 = vmatprep.subr.bf16.mxu1 %v8707_v62  ;;  %v469_v45 = vld [vmem:[%s10523_s15 + $0x328] sm:$0xff]  ;;  %v8753_v49 = vcombine.high %v464_v42, %v468_v43  ;;  %v472_v51 = vld [vmem:[%s10523_s15 + $0x340] sm:$0xff]  ;;  %v8752_v56 = vcombine.low %v464_v42, %v468_v43 }
  0x8c   : > { %v8755_v50 = vcombine.high %v465_v44, %v469_v45  ;;  %v476_v52 = vld [vmem:[%s10523_s15 + $0x360] sm:$0xff]  ;;  %v473_v53 = vld [vmem:[%s10523_s15 + $0x348] sm:$0xff]  ;;  %v8754_v57 = vcombine.low %v465_v44, %v469_v45 }
  0x8d   : > { %v477_v54 = vld [vmem:[%s10523_s15 + $0x368] sm:$0xff]  ;;  %v8761_v58 = vcombine.high %v472_v51, %v476_v52  ;;  %v480_v60 = vld [vmem:[%s10523_s15 + $0x380] sm:$0xff]  ;;  %v8760_v2 = vcombine.low %v472_v51, %v476_v52 }
  0x8e   : > { %6641 = vmatpush1.bf16.msra.mxu0 %v8704_v4  ;;  %6969 = vmatpush1.bf16.msra.mxu1 %v8706_v6  ;;  %v8763_v59 = vcombine.high %v473_v53, %v477_v54  ;;  %v484_v62 = vld [vmem:[%s10523_s15 + $0x3a0] sm:$0xff]  ;;  %v481_v63 = vld [vmem:[%s10523_s15 + $0x388] sm:$0xff]  ;;  %v8762_v3 = vcombine.low %v473_v53, %v477_v54 }
  0x8f   : > { %6642 = vmatprep.subr.bf16.mxu0 %v8713_v7  ;;  %6970 = vmatprep.subr.bf16.mxu1 %v8715_v8  ;;  %v485_v0 = vld [vmem:[%s10523_s15 + $0x3a8] sm:$0xff]  ;;  %v8769_v4 = vcombine.high %v480_v60, %v484_v62  ;;  %v488_v6 = vld [vmem:[%s10523_s15 + $0x3c0] sm:$0xff]  ;;  %v8768_v10 = vcombine.low %v480_v60, %v484_v62 }
  0x90   : > { %v8771_v5 = vcombine.high %v481_v63, %v485_v0  ;;  %v492_v7 = vld [vmem:[%s10523_s15 + $0x3e0] sm:$0xff]  ;;  %v489_v8 = vld [vmem:[%s10523_s15 + $0x3c8] sm:$0xff]  ;;  %v8770_v12 = vcombine.low %v481_v63, %v485_v0 }
  0x91   : > { %v493_v9 = vld [vmem:[%s10523_s15 + $0x3e8] sm:$0xff]  ;;  %v8777_v13 = vcombine.high %v488_v6, %v492_v7  ;;  %v8776_v19 = vcombine.low %v488_v6, %v492_v7 }
  0x92   : > { %6643 = vmatpush1.bf16.msra.mxu0 %v8712_v14  ;;  %6971 = vmatpush1.bf16.msra.mxu1 %v8714_v15  ;;  %v8779_v14 = vcombine.high %v489_v8, %v493_v9  ;;  %v496_v15 = vld [vmem:[%s10523_s15 + $0x400] sm:$0xff]  ;;  %v501_v18 = vld [vmem:[%s10523_s15 + $0x428] sm:$0xff]  ;;  %v8778_v20 = vcombine.low %v489_v8, %v493_v9 }
  0x93   : > { %6644 = vmatprep.subr.bf16.mxu0 %v8721_v16  ;;  %6972 = vmatprep.subr.bf16.mxu1 %v8723_v17  ;;  %v500_v16 = vld [vmem:[%s10523_s15 + $0x420] sm:$0xff]  ;;  %v497_v17 = vld [vmem:[%s10523_s15 + $0x408] sm:$0xff] }
  0x94   : > { %v8785_v21 = vcombine.high %v496_v15, %v500_v16  ;;  %v505_v26 = vld [vmem:[%s10523_s15 + $0x448] sm:$0xff]  ;;  %v8784_v28 = vcombine.low %v496_v15, %v500_v16  ;;  %v8786_v29 = vcombine.low %v497_v17, %v501_v18 }
  0x95   : > { %v509_v27 = vld [vmem:[%s10523_s15 + $0x468] sm:$0xff] }
  0x96   : > { %6645 = vmatpush1.bf16.msra.mxu0 %v8720_v22  ;;  %6973 = vmatpush1.bf16.msra.mxu1 %v8722_v23  ;;  %v8787_v22 = vcombine.high %v497_v17, %v501_v18  ;;  %v504_v23 = vld [vmem:[%s10523_s15 + $0x440] sm:$0xff]  ;;  %v517_v35 = vld [vmem:[%s10523_s15 + $0x4a8] sm:$0xff]  ;;  %v8794_v37 = vcombine.low %v505_v26, %v509_v27 }
  0x97   : > { %6646 = vmatprep.subr.bf16.mxu0 %v8729_v24  ;;  %6974 = vmatprep.subr.bf16.mxu1 %v8731_v25  ;;  %v508_v24 = vld [vmem:[%s10523_s15 + $0x460] sm:$0xff]  ;;  %v10632_v25 = vrot.slane %v10581_v1, %v10570_v55  ;;  %v513_v1 = vld [vmem:[%s10523_s15 + $0x488] sm:$0xff] }
  0x98   : > { %v8792_v36 = vcombine.low %v504_v23, %v508_v24  ;;  %v521_v42 = vld [vmem:[%s10523_s15 + $0x4c8] sm:$0xff]  ;;  %v8802_v45 = vcombine.low %v513_v1, %v517_v35 }
  0x99   : > { %v525_v43 = vld [vmem:[%s10523_s15 + $0x4e8] sm:$0xff] }
  0x9a   : > { %6647 = vmatpush1.bf16.msra.mxu0 %v8728_v30  ;;  %6975 = vmatpush1.bf16.msra.mxu1 %v8730_v31  ;;  %v8793_v30 = vcombine.high %v504_v23, %v508_v24  ;;  %v8795_v31 = vcombine.high %v505_v26, %v509_v27  ;;  %v529_v51 = vld [vmem:[%s10523_s15 + $0x508] sm:$0xff]  ;;  %v8810_v54 = vcombine.low %v521_v42, %v525_v43 }
  0x9b   : > { %6648 = vmatprep.subr.bf16.mxu0 %v8737_v32  ;;  %6976 = vmatprep.subr.bf16.mxu1 %v8739_v33  ;;  %v512_v32 = vld [vmem:[%s10523_s15 + $0x480] sm:$0xff]  ;;  %v533_v52 = vld [vmem:[%s10523_s15 + $0x528] sm:$0xff] }
  0x9c   : > { %v516_v33 = vld [vmem:[%s10523_s15 + $0x4a0] sm:$0xff]  ;;  %v537_v60 = vld [vmem:[%s10523_s15 + $0x548] sm:$0xff]  ;;  %v8818_v0 = vcombine.low %v529_v51, %v533_v52 }
  0x9d   : > { %v8800_v44 = vcombine.low %v512_v32, %v516_v33  ;;  %v541_v62 = vld [vmem:[%s10523_s15 + $0x568] sm:$0xff] }
  0x9e   : > { %6649 = vmatpush1.bf16.msra.mxu0 %v8736_v38  ;;  %6977 = vmatpush1.bf16.msra.mxu1 %v8738_v39  ;;  %v8801_v38 = vcombine.high %v512_v32, %v516_v33  ;;  %v8803_v39 = vcombine.high %v513_v1, %v517_v35  ;;  %v545_v6 = vld [vmem:[%s10523_s15 + $0x588] sm:$0xff]  ;;  %v8826_v9 = vcombine.low %v537_v60, %v541_v62 }
  0x9f   : > { %6650 = vmatprep.subr.bf16.mxu0 %v8745_v40  ;;  %6978 = vmatprep.subr.bf16.mxu1 %v8747_v41  ;;  %v520_v40 = vld [vmem:[%s10523_s15 + $0x4c0] sm:$0xff]  ;;  %v549_v7 = vld [vmem:[%s10523_s15 + $0x5a8] sm:$0xff] }
  0xa0   : > { %v524_v41 = vld [vmem:[%s10523_s15 + $0x4e0] sm:$0xff]  ;;  %v553_v15 = vld [vmem:[%s10523_s15 + $0x5c8] sm:$0xff]  ;;  %v8834_v18 = vcombine.low %v545_v6, %v549_v7 }
  0xa1   : > { %v8808_v53 = vcombine.low %v520_v40, %v524_v41  ;;  %v557_v16 = vld [vmem:[%s10523_s15 + $0x5e8] sm:$0xff] }
  0xa2   : > { %6651 = vmatpush1.bf16.msra.mxu0 %v8744_v47  ;;  %6979 = vmatpush1.bf16.msra.mxu1 %v8746_v48  ;;  %v8809_v47 = vcombine.high %v520_v40, %v524_v41  ;;  %v8811_v48 = vcombine.high %v521_v42, %v525_v43  ;;  %v561_v23 = vld [vmem:[%s10523_s15 + $0x608] sm:$0xff]  ;;  %v8842_v27 = vcombine.low %v553_v15, %v557_v16 }
  0xa3   : > { %6652 = vmatprep.subr.bf16.mxu0 %v8753_v49  ;;  %6980 = vmatprep.subr.bf16.mxu1 %v8755_v50  ;;  %v528_v49 = vld [vmem:[%s10523_s15 + $0x500] sm:$0xff]  ;;  %v565_v24 = vld [vmem:[%s10523_s15 + $0x628] sm:$0xff] }
  0xa4   : > { %v532_v50 = vld [vmem:[%s10523_s15 + $0x520] sm:$0xff]  ;;  %v569_v32 = vld [vmem:[%s10523_s15 + $0x648] sm:$0xff]  ;;  %v8850_v35 = vcombine.low %v561_v23, %v565_v24 }
  0xa5   : > { %v8816_v63 = vcombine.low %v528_v49, %v532_v50  ;;  %v573_v33 = vld [vmem:[%s10523_s15 + $0x668] sm:$0xff] }
  0xa6   : > { %6653 = vmatpush1.bf16.msra.mxu0 %v8752_v56  ;;  %6981 = vmatpush1.bf16.msra.mxu1 %v8754_v57  ;;  %v8817_v56 = vcombine.high %v528_v49, %v532_v50  ;;  %v8819_v57 = vcombine.high %v529_v51, %v533_v52  ;;  %v577_v40 = vld [vmem:[%s10523_s15 + $0x688] sm:$0xff]  ;;  %v8858_v43 = vcombine.low %v569_v32, %v573_v33 }
  0xa7   : > { %6654 = vmatprep.subr.bf16.mxu0 %v8761_v58  ;;  %6982 = vmatprep.subr.bf16.mxu1 %v8763_v59  ;;  %v536_v58 = vld [vmem:[%s10523_s15 + $0x540] sm:$0xff]  ;;  %v581_v41 = vld [vmem:[%s10523_s15 + $0x6a8] sm:$0xff] }
  0xa8   : > { %v540_v59 = vld [vmem:[%s10523_s15 + $0x560] sm:$0xff]  ;;  %v585_v49 = vld [vmem:[%s10523_s15 + $0x6c8] sm:$0xff]  ;;  %v8866_v52 = vcombine.low %v577_v40, %v581_v41 }
  0xa9   : > { %v8824_v8 = vcombine.low %v536_v58, %v540_v59  ;;  %v589_v50 = vld [vmem:[%s10523_s15 + $0x6e8] sm:$0xff] }
  0xaa   : > { %6655 = vmatpush1.bf16.msra.mxu0 %v8760_v2  ;;  %6983 = vmatpush1.bf16.msra.mxu1 %v8762_v3  ;;  %v8825_v2 = vcombine.high %v536_v58, %v540_v59  ;;  %v8827_v3 = vcombine.high %v537_v60, %v541_v62  ;;  %v593_v58 = vld [vmem:[%s10523_s15 + $0x708] sm:$0xff]  ;;  %v8874_v62 = vcombine.low %v585_v49, %v589_v50 }
  0xab   : > { %6656 = vmatprep.subr.bf16.mxu0 %v8769_v4  ;;  %6984 = vmatprep.subr.bf16.mxu1 %v8771_v5  ;;  %v544_v4 = vld [vmem:[%s10523_s15 + $0x580] sm:$0xff]  ;;  %v597_v59 = vld [vmem:[%s10523_s15 + $0x728] sm:$0xff] }
  0xac   : > { %v548_v5 = vld [vmem:[%s10523_s15 + $0x5a0] sm:$0xff] }
  0xad   : > { %v8832_v17 = vcombine.low %v544_v4, %v548_v5 }
  0xae   : > { %6657 = vmatpush1.bf16.msra.mxu0 %v8768_v10  ;;  %6985 = vmatpush1.bf16.msra.mxu1 %v8770_v12  ;;  %v8833_v10 = vcombine.high %v544_v4, %v548_v5  ;;  %v8835_v12 = vcombine.high %v545_v6, %v549_v7  ;;  %v601_v4 = vld [vmem:[%s10523_s15 + $0x748] sm:$0xff]  ;;  %v8882_v7 = vcombine.low %v593_v58, %v597_v59 }
  0xaf   : > { %6658 = vmatprep.subr.bf16.mxu0 %v8777_v13  ;;  %6986 = vmatprep.subr.bf16.mxu1 %v8779_v14  ;;  %v552_v13 = vld [vmem:[%s10523_s15 + $0x5c0] sm:$0xff]  ;;  %v605_v5 = vld [vmem:[%s10523_s15 + $0x768] sm:$0xff] }
  0xb0   : > { %v556_v14 = vld [vmem:[%s10523_s15 + $0x5e0] sm:$0xff] }
  0xb1   : > { %v8840_v26 = vcombine.low %v552_v13, %v556_v14 }
  0xb2   : > { %6659 = vmatpush1.bf16.msra.mxu0 %v8776_v19  ;;  %6987 = vmatpush1.bf16.msra.mxu1 %v8778_v20  ;;  %v8841_v19 = vcombine.high %v552_v13, %v556_v14  ;;  %v8843_v20 = vcombine.high %v553_v15, %v557_v16  ;;  %v609_v13 = vld [vmem:[%s10523_s15 + $0x788] sm:$0xff]  ;;  %v8890_v16 = vcombine.low %v601_v4, %v605_v5 }
  0xb3   : > { %6669 = vmatprep.subr.bf16.mxu0 %v8785_v21  ;;  %6997 = vmatprep.subr.bf16.mxu1 %v8787_v22  ;;  %v560_v21 = vld [vmem:[%s10523_s15 + $0x600] sm:$0xff]  ;;  %v613_v14 = vld [vmem:[%s10523_s15 + $0x7a8] sm:$0xff] }
  0xb4   : > { %v564_v22 = vld [vmem:[%s10523_s15 + $0x620] sm:$0xff] }
  0xb5   : > { %6661 = vmatmul.mubr.bf16.vlgmr.msra.gmra.mrb[0].mxu0 %v10632_v25  ;;  %6989 = vmatmul.mubr.bf16.vlgmr.msra.gmra.mrb[0].mxu1 %v10632_v25  ;;  %v8848_v1 = vcombine.low %v560_v21, %v564_v22 }
  0xb6   : > { %6670 = vmatpush1.bf16.msra.mxu0 %v8784_v28  ;;  %6998 = vmatpush1.bf16.msra.mxu1 %v8786_v29  ;;  %v8849_v28 = vcombine.high %v560_v21, %v564_v22  ;;  %v8851_v29 = vcombine.high %v561_v23, %v565_v24  ;;  %v1394_v21 = vcombine.high %v10575_v61, %v10575_v61  ;;  %v617_v22 = vld [vmem:[%s10523_s15 + $0x7c8] sm:$0xff] }
  0xb7   : > { %6671 = vmatprep.subr.bf16.mxu0 %v8793_v30  ;;  %6999 = vmatprep.subr.bf16.mxu1 %v8795_v31  ;;  %v568_v30 = vld [vmem:[%s10523_s15 + $0x640] sm:$0xff]  ;;  %v621_v23 = vld [vmem:[%s10523_s15 + $0x7e8] sm:$0xff] }
  0xb8   : > { %6701 = vmatprep.mubr.bf16.mxu0 %v10640_v34  ;;  %7029 = vmatprep.mubr.bf16.mxu1 %v10640_v34  ;;  %v572_v31 = vld [vmem:[%s10523_s15 + $0x660] sm:$0xff]  ;;  %v625_v61 = vld [vmem:[%s10523_s15 + $0x808] sm:$0xff] }
  0xb9   : > { %v8856_v42 = vcombine.low %v568_v30, %v572_v31 }
  0xba   : > { %6672 = vmatpush1.bf16.msra.mxu0 %v8792_v36  ;;  %7000 = vmatpush1.bf16.msra.mxu1 %v8794_v37  ;;  %v8857_v36 = vcombine.high %v568_v30, %v572_v31  ;;  %v8859_v37 = vcombine.high %v569_v32, %v573_v33  ;;  %v628_v30 = vld [vmem:[%s10523_s15 + $0x820] sm:$0xff]  ;;  %v10705_v31 = vrot.slane %v1394_v21, %v10570_v55  ;;  %v629_v32 = vld [vmem:[%s10523_s15 + $0x828] sm:$0xff] }
  0xbb   : > { %6673 = vmatprep.subr.bf16.mxu0 %v8801_v38  ;;  %7001 = vmatprep.subr.bf16.mxu1 %v8803_v39  ;;  %v576_v38 = vld [vmem:[%s10523_s15 + $0x680] sm:$0xff] }
  0xbc   : > { %v580_v39 = vld [vmem:[%s10523_s15 + $0x6a0] sm:$0xff] }
  0xbd   : > { %v8864_v51 = vcombine.low %v576_v38, %v580_v39  ;;  %v672_v21 = vld [vmem:[%s10523_s15 + $0x980] sm:$0xff] }
  0xbe   : > { %6674 = vmatpush1.bf16.msra.mxu0 %v8800_v44  ;;  %7002 = vmatpush1.bf16.msra.mxu1 %v8802_v45  ;;  %v8865_v44 = vcombine.high %v576_v38, %v580_v39  ;;  %v8867_v45 = vcombine.high %v577_v40, %v581_v41  ;;  %v636_v38 = vld [vmem:[%s10523_s15 + $0x860] sm:$0xff]  ;;  %v1410_v39 = vcombine.high %v10705_v31, %v10705_v31  ;;  %v633_v41 = vld [vmem:[%s10523_s15 + $0x848] sm:$0xff] }
  0xbf   : > { %6675 = vmatprep.subr.bf16.mxu0 %v8809_v47  ;;  %7003 = vmatprep.subr.bf16.mxu1 %v8811_v48  ;;  %v584_v47 = vld [vmem:[%s10523_s15 + $0x6c0] sm:$0xff]  ;;  %v10715_v40 = vcombine.high %v10632_v25, %v10632_v25 }
  0xc0   : > { %v588_v48 = vld [vmem:[%s10523_s15 + $0x6e0] sm:$0xff] }
  0xc1   : > { %v8872_v60 = vcombine.low %v584_v47, %v588_v48 }
  0xc2   : > { %6676 = vmatpush1.bf16.msra.mxu0 %v8808_v53  ;;  %7004 = vmatpush1.bf16.msra.mxu1 %v8810_v54  ;;  %v8873_v53 = vcombine.high %v584_v47, %v588_v48  ;;  %v8875_v54 = vcombine.high %v585_v49, %v589_v50  ;;  %v640_v48 = vld [vmem:[%s10523_s15 + $0x880] sm:$0xff]  ;;  %v10722_v50 = vrot.slane %v1410_v39, %v10570_v55 }
  0xc3   : > { %6677 = vmatprep.subr.bf16.mxu0 %v8817_v56  ;;  %7005 = vmatprep.subr.bf16.mxu1 %v8819_v57  ;;  %v592_v56 = vld [vmem:[%s10523_s15 + $0x700] sm:$0xff] }
  0xc4   : > { %v596_v57 = vld [vmem:[%s10523_s15 + $0x720] sm:$0xff] }
  0xc5   : > { %v8880_v6 = vcombine.low %v592_v56, %v596_v57  ;;  %v644_v49 = vld [vmem:[%s10523_s15 + $0x8a0] sm:$0xff] }
  0xc6   : > { %6678 = vmatpush1.bf16.msra.mxu0 %v8816_v63  ;;  %7006 = vmatpush1.bf16.msra.mxu1 %v8818_v0  ;;  %v8881_v63 = vcombine.high %v592_v56, %v596_v57  ;;  %v8883_v0 = vcombine.high %v593_v58, %v597_v59  ;;  %v8929_v56 = vcombine.high %v640_v48, %v644_v49  ;;  %v648_v58 = vld [vmem:[%s10523_s15 + $0x8c0] sm:$0xff] }
  0xc7   : > { %6679 = vmatprep.subr.bf16.mxu0 %v8825_v2  ;;  %7007 = vmatprep.subr.bf16.mxu1 %v8827_v3  ;;  %v600_v2 = vld [vmem:[%s10523_s15 + $0x740] sm:$0xff] }
  0xc8   : > { %v604_v3 = vld [vmem:[%s10523_s15 + $0x760] sm:$0xff] }
  0xc9   : > { %v8888_v15 = vcombine.low %v600_v2, %v604_v3  ;;  %v652_v59 = vld [vmem:[%s10523_s15 + $0x8e0] sm:$0xff] }
  0xca   : > { %6680 = vmatpush1.bf16.msra.mxu0 %v8824_v8  ;;  %7008 = vmatpush1.bf16.msra.mxu1 %v8826_v9  ;;  %v8889_v8 = vcombine.high %v600_v2, %v604_v3  ;;  %v8891_v9 = vcombine.high %v601_v4, %v605_v5  ;;  %v8937_v2 = vcombine.high %v648_v58, %v652_v59  ;;  %v656_v4 = vld [vmem:[%s10523_s15 + $0x900] sm:$0xff] }
  0xcb   : > { %6681 = vmatprep.subr.bf16.mxu0 %v8833_v10  ;;  %7009 = vmatprep.subr.bf16.mxu1 %v8835_v12  ;;  %v608_v10 = vld [vmem:[%s10523_s15 + $0x780] sm:$0xff] }
  0xcc   : > { %v612_v12 = vld [vmem:[%s10523_s15 + $0x7a0] sm:$0xff] }
  0xcd   : > { %v8896_v24 = vcombine.low %v608_v10, %v612_v12  ;;  %v660_v5 = vld [vmem:[%s10523_s15 + $0x920] sm:$0xff] }
  0xce   : > { %6682 = vmatpush1.bf16.msra.mxu0 %v8832_v17  ;;  %7010 = vmatpush1.bf16.msra.mxu1 %v8834_v18  ;;  %v8897_v17 = vcombine.high %v608_v10, %v612_v12  ;;  %v8899_v18 = vcombine.high %v609_v13, %v613_v14  ;;  %v8945_v10 = vcombine.high %v656_v4, %v660_v5  ;;  %v692_v39 = vld [vmem:[%s10523_s15 + $0xa20] sm:$0xff] }
  0xcf   : > { %6683 = vmatprep.subr.bf16.mxu0 %v8841_v19  ;;  %7011 = vmatprep.subr.bf16.mxu1 %v8843_v20  ;;  %v616_v19 = vld [vmem:[%s10523_s15 + $0x7c0] sm:$0xff] }
  0xd0   : > { %v620_v20 = vld [vmem:[%s10523_s15 + $0x7e0] sm:$0xff] }
  0xd1   : > { %v8904_v33 = vcombine.low %v616_v19, %v620_v20 }
  0xd2   : > { %6684 = vmatpush1.bf16.msra.mxu0 %v8840_v26  ;;  %7012 = vmatpush1.bf16.msra.mxu1 %v8842_v27  ;;  %v8898_v26 = vcombine.low %v609_v13, %v613_v14  ;;  %v8905_v27 = vcombine.high %v616_v19, %v620_v20  ;;  %v664_v13 = vld [vmem:[%s10523_s15 + $0x940] sm:$0xff] }
  0xd3   : > { %6685 = vmatprep.subr.bf16.mxu0 %v8849_v28  ;;  %7013 = vmatprep.subr.bf16.mxu1 %v8851_v29  ;;  %v8907_v28 = vcombine.high %v617_v22, %v621_v23  ;;  %v624_v29 = vld [vmem:[%s10523_s15 + $0x800] sm:$0xff] }
  0xd4   : > { %v668_v14 = vld [vmem:[%s10523_s15 + $0x960] sm:$0xff] }
  0xd5   : > { %v8953_v19 = vcombine.high %v664_v13, %v668_v14 }
  0xd6   : > { %6686 = vmatpush1.bf16.msra.mxu0 %v8848_v1  ;;  %7014 = vmatpush1.bf16.msra.mxu1 %v8850_v35  ;;  %v8906_v1 = vcombine.low %v617_v22, %v621_v23  ;;  %v8913_v35 = vcombine.high %v624_v29, %v628_v30  ;;  %v676_v22 = vld [vmem:[%s10523_s15 + $0x9a0] sm:$0xff]  ;;  %v673_v23 = vld [vmem:[%s10523_s15 + $0x988] sm:$0xff] }
  0xd7   : > { %6687 = vmatprep.subr.bf16.mxu0 %v8857_v36  ;;  %7015 = vmatprep.subr.bf16.mxu1 %v8859_v37  ;;  %v8915_v36 = vcombine.high %v625_v61, %v629_v32  ;;  %v632_v37 = vld [vmem:[%s10523_s15 + $0x840] sm:$0xff] }
  0xda   : > { %6688 = vmatpush1.bf16.msra.mxu0 %v8856_v42  ;;  %7016 = vmatpush1.bf16.msra.mxu1 %v8858_v43  ;;  %v637_v42 = vld [vmem:[%s10523_s15 + $0x868] sm:$0xff]  ;;  %v8912_v43 = vcombine.low %v624_v29, %v628_v30  ;;  %v680_v30 = vld [vmem:[%s10523_s15 + $0x9c0] sm:$0xff] }
  0xdb   : > { %6689 = vmatprep.subr.bf16.mxu0 %v8865_v44  ;;  %7017 = vmatprep.subr.bf16.mxu1 %v8867_v45  ;;  %v8914_v44 = vcombine.low %v625_v61, %v629_v32  ;;  %v8921_v45 = vcombine.high %v632_v37, %v636_v38  ;;  %v8923_v47 = vcombine.high %v633_v41, %v637_v42  ;;  %v684_v61 = vld [vmem:[%s10523_s15 + $0x9e0] sm:$0xff]  ;;  %v681_v32 = vld [vmem:[%s10523_s15 + $0x9c8] sm:$0xff] }
  0xde   : > { %6690 = vmatpush1.bf16.msra.mxu0 %v8864_v51  ;;  %7018 = vmatpush1.bf16.msra.mxu1 %v8866_v52  ;;  %v641_v51 = vld [vmem:[%s10523_s15 + $0x888] sm:$0xff] }
  0xdf   : > { %6691 = vmatprep.subr.bf16.mxu0 %v8873_v53  ;;  %7019 = vmatprep.subr.bf16.mxu1 %v8875_v54  ;;  %v645_v52 = vld [vmem:[%s10523_s15 + $0x8a8] sm:$0xff]  ;;  %v8920_v53 = vcombine.low %v632_v37, %v636_v38  ;;  %v8922_v54 = vcombine.low %v633_v41, %v637_v42  ;;  %v688_v38 = vld [vmem:[%s10523_s15 + $0xa00] sm:$0xff] }
  0xe0   : > { %v8931_v57 = vcombine.high %v641_v51, %v645_v52  ;;  %v689_v41 = vld [vmem:[%s10523_s15 + $0xa08] sm:$0xff] }
  0xe1   : > { %v693_v42 = vld [vmem:[%s10523_s15 + $0xa28] sm:$0xff] }
  0xe2   : > { %6692 = vmatpush1.bf16.msra.mxu0 %v8872_v60  ;;  %7020 = vmatpush1.bf16.msra.mxu1 %v8874_v62  ;;  %v649_v60 = vld [vmem:[%s10523_s15 + $0x8c8] sm:$0xff] }
  0xe3   : > { %6693 = vmatprep.subr.bf16.mxu0 %v8881_v63  ;;  %7021 = vmatprep.subr.bf16.mxu1 %v8883_v0  ;;  %v653_v62 = vld [vmem:[%s10523_s15 + $0x8e8] sm:$0xff]  ;;  %v8928_v63 = vcombine.low %v640_v48, %v644_v49  ;;  %v8930_v0 = vcombine.low %v641_v51, %v645_v52  ;;  %v696_v48 = vld [vmem:[%s10523_s15 + $0xa40] sm:$0xff] }
  0xe4   : > { %v8939_v3 = vcombine.high %v649_v60, %v653_v62  ;;  %v700_v49 = vld [vmem:[%s10523_s15 + $0xa60] sm:$0xff]  ;;  %v697_v51 = vld [vmem:[%s10523_s15 + $0xa48] sm:$0xff] }
  0xe5   : > { %v701_v52 = vld [vmem:[%s10523_s15 + $0xa68] sm:$0xff] }
  0xe6   : > { %6694 = vmatpush1.bf16.msra.mxu0 %v8880_v6  ;;  %7022 = vmatpush1.bf16.msra.mxu1 %v8882_v7  ;;  %v657_v6 = vld [vmem:[%s10523_s15 + $0x908] sm:$0xff] }
  0xe7   : > { %6695 = vmatprep.subr.bf16.mxu0 %v8889_v8  ;;  %7023 = vmatprep.subr.bf16.mxu1 %v8891_v9  ;;  %v661_v7 = vld [vmem:[%s10523_s15 + $0x928] sm:$0xff]  ;;  %v8936_v8 = vcombine.low %v648_v58, %v652_v59  ;;  %v8938_v9 = vcombine.low %v649_v60, %v653_v62  ;;  %v704_v58 = vld [vmem:[%s10523_s15 + $0xa80] sm:$0xff] }
  0xe8   : > { %v8947_v12 = vcombine.high %v657_v6, %v661_v7  ;;  %v708_v59 = vld [vmem:[%s10523_s15 + $0xaa0] sm:$0xff]  ;;  %v705_v60 = vld [vmem:[%s10523_s15 + $0xa88] sm:$0xff] }
  0xe9   : > { %v709_v62 = vld [vmem:[%s10523_s15 + $0xaa8] sm:$0xff] }
  0xea   : > { %6696 = vmatpush1.bf16.msra.mxu0 %v8888_v15  ;;  %7024 = vmatpush1.bf16.msra.mxu1 %v8890_v16  ;;  %v665_v15 = vld [vmem:[%s10523_s15 + $0x948] sm:$0xff] }
  0xeb   : > { %6697 = vmatprep.subr.bf16.mxu0 %v8897_v17  ;;  %7025 = vmatprep.subr.bf16.mxu1 %v8899_v18  ;;  %v669_v16 = vld [vmem:[%s10523_s15 + $0x968] sm:$0xff]  ;;  %v8944_v17 = vcombine.low %v656_v4, %v660_v5  ;;  %v8946_v18 = vcombine.low %v657_v6, %v661_v7  ;;  %v712_v4 = vld [vmem:[%s10523_s15 + $0xac0] sm:$0xff] }
  0xec   : > { %v8955_v20 = vcombine.high %v665_v15, %v669_v16  ;;  %v716_v5 = vld [vmem:[%s10523_s15 + $0xae0] sm:$0xff]  ;;  %v713_v6 = vld [vmem:[%s10523_s15 + $0xac8] sm:$0xff] }
  0xed   : > { %v717_v7 = vld [vmem:[%s10523_s15 + $0xae8] sm:$0xff] }
  0xee   : > { %6698 = vmatpush1.bf16.msra.mxu0 %v8896_v24  ;;  %7026 = vmatpush1.bf16.msra.mxu1 %v8898_v26  ;;  %v677_v24 = vld [vmem:[%s10523_s15 + $0x9a8] sm:$0xff]  ;;  %v8952_v26 = vcombine.low %v664_v13, %v668_v14  ;;  %v720_v13 = vld [vmem:[%s10523_s15 + $0xb00] sm:$0xff] }
  0xef   : > { %6699 = vmatprep.subr.bf16.mxu0 %v8905_v27  ;;  %7027 = vmatprep.subr.bf16.mxu1 %v8907_v28  ;;  %v8954_v27 = vcombine.low %v665_v15, %v669_v16  ;;  %v8961_v28 = vcombine.high %v672_v21, %v676_v22  ;;  %v8963_v29 = vcombine.high %v673_v23, %v677_v24  ;;  %v724_v14 = vld [vmem:[%s10523_s15 + $0xb20] sm:$0xff]  ;;  %v721_v15 = vld [vmem:[%s10523_s15 + $0xb08] sm:$0xff] }
  0xf0   : > { %v725_v16 = vld [vmem:[%s10523_s15 + $0xb28] sm:$0xff] }
  0xf2   : > { %6700 = vmatpush1.bf16.msra.mxu0 %v8904_v33  ;;  %7028 = vmatpush1.bf16.msra.mxu1 %v8906_v1  ;;  %v685_v33 = vld [vmem:[%s10523_s15 + $0x9e8] sm:$0xff]  ;;  %v8960_v1 = vcombine.low %v672_v21, %v676_v22  ;;  %v728_v21 = vld [vmem:[%s10523_s15 + $0xb40] sm:$0xff] }
  0xf3   : > { %6710 = vmatprep.subr.bf16.mxu0 %v8913_v35  ;;  %7038 = vmatprep.subr.bf16.mxu1 %v8915_v36  ;;  %v8962_v35 = vcombine.low %v673_v23, %v677_v24  ;;  %v8969_v36 = vcombine.high %v680_v30, %v684_v61  ;;  %v8971_v37 = vcombine.high %v681_v32, %v685_v33  ;;  %v732_v22 = vld [vmem:[%s10523_s15 + $0xb60] sm:$0xff]  ;;  %v729_v23 = vld [vmem:[%s10523_s15 + $0xb48] sm:$0xff] }
  0xf4   : > { %v733_v24 = vld [vmem:[%s10523_s15 + $0xb68] sm:$0xff] }
  0xf5   : > { %6702 = vmatmul.mubr.bf16.vlgmr.msra.gmra.mrb[0].mxu0 %v10715_v40  ;;  %7030 = vmatmul.mubr.bf16.vlgmr.msra.gmra.mrb[0].mxu1 %v10715_v40 }
  0xf6   : > { %6711 = vmatpush1.bf16.msra.mxu0 %v8912_v43  ;;  %7039 = vmatpush1.bf16.msra.mxu1 %v8914_v44  ;;  %v8968_v43 = vcombine.low %v680_v30, %v684_v61  ;;  %v8970_v44 = vcombine.low %v681_v32, %v685_v33  ;;  %v736_v30 = vld [vmem:[%s10523_s15 + $0xb80] sm:$0xff]  ;;  %v737_v32 = vld [vmem:[%s10523_s15 + $0xb88] sm:$0xff] }
  0xf7   : > { %6712 = vmatprep.subr.bf16.mxu0 %v8921_v45  ;;  %7040 = vmatprep.subr.bf16.mxu1 %v8923_v47  ;;  %v8977_v45 = vcombine.high %v688_v38, %v692_v39  ;;  %v8979_v47 = vcombine.high %v689_v41, %v693_v42  ;;  %v740_v61 = vld [vmem:[%s10523_s15 + $0xba0] sm:$0xff]  ;;  %v741_v33 = vld [vmem:[%s10523_s15 + $0xba8] sm:$0xff] }
  0xf8   : > { %6742 = vmatprep.mubr.bf16.mxu0 %v10722_v50  ;;  %7070 = vmatprep.mubr.bf16.mxu1 %v10722_v50 }
  0xfa   : > { %6713 = vmatpush1.bf16.msra.mxu0 %v8920_v53  ;;  %7041 = vmatpush1.bf16.msra.mxu1 %v8922_v54  ;;  %v8976_v53 = vcombine.low %v688_v38, %v692_v39  ;;  %v8978_v54 = vcombine.low %v689_v41, %v693_v42  ;;  %v744_v38 = vld [vmem:[%s10523_s15 + $0xbc0] sm:$0xff]  ;;  %v745_v41 = vld [vmem:[%s10523_s15 + $0xbc8] sm:$0xff] }
  0xfb   : > { %6714 = vmatprep.subr.bf16.mxu0 %v8929_v56  ;;  %7042 = vmatprep.subr.bf16.mxu1 %v8931_v57  ;;  %v8985_v56 = vcombine.high %v696_v48, %v700_v49  ;;  %v8987_v57 = vcombine.high %v697_v51, %v701_v52  ;;  %v748_v39 = vld [vmem:[%s10523_s15 + $0xbe0] sm:$0xff]  ;;  %v749_v42 = vld [vmem:[%s10523_s15 + $0xbe8] sm:$0xff] }
  0xfe   : > { %6715 = vmatpush1.bf16.msra.mxu0 %v8928_v63  ;;  %7043 = vmatpush1.bf16.msra.mxu1 %v8930_v0  ;;  %v8984_v63 = vcombine.low %v696_v48, %v700_v49  ;;  %v8986_v0 = vcombine.low %v697_v51, %v701_v52  ;;  %v752_v48 = vld [vmem:[%s10523_s15 + $0xc00] sm:$0xff]  ;;  %v753_v51 = vld [vmem:[%s10523_s15 + $0xc08] sm:$0xff] }
  0xff   : > { %6716 = vmatprep.subr.bf16.mxu0 %v8937_v2  ;;  %7044 = vmatprep.subr.bf16.mxu1 %v8939_v3  ;;  %v8993_v2 = vcombine.high %v704_v58, %v708_v59  ;;  %v8995_v3 = vcombine.high %v705_v60, %v709_v62  ;;  %v756_v49 = vld [vmem:[%s10523_s15 + $0xc20] sm:$0xff]  ;;  %v757_v52 = vld [vmem:[%s10523_s15 + $0xc28] sm:$0xff] }
 0x102   : > { %6717 = vmatpush1.bf16.msra.mxu0 %v8936_v8  ;;  %7045 = vmatpush1.bf16.msra.mxu1 %v8938_v9  ;;  %v8992_v8 = vcombine.low %v704_v58, %v708_v59  ;;  %v8994_v9 = vcombine.low %v705_v60, %v709_v62  ;;  %v760_v58 = vld [vmem:[%s10523_s15 + $0xc40] sm:$0xff]  ;;  %v10790_v60 = vrot.slane %v10705_v31, %v10570_v55  ;;  %v761_v62 = vld [vmem:[%s10523_s15 + $0xc48] sm:$0xff] }
 0x103   : > { %6718 = vmatprep.subr.bf16.mxu0 %v8945_v10  ;;  %7046 = vmatprep.subr.bf16.mxu1 %v8947_v12  ;;  %v9001_v10 = vcombine.high %v712_v4, %v716_v5  ;;  %v9003_v12 = vcombine.high %v713_v6, %v717_v7  ;;  %v764_v59 = vld [vmem:[%s10523_s15 + $0xc60] sm:$0xff]  ;;  %v769_v31 = vld [vmem:[%s10523_s15 + $0xc88] sm:$0xff] }
 0x106   : > { %6719 = vmatpush1.bf16.msra.mxu0 %v8944_v17  ;;  %7047 = vmatpush1.bf16.msra.mxu1 %v8946_v18  ;;  %v9000_v17 = vcombine.low %v712_v4, %v716_v5  ;;  %v9002_v18 = vcombine.low %v713_v6, %v717_v7  ;;  %v768_v5 = vld [vmem:[%s10523_s15 + $0xc80] sm:$0xff]  ;;  %v10798_v7 = vcombine.high %v10722_v50, %v10722_v50 }
 0x107   : > { %6720 = vmatprep.subr.bf16.mxu0 %v8953_v19  ;;  %7048 = vmatprep.subr.bf16.mxu1 %v8955_v20  ;;  %v9009_v19 = vcombine.high %v720_v13, %v724_v14  ;;  %v9011_v20 = vcombine.high %v721_v15, %v725_v16  ;;  %v772_v6 = vld [vmem:[%s10523_s15 + $0xca0] sm:$0xff] }
 0x10a   : > { %6721 = vmatpush1.bf16.msra.mxu0 %v8952_v26  ;;  %7049 = vmatpush1.bf16.msra.mxu1 %v8954_v27  ;;  %v9008_v26 = vcombine.low %v720_v13, %v724_v14  ;;  %v9010_v27 = vcombine.low %v721_v15, %v725_v16  ;;  %v776_v14 = vld [vmem:[%s10523_s15 + $0xcc0] sm:$0xff]  ;;  %v777_v16 = vld [vmem:[%s10523_s15 + $0xcc8] sm:$0xff] }
 0x10b   : > { %6722 = vmatprep.subr.bf16.mxu0 %v8961_v28  ;;  %7050 = vmatprep.subr.bf16.mxu1 %v8963_v29  ;;  %v9017_v28 = vcombine.high %v728_v21, %v732_v22  ;;  %v9019_v29 = vcombine.high %v729_v23, %v733_v24  ;;  %v780_v15 = vld [vmem:[%s10523_s15 + $0xce0] sm:$0xff] }
 0x10e   : > { %6723 = vmatpush1.bf16.msra.mxu0 %v8960_v1  ;;  %7051 = vmatpush1.bf16.msra.mxu1 %v8962_v35  ;;  %v9016_v1 = vcombine.low %v728_v21, %v732_v22  ;;  %v9018_v35 = vcombine.low %v729_v23, %v733_v24  ;;  %v784_v22 = vld [vmem:[%s10523_s15 + $0xd00] sm:$0xff]  ;;  %v785_v24 = vld [vmem:[%s10523_s15 + $0xd08] sm:$0xff] }
 0x10f   : > { %6724 = vmatprep.subr.bf16.mxu0 %v8969_v36  ;;  %7052 = vmatprep.subr.bf16.mxu1 %v8971_v37  ;;  %v9025_v36 = vcombine.high %v736_v30, %v740_v61  ;;  %v9027_v37 = vcombine.high %v737_v32, %v741_v33  ;;  %v788_v23 = vld [vmem:[%s10523_s15 + $0xd20] sm:$0xff] }
 0x112   : > { %6725 = vmatpush1.bf16.msra.mxu0 %v8968_v43  ;;  %7053 = vmatpush1.bf16.msra.mxu1 %v8970_v44  ;;  %v9024_v43 = vcombine.low %v736_v30, %v740_v61  ;;  %v9026_v44 = vcombine.low %v737_v32, %v741_v33  ;;  %v792_v61 = vld [vmem:[%s10523_s15 + $0xd40] sm:$0xff]  ;;  %v793_v33 = vld [vmem:[%s10523_s15 + $0xd48] sm:$0xff] }
 0x113   : > { %6726 = vmatprep.subr.bf16.mxu0 %v8977_v45  ;;  %7054 = vmatprep.subr.bf16.mxu1 %v8979_v47  ;;  %v9033_v45 = vcombine.high %v744_v38, %v748_v39  ;;  %v9035_v47 = vcombine.high %v745_v41, %v749_v42  ;;  %v796_v32 = vld [vmem:[%s10523_s15 + $0xd60] sm:$0xff] }
 0x116   : > { %6727 = vmatpush1.bf16.msra.mxu0 %v8976_v53  ;;  %7055 = vmatpush1.bf16.msra.mxu1 %v8978_v54  ;;  %v9032_v53 = vcombine.low %v744_v38, %v748_v39  ;;  %v9034_v54 = vcombine.low %v745_v41, %v749_v42  ;;  %v800_v39 = vld [vmem:[%s10523_s15 + $0xd80] sm:$0xff]  ;;  %v801_v42 = vld [vmem:[%s10523_s15 + $0xd88] sm:$0xff] }
 0x117   : > { %6728 = vmatprep.subr.bf16.mxu0 %v8985_v56  ;;  %7056 = vmatprep.subr.bf16.mxu1 %v8987_v57  ;;  %v9041_v56 = vcombine.high %v752_v48, %v756_v49  ;;  %v9043_v57 = vcombine.high %v753_v51, %v757_v52  ;;  %v804_v41 = vld [vmem:[%s10523_s15 + $0xda0] sm:$0xff] }
 0x11a   : > { %6729 = vmatpush1.bf16.msra.mxu0 %v8984_v63  ;;  %7057 = vmatpush1.bf16.msra.mxu1 %v8986_v0  ;;  %v765_v63 = vld [vmem:[%s10523_s15 + $0xc68] sm:$0xff]  ;;  %v9040_v0 = vcombine.low %v752_v48, %v756_v49  ;;  %v808_v49 = vld [vmem:[%s10523_s15 + $0xdc0] sm:$0xff] }
 0x11b   : > { %6730 = vmatprep.subr.bf16.mxu0 %v8993_v2  ;;  %7058 = vmatprep.subr.bf16.mxu1 %v8995_v3  ;;  %v9042_v2 = vcombine.low %v753_v51, %v757_v52  ;;  %v9049_v3 = vcombine.high %v760_v58, %v764_v59  ;;  %v9051_v4 = vcombine.high %v761_v62, %v765_v63  ;;  %v812_v51 = vld [vmem:[%s10523_s15 + $0xde0] sm:$0xff]  ;;  %v809_v52 = vld [vmem:[%s10523_s15 + $0xdc8] sm:$0xff] }
 0x11e   : > { %6731 = vmatpush1.bf16.msra.mxu0 %v8992_v8  ;;  %7059 = vmatpush1.bf16.msra.mxu1 %v8994_v9  ;;  %v773_v8 = vld [vmem:[%s10523_s15 + $0xca8] sm:$0xff]  ;;  %v9048_v9 = vcombine.low %v760_v58, %v764_v59  ;;  %v816_v59 = vld [vmem:[%s10523_s15 + $0xe00] sm:$0xff] }
 0x11f   : > { %6732 = vmatprep.subr.bf16.mxu0 %v9001_v10  ;;  %7060 = vmatprep.subr.bf16.mxu1 %v9003_v12  ;;  %v9050_v10 = vcombine.low %v761_v62, %v765_v63  ;;  %v9057_v12 = vcombine.high %v768_v5, %v772_v6  ;;  %v9059_v13 = vcombine.high %v769_v31, %v773_v8  ;;  %v820_v62 = vld [vmem:[%s10523_s15 + $0xe20] sm:$0xff]  ;;  %v817_v63 = vld [vmem:[%s10523_s15 + $0xe08] sm:$0xff] }
 0x122   : > { %6733 = vmatpush1.bf16.msra.mxu0 %v9000_v17  ;;  %7061 = vmatpush1.bf16.msra.mxu1 %v9002_v18  ;;  %v781_v17 = vld [vmem:[%s10523_s15 + $0xce8] sm:$0xff]  ;;  %v9056_v18 = vcombine.low %v768_v5, %v772_v6  ;;  %v824_v6 = vld [vmem:[%s10523_s15 + $0xe40] sm:$0xff] }
 0x123   : > { %6734 = vmatprep.subr.bf16.mxu0 %v9009_v19  ;;  %7062 = vmatprep.subr.bf16.mxu1 %v9011_v20  ;;  %v9058_v19 = vcombine.low %v769_v31, %v773_v8  ;;  %v9065_v20 = vcombine.high %v776_v14, %v780_v15  ;;  %v9067_v21 = vcombine.high %v777_v16, %v781_v17  ;;  %v828_v31 = vld [vmem:[%s10523_s15 + $0xe60] sm:$0xff]  ;;  %v825_v8 = vld [vmem:[%s10523_s15 + $0xe48] sm:$0xff] }
 0x126   : > { %6735 = vmatpush1.bf16.msra.mxu0 %v9008_v26  ;;  %7063 = vmatpush1.bf16.msra.mxu1 %v9010_v27  ;;  %v789_v26 = vld [vmem:[%s10523_s15 + $0xd28] sm:$0xff]  ;;  %v9064_v27 = vcombine.low %v776_v14, %v780_v15  ;;  %v832_v15 = vld [vmem:[%s10523_s15 + $0xe80] sm:$0xff] }
 0x127   : > { %6736 = vmatprep.subr.bf16.mxu0 %v9017_v28  ;;  %7064 = vmatprep.subr.bf16.mxu1 %v9019_v29  ;;  %v9066_v28 = vcombine.low %v777_v16, %v781_v17  ;;  %v9073_v29 = vcombine.high %v784_v22, %v788_v23  ;;  %v9075_v30 = vcombine.high %v785_v24, %v789_v26  ;;  %v836_v16 = vld [vmem:[%s10523_s15 + $0xea0] sm:$0xff]  ;;  %v833_v17 = vld [vmem:[%s10523_s15 + $0xe88] sm:$0xff] }
 0x12a   : > { %6737 = vmatpush1.bf16.msra.mxu0 %v9016_v1  ;;  %7065 = vmatpush1.bf16.msra.mxu1 %v9018_v35  ;;  %v797_v1 = vld [vmem:[%s10523_s15 + $0xd68] sm:$0xff]  ;;  %v9072_v35 = vcombine.low %v784_v22, %v788_v23  ;;  %v840_v23 = vld [vmem:[%s10523_s15 + $0xec0] sm:$0xff] }
 0x12b   : > { %6738 = vmatprep.subr.bf16.mxu0 %v9025_v36  ;;  %7066 = vmatprep.subr.bf16.mxu1 %v9027_v37  ;;  %v9074_v36 = vcombine.low %v785_v24, %v789_v26  ;;  %v9081_v37 = vcombine.high %v792_v61, %v796_v32  ;;  %v9083_v38 = vcombine.high %v793_v33, %v797_v1  ;;  %v844_v24 = vld [vmem:[%s10523_s15 + $0xee0] sm:$0xff]  ;;  %v841_v26 = vld [vmem:[%s10523_s15 + $0xec8] sm:$0xff] }
 0x12e   : > { %6739 = vmatpush1.bf16.msra.mxu0 %v9024_v43  ;;  %7067 = vmatpush1.bf16.msra.mxu1 %v9026_v44  ;;  %v805_v43 = vld [vmem:[%s10523_s15 + $0xda8] sm:$0xff]  ;;  %v9080_v44 = vcombine.low %v792_v61, %v796_v32  ;;  %v848_v32 = vld [vmem:[%s10523_s15 + $0xf00] sm:$0xff] }
 0x12f   : > { %6740 = vmatprep.subr.bf16.mxu0 %v9033_v45  ;;  %7068 = vmatprep.subr.bf16.mxu1 %v9035_v47  ;;  %v9082_v45 = vcombine.low %v793_v33, %v797_v1  ;;  %v9089_v47 = vcombine.high %v800_v39, %v804_v41  ;;  %v9091_v48 = vcombine.high %v801_v42, %v805_v43  ;;  %v852_v33 = vld [vmem:[%s10523_s15 + $0xf20] sm:$0xff]  ;;  %v849_v1 = vld [vmem:[%s10523_s15 + $0xf08] sm:$0xff] }
 0x132   : > { %6741 = vmatpush1.bf16.msra.mxu0 %v9032_v53  ;;  %7069 = vmatpush1.bf16.msra.mxu1 %v9034_v54  ;;  %v813_v53 = vld [vmem:[%s10523_s15 + $0xde8] sm:$0xff]  ;;  %v9088_v54 = vcombine.low %v800_v39, %v804_v41  ;;  %v856_v41 = vld [vmem:[%s10523_s15 + $0xf40] sm:$0xff] }
 0x133   : > { %6751 = vmatprep.subr.bf16.mxu0 %v9041_v56  ;;  %7079 = vmatprep.subr.bf16.mxu1 %v9043_v57  ;;  %v9090_v56 = vcombine.low %v801_v42, %v805_v43  ;;  %v9097_v57 = vcombine.high %v808_v49, %v812_v51  ;;  %v9099_v58 = vcombine.high %v809_v52, %v813_v53  ;;  %v860_v42 = vld [vmem:[%s10523_s15 + $0xf60] sm:$0xff]  ;;  %v857_v43 = vld [vmem:[%s10523_s15 + $0xf48] sm:$0xff] }
 0x135   : > { %6743 = vmatmul.mubr.bf16.vlgmr.msra.gmra.mrb[0].mxu0 %v10790_v60  ;;  %7071 = vmatmul.mubr.bf16.vlgmr.msra.gmra.mrb[0].mxu1 %v10790_v60 }
 0x136   : > { %6752 = vmatpush1.bf16.msra.mxu0 %v9040_v0  ;;  %7080 = vmatpush1.bf16.msra.mxu1 %v9042_v2  ;;  %v821_v0 = vld [vmem:[%s10523_s15 + $0xe28] sm:$0xff]  ;;  %v9096_v2 = vcombine.low %v808_v49, %v812_v51  ;;  %v864_v51 = vld [vmem:[%s10523_s15 + $0xf80] sm:$0xff] }
 0x137   : > { %6753 = vmatprep.subr.bf16.mxu0 %v9049_v3  ;;  %7081 = vmatprep.subr.bf16.mxu1 %v9051_v4  ;;  %v9098_v3 = vcombine.low %v809_v52, %v813_v53  ;;  %v9105_v4 = vcombine.high %v816_v59, %v820_v62  ;;  %v9107_v5 = vcombine.high %v817_v63, %v821_v0  ;;  %v868_v52 = vld [vmem:[%s10523_s15 + $0xfa0] sm:$0xff]  ;;  %v865_v53 = vld [vmem:[%s10523_s15 + $0xf88] sm:$0xff] }
 0x138   : > { %6783 = vmatprep.mubr.bf16.mxu0 %v10798_v7  ;;  %7111 = vmatprep.mubr.bf16.mxu1 %v10798_v7 }
 0x13a   : > { %6754 = vmatpush1.bf16.msra.mxu0 %v9048_v9  ;;  %7082 = vmatpush1.bf16.msra.mxu1 %v9050_v10  ;;  %v829_v9 = vld [vmem:[%s10523_s15 + $0xe68] sm:$0xff]  ;;  %v9104_v10 = vcombine.low %v816_v59, %v820_v62  ;;  %v872_v62 = vld [vmem:[%s10523_s15 + $0xfc0] sm:$0xff] }
 0x13b   : > { %6755 = vmatprep.subr.bf16.mxu0 %v9057_v12  ;;  %7083 = vmatprep.subr.bf16.mxu1 %v9059_v13  ;;  %v9106_v12 = vcombine.low %v817_v63, %v821_v0  ;;  %v9113_v13 = vcombine.high %v824_v6, %v828_v31  ;;  %v9115_v14 = vcombine.high %v825_v8, %v829_v9  ;;  %v876_v63 = vld [vmem:[%s10523_s15 + $0xfe0] sm:$0xff]  ;;  %v873_v0 = vld [vmem:[%s10523_s15 + $0xfc8] sm:$0xff] }
 0x13e   : > { %6756 = vmatpush1.bf16.msra.mxu0 %v9056_v18  ;;  %7084 = vmatpush1.bf16.msra.mxu1 %v9058_v19  ;;  %v837_v18 = vld [vmem:[%s10523_s15 + $0xea8] sm:$0xff]  ;;  %v9112_v19 = vcombine.low %v824_v6, %v828_v31  ;;  %v9161_v6 = vcombine.high %v872_v62, %v876_v63 }
 0x13f   : > { %6757 = vmatprep.subr.bf16.mxu0 %v9065_v20  ;;  %7085 = vmatprep.subr.bf16.mxu1 %v9067_v21  ;;  %v9114_v20 = vcombine.low %v825_v8, %v829_v9  ;;  %v9121_v21 = vcombine.high %v832_v15, %v836_v16  ;;  %v9123_v22 = vcombine.high %v833_v17, %v837_v18  ;;  %v880_v8 = vld [vmem:[%s10523_s15 + $0x1000] sm:$0xff] }
 0x140   : > { %v884_v9 = vld [vmem:[%s10523_s15 + $0x1020] sm:$0xff] }
 0x142   : > { %6758 = vmatpush1.bf16.msra.mxu0 %v9064_v27  ;;  %7086 = vmatpush1.bf16.msra.mxu1 %v9066_v28  ;;  %v845_v27 = vld [vmem:[%s10523_s15 + $0xee8] sm:$0xff]  ;;  %v9120_v28 = vcombine.low %v832_v15, %v836_v16  ;;  %v9169_v16 = vcombine.high %v880_v8, %v884_v9 }
 0x143   : > { %6759 = vmatprep.subr.bf16.mxu0 %v9073_v29  ;;  %7087 = vmatprep.subr.bf16.mxu1 %v9075_v30  ;;  %v9122_v29 = vcombine.low %v833_v17, %v837_v18  ;;  %v9129_v30 = vcombine.high %v840_v23, %v844_v24  ;;  %v9131_v61 = vcombine.high %v841_v26, %v845_v27  ;;  %v888_v18 = vld [vmem:[%s10523_s15 + $0x1040] sm:$0xff] }
 0x146   : > { %6760 = vmatpush1.bf16.msra.mxu0 %v9072_v35  ;;  %7088 = vmatpush1.bf16.msra.mxu1 %v9074_v36  ;;  %v853_v35 = vld [vmem:[%s10523_s15 + $0xf28] sm:$0xff]  ;;  %v9128_v36 = vcombine.low %v840_v23, %v844_v24  ;;  %v9168_v24 = vcombine.low %v880_v8, %v884_v9 }
 0x147   : > { %6761 = vmatprep.subr.bf16.mxu0 %v9081_v37  ;;  %7089 = vmatprep.subr.bf16.mxu1 %v9083_v38  ;;  %v9130_v37 = vcombine.low %v841_v26, %v845_v27  ;;  %v9137_v38 = vcombine.high %v848_v32, %v852_v33  ;;  %v9139_v39 = vcombine.high %v849_v1, %v853_v35  ;;  %v893_v23 = vld [vmem:[%s10523_s15 + $0x1068] sm:$0xff] }
 0x148   : > { %v929_v8 = vld [vmem:[%s10523_s15 + $0x1188] sm:$0xff] }
 0x149   : > { %v933_v9 = vld [vmem:[%s10523_s15 + $0x11a8] sm:$0xff] }
 0x14a   : > { %6762 = vmatpush1.bf16.msra.mxu0 %v9080_v44  ;;  %7090 = vmatpush1.bf16.msra.mxu1 %v9082_v45  ;;  %v861_v44 = vld [vmem:[%s10523_s15 + $0xf68] sm:$0xff]  ;;  %v9136_v45 = vcombine.low %v848_v32, %v852_v33 }
 0x14b   : > { %6763 = vmatprep.subr.bf16.mxu0 %v9089_v47  ;;  %7091 = vmatprep.subr.bf16.mxu1 %v9091_v48  ;;  %v9138_v47 = vcombine.low %v849_v1, %v853_v35  ;;  %v9145_v48 = vcombine.high %v856_v41, %v860_v42  ;;  %v9147_v49 = vcombine.high %v857_v43, %v861_v44  ;;  %v897_v32 = vld [vmem:[%s10523_s15 + $0x1088] sm:$0xff] }
 0x14c   : > { %v901_v33 = vld [vmem:[%s10523_s15 + $0x10a8] sm:$0xff] }
 0x14e   : > { %6764 = vmatpush1.bf16.msra.mxu0 %v9088_v54  ;;  %7092 = vmatpush1.bf16.msra.mxu1 %v9090_v56  ;;  %v869_v54 = vld [vmem:[%s10523_s15 + $0xfa8] sm:$0xff]  ;;  %v9144_v56 = vcombine.low %v856_v41, %v860_v42 }
 0x14f   : > { %6765 = vmatprep.subr.bf16.mxu0 %v9097_v57  ;;  %7093 = vmatprep.subr.bf16.mxu1 %v9099_v58  ;;  %v9146_v57 = vcombine.low %v857_v43, %v861_v44  ;;  %v9153_v58 = vcombine.high %v864_v51, %v868_v52  ;;  %v9155_v59 = vcombine.high %v865_v53, %v869_v54  ;;  %v905_v41 = vld [vmem:[%s10523_s15 + $0x10c8] sm:$0xff] }
 0x150   : > { %v909_v42 = vld [vmem:[%s10523_s15 + $0x10e8] sm:$0xff]  ;;  %v9186_v44 = vcombine.low %v897_v32, %v901_v33 }
 0x152   : > { %6766 = vmatpush1.bf16.msra.mxu0 %v9096_v2  ;;  %7094 = vmatpush1.bf16.msra.mxu1 %v9098_v3  ;;  %v877_v2 = vld [vmem:[%s10523_s15 + $0xfe8] sm:$0xff]  ;;  %v10859_v3 = vld [vmem:[%s10537_s12 + $0x8] sm:$0xff] }
 0x153   : > { %6767 = vmatprep.subr.bf16.mxu0 %v9105_v4  ;;  %7095 = vmatprep.subr.bf16.mxu1 %v9107_v5  ;;  %v9152_v4 = vcombine.low %v864_v51, %v868_v52  ;;  %v9154_v5 = vcombine.low %v865_v53, %v869_v54  ;;  %v9163_v31 = vcombine.high %v873_v0, %v877_v2  ;;  %v913_v51 = vld [vmem:[%s10523_s15 + $0x1108] sm:$0xff] }
 0x154   : > { %v9162_v15 = vcombine.low %v873_v0, %v877_v2  ;;  %v917_v52 = vld [vmem:[%s10523_s15 + $0x1128] sm:$0xff]  ;;  %v9194_v54 = vcombine.low %v905_v41, %v909_v42 }
 0x155   : > { %v9202_v2 = vcombine.low %v913_v51, %v917_v52 }
 0x156   : > { %6768 = vmatpush1.bf16.msra.mxu0 %v9104_v10  ;;  %7096 = vmatpush1.bf16.msra.mxu1 %v9106_v12  ;;  %v10865_v10 = vrot.slane %v10859_v3, %v10570_v55  ;;  %v881_v12 = vld [vmem:[%s10523_s15 + $0x1008] sm:$0xff] }
 0x157   : > { %6769 = vmatprep.subr.bf16.mxu0 %v9113_v13  ;;  %7097 = vmatprep.subr.bf16.mxu1 %v9115_v14  ;;  %v885_v13 = vld [vmem:[%s10523_s15 + $0x1028] sm:$0xff]  ;;  %v9160_v14 = vcombine.low %v872_v62, %v876_v63 }
 0x158   : > { %v9171_v17 = vcombine.high %v881_v12, %v885_v13  ;;  %v9170_v26 = vcombine.low %v881_v12, %v885_v13  ;;  %v921_v62 = vld [vmem:[%s10523_s15 + $0x1148] sm:$0xff] }
 0x159   : > { %v925_v63 = vld [vmem:[%s10523_s15 + $0x1168] sm:$0xff] }
 0x15a   : > { %6770 = vmatpush1.bf16.msra.mxu0 %v9112_v19  ;;  %7098 = vmatpush1.bf16.msra.mxu1 %v9114_v20  ;;  %v892_v19 = vld [vmem:[%s10523_s15 + $0x1060] sm:$0xff]  ;;  %v1458_v20 = vcombine.high %v10865_v10, %v10865_v10  ;;  %v9210_v13 = vcombine.low %v921_v62, %v925_v63 }
 0x15b   : > { %6771 = vmatprep.subr.bf16.mxu0 %v9121_v21  ;;  %7099 = vmatprep.subr.bf16.mxu1 %v9123_v22  ;;  %v10875_v21 = vcombine.high %v10790_v60, %v10790_v60  ;;  %v889_v22 = vld [vmem:[%s10523_s15 + $0x1048] sm:$0xff]  ;;  %v9177_v27 = vcombine.high %v888_v18, %v892_v19  ;;  %v9176_v1 = vcombine.low %v888_v18, %v892_v19 }
 0x15c   : > { %v9178_v35 = vcombine.low %v889_v22, %v893_v23  ;;  %v937_v18 = vld [vmem:[%s10523_s15 + $0x11c8] sm:$0xff] }
 0x15d   : > { %v941_v19 = vld [vmem:[%s10523_s15 + $0x11e8] sm:$0xff] }
 0x15e   : > { %6772 = vmatpush1.bf16.msra.mxu0 %v9120_v28  ;;  %7100 = vmatpush1.bf16.msra.mxu1 %v9122_v29  ;;  %v9179_v28 = vcombine.high %v889_v22, %v893_v23  ;;  %v896_v29 = vld [vmem:[%s10523_s15 + $0x1080] sm:$0xff]  ;;  %v9218_v22 = vcombine.low %v929_v8, %v933_v9 }
 0x15f   : > { %6773 = vmatprep.subr.bf16.mxu0 %v9129_v30  ;;  %7101 = vmatprep.subr.bf16.mxu1 %v9131_v61  ;;  %v900_v30 = vld [vmem:[%s10523_s15 + $0x10a0] sm:$0xff]  ;;  %v10882_v61 = vrot.slane %v1458_v20, %v10570_v55 }
 0x160   : > { %v9184_v43 = vcombine.low %v896_v29, %v900_v30 }
 0x162   : > { %6774 = vmatpush1.bf16.msra.mxu0 %v9128_v36  ;;  %7102 = vmatpush1.bf16.msra.mxu1 %v9130_v37  ;;  %v9185_v36 = vcombine.high %v896_v29, %v900_v30  ;;  %v9187_v37 = vcombine.high %v897_v32, %v901_v33  ;;  %v949_v29 = vld [vmem:[%s10523_s15 + $0x1228] sm:$0xff]  ;;  %v9226_v32 = vcombine.low %v937_v18, %v941_v19 }
 0x163   : > { %6775 = vmatprep.subr.bf16.mxu0 %v9137_v38  ;;  %7103 = vmatprep.subr.bf16.mxu1 %v9139_v39  ;;  %v904_v38 = vld [vmem:[%s10523_s15 + $0x10c0] sm:$0xff] }
 0x164   : > { %v908_v39 = vld [vmem:[%s10523_s15 + $0x10e0] sm:$0xff] }
 0x165   : > { %v9192_v53 = vcombine.low %v904_v38, %v908_v39 }
 0x166   : > { %6776 = vmatpush1.bf16.msra.mxu0 %v9136_v45  ;;  %7104 = vmatpush1.bf16.msra.mxu1 %v9138_v47  ;;  %v9193_v45 = vcombine.high %v904_v38, %v908_v39  ;;  %v9195_v47 = vcombine.high %v905_v41, %v909_v42  ;;  %v957_v38 = vld [vmem:[%s10523_s15 + $0x1268] sm:$0xff] }
 0x167   : > { %6777 = vmatprep.subr.bf16.mxu0 %v9145_v48  ;;  %7105 = vmatprep.subr.bf16.mxu1 %v9147_v49  ;;  %v912_v48 = vld [vmem:[%s10523_s15 + $0x1100] sm:$0xff] }
 0x168   : > { %v916_v49 = vld [vmem:[%s10523_s15 + $0x1120] sm:$0xff] }
 0x169   : > { %v9200_v0 = vcombine.low %v912_v48, %v916_v49 }
 0x16a   : > { %6778 = vmatpush1.bf16.msra.mxu0 %v9144_v56  ;;  %7106 = vmatpush1.bf16.msra.mxu1 %v9146_v57  ;;  %v9201_v56 = vcombine.high %v912_v48, %v916_v49  ;;  %v9203_v57 = vcombine.high %v913_v51, %v917_v52  ;;  %v965_v48 = vld [vmem:[%s10523_s15 + $0x12a8] sm:$0xff] }
 0x16b   : > { %6779 = vmatprep.subr.bf16.mxu0 %v9153_v58  ;;  %7107 = vmatprep.subr.bf16.mxu1 %v9155_v59  ;;  %v920_v58 = vld [vmem:[%s10523_s15 + $0x1140] sm:$0xff] }
 0x16c   : > { %v924_v59 = vld [vmem:[%s10523_s15 + $0x1160] sm:$0xff] }
 0x16d   : > { %v9208_v12 = vcombine.low %v920_v58, %v924_v59 }
 0x16e   : > { %6780 = vmatpush1.bf16.msra.mxu0 %v9152_v4  ;;  %7108 = vmatpush1.bf16.msra.mxu1 %v9154_v5  ;;  %v9209_v4 = vcombine.high %v920_v58, %v924_v59  ;;  %v9211_v5 = vcombine.high %v921_v62, %v925_v63  ;;  %v973_v58 = vld [vmem:[%s10523_s15 + $0x12e8] sm:$0xff] }
 0x16f   : > { %6781 = vmatprep.subr.bf16.mxu0 %v9161_v6  ;;  %7109 = vmatprep.subr.bf16.mxu1 %v9163_v31  ;;  %v928_v6 = vld [vmem:[%s10523_s15 + $0x1180] sm:$0xff] }
 0x170   : > { %v932_v31 = vld [vmem:[%s10523_s15 + $0x11a0] sm:$0xff] }
 0x171   : > { %v9216_v20 = vcombine.low %v928_v6, %v932_v31 }
 0x172   : > { %6782 = vmatpush1.bf16.msra.mxu0 %v9160_v14  ;;  %7110 = vmatpush1.bf16.msra.mxu1 %v9162_v15  ;;  %v9217_v14 = vcombine.high %v928_v6, %v932_v31  ;;  %v9219_v15 = vcombine.high %v929_v8, %v933_v9  ;;  %v981_v6 = vld [vmem:[%s10523_s15 + $0x1328] sm:$0xff] }
 0x173   : > { %6792 = vmatprep.subr.bf16.mxu0 %v9169_v16  ;;  %7120 = vmatprep.subr.bf16.mxu1 %v9171_v17  ;;  %v936_v16 = vld [vmem:[%s10523_s15 + $0x11c0] sm:$0xff] }
 0x174   : > { %v940_v17 = vld [vmem:[%s10523_s15 + $0x11e0] sm:$0xff] }
 0x175   : > { %6784 = vmatmul.mubr.bf16.vlgmr.msra.gmra.mrb[0].mxu0 %v10875_v21  ;;  %7112 = vmatmul.mubr.bf16.vlgmr.msra.gmra.mrb[0].mxu1 %v10875_v21  ;;  %v9225_v23 = vcombine.high %v936_v16, %v940_v17  ;;  %v9224_v30 = vcombine.low %v936_v16, %v940_v17  ;;  %v989_v16 = vld [vmem:[%s10523_s15 + $0x1368] sm:$0xff] }
 0x176   : > { %6793 = vmatpush1.bf16.msra.mxu0 %v9168_v24  ;;  %7121 = vmatpush1.bf16.msra.mxu1 %v9170_v26  ;;  %v9227_v24 = vcombine.high %v937_v18, %v941_v19  ;;  %v944_v26 = vld [vmem:[%s10523_s15 + $0x1200] sm:$0xff] }
 0x177   : > { %6794 = vmatprep.subr.bf16.mxu0 %v9177_v27  ;;  %7122 = vmatprep.subr.bf16.mxu1 %v9179_v28  ;;  %v948_v27 = vld [vmem:[%s10523_s15 + $0x1220] sm:$0xff]  ;;  %v945_v28 = vld [vmem:[%s10523_s15 + $0x1208] sm:$0xff] }
 0x178   : > { %6824 = vmatprep.mubr.bf16.mxu0 %v10882_v61  ;;  %7152 = vmatprep.mubr.bf16.mxu1 %v10882_v61  ;;  %v9233_v33 = vcombine.high %v944_v26, %v948_v27  ;;  %v9232_v39 = vcombine.low %v944_v26, %v948_v27  ;;  %v9234_v41 = vcombine.low %v945_v28, %v949_v29  ;;  %v997_v26 = vld [vmem:[%s10523_s15 + $0x13a8] sm:$0xff] }
 0x17a   : > { %6795 = vmatpush1.bf16.msra.mxu0 %v9176_v1  ;;  %7123 = vmatpush1.bf16.msra.mxu1 %v9178_v35  ;;  %v9235_v1 = vcombine.high %v945_v28, %v949_v29  ;;  %v952_v35 = vld [vmem:[%s10523_s15 + $0x1240] sm:$0xff] }
 0x17b   : > { %6796 = vmatprep.subr.bf16.mxu0 %v9185_v36  ;;  %7124 = vmatprep.subr.bf16.mxu1 %v9187_v37  ;;  %v956_v36 = vld [vmem:[%s10523_s15 + $0x1260] sm:$0xff]  ;;  %v953_v37 = vld [vmem:[%s10523_s15 + $0x1248] sm:$0xff] }
 0x17c   : > { %v9241_v42 = vcombine.high %v952_v35, %v956_v36  ;;  %v9240_v49 = vcombine.low %v952_v35, %v956_v36  ;;  %v9242_v51 = vcombine.low %v953_v37, %v957_v38  ;;  %v1005_v35 = vld [vmem:[%s10523_s15 + $0x13e8] sm:$0xff] }
 0x17e   : > { %6797 = vmatpush1.bf16.msra.mxu0 %v9184_v43  ;;  %7125 = vmatpush1.bf16.msra.mxu1 %v9186_v44  ;;  %v9243_v43 = vcombine.high %v953_v37, %v957_v38  ;;  %v960_v44 = vld [vmem:[%s10523_s15 + $0x1280] sm:$0xff] }
 0x17f   : > { %6798 = vmatprep.subr.bf16.mxu0 %v9193_v45  ;;  %7126 = vmatprep.subr.bf16.mxu1 %v9195_v47  ;;  %v964_v45 = vld [vmem:[%s10523_s15 + $0x12a0] sm:$0xff]  ;;  %v961_v47 = vld [vmem:[%s10523_s15 + $0x1288] sm:$0xff] }
 0x180   : > { %v9249_v52 = vcombine.high %v960_v44, %v964_v45  ;;  %v9248_v59 = vcombine.low %v960_v44, %v964_v45  ;;  %v9250_v62 = vcombine.low %v961_v47, %v965_v48  ;;  %v1013_v44 = vld [vmem:[%s10523_s15 + $0x1428] sm:$0xff] }
 0x182   : > { %6799 = vmatpush1.bf16.msra.mxu0 %v9192_v53  ;;  %7127 = vmatpush1.bf16.msra.mxu1 %v9194_v54  ;;  %v9251_v53 = vcombine.high %v961_v47, %v965_v48  ;;  %v968_v54 = vld [vmem:[%s10523_s15 + $0x12c0] sm:$0xff] }
 0x183   : > { %6800 = vmatprep.subr.bf16.mxu0 %v9201_v56  ;;  %7128 = vmatprep.subr.bf16.mxu1 %v9203_v57  ;;  %v972_v56 = vld [vmem:[%s10523_s15 + $0x12e0] sm:$0xff]  ;;  %v969_v57 = vld [vmem:[%s10523_s15 + $0x12c8] sm:$0xff] }
 0x184   : > { %v9257_v63 = vcombine.high %v968_v54, %v972_v56  ;;  %v9256_v31 = vcombine.low %v968_v54, %v972_v56  ;;  %v9258_v8 = vcombine.low %v969_v57, %v973_v58  ;;  %v1017_v54 = vld [vmem:[%s10523_s15 + $0x1448] sm:$0xff] }
 0x185   : > { %v1021_v56 = vld [vmem:[%s10523_s15 + $0x1468] sm:$0xff] }
 0x186   : > { %6801 = vmatpush1.bf16.msra.mxu0 %v9200_v0  ;;  %7129 = vmatpush1.bf16.msra.mxu1 %v9202_v2  ;;  %v9259_v0 = vcombine.high %v969_v57, %v973_v58  ;;  %v976_v2 = vld [vmem:[%s10523_s15 + $0x1300] sm:$0xff] }
 0x187   : > { %6802 = vmatprep.subr.bf16.mxu0 %v9209_v4  ;;  %7130 = vmatprep.subr.bf16.mxu1 %v9211_v5  ;;  %v980_v4 = vld [vmem:[%s10523_s15 + $0x1320] sm:$0xff]  ;;  %v977_v5 = vld [vmem:[%s10523_s15 + $0x1308] sm:$0xff] }
 0x188   : > { %v9265_v9 = vcombine.high %v976_v2, %v980_v4  ;;  %v9264_v17 = vcombine.low %v976_v2, %v980_v4  ;;  %v9266_v18 = vcombine.low %v977_v5, %v981_v6  ;;  %v10958_v2 = vcombine.high %v10882_v61, %v10882_v61  ;;  %v1029_v4 = vld [vmem:[%s10523_s15 + $0x14a8] sm:$0xff] }
 0x18a   : > { %6803 = vmatpush1.bf16.msra.mxu0 %v9208_v12  ;;  %7131 = vmatpush1.bf16.msra.mxu1 %v9210_v13  ;;  %v9267_v12 = vcombine.high %v977_v5, %v981_v6  ;;  %v984_v13 = vld [vmem:[%s10523_s15 + $0x1340] sm:$0xff]  ;;  %v9306_v6 = vcombine.low %v1017_v54, %v1021_v56 }
 0x18b   : > { %6804 = vmatprep.subr.bf16.mxu0 %v9217_v14  ;;  %7132 = vmatprep.subr.bf16.mxu1 %v9219_v15  ;;  %v988_v14 = vld [vmem:[%s10523_s15 + $0x1360] sm:$0xff]  ;;  %v985_v15 = vld [vmem:[%s10523_s15 + $0x1348] sm:$0xff] }
 0x18c   : > { %v9273_v19 = vcombine.high %v984_v13, %v988_v14  ;;  %v9272_v27 = vcombine.low %v984_v13, %v988_v14  ;;  %v9274_v28 = vcombine.low %v985_v15, %v989_v16  ;;  %v1033_v13 = vld [vmem:[%s10523_s15 + $0x14c8] sm:$0xff] }
 0x18d   : > { %v1037_v14 = vld [vmem:[%s10523_s15 + $0x14e8] sm:$0xff] }
 0x18e   : > { %6805 = vmatpush1.bf16.msra.mxu0 %v9216_v20  ;;  %7133 = vmatpush1.bf16.msra.mxu1 %v9218_v22  ;;  %v9275_v20 = vcombine.high %v985_v15, %v989_v16  ;;  %v992_v22 = vld [vmem:[%s10523_s15 + $0x1380] sm:$0xff] }
 0x18f   : > { %6806 = vmatprep.subr.bf16.mxu0 %v9225_v23  ;;  %7134 = vmatprep.subr.bf16.mxu1 %v9227_v24  ;;  %v996_v23 = vld [vmem:[%s10523_s15 + $0x13a0] sm:$0xff]  ;;  %v993_v24 = vld [vmem:[%s10523_s15 + $0x1388] sm:$0xff] }
 0x190   : > { %v9281_v29 = vcombine.high %v992_v22, %v996_v23  ;;  %v9280_v36 = vcombine.low %v992_v22, %v996_v23  ;;  %v9282_v37 = vcombine.low %v993_v24, %v997_v26  ;;  %v1041_v22 = vld [vmem:[%s10523_s15 + $0x1508] sm:$0xff] }
 0x191   : > { %v1045_v23 = vld [vmem:[%s10523_s15 + $0x1528] sm:$0xff] }
 0x192   : > { %6807 = vmatpush1.bf16.msra.mxu0 %v9224_v30  ;;  %7135 = vmatpush1.bf16.msra.mxu1 %v9226_v32  ;;  %v9283_v30 = vcombine.high %v993_v24, %v997_v26  ;;  %v1000_v32 = vld [vmem:[%s10523_s15 + $0x13c0] sm:$0xff]  ;;  %v9322_v26 = vcombine.low %v1033_v13, %v1037_v14 }
 0x193   : > { %6808 = vmatprep.subr.bf16.mxu0 %v9233_v33  ;;  %7136 = vmatprep.subr.bf16.mxu1 %v9235_v1  ;;  %v1004_v33 = vld [vmem:[%s10523_s15 + $0x13e0] sm:$0xff]  ;;  %v1001_v1 = vld [vmem:[%s10523_s15 + $0x13c8] sm:$0xff] }
 0x194   : > { %v9289_v38 = vcombine.high %v1000_v32, %v1004_v33  ;;  %v9288_v45 = vcombine.low %v1000_v32, %v1004_v33  ;;  %v9290_v47 = vcombine.low %v1001_v1, %v1005_v35  ;;  %v1049_v32 = vld [vmem:[%s10523_s15 + $0x1548] sm:$0xff] }
 0x195   : > { %v1053_v33 = vld [vmem:[%s10523_s15 + $0x1568] sm:$0xff] }
 0x196   : > { %6809 = vmatpush1.bf16.msra.mxu0 %v9232_v39  ;;  %7137 = vmatpush1.bf16.msra.mxu1 %v9234_v41  ;;  %v9291_v39 = vcombine.high %v1001_v1, %v1005_v35  ;;  %v1008_v41 = vld [vmem:[%s10523_s15 + $0x1400] sm:$0xff]  ;;  %v9330_v35 = vcombine.low %v1041_v22, %v1045_v23 }
 0x197   : > { %6810 = vmatprep.subr.bf16.mxu0 %v9241_v42  ;;  %7138 = vmatprep.subr.bf16.mxu1 %v9243_v43  ;;  %v1012_v42 = vld [vmem:[%s10523_s15 + $0x1420] sm:$0xff]  ;;  %v1009_v43 = vld [vmem:[%s10523_s15 + $0x1408] sm:$0xff] }
 0x198   : > { %v9297_v48 = vcombine.high %v1008_v41, %v1012_v42  ;;  %v9296_v57 = vcombine.low %v1008_v41, %v1012_v42  ;;  %v9298_v58 = vcombine.low %v1009_v43, %v1013_v44  ;;  %v1057_v41 = vld [vmem:[%s10523_s15 + $0x1588] sm:$0xff] }
 0x199   : > { %v1061_v42 = vld [vmem:[%s10523_s15 + $0x15a8] sm:$0xff] }
 0x19a   : > { %6811 = vmatpush1.bf16.msra.mxu0 %v9240_v49  ;;  %7139 = vmatpush1.bf16.msra.mxu1 %v9242_v51  ;;  %v9299_v49 = vcombine.high %v1009_v43, %v1013_v44  ;;  %v1016_v51 = vld [vmem:[%s10523_s15 + $0x1440] sm:$0xff]  ;;  %v9338_v44 = vcombine.low %v1049_v32, %v1053_v33 }
 0x19b   : > { %6812 = vmatprep.subr.bf16.mxu0 %v9249_v52  ;;  %7140 = vmatprep.subr.bf16.mxu1 %v9251_v53  ;;  %v1020_v52 = vld [vmem:[%s10523_s15 + $0x1460] sm:$0xff]  ;;  %v10950_v53 = vrot.slane %v10865_v10, %v10570_v55  ;;  %v1025_v10 = vld [vmem:[%s10523_s15 + $0x1488] sm:$0xff] }
 0x19c   : > { %v9304_v5 = vcombine.low %v1016_v51, %v1020_v52  ;;  %v9314_v16 = vcombine.low %v1025_v10, %v1029_v4 }
 0x19e   : > { %6813 = vmatpush1.bf16.msra.mxu0 %v9248_v59  ;;  %7141 = vmatpush1.bf16.msra.mxu1 %v9250_v62  ;;  %v9305_v59 = vcombine.high %v1016_v51, %v1020_v52  ;;  %v9307_v62 = vcombine.high %v1017_v54, %v1021_v56  ;;  %v1065_v51 = vld [vmem:[%s10523_s15 + $0x15c8] sm:$0xff]  ;;  %v9346_v56 = vcombine.low %v1057_v41, %v1061_v42 }
 0x19f   : > { %6814 = vmatprep.subr.bf16.mxu0 %v9257_v63  ;;  %7142 = vmatprep.subr.bf16.mxu1 %v9259_v0  ;;  %v1024_v63 = vld [vmem:[%s10523_s15 + $0x1480] sm:$0xff]  ;;  %v1069_v52 = vld [vmem:[%s10523_s15 + $0x15e8] sm:$0xff] }
 0x1a0   : > { %v1028_v0 = vld [vmem:[%s10523_s15 + $0x14a0] sm:$0xff] }
 0x1a1   : > { %v9312_v15 = vcombine.low %v1024_v63, %v1028_v0 }
 0x1a2   : > { %6815 = vmatpush1.bf16.msra.mxu0 %v9256_v31  ;;  %7143 = vmatpush1.bf16.msra.mxu1 %v9258_v8  ;;  %v9313_v31 = vcombine.high %v1024_v63, %v1028_v0  ;;  %v9315_v8 = vcombine.high %v1025_v10, %v1029_v4  ;;  %v1073_v63 = vld [vmem:[%s10523_s15 + $0x1608] sm:$0xff]  ;;  %v9354_v4 = vcombine.low %v1065_v51, %v1069_v52 }
 0x1a3   : > { %6816 = vmatprep.subr.bf16.mxu0 %v9265_v9  ;;  %7144 = vmatprep.subr.bf16.mxu1 %v9267_v12  ;;  %v1032_v9 = vld [vmem:[%s10523_s15 + $0x14c0] sm:$0xff]  ;;  %v1077_v0 = vld [vmem:[%s10523_s15 + $0x1628] sm:$0xff] }
 0x1a4   : > { %v1036_v12 = vld [vmem:[%s10523_s15 + $0x14e0] sm:$0xff] }
 0x1a5   : > { %v9320_v24 = vcombine.low %v1032_v9, %v1036_v12 }
 0x1a6   : > { %6817 = vmatpush1.bf16.msra.mxu0 %v9264_v17  ;;  %7145 = vmatpush1.bf16.msra.mxu1 %v9266_v18  ;;  %v9321_v17 = vcombine.high %v1032_v9, %v1036_v12  ;;  %v9323_v18 = vcombine.high %v1033_v13, %v1037_v14  ;;  %v1081_v9 = vld [vmem:[%s10523_s15 + $0x1648] sm:$0xff]  ;;  %v9362_v14 = vcombine.low %v1073_v63, %v1077_v0 }
 0x1a7   : > { %6818 = vmatprep.subr.bf16.mxu0 %v9273_v19  ;;  %7146 = vmatprep.subr.bf16.mxu1 %v9275_v20  ;;  %v1040_v19 = vld [vmem:[%s10523_s15 + $0x1500] sm:$0xff]  ;;  %v1085_v12 = vld [vmem:[%s10523_s15 + $0x1668] sm:$0xff] }
 0x1a8   : > { %v1044_v20 = vld [vmem:[%s10523_s15 + $0x1520] sm:$0xff] }
 0x1a9   : > { %v9328_v1 = vcombine.low %v1040_v19, %v1044_v20 }
 0x1aa   : > { %6819 = vmatpush1.bf16.msra.mxu0 %v9272_v27  ;;  %7147 = vmatpush1.bf16.msra.mxu1 %v9274_v28  ;;  %v9329_v27 = vcombine.high %v1040_v19, %v1044_v20  ;;  %v9331_v28 = vcombine.high %v1041_v22, %v1045_v23  ;;  %v1089_v19 = vld [vmem:[%s10523_s15 + $0x1688] sm:$0xff]  ;;  %v9370_v23 = vcombine.low %v1081_v9, %v1085_v12 }
 0x1ab   : > { %6820 = vmatprep.subr.bf16.mxu0 %v9281_v29  ;;  %7148 = vmatprep.subr.bf16.mxu1 %v9283_v30  ;;  %v1048_v29 = vld [vmem:[%s10523_s15 + $0x1540] sm:$0xff]  ;;  %v1093_v20 = vld [vmem:[%s10523_s15 + $0x16a8] sm:$0xff] }
 0x1ac   : > { %v1052_v30 = vld [vmem:[%s10523_s15 + $0x1560] sm:$0xff] }
 0x1ad   : > { %v9336_v43 = vcombine.low %v1048_v29, %v1052_v30 }
 0x1ae   : > { %6821 = vmatpush1.bf16.msra.mxu0 %v9280_v36  ;;  %7149 = vmatpush1.bf16.msra.mxu1 %v9282_v37  ;;  %v9337_v36 = vcombine.high %v1048_v29, %v1052_v30  ;;  %v9339_v37 = vcombine.high %v1049_v32, %v1053_v33  ;;  %v1097_v29 = vld [vmem:[%s10523_s15 + $0x16c8] sm:$0xff]  ;;  %v9378_v33 = vcombine.low %v1089_v19, %v1093_v20 }
 0x1af   : > { %6822 = vmatprep.subr.bf16.mxu0 %v9289_v38  ;;  %7150 = vmatprep.subr.bf16.mxu1 %v9291_v39  ;;  %v1056_v38 = vld [vmem:[%s10523_s15 + $0x1580] sm:$0xff]  ;;  %v1101_v30 = vld [vmem:[%s10523_s15 + $0x16e8] sm:$0xff] }
 0x1b0   : > { %v1060_v39 = vld [vmem:[%s10523_s15 + $0x15a0] sm:$0xff] }
 0x1b1   : > { %v9344_v54 = vcombine.low %v1056_v38, %v1060_v39 }
 0x1b2   : > { %6823 = vmatpush1.bf16.msra.mxu0 %v9288_v45  ;;  %7151 = vmatpush1.bf16.msra.mxu1 %v9290_v47  ;;  %v9345_v45 = vcombine.high %v1056_v38, %v1060_v39  ;;  %v9347_v47 = vcombine.high %v1057_v41, %v1061_v42  ;;  %v1105_v38 = vld [vmem:[%s10523_s15 + $0x1708] sm:$0xff]  ;;  %v9386_v42 = vcombine.low %v1097_v29, %v1101_v30 }
 0x1b3   : > { %6833 = vmatprep.subr.bf16.mxu0 %v9297_v48  ;;  %7161 = vmatprep.subr.bf16.mxu1 %v9299_v49  ;;  %v1064_v48 = vld [vmem:[%s10523_s15 + $0x15c0] sm:$0xff]  ;;  %v1109_v39 = vld [vmem:[%s10523_s15 + $0x1728] sm:$0xff] }
 0x1b4   : > { %v1068_v49 = vld [vmem:[%s10523_s15 + $0x15e0] sm:$0xff] }
 0x1b5   : > { %6825 = vmatmul.mubr.bf16.vlgmr.msra.gmra.mrb[0].mxu0 %v10950_v53  ;;  %7153 = vmatmul.mubr.bf16.vlgmr.msra.gmra.mrb[0].mxu1 %v10950_v53  ;;  %v9352_v10 = vcombine.low %v1064_v48, %v1068_v49 }
 0x1b6   : > { %6834 = vmatpush1.bf16.msra.mxu0 %v9296_v57  ;;  %7162 = vmatpush1.bf16.msra.mxu1 %v9298_v58  ;;  %v9353_v57 = vcombine.high %v1064_v48, %v1068_v49  ;;  %v9355_v58 = vcombine.high %v1065_v51, %v1069_v52  ;;  %v1113_v48 = vld [vmem:[%s10523_s15 + $0x1748] sm:$0xff]  ;;  %v9394_v52 = vcombine.low %v1105_v38, %v1109_v39 }
 0x1b7   : > { %6835 = vmatprep.subr.bf16.mxu0 %v9305_v59  ;;  %7163 = vmatprep.subr.bf16.mxu1 %v9307_v62  ;;  %v1072_v59 = vld [vmem:[%s10523_s15 + $0x1600] sm:$0xff]  ;;  %v1117_v49 = vld [vmem:[%s10523_s15 + $0x1768] sm:$0xff] }
 0x1b8   : > { %6865 = vmatprep.mubr.bf16.mxu0 %v10958_v2  ;;  %7193 = vmatprep.mubr.bf16.mxu1 %v10958_v2  ;;  %v1076_v62 = vld [vmem:[%s10523_s15 + $0x1620] sm:$0xff] }
 0x1b9   : > { %v9360_v13 = vcombine.low %v1072_v59, %v1076_v62 }
 0x1ba   : > { %6836 = vmatpush1.bf16.msra.mxu0 %v9304_v5  ;;  %7164 = vmatpush1.bf16.msra.mxu1 %v9306_v6  ;;  %v9361_v5 = vcombine.high %v1072_v59, %v1076_v62  ;;  %v9363_v6 = vcombine.high %v1073_v63, %v1077_v0  ;;  %v1121_v59 = vld [vmem:[%s10523_s15 + $0x1788] sm:$0xff]  ;;  %v9402_v0 = vcombine.low %v1113_v48, %v1117_v49 }
 0x1bb   : > { %6837 = vmatprep.subr.bf16.mxu0 %v9313_v31  ;;  %7165 = vmatprep.subr.bf16.mxu1 %v9315_v8  ;;  %v1080_v31 = vld [vmem:[%s10523_s15 + $0x1640] sm:$0xff]  ;;  %v1125_v62 = vld [vmem:[%s10523_s15 + $0x17a8] sm:$0xff] }
 0x1bc   : > { %v1084_v8 = vld [vmem:[%s10523_s15 + $0x1660] sm:$0xff] }
 0x1bd   : > { %v9368_v22 = vcombine.low %v1080_v31, %v1084_v8 }
 0x1be   : > { %6838 = vmatpush1.bf16.msra.mxu0 %v9312_v15  ;;  %7166 = vmatpush1.bf16.msra.mxu1 %v9314_v16  ;;  %v9369_v15 = vcombine.high %v1080_v31, %v1084_v8  ;;  %v9371_v16 = vcombine.high %v1081_v9, %v1085_v12  ;;  %v1443_v31 = vcombine.high %v10859_v3, %v10859_v3  ;;  %v1129_v8 = vld [vmem:[%s10523_s15 + $0x17c8] sm:$0xff] }
 0x1bf   : > { %6839 = vmatprep.subr.bf16.mxu0 %v9321_v17  ;;  %7167 = vmatprep.subr.bf16.mxu1 %v9323_v18  ;;  %v1088_v17 = vld [vmem:[%s10523_s15 + $0x1680] sm:$0xff]  ;;  %v1133_v9 = vld [vmem:[%s10523_s15 + $0x17e8] sm:$0xff] }
 0x1c0   : > { %v1092_v18 = vld [vmem:[%s10523_s15 + $0x16a0] sm:$0xff]  ;;  %v1137_v3 = vld [vmem:[%s10523_s15 + $0x1808] sm:$0xff] }
 0x1c1   : > { %v9376_v32 = vcombine.low %v1088_v17, %v1092_v18 }
 0x1c2   : > { %6840 = vmatpush1.bf16.msra.mxu0 %v9320_v24  ;;  %7168 = vmatpush1.bf16.msra.mxu1 %v9322_v26  ;;  %v9377_v24 = vcombine.high %v1088_v17, %v1092_v18  ;;  %v9379_v26 = vcombine.high %v1089_v19, %v1093_v20  ;;  %v1140_v17 = vld [vmem:[%s10523_s15 + $0x1820] sm:$0xff]  ;;  %v11023_v18 = vrot.slane %v1443_v31, %v10570_v55  ;;  %v1141_v19 = vld [vmem:[%s10523_s15 + $0x1828] sm:$0xff] }
 0x1c3   : > { %6841 = vmatprep.subr.bf16.mxu0 %v9329_v27  ;;  %7169 = vmatprep.subr.bf16.mxu1 %v9331_v28  ;;  %v1096_v27 = vld [vmem:[%s10523_s15 + $0x16c0] sm:$0xff] }
 0x1c4   : > { %v1100_v28 = vld [vmem:[%s10523_s15 + $0x16e0] sm:$0xff] }
 0x1c5   : > { %v9384_v41 = vcombine.low %v1096_v27, %v1100_v28  ;;  %v1176_v31 = vld [vmem:[%s10523_s15 + $0x1940] sm:$0xff] }
 0x1c6   : > { %6842 = vmatpush1.bf16.msra.mxu0 %v9328_v1  ;;  %7170 = vmatpush1.bf16.msra.mxu1 %v9330_v35  ;;  %v9385_v1 = vcombine.high %v1096_v27, %v1100_v28  ;;  %v9387_v35 = vcombine.high %v1097_v29, %v1101_v30  ;;  %v1148_v27 = vld [vmem:[%s10523_s15 + $0x1860] sm:$0xff]  ;;  %v1459_v28 = vcombine.high %v11023_v18, %v11023_v18  ;;  %v1145_v30 = vld [vmem:[%s10523_s15 + $0x1848] sm:$0xff] }
 0x1c7   : > { %6843 = vmatprep.subr.bf16.mxu0 %v9337_v36  ;;  %7171 = vmatprep.subr.bf16.mxu1 %v9339_v37  ;;  %v1104_v36 = vld [vmem:[%s10523_s15 + $0x1700] sm:$0xff]  ;;  %v11033_v29 = vcombine.high %v10950_v53, %v10950_v53 }
 0x1c8   : > { %v1108_v37 = vld [vmem:[%s10523_s15 + $0x1720] sm:$0xff] }
 0x1c9   : > { %v9392_v51 = vcombine.low %v1104_v36, %v1108_v37 }
 0x1ca   : > { %6844 = vmatpush1.bf16.msra.mxu0 %v9336_v43  ;;  %7172 = vmatpush1.bf16.msra.mxu1 %v9338_v44  ;;  %v9393_v43 = vcombine.high %v1104_v36, %v1108_v37  ;;  %v9395_v44 = vcombine.high %v1105_v38, %v1109_v39  ;;  %v1152_v37 = vld [vmem:[%s10523_s15 + $0x1880] sm:$0xff]  ;;  %v11040_v39 = vrot.slane %v1459_v28, %v10570_v55 }
 0x1cb   : > { %6845 = vmatprep.subr.bf16.mxu0 %v9345_v45  ;;  %7173 = vmatprep.subr.bf16.mxu1 %v9347_v47  ;;  %v1112_v45 = vld [vmem:[%s10523_s15 + $0x1740] sm:$0xff] }
 0x1cc   : > { %v1116_v47 = vld [vmem:[%s10523_s15 + $0x1760] sm:$0xff] }
 0x1cd   : > { %v9400_v63 = vcombine.low %v1112_v45, %v1116_v47  ;;  %v1156_v38 = vld [vmem:[%s10523_s15 + $0x18a0] sm:$0xff] }
 0x1ce   : > { %6846 = vmatpush1.bf16.msra.mxu0 %v9344_v54  ;;  %7174 = vmatpush1.bf16.msra.mxu1 %v9346_v56  ;;  %v9401_v54 = vcombine.high %v1112_v45, %v1116_v47  ;;  %v9403_v56 = vcombine.high %v1113_v48, %v1117_v49  ;;  %v9441_v45 = vcombine.high %v1152_v37, %v1156_v38  ;;  %v1160_v48 = vld [vmem:[%s10523_s15 + $0x18c0] sm:$0xff] }
 0x1cf   : > { %6847 = vmatprep.subr.bf16.mxu0 %v9353_v57  ;;  %7175 = vmatprep.subr.bf16.mxu1 %v9355_v58  ;;  %v1120_v57 = vld [vmem:[%s10523_s15 + $0x1780] sm:$0xff] }
 0x1d0   : > { %v1124_v58 = vld [vmem:[%s10523_s15 + $0x17a0] sm:$0xff] }
 0x1d1   : > { %v9408_v12 = vcombine.low %v1120_v57, %v1124_v58  ;;  %v1164_v49 = vld [vmem:[%s10523_s15 + $0x18e0] sm:$0xff] }
 0x1d2   : > { %6848 = vmatpush1.bf16.msra.mxu0 %v9352_v10  ;;  %7176 = vmatpush1.bf16.msra.mxu1 %v9354_v4  ;;  %v9409_v10 = vcombine.high %v1120_v57, %v1124_v58  ;;  %v9411_v4 = vcombine.high %v1121_v59, %v1125_v62  ;;  %v9449_v57 = vcombine.high %v1160_v48, %v1164_v49  ;;  %v1196_v28 = vld [vmem:[%s10523_s15 + $0x19e0] sm:$0xff] }
 0x1d3   : > { %6849 = vmatprep.subr.bf16.mxu0 %v9361_v5  ;;  %7177 = vmatprep.subr.bf16.mxu1 %v9363_v6  ;;  %v1128_v5 = vld [vmem:[%s10523_s15 + $0x17c0] sm:$0xff] }
 0x1d4   : > { %v1132_v6 = vld [vmem:[%s10523_s15 + $0x17e0] sm:$0xff] }
 0x1d5   : > { %v9416_v20 = vcombine.low %v1128_v5, %v1132_v6 }
 0x1d6   : > { %6850 = vmatpush1.bf16.msra.mxu0 %v9360_v13  ;;  %7178 = vmatpush1.bf16.msra.mxu1 %v9362_v14  ;;  %v9410_v13 = vcombine.low %v1121_v59, %v1125_v62  ;;  %v9417_v14 = vcombine.high %v1128_v5, %v1132_v6  ;;  %v1168_v59 = vld [vmem:[%s10523_s15 + $0x1900] sm:$0xff] }
 0x1d7   : > { %6851 = vmatprep.subr.bf16.mxu0 %v9369_v15  ;;  %7179 = vmatprep.subr.bf16.mxu1 %v9371_v16  ;;  %v9419_v15 = vcombine.high %v1129_v8, %v1133_v9  ;;  %v1136_v16 = vld [vmem:[%s10523_s15 + $0x1800] sm:$0xff] }
 0x1d8   : > { %v1172_v62 = vld [vmem:[%s10523_s15 + $0x1920] sm:$0xff] }
 0x1d9   : > { %v9457_v5 = vcombine.high %v1168_v59, %v1172_v62 }
 0x1da   : > { %6852 = vmatpush1.bf16.msra.mxu0 %v9368_v22  ;;  %7180 = vmatpush1.bf16.msra.mxu1 %v9370_v23  ;;  %v9418_v22 = vcombine.low %v1129_v8, %v1133_v9  ;;  %v9425_v23 = vcombine.high %v1136_v16, %v1140_v17  ;;  %v1180_v8 = vld [vmem:[%s10523_s15 + $0x1960] sm:$0xff]  ;;  %v1177_v9 = vld [vmem:[%s10523_s15 + $0x1948] sm:$0xff] }
 0x1db   : > { %6853 = vmatprep.subr.bf16.mxu0 %v9377_v24  ;;  %7181 = vmatprep.subr.bf16.mxu1 %v9379_v26  ;;  %v9427_v24 = vcombine.high %v1137_v3, %v1141_v19  ;;  %v1144_v26 = vld [vmem:[%s10523_s15 + $0x1840] sm:$0xff] }
 0x1de   : > { %6854 = vmatpush1.bf16.msra.mxu0 %v9376_v32  ;;  %7182 = vmatpush1.bf16.msra.mxu1 %v9378_v33  ;;  %v1149_v32 = vld [vmem:[%s10523_s15 + $0x1868] sm:$0xff]  ;;  %v9424_v33 = vcombine.low %v1136_v16, %v1140_v17  ;;  %v1184_v17 = vld [vmem:[%s10523_s15 + $0x1980] sm:$0xff] }
 0x1df   : > { %6855 = vmatprep.subr.bf16.mxu0 %v9385_v1  ;;  %7183 = vmatprep.subr.bf16.mxu1 %v9387_v35  ;;  %v9426_v1 = vcombine.low %v1137_v3, %v1141_v19  ;;  %v9433_v35 = vcombine.high %v1144_v26, %v1148_v27  ;;  %v9435_v36 = vcombine.high %v1145_v30, %v1149_v32  ;;  %v1188_v3 = vld [vmem:[%s10523_s15 + $0x19a0] sm:$0xff]  ;;  %v1185_v19 = vld [vmem:[%s10523_s15 + $0x1988] sm:$0xff] }
 0x1e2   : > { %6856 = vmatpush1.bf16.msra.mxu0 %v9384_v41  ;;  %7184 = vmatpush1.bf16.msra.mxu1 %v9386_v42  ;;  %v1153_v41 = vld [vmem:[%s10523_s15 + $0x1888] sm:$0xff] }
 0x1e3   : > { %6857 = vmatprep.subr.bf16.mxu0 %v9393_v43  ;;  %7185 = vmatprep.subr.bf16.mxu1 %v9395_v44  ;;  %v1157_v42 = vld [vmem:[%s10523_s15 + $0x18a8] sm:$0xff]  ;;  %v9432_v43 = vcombine.low %v1144_v26, %v1148_v27  ;;  %v9434_v44 = vcombine.low %v1145_v30, %v1149_v32  ;;  %v1192_v27 = vld [vmem:[%s10523_s15 + $0x19c0] sm:$0xff] }
 0x1e4   : > { %v9443_v47 = vcombine.high %v1153_v41, %v1157_v42  ;;  %v1193_v30 = vld [vmem:[%s10523_s15 + $0x19c8] sm:$0xff] }
 0x1e5   : > { %v1197_v32 = vld [vmem:[%s10523_s15 + $0x19e8] sm:$0xff] }
 0x1e6   : > { %6858 = vmatpush1.bf16.msra.mxu0 %v9392_v51  ;;  %7186 = vmatpush1.bf16.msra.mxu1 %v9394_v52  ;;  %v1161_v51 = vld [vmem:[%s10523_s15 + $0x18c8] sm:$0xff] }
 0x1e7   : > { %6859 = vmatprep.subr.bf16.mxu0 %v9401_v54  ;;  %7187 = vmatprep.subr.bf16.mxu1 %v9403_v56  ;;  %v1165_v52 = vld [vmem:[%s10523_s15 + $0x18e8] sm:$0xff]  ;;  %v9440_v54 = vcombine.low %v1152_v37, %v1156_v38  ;;  %v9442_v56 = vcombine.low %v1153_v41, %v1157_v42  ;;  %v1200_v37 = vld [vmem:[%s10523_s15 + $0x1a00] sm:$0xff] }
 0x1e8   : > { %v9451_v58 = vcombine.high %v1161_v51, %v1165_v52  ;;  %v1204_v38 = vld [vmem:[%s10523_s15 + $0x1a20] sm:$0xff]  ;;  %v1201_v41 = vld [vmem:[%s10523_s15 + $0x1a08] sm:$0xff] }
 0x1e9   : > { %v1205_v42 = vld [vmem:[%s10523_s15 + $0x1a28] sm:$0xff] }
 0x1ea   : > { %6860 = vmatpush1.bf16.msra.mxu0 %v9400_v63  ;;  %7188 = vmatpush1.bf16.msra.mxu1 %v9402_v0  ;;  %v1169_v63 = vld [vmem:[%s10523_s15 + $0x1908] sm:$0xff] }
 0x1eb   : > { %6861 = vmatprep.subr.bf16.mxu0 %v9409_v10  ;;  %7189 = vmatprep.subr.bf16.mxu1 %v9411_v4  ;;  %v1173_v0 = vld [vmem:[%s10523_s15 + $0x1928] sm:$0xff]  ;;  %v9448_v10 = vcombine.low %v1160_v48, %v1164_v49  ;;  %v9450_v4 = vcombine.low %v1161_v51, %v1165_v52  ;;  %v1208_v48 = vld [vmem:[%s10523_s15 + $0x1a40] sm:$0xff] }
 0x1ec   : > { %v9459_v6 = vcombine.high %v1169_v63, %v1173_v0  ;;  %v1212_v49 = vld [vmem:[%s10523_s15 + $0x1a60] sm:$0xff]  ;;  %v1209_v51 = vld [vmem:[%s10523_s15 + $0x1a48] sm:$0xff] }
 0x1ed   : > { %v1213_v52 = vld [vmem:[%s10523_s15 + $0x1a68] sm:$0xff] }
 0x1ee   : > { %6862 = vmatpush1.bf16.msra.mxu0 %v9408_v12  ;;  %7190 = vmatpush1.bf16.msra.mxu1 %v9410_v13  ;;  %v1181_v12 = vld [vmem:[%s10523_s15 + $0x1968] sm:$0xff]  ;;  %v9456_v13 = vcombine.low %v1168_v59, %v1172_v62  ;;  %v1216_v59 = vld [vmem:[%s10523_s15 + $0x1a80] sm:$0xff] }
 0x1ef   : > { %6863 = vmatprep.subr.bf16.mxu0 %v9417_v14  ;;  %7191 = vmatprep.subr.bf16.mxu1 %v9419_v15  ;;  %v9458_v14 = vcombine.low %v1169_v63, %v1173_v0  ;;  %v9465_v15 = vcombine.high %v1176_v31, %v1180_v8  ;;  %v9467_v16 = vcombine.high %v1177_v9, %v1181_v12  ;;  %v1220_v62 = vld [vmem:[%s10523_s15 + $0x1aa0] sm:$0xff]  ;;  %v1217_v63 = vld [vmem:[%s10523_s15 + $0x1a88] sm:$0xff] }
 0x1f0   : > { %v1221_v0 = vld [vmem:[%s10523_s15 + $0x1aa8] sm:$0xff] }
 0x1f2   : > { %6864 = vmatpush1.bf16.msra.mxu0 %v9416_v20  ;;  %7192 = vmatpush1.bf16.msra.mxu1 %v9418_v22  ;;  %v1189_v20 = vld [vmem:[%s10523_s15 + $0x19a8] sm:$0xff]  ;;  %v9464_v22 = vcombine.low %v1176_v31, %v1180_v8  ;;  %v1224_v31 = vld [vmem:[%s10523_s15 + $0x1ac0] sm:$0xff] }
 0x1f3   : > { %6874 = vmatprep.subr.bf16.mxu0 %v9425_v23  ;;  %7202 = vmatprep.subr.bf16.mxu1 %v9427_v24  ;;  %v9466_v23 = vcombine.low %v1177_v9, %v1181_v12  ;;  %v9473_v24 = vcombine.high %v1184_v17, %v1188_v3  ;;  %v9475_v26 = vcombine.high %v1185_v19, %v1189_v20  ;;  %v1228_v8 = vld [vmem:[%s10523_s15 + $0x1ae0] sm:$0xff]  ;;  %v1225_v9 = vld [vmem:[%s10523_s15 + $0x1ac8] sm:$0xff] }
 0x1f4   : > { %v1229_v12 = vld [vmem:[%s10523_s15 + $0x1ae8] sm:$0xff] }
 0x1f5   : > { %6866 = vmatmul.mubr.bf16.vlgmr.msra.gmra.mrb[0].mxu0 %v11033_v29  ;;  %7194 = vmatmul.mubr.bf16.vlgmr.msra.gmra.mrb[0].mxu1 %v11033_v29 }
 0x1f6   : > { %6875 = vmatpush1.bf16.msra.mxu0 %v9424_v33  ;;  %7203 = vmatpush1.bf16.msra.mxu1 %v9426_v1  ;;  %v9472_v33 = vcombine.low %v1184_v17, %v1188_v3  ;;  %v9474_v1 = vcombine.low %v1185_v19, %v1189_v20  ;;  %v1232_v17 = vld [vmem:[%s10523_s15 + $0x1b00] sm:$0xff]  ;;  %v1233_v19 = vld [vmem:[%s10523_s15 + $0x1b08] sm:$0xff] }
 0x1f7   : > { %6876 = vmatprep.subr.bf16.mxu0 %v9433_v35  ;;  %7204 = vmatprep.subr.bf16.mxu1 %v9435_v36  ;;  %v9481_v35 = vcombine.high %v1192_v27, %v1196_v28  ;;  %v9483_v36 = vcombine.high %v1193_v30, %v1197_v32  ;;  %v1236_v3 = vld [vmem:[%s10523_s15 + $0x1b20] sm:$0xff]  ;;  %v1237_v20 = vld [vmem:[%s10523_s15 + $0x1b28] sm:$0xff] }
 0x1f8   : > { %6906 = vmatprep.mubr.bf16.mxu0 %v11040_v39  ;;  %7234 = vmatprep.mubr.bf16.mxu1 %v11040_v39 }
 0x1fa   : > { %6877 = vmatpush1.bf16.msra.mxu0 %v9432_v43  ;;  %7205 = vmatpush1.bf16.msra.mxu1 %v9434_v44  ;;  %v9480_v43 = vcombine.low %v1192_v27, %v1196_v28  ;;  %v9482_v44 = vcombine.low %v1193_v30, %v1197_v32  ;;  %v1240_v27 = vld [vmem:[%s10523_s15 + $0x1b40] sm:$0xff]  ;;  %v1241_v30 = vld [vmem:[%s10523_s15 + $0x1b48] sm:$0xff] }
 0x1fb   : > { %6878 = vmatprep.subr.bf16.mxu0 %v9441_v45  ;;  %7206 = vmatprep.subr.bf16.mxu1 %v9443_v47  ;;  %v9489_v45 = vcombine.high %v1200_v37, %v1204_v38  ;;  %v9491_v47 = vcombine.high %v1201_v41, %v1205_v42  ;;  %v1244_v28 = vld [vmem:[%s10523_s15 + $0x1b60] sm:$0xff]  ;;  %v1245_v32 = vld [vmem:[%s10523_s15 + $0x1b68] sm:$0xff] }
 0x1fe   : > { %6879 = vmatpush1.bf16.msra.mxu0 %v9440_v54  ;;  %7207 = vmatpush1.bf16.msra.mxu1 %v9442_v56  ;;  %v9488_v54 = vcombine.low %v1200_v37, %v1204_v38  ;;  %v9490_v56 = vcombine.low %v1201_v41, %v1205_v42  ;;  %v1248_v37 = vld [vmem:[%s10523_s15 + $0x1b80] sm:$0xff]  ;;  %v1249_v41 = vld [vmem:[%s10523_s15 + $0x1b88] sm:$0xff] }
 0x1ff   : > { %6880 = vmatprep.subr.bf16.mxu0 %v9449_v57  ;;  %7208 = vmatprep.subr.bf16.mxu1 %v9451_v58  ;;  %v9497_v57 = vcombine.high %v1208_v48, %v1212_v49  ;;  %v9499_v58 = vcombine.high %v1209_v51, %v1213_v52  ;;  %v1252_v38 = vld [vmem:[%s10523_s15 + $0x1ba0] sm:$0xff]  ;;  %v1253_v42 = vld [vmem:[%s10523_s15 + $0x1ba8] sm:$0xff] }
 0x202   : > { %6881 = vmatpush1.bf16.msra.mxu0 %v9448_v10  ;;  %7209 = vmatpush1.bf16.msra.mxu1 %v9450_v4  ;;  %v9496_v10 = vcombine.low %v1208_v48, %v1212_v49  ;;  %v9498_v4 = vcombine.low %v1209_v51, %v1213_v52  ;;  %v1256_v48 = vld [vmem:[%s10523_s15 + $0x1bc0] sm:$0xff]  ;;  %v1257_v51 = vld [vmem:[%s10523_s15 + $0x1bc8] sm:$0xff] }
 0x203   : > { %6882 = vmatprep.subr.bf16.mxu0 %v9457_v5  ;;  %7210 = vmatprep.subr.bf16.mxu1 %v9459_v6  ;;  %v9505_v5 = vcombine.high %v1216_v59, %v1220_v62  ;;  %v9507_v6 = vcombine.high %v1217_v63, %v1221_v0  ;;  %v1260_v49 = vld [vmem:[%s10523_s15 + $0x1be0] sm:$0xff]  ;;  %v1261_v52 = vld [vmem:[%s10523_s15 + $0x1be8] sm:$0xff] }
 0x206   : > { %6883 = vmatpush1.bf16.msra.mxu0 %v9456_v13  ;;  %7211 = vmatpush1.bf16.msra.mxu1 %v9458_v14  ;;  %v9504_v13 = vcombine.low %v1216_v59, %v1220_v62  ;;  %v9506_v14 = vcombine.low %v1217_v63, %v1221_v0  ;;  %v1264_v59 = vld [vmem:[%s10523_s15 + $0x1c00] sm:$0xff]  ;;  %v1265_v63 = vld [vmem:[%s10523_s15 + $0x1c08] sm:$0xff] }
 0x207   : > { %6884 = vmatprep.subr.bf16.mxu0 %v9465_v15  ;;  %7212 = vmatprep.subr.bf16.mxu1 %v9467_v16  ;;  %v9513_v15 = vcombine.high %v1224_v31, %v1228_v8  ;;  %v9515_v16 = vcombine.high %v1225_v9, %v1229_v12  ;;  %v1268_v62 = vld [vmem:[%s10523_s15 + $0x1c20] sm:$0xff]  ;;  %v1269_v0 = vld [vmem:[%s10523_s15 + $0x1c28] sm:$0xff] }
 0x20a   : > { %6885 = vmatpush1.bf16.msra.mxu0 %v9464_v22  ;;  %7213 = vmatpush1.bf16.msra.mxu1 %v9466_v23  ;;  %v9512_v22 = vcombine.low %v1224_v31, %v1228_v8  ;;  %v9514_v23 = vcombine.low %v1225_v9, %v1229_v12  ;;  %v1272_v31 = vld [vmem:[%s10523_s15 + $0x1c40] sm:$0xff]  ;;  %v11108_v9 = vrot.slane %v11023_v18, %v10570_v55  ;;  %v1273_v12 = vld [vmem:[%s10523_s15 + $0x1c48] sm:$0xff] }
 0x20b   : > { %6886 = vmatprep.subr.bf16.mxu0 %v9473_v24  ;;  %7214 = vmatprep.subr.bf16.mxu1 %v9475_v26  ;;  %v9521_v24 = vcombine.high %v1232_v17, %v1236_v3  ;;  %v9523_v26 = vcombine.high %v1233_v19, %v1237_v20  ;;  %v1276_v8 = vld [vmem:[%s10523_s15 + $0x1c60] sm:$0xff]  ;;  %v1281_v55 = vld [vmem:[%s10523_s15 + $0x1c88] sm:$0xff] }
 0x20c   : > { %v1285_v18 = vld [vmem:[%s10523_s15 + $0x1ca8] sm:$0xff] }
 0x20e   : > { %6887 = vmatpush1.bf16.msra.mxu0 %v9472_v33  ;;  %7215 = vmatpush1.bf16.msra.mxu1 %v9474_v1  ;;  %v9520_v33 = vcombine.low %v1232_v17, %v1236_v3  ;;  %v9522_v1 = vcombine.low %v1233_v19, %v1237_v20  ;;  %v1280_v3 = vld [vmem:[%s10523_s15 + $0x1c80] sm:$0xff]  ;;  %v11116_v20 = vcombine.high %v11040_v39, %v11040_v39 }
 0x20f   : > { %6888 = vmatprep.subr.bf16.mxu0 %v9481_v35  ;;  %7216 = vmatprep.subr.bf16.mxu1 %v9483_v36  ;;  %v9529_v35 = vcombine.high %v1240_v27, %v1244_v28  ;;  %v9531_v36 = vcombine.high %v1241_v30, %v1245_v32  ;;  %v1284_v19 = vld [vmem:[%s10523_s15 + $0x1ca0] sm:$0xff] }
 0x212   : > { %6889 = vmatpush1.bf16.msra.mxu0 %v9480_v43  ;;  %7217 = vmatpush1.bf16.msra.mxu1 %v9482_v44  ;;  %v9528_v43 = vcombine.low %v1240_v27, %v1244_v28  ;;  %v9530_v44 = vcombine.low %v1241_v30, %v1245_v32  ;;  %v1288_v27 = vld [vmem:[%s10523_s15 + $0x1cc0] sm:$0xff]  ;;  %v1289_v30 = vld [vmem:[%s10523_s15 + $0x1cc8] sm:$0xff] }
 0x213   : > { %6890 = vmatprep.subr.bf16.mxu0 %v9489_v45  ;;  %7218 = vmatprep.subr.bf16.mxu1 %v9491_v47  ;;  %v9537_v45 = vcombine.high %v1248_v37, %v1252_v38  ;;  %v9539_v47 = vcombine.high %v1249_v41, %v1253_v42  ;;  %v1292_v28 = vld [vmem:[%s10523_s15 + $0x1ce0] sm:$0xff]  ;;  %v1293_v32 = vld [vmem:[%s10523_s15 + $0x1ce8] sm:$0xff] }
 0x216   : > { %6891 = vmatpush1.bf16.msra.mxu0 %v9488_v54  ;;  %7219 = vmatpush1.bf16.msra.mxu1 %v9490_v56  ;;  %v9536_v54 = vcombine.low %v1248_v37, %v1252_v38  ;;  %v9538_v56 = vcombine.low %v1249_v41, %v1253_v42  ;;  %v1296_v37 = vld [vmem:[%s10523_s15 + $0x1d00] sm:$0xff]  ;;  %v1297_v41 = vld [vmem:[%s10523_s15 + $0x1d08] sm:$0xff] }
 0x217   : > { %6892 = vmatprep.subr.bf16.mxu0 %v9497_v57  ;;  %7220 = vmatprep.subr.bf16.mxu1 %v9499_v58  ;;  %v9545_v57 = vcombine.high %v1256_v48, %v1260_v49  ;;  %v9547_v58 = vcombine.high %v1257_v51, %v1261_v52  ;;  %v1300_v38 = vld [vmem:[%s10523_s15 + $0x1d20] sm:$0xff]  ;;  %v1301_v42 = vld [vmem:[%s10523_s15 + $0x1d28] sm:$0xff] }
 0x21a   : > { %6893 = vmatpush1.bf16.msra.mxu0 %v9496_v10  ;;  %7221 = vmatpush1.bf16.msra.mxu1 %v9498_v4  ;;  %v9544_v10 = vcombine.low %v1256_v48, %v1260_v49  ;;  %v9546_v4 = vcombine.low %v1257_v51, %v1261_v52  ;;  %v1304_v48 = vld [vmem:[%s10523_s15 + $0x1d40] sm:$0xff]  ;;  %v1305_v51 = vld [vmem:[%s10523_s15 + $0x1d48] sm:$0xff] }
 0x21b   : > { %6894 = vmatprep.subr.bf16.mxu0 %v9505_v5  ;;  %7222 = vmatprep.subr.bf16.mxu1 %v9507_v6  ;;  %v9553_v5 = vcombine.high %v1264_v59, %v1268_v62  ;;  %v9555_v6 = vcombine.high %v1265_v63, %v1269_v0  ;;  %v1308_v49 = vld [vmem:[%s10523_s15 + $0x1d60] sm:$0xff]  ;;  %v1309_v52 = vld [vmem:[%s10523_s15 + $0x1d68] sm:$0xff] }
 0x21e   : > { %6895 = vmatpush1.bf16.msra.mxu0 %v9504_v13  ;;  %7223 = vmatpush1.bf16.msra.mxu1 %v9506_v14  ;;  %v1277_v13 = vld [vmem:[%s10523_s15 + $0x1c68] sm:$0xff]  ;;  %v9552_v14 = vcombine.low %v1264_v59, %v1268_v62  ;;  %v1312_v59 = vld [vmem:[%s10523_s15 + $0x1d80] sm:$0xff] }
 0x21f   : > { %6896 = vmatprep.subr.bf16.mxu0 %v9513_v15  ;;  %7224 = vmatprep.subr.bf16.mxu1 %v9515_v16  ;;  %v9554_v15 = vcombine.low %v1265_v63, %v1269_v0  ;;  %v9561_v16 = vcombine.high %v1272_v31, %v1276_v8  ;;  %v9563_v17 = vcombine.high %v1273_v12, %v1277_v13  ;;  %v1316_v62 = vld [vmem:[%s10523_s15 + $0x1da0] sm:$0xff]  ;;  %v1313_v63 = vld [vmem:[%s10523_s15 + $0x1d88] sm:$0xff] }
 0x220   : > { %v1317_v0 = vld [vmem:[%s10523_s15 + $0x1da8] sm:$0xff] }
 0x222   : > { %6897 = vmatpush1.bf16.msra.mxu0 %v9512_v22  ;;  %7225 = vmatpush1.bf16.msra.mxu1 %v9514_v23  ;;  %v9560_v22 = vcombine.low %v1272_v31, %v1276_v8  ;;  %v9562_v23 = vcombine.low %v1273_v12, %v1277_v13  ;;  %v1320_v31 = vld [vmem:[%s10523_s15 + $0x1dc0] sm:$0xff]  ;;  %v1321_v12 = vld [vmem:[%s10523_s15 + $0x1dc8] sm:$0xff] }
 0x223   : > { %6898 = vmatprep.subr.bf16.mxu0 %v9521_v24  ;;  %7226 = vmatprep.subr.bf16.mxu1 %v9523_v26  ;;  %v9569_v24 = vcombine.high %v1280_v3, %v1284_v19  ;;  %v9571_v26 = vcombine.high %v1281_v55, %v1285_v18  ;;  %v1324_v8 = vld [vmem:[%s10523_s15 + $0x1de0] sm:$0xff]  ;;  %v1325_v13 = vld [vmem:[%s10523_s15 + $0x1de8] sm:$0xff] }
 0x226   : > { %6899 = vmatpush1.bf16.msra.mxu0 %v9520_v33  ;;  %7227 = vmatpush1.bf16.msra.mxu1 %v9522_v1  ;;  %v9568_v33 = vcombine.low %v1280_v3, %v1284_v19  ;;  %v9570_v1 = vcombine.low %v1281_v55, %v1285_v18  ;;  %v1328_v3 = vld [vmem:[%s10523_s15 + $0x1e00] sm:$0xff]  ;;  %v1329_v55 = vld [vmem:[%s10523_s15 + $0x1e08] sm:$0xff] }
 0x227   : > { %6900 = vmatprep.subr.bf16.mxu0 %v9529_v35  ;;  %7228 = vmatprep.subr.bf16.mxu1 %v9531_v36  ;;  %v9577_v35 = vcombine.high %v1288_v27, %v1292_v28  ;;  %v9579_v36 = vcombine.high %v1289_v30, %v1293_v32  ;;  %v1332_v19 = vld [vmem:[%s10523_s15 + $0x1e20] sm:$0xff]  ;;  %v1333_v18 = vld [vmem:[%s10523_s15 + $0x1e28] sm:$0xff] }
 0x22a   : > { %6901 = vmatpush1.bf16.msra.mxu0 %v9528_v43  ;;  %7229 = vmatpush1.bf16.msra.mxu1 %v9530_v44  ;;  %v9576_v43 = vcombine.low %v1288_v27, %v1292_v28  ;;  %v9578_v44 = vcombine.low %v1289_v30, %v1293_v32  ;;  %v1336_v27 = vld [vmem:[%s10523_s15 + $0x1e40] sm:$0xff]  ;;  %v1337_v30 = vld [vmem:[%s10523_s15 + $0x1e48] sm:$0xff] }
 0x22b   : > { %6902 = vmatprep.subr.bf16.mxu0 %v9537_v45  ;;  %7230 = vmatprep.subr.bf16.mxu1 %v9539_v47  ;;  %v9585_v45 = vcombine.high %v1296_v37, %v1300_v38  ;;  %v9587_v47 = vcombine.high %v1297_v41, %v1301_v42  ;;  %v1340_v28 = vld [vmem:[%s10523_s15 + $0x1e60] sm:$0xff]  ;;  %v1341_v32 = vld [vmem:[%s10523_s15 + $0x1e68] sm:$0xff] }
 0x22e   : > { %6903 = vmatpush1.bf16.msra.mxu0 %v9536_v54  ;;  %7231 = vmatpush1.bf16.msra.mxu1 %v9538_v56  ;;  %v9584_v54 = vcombine.low %v1296_v37, %v1300_v38  ;;  %v9586_v56 = vcombine.low %v1297_v41, %v1301_v42  ;;  %v1344_v37 = vld [vmem:[%s10523_s15 + $0x1e80] sm:$0xff]  ;;  %v1345_v41 = vld [vmem:[%s10523_s15 + $0x1e88] sm:$0xff] }
 0x22f   : > { %6904 = vmatprep.subr.bf16.mxu0 %v9545_v57  ;;  %7232 = vmatprep.subr.bf16.mxu1 %v9547_v58  ;;  %v9593_v57 = vcombine.high %v1304_v48, %v1308_v49  ;;  %v9595_v58 = vcombine.high %v1305_v51, %v1309_v52  ;;  %v1348_v38 = vld [vmem:[%s10523_s15 + $0x1ea0] sm:$0xff]  ;;  %v1349_v42 = vld [vmem:[%s10523_s15 + $0x1ea8] sm:$0xff] }
 0x232   : > { %6905 = vmatpush1.bf16.msra.mxu0 %v9544_v10  ;;  %7233 = vmatpush1.bf16.msra.mxu1 %v9546_v4  ;;  %v9592_v10 = vcombine.low %v1304_v48, %v1308_v49  ;;  %v9594_v4 = vcombine.low %v1305_v51, %v1309_v52  ;;  %v1352_v48 = vld [vmem:[%s10523_s15 + $0x1ec0] sm:$0xff]  ;;  %v1353_v51 = vld [vmem:[%s10523_s15 + $0x1ec8] sm:$0xff] }
 0x233   : > { %6915 = vmatprep.subr.bf16.mxu0 %v9553_v5  ;;  %7243 = vmatprep.subr.bf16.mxu1 %v9555_v6  ;;  %v9601_v5 = vcombine.high %v1312_v59, %v1316_v62  ;;  %v9603_v6 = vcombine.high %v1313_v63, %v1317_v0  ;;  %v1356_v49 = vld [vmem:[%s10523_s15 + $0x1ee0] sm:$0xff]  ;;  %v1357_v52 = vld [vmem:[%s10523_s15 + $0x1ee8] sm:$0xff] }
 0x235   : > { %6907 = vmatmul.mubr.bf16.vlgmr.msra.gmra.mrb[0].mxu0 %v11108_v9  ;;  %7235 = vmatmul.mubr.bf16.vlgmr.msra.gmra.mrb[0].mxu1 %v11108_v9 }
 0x236   : > { %6916 = vmatpush1.bf16.msra.mxu0 %v9552_v14  ;;  %7244 = vmatpush1.bf16.msra.mxu1 %v9554_v15  ;;  %v9600_v14 = vcombine.low %v1312_v59, %v1316_v62  ;;  %v9602_v15 = vcombine.low %v1313_v63, %v1317_v0  ;;  %v1360_v59 = vld [vmem:[%s10523_s15 + $0x1f00] sm:$0xff]  ;;  %v1361_v63 = vld [vmem:[%s10523_s15 + $0x1f08] sm:$0xff] }
 0x237   : > { %6917 = vmatprep.subr.bf16.mxu0 %v9561_v16  ;;  %7245 = vmatprep.subr.bf16.mxu1 %v9563_v17  ;;  %v9609_v16 = vcombine.high %v1320_v31, %v1324_v8  ;;  %v9611_v17 = vcombine.high %v1321_v12, %v1325_v13  ;;  %v1364_v62 = vld [vmem:[%s10523_s15 + $0x1f20] sm:$0xff]  ;;  %v1365_v0 = vld [vmem:[%s10523_s15 + $0x1f28] sm:$0xff] }
 0x238   : > { %6947 = vmatprep.mubr.bf16.mxu0 %v11116_v20  ;;  %7275 = vmatprep.mubr.bf16.mxu1 %v11116_v20 }
 0x23a   : > { %6918 = vmatpush1.bf16.msra.mxu0 %v9560_v22  ;;  %7246 = vmatpush1.bf16.msra.mxu1 %v9562_v23  ;;  %v9608_v22 = vcombine.low %v1320_v31, %v1324_v8  ;;  %v9610_v23 = vcombine.low %v1321_v12, %v1325_v13  ;;  %v1368_v31 = vld [vmem:[%s10523_s15 + $0x1f40] sm:$0xff]  ;;  %v1369_v12 = vld [vmem:[%s10523_s15 + $0x1f48] sm:$0xff] }
 0x23b   : > { %6919 = vmatprep.subr.bf16.mxu0 %v9569_v24  ;;  %7247 = vmatprep.subr.bf16.mxu1 %v9571_v26  ;;  %v9617_v24 = vcombine.high %v1328_v3, %v1332_v19  ;;  %v9619_v26 = vcombine.high %v1329_v55, %v1333_v18  ;;  %v1372_v8 = vld [vmem:[%s10523_s15 + $0x1f60] sm:$0xff]  ;;  %v1373_v13 = vld [vmem:[%s10523_s15 + $0x1f68] sm:$0xff] }
 0x23e   : > { %6920 = vmatpush1.bf16.msra.mxu0 %v9568_v33  ;;  %7248 = vmatpush1.bf16.msra.mxu1 %v9570_v1  ;;  %v9616_v33 = vcombine.low %v1328_v3, %v1332_v19  ;;  %v9618_v1 = vcombine.low %v1329_v55, %v1333_v18  ;;  %v1376_v3 = vld [vmem:[%s10523_s15 + $0x1f80] sm:$0xff]  ;;  %v1377_v55 = vld [vmem:[%s10523_s15 + $0x1f88] sm:$0xff] }
 0x23f   : > { %6921 = vmatprep.subr.bf16.mxu0 %v9577_v35  ;;  %7249 = vmatprep.subr.bf16.mxu1 %v9579_v36  ;;  %v9625_v35 = vcombine.high %v1336_v27, %v1340_v28  ;;  %v9627_v36 = vcombine.high %v1337_v30, %v1341_v32  ;;  %v1380_v19 = vld [vmem:[%s10523_s15 + $0x1fa0] sm:$0xff]  ;;  %v1381_v18 = vld [vmem:[%s10523_s15 + $0x1fa8] sm:$0xff] }
 0x242   : > { %6922 = vmatpush1.bf16.msra.mxu0 %v9576_v43  ;;  %7250 = vmatpush1.bf16.msra.mxu1 %v9578_v44  ;;  %v9624_v43 = vcombine.low %v1336_v27, %v1340_v28  ;;  %v9626_v44 = vcombine.low %v1337_v30, %v1341_v32  ;;  %v1384_v27 = vld [vmem:[%s10523_s15 + $0x1fc0] sm:$0xff]  ;;  %v1385_v30 = vld [vmem:[%s10523_s15 + $0x1fc8] sm:$0xff] }
 0x243   : > { %6923 = vmatprep.subr.bf16.mxu0 %v9585_v45  ;;  %7251 = vmatprep.subr.bf16.mxu1 %v9587_v47  ;;  %v9633_v45 = vcombine.high %v1344_v37, %v1348_v38  ;;  %v9635_v47 = vcombine.high %v1345_v41, %v1349_v42  ;;  %v1388_v28 = vld [vmem:[%s10523_s15 + $0x1fe0] sm:$0xff]  ;;  %v1389_v32 = vld [vmem:[%s10523_s15 + $0x1fe8] sm:$0xff] }
 0x246   : > { %6924 = vmatpush1.bf16.msra.mxu0 %v9584_v54  ;;  %7252 = vmatpush1.bf16.msra.mxu1 %v9586_v56  ;;  %v9632_v54 = vcombine.low %v1344_v37, %v1348_v38  ;;  %v9634_v56 = vcombine.low %v1345_v41, %v1349_v42  ;;  %v370_v37 = vld [vmem:[%s10523_s15 + $0x10] sm:$0xff]  ;;  %v371_v41 = vld [vmem:[%s10523_s15 + $0x18] sm:$0xff] }
 0x247   : > { %6925 = vmatprep.subr.bf16.mxu0 %v9593_v57  ;;  %7253 = vmatprep.subr.bf16.mxu1 %v9595_v58  ;;  %v9641_v57 = vcombine.high %v1352_v48, %v1356_v49  ;;  %v9643_v58 = vcombine.high %v1353_v51, %v1357_v52  ;;  %v374_v38 = vld [vmem:[%s10523_s15 + $0x30] sm:$0xff]  ;;  %v375_v42 = vld [vmem:[%s10523_s15 + $0x38] sm:$0xff] }
 0x24a   : > { %6926 = vmatpush1.bf16.msra.mxu0 %v9592_v10  ;;  %7254 = vmatpush1.bf16.msra.mxu1 %v9594_v4  ;;  %v9640_v10 = vcombine.low %v1352_v48, %v1356_v49  ;;  %v9642_v4 = vcombine.low %v1353_v51, %v1357_v52  ;;  %v378_v48 = vld [vmem:[%s10523_s15 + $0x50] sm:$0xff]  ;;  %v11184_v51 = vcombine.high %v11108_v9, %v11108_v9  ;;  %v379_v52 = vld [vmem:[%s10523_s15 + $0x58] sm:$0xff] }
 0x24b   : > { %6927 = vmatprep.subr.bf16.mxu0 %v9601_v5  ;;  %7255 = vmatprep.subr.bf16.mxu1 %v9603_v6  ;;  %v9649_v5 = vcombine.high %v1360_v59, %v1364_v62  ;;  %v9651_v6 = vcombine.high %v1361_v63, %v1365_v0  ;;  %v382_v49 = vld [vmem:[%s10523_s15 + $0x70] sm:$0xff] }
 0x24e   : > { %6928 = vmatpush1.bf16.msra.mxu0 %v9600_v14  ;;  %7256 = vmatpush1.bf16.msra.mxu1 %v9602_v15  ;;  %v9648_v14 = vcombine.low %v1360_v59, %v1364_v62  ;;  %v9650_v15 = vcombine.low %v1361_v63, %v1365_v0  ;;  %v386_v62 = vld [vmem:[%s10523_s15 + $0x90] sm:$0xff]  ;;  %v387_v0 = vld [vmem:[%s10523_s15 + $0x98] sm:$0xff] }
 0x24f   : > { %6929 = vmatprep.subr.bf16.mxu0 %v9609_v16  ;;  %7257 = vmatprep.subr.bf16.mxu1 %v9611_v17  ;;  %v9657_v16 = vcombine.high %v1368_v31, %v1372_v8  ;;  %v9659_v17 = vcombine.high %v1369_v12, %v1373_v13  ;;  %v390_v63 = vld [vmem:[%s10523_s15 + $0xb0] sm:$0xff] }
 0x252   : > { %6930 = vmatpush1.bf16.msra.mxu0 %v9608_v22  ;;  %7258 = vmatpush1.bf16.msra.mxu1 %v9610_v23  ;;  %v9656_v22 = vcombine.low %v1368_v31, %v1372_v8  ;;  %v9658_v23 = vcombine.low %v1369_v12, %v1373_v13  ;;  %v394_v8 = vld [vmem:[%s10523_s15 + $0xd0] sm:$0xff]  ;;  %v395_v13 = vld [vmem:[%s10523_s15 + $0xd8] sm:$0xff] }
 0x253   : > { %6931 = vmatprep.subr.bf16.mxu0 %v9617_v24  ;;  %7259 = vmatprep.subr.bf16.mxu1 %v9619_v26  ;;  %v9665_v24 = vcombine.high %v1376_v3, %v1380_v19  ;;  %v9667_v26 = vcombine.high %v1377_v55, %v1381_v18  ;;  %v398_v12 = vld [vmem:[%s10523_s15 + $0xf0] sm:$0xff] }
 0x256   : > { %6932 = vmatpush1.bf16.msra.mxu0 %v9616_v33  ;;  %7260 = vmatpush1.bf16.msra.mxu1 %v9618_v1  ;;  %v9664_v33 = vcombine.low %v1376_v3, %v1380_v19  ;;  %v9666_v1 = vcombine.low %v1377_v55, %v1381_v18  ;;  %v402_v19 = vld [vmem:[%s10523_s15 + $0x110] sm:$0xff]  ;;  %v403_v18 = vld [vmem:[%s10523_s15 + $0x118] sm:$0xff] }
 0x257   : > { %6933 = vmatprep.subr.bf16.mxu0 %v9625_v35  ;;  %7261 = vmatprep.subr.bf16.mxu1 %v9627_v36  ;;  %v9673_v35 = vcombine.high %v1384_v27, %v1388_v28  ;;  %v9675_v36 = vcombine.high %v1385_v30, %v1389_v32  ;;  %v406_v55 = vld [vmem:[%s10523_s15 + $0x130] sm:$0xff] }
 0x25a   : > { %6934 = vmatpush1.bf16.msra.mxu0 %v9624_v43  ;;  %7262 = vmatpush1.bf16.msra.mxu1 %v9626_v44  ;;  %v9672_v43 = vcombine.low %v1384_v27, %v1388_v28  ;;  %v9674_v44 = vcombine.low %v1385_v30, %v1389_v32  ;;  %v410_v27 = vld [vmem:[%s10523_s15 + $0x150] sm:$0xff]  ;;  %v411_v30 = vld [vmem:[%s10523_s15 + $0x158] sm:$0xff] }
 0x25b   : > { %6935 = vmatprep.subr.bf16.mxu0 %v9633_v45  ;;  %7263 = vmatprep.subr.bf16.mxu1 %v9635_v47  ;;  %v8661_v45 = vcombine.high %v370_v37, %v374_v38  ;;  %v8663_v47 = vcombine.high %v371_v41, %v375_v42  ;;  %v414_v28 = vld [vmem:[%s10523_s15 + $0x170] sm:$0xff]  ;;  %v415_v32 = vld [vmem:[%s10523_s15 + $0x178] sm:$0xff] }
 0x25e   : > { %6936 = vmatpush1.bf16.msra.mxu0 %v9632_v54  ;;  %7264 = vmatpush1.bf16.msra.mxu1 %v9634_v56  ;;  %v383_v54 = vld [vmem:[%s10523_s15 + $0x78] sm:$0xff]  ;;  %v8660_v56 = vcombine.low %v370_v37, %v374_v38  ;;  %v418_v37 = vld [vmem:[%s10523_s15 + $0x190] sm:$0xff] }
 0x25f   : > { %6937 = vmatprep.subr.bf16.mxu0 %v9641_v57  ;;  %7265 = vmatprep.subr.bf16.mxu1 %v9643_v58  ;;  %v8662_v57 = vcombine.low %v371_v41, %v375_v42  ;;  %v8669_v58 = vcombine.high %v378_v48, %v382_v49  ;;  %v8671_v59 = vcombine.high %v379_v52, %v383_v54  ;;  %v422_v38 = vld [vmem:[%s10523_s15 + $0x1b0] sm:$0xff]  ;;  %v419_v41 = vld [vmem:[%s10523_s15 + $0x198] sm:$0xff] }
 0x260   : > { %v423_v42 = vld [vmem:[%s10523_s15 + $0x1b8] sm:$0xff] }
 0x262   : > { %6938 = vmatpush1.bf16.msra.mxu0 %v9640_v10  ;;  %7266 = vmatpush1.bf16.msra.mxu1 %v9642_v4  ;;  %v391_v10 = vld [vmem:[%s10523_s15 + $0xb8] sm:$0xff]  ;;  %v8668_v4 = vcombine.low %v378_v48, %v382_v49  ;;  %v426_v48 = vld [vmem:[%s10523_s15 + $0x1d0] sm:$0xff] }
 0x263   : > { %6939 = vmatprep.subr.bf16.mxu0 %v9649_v5  ;;  %7267 = vmatprep.subr.bf16.mxu1 %v9651_v6  ;;  %v8670_v5 = vcombine.low %v379_v52, %v383_v54  ;;  %v8677_v6 = vcombine.high %v386_v62, %v390_v63  ;;  %v8679_v31 = vcombine.high %v387_v0, %v391_v10  ;;  %v430_v49 = vld [vmem:[%s10523_s15 + $0x1f0] sm:$0xff]  ;;  %v427_v52 = vld [vmem:[%s10523_s15 + $0x1d8] sm:$0xff] }
 0x264   : > { %v431_v54 = vld [vmem:[%s10523_s15 + $0x1f8] sm:$0xff] }
 0x266   : > { %6940 = vmatpush1.bf16.msra.mxu0 %v9648_v14  ;;  %7268 = vmatpush1.bf16.msra.mxu1 %v9650_v15  ;;  %v399_v14 = vld [vmem:[%s10523_s15 + $0xf8] sm:$0xff]  ;;  %v8676_v15 = vcombine.low %v386_v62, %v390_v63  ;;  %v434_v62 = vld [vmem:[%s10523_s15 + $0x210] sm:$0xff] }
 0x267   : > { %6941 = vmatprep.subr.bf16.mxu0 %v9657_v16  ;;  %7269 = vmatprep.subr.bf16.mxu1 %v9659_v17  ;;  %v8678_v16 = vcombine.low %v387_v0, %v391_v10  ;;  %v8685_v17 = vcombine.high %v394_v8, %v398_v12  ;;  %v8687_v3 = vcombine.high %v395_v13, %v399_v14  ;;  %v438_v63 = vld [vmem:[%s10523_s15 + $0x230] sm:$0xff]  ;;  %v435_v0 = vld [vmem:[%s10523_s15 + $0x218] sm:$0xff] }
 0x268   : > { %v439_v10 = vld [vmem:[%s10523_s15 + $0x238] sm:$0xff] }
 0x26a   : > { %6942 = vmatpush1.bf16.msra.mxu0 %v9656_v22  ;;  %7270 = vmatpush1.bf16.msra.mxu1 %v9658_v23  ;;  %v407_v22 = vld [vmem:[%s10523_s15 + $0x138] sm:$0xff]  ;;  %v8684_v23 = vcombine.low %v394_v8, %v398_v12  ;;  %v442_v8 = vld [vmem:[%s10523_s15 + $0x250] sm:$0xff] }
 0x26b   : > { %6943 = vmatprep.subr.bf16.mxu0 %v9665_v24  ;;  %7271 = vmatprep.subr.bf16.mxu1 %v9667_v26  ;;  %v8693_v24 = vcombine.high %v402_v19, %v406_v55  ;;  %v8695_v26 = vcombine.high %v403_v18, %v407_v22  ;;  %v446_v12 = vld [vmem:[%s10523_s15 + $0x270] sm:$0xff] }
 0x26e   : > { %6944 = vmatpush1.bf16.msra.mxu0 %v9664_v33  ;;  %7272 = vmatpush1.bf16.msra.mxu1 %v9666_v1  ;;  %v8692_v33 = vcombine.low %v402_v19, %v406_v55  ;;  %v8694_v1 = vcombine.low %v403_v18, %v407_v22  ;;  %v450_v19 = vld [vmem:[%s10523_s15 + $0x290] sm:$0xff]  ;;  %v451_v18 = vld [vmem:[%s10523_s15 + $0x298] sm:$0xff] }
 0x26f   : > { %6945 = vmatprep.subr.bf16.mxu0 %v9673_v35  ;;  %7273 = vmatprep.subr.bf16.mxu1 %v9675_v36  ;;  %v8701_v35 = vcombine.high %v410_v27, %v414_v28  ;;  %v8703_v36 = vcombine.high %v411_v30, %v415_v32  ;;  %v454_v55 = vld [vmem:[%s10523_s15 + $0x2b0] sm:$0xff]  ;;  %v455_v22 = vld [vmem:[%s10523_s15 + $0x2b8] sm:$0xff] }
 0x272   : > { %6946 = vmatpush1.bf16.msra.mxu0 %v9672_v43  ;;  %7274 = vmatpush1.bf16.msra.mxu1 %v9674_v44  ;;  %v8700_v43 = vcombine.low %v410_v27, %v414_v28  ;;  %v8702_v44 = vcombine.low %v411_v30, %v415_v32  ;;  %v458_v27 = vld [vmem:[%s10523_s15 + $0x2d0] sm:$0xff]  ;;  %v459_v30 = vld [vmem:[%s10523_s15 + $0x2d8] sm:$0xff] }
 0x273   : > { %7284 = vmatprep.subr.bf16.mxu0 %v8661_v45  ;;  %7612 = vmatprep.subr.bf16.mxu1 %v8663_v47  ;;  %v8709_v45 = vcombine.high %v418_v37, %v422_v38  ;;  %v8711_v47 = vcombine.high %v419_v41, %v423_v42  ;;  %v462_v28 = vld [vmem:[%s10523_s15 + $0x2f0] sm:$0xff]  ;;  %v463_v32 = vld [vmem:[%s10523_s15 + $0x2f8] sm:$0xff] }
 0x275   : > { %6948 = vmatmul.mubr.bf16.vlgmr.msra.gmra.mrb[0].mxu0 %v11184_v51  ;;  %7276 = vmatmul.mubr.bf16.vlgmr.msra.gmra.mrb[0].mxu1 %v11184_v51 }
 0x276   : > { %7285 = vmatpush1.bf16.msra.mxu0 %v8660_v56  ;;  %7613 = vmatpush1.bf16.msra.mxu1 %v8662_v57  ;;  %v8708_v56 = vcombine.low %v418_v37, %v422_v38  ;;  %v8710_v57 = vcombine.low %v419_v41, %v423_v42  ;;  %v466_v37 = vld [vmem:[%s10523_s15 + $0x310] sm:$0xff]  ;;  %v467_v41 = vld [vmem:[%s10523_s15 + $0x318] sm:$0xff] }
 0x277   : > { %7286 = vmatprep.subr.bf16.mxu0 %v8669_v58  ;;  %7614 = vmatprep.subr.bf16.mxu1 %v8671_v59  ;;  %v8717_v58 = vcombine.high %v426_v48, %v430_v49  ;;  %v8719_v59 = vcombine.high %v427_v52, %v431_v54  ;;  %v470_v38 = vld [vmem:[%s10523_s15 + $0x330] sm:$0xff]  ;;  %v471_v42 = vld [vmem:[%s10523_s15 + $0x338] sm:$0xff] }
 0x278   : > { %7316 = vmatprep.mubr.bf16.mxu0 %v10590_v11  ;;  %7644 = vmatprep.mubr.bf16.mxu1 %v10590_v11  ;;  %v8686_v11 = vcombine.low %v395_v13, %v399_v14  ;;  %v443_v13 = vld [vmem:[%s10523_s15 + $0x258] sm:$0xff] }
 0x279   : > { %v447_v14 = vld [vmem:[%s10523_s15 + $0x278] sm:$0xff] }
 0x27a   : > { %7287 = vmatpush1.bf16.msra.mxu0 %v8668_v4  ;;  %7615 = vmatpush1.bf16.msra.mxu1 %v8670_v5  ;;  %v8716_v4 = vcombine.low %v426_v48, %v430_v49  ;;  %v8718_v5 = vcombine.low %v427_v52, %v431_v54  ;;  %v474_v48 = vld [vmem:[%s10523_s15 + $0x350] sm:$0xff]  ;;  %v475_v52 = vld [vmem:[%s10523_s15 + $0x358] sm:$0xff] }
 0x27b   : > { %7288 = vmatprep.subr.bf16.mxu0 %v8677_v6  ;;  %7616 = vmatprep.subr.bf16.mxu1 %v8679_v31  ;;  %v8725_v6 = vcombine.high %v434_v62, %v438_v63  ;;  %v8727_v31 = vcombine.high %v435_v0, %v439_v10  ;;  %v478_v49 = vld [vmem:[%s10523_s15 + $0x370] sm:$0xff]  ;;  %v479_v54 = vld [vmem:[%s10523_s15 + $0x378] sm:$0xff] }
 0x27e   : > { %7289 = vmatpush1.bf16.msra.mxu0 %v8676_v15  ;;  %7617 = vmatpush1.bf16.msra.mxu1 %v8678_v16  ;;  %v8724_v15 = vcombine.low %v434_v62, %v438_v63  ;;  %v8726_v16 = vcombine.low %v435_v0, %v439_v10  ;;  %v482_v62 = vld [vmem:[%s10523_s15 + $0x390] sm:$0xff]  ;;  %v483_v0 = vld [vmem:[%s10523_s15 + $0x398] sm:$0xff] }
 0x27f   : > { %7290 = vmatprep.subr.bf16.mxu0 %v8685_v17  ;;  %7618 = vmatprep.subr.bf16.mxu1 %v8687_v3  ;;  %v8733_v17 = vcombine.high %v442_v8, %v446_v12  ;;  %v8735_v3 = vcombine.high %v443_v13, %v447_v14  ;;  %v486_v63 = vld [vmem:[%s10523_s15 + $0x3b0] sm:$0xff]  ;;  %v487_v10 = vld [vmem:[%s10523_s15 + $0x3b8] sm:$0xff] }
 0x282   : > { %7291 = vmatpush1.bf16.msra.mxu0 %v8684_v23  ;;  %7619 = vmatpush1.bf16.msra.mxu1 %v8686_v11  ;;  %v8732_v23 = vcombine.low %v442_v8, %v446_v12  ;;  %v8734_v11 = vcombine.low %v443_v13, %v447_v14  ;;  %v490_v8 = vld [vmem:[%s10523_s15 + $0x3d0] sm:$0xff]  ;;  %v491_v13 = vld [vmem:[%s10523_s15 + $0x3d8] sm:$0xff] }
 0x283   : > { %7292 = vmatprep.subr.bf16.mxu0 %v8693_v24  ;;  %7620 = vmatprep.subr.bf16.mxu1 %v8695_v26  ;;  %v8741_v24 = vcombine.high %v450_v19, %v454_v55  ;;  %v8743_v26 = vcombine.high %v451_v18, %v455_v22  ;;  %v494_v12 = vld [vmem:[%s10523_s15 + $0x3f0] sm:$0xff]  ;;  %v495_v14 = vld [vmem:[%s10523_s15 + $0x3f8] sm:$0xff] }
 0x286   : > { %7293 = vmatpush1.bf16.msra.mxu0 %v8692_v33  ;;  %7621 = vmatpush1.bf16.msra.mxu1 %v8694_v1  ;;  %v8740_v33 = vcombine.low %v450_v19, %v454_v55  ;;  %v8742_v1 = vcombine.low %v451_v18, %v455_v22  ;;  %v498_v19 = vld [vmem:[%s10523_s15 + $0x410] sm:$0xff]  ;;  %v499_v18 = vld [vmem:[%s10523_s15 + $0x418] sm:$0xff] }
 0x287   : > { %7294 = vmatprep.subr.bf16.mxu0 %v8701_v35  ;;  %7622 = vmatprep.subr.bf16.mxu1 %v8703_v36  ;;  %v8749_v35 = vcombine.high %v458_v27, %v462_v28  ;;  %v8751_v36 = vcombine.high %v459_v30, %v463_v32  ;;  %v502_v55 = vld [vmem:[%s10523_s15 + $0x430] sm:$0xff]  ;;  %v503_v22 = vld [vmem:[%s10523_s15 + $0x438] sm:$0xff] }
 0x28a   : > { %7295 = vmatpush1.bf16.msra.mxu0 %v8700_v43  ;;  %7623 = vmatpush1.bf16.msra.mxu1 %v8702_v44  ;;  %v8748_v43 = vcombine.low %v458_v27, %v462_v28  ;;  %v8750_v44 = vcombine.low %v459_v30, %v463_v32  ;;  %v506_v27 = vld [vmem:[%s10523_s15 + $0x450] sm:$0xff]  ;;  %v507_v30 = vld [vmem:[%s10523_s15 + $0x458] sm:$0xff] }
 0x28b   : > { %7296 = vmatprep.subr.bf16.mxu0 %v8709_v45  ;;  %7624 = vmatprep.subr.bf16.mxu1 %v8711_v47  ;;  %v8757_v45 = vcombine.high %v466_v37, %v470_v38  ;;  %v8759_v47 = vcombine.high %v467_v41, %v471_v42  ;;  %v510_v28 = vld [vmem:[%s10523_s15 + $0x470] sm:$0xff]  ;;  %v511_v32 = vld [vmem:[%s10523_s15 + $0x478] sm:$0xff] }
 0x28e   : > { %7297 = vmatpush1.bf16.msra.mxu0 %v8708_v56  ;;  %7625 = vmatpush1.bf16.msra.mxu1 %v8710_v57  ;;  %v8756_v56 = vcombine.low %v466_v37, %v470_v38  ;;  %v8758_v57 = vcombine.low %v467_v41, %v471_v42  ;;  %v514_v37 = vld [vmem:[%s10523_s15 + $0x490] sm:$0xff]  ;;  %v515_v41 = vld [vmem:[%s10523_s15 + $0x498] sm:$0xff] }
 0x28f   : > { %7298 = vmatprep.subr.bf16.mxu0 %v8717_v58  ;;  %7626 = vmatprep.subr.bf16.mxu1 %v8719_v59  ;;  %v8765_v58 = vcombine.high %v474_v48, %v478_v49  ;;  %v8767_v59 = vcombine.high %v475_v52, %v479_v54  ;;  %v518_v38 = vld [vmem:[%s10523_s15 + $0x4b0] sm:$0xff]  ;;  %v519_v42 = vld [vmem:[%s10523_s15 + $0x4b8] sm:$0xff] }
 0x292   : > { %7299 = vmatpush1.bf16.msra.mxu0 %v8716_v4  ;;  %7627 = vmatpush1.bf16.msra.mxu1 %v8718_v5  ;;  %v8764_v4 = vcombine.low %v474_v48, %v478_v49  ;;  %v8766_v5 = vcombine.low %v475_v52, %v479_v54  ;;  %v522_v48 = vld [vmem:[%s10523_s15 + $0x4d0] sm:$0xff]  ;;  %v523_v52 = vld [vmem:[%s10523_s15 + $0x4d8] sm:$0xff] }
 0x293   : > { %7300 = vmatprep.subr.bf16.mxu0 %v8725_v6  ;;  %7628 = vmatprep.subr.bf16.mxu1 %v8727_v31  ;;  %v8773_v6 = vcombine.high %v482_v62, %v486_v63  ;;  %v8775_v31 = vcombine.high %v483_v0, %v487_v10  ;;  %v526_v49 = vld [vmem:[%s10523_s15 + $0x4f0] sm:$0xff]  ;;  %v527_v54 = vld [vmem:[%s10523_s15 + $0x4f8] sm:$0xff] }
 0x296   : > { %7301 = vmatpush1.bf16.msra.mxu0 %v8724_v15  ;;  %7629 = vmatpush1.bf16.msra.mxu1 %v8726_v16  ;;  %v8772_v15 = vcombine.low %v482_v62, %v486_v63  ;;  %v8774_v16 = vcombine.low %v483_v0, %v487_v10  ;;  %v534_v62 = vld [vmem:[%s10523_s15 + $0x530] sm:$0xff]  ;;  %v531_v63 = vld [vmem:[%s10523_s15 + $0x518] sm:$0xff]  ;;  %v8812_v10 = vcombine.low %v522_v48, %v526_v49 }
 0x297   : > { %7302 = vmatprep.subr.bf16.mxu0 %v8733_v17  ;;  %7630 = vmatprep.subr.bf16.mxu1 %v8735_v3  ;;  %v8781_v17 = vcombine.high %v490_v8, %v494_v12  ;;  %v8783_v3 = vcombine.high %v491_v13, %v495_v14  ;;  %v535_v0 = vld [vmem:[%s10523_s15 + $0x538] sm:$0xff] }
 0x29a   : > { %7303 = vmatpush1.bf16.msra.mxu0 %v8732_v23  ;;  %7631 = vmatpush1.bf16.msra.mxu1 %v8734_v11  ;;  %v8780_v23 = vcombine.low %v490_v8, %v494_v12  ;;  %v8782_v11 = vcombine.low %v491_v13, %v495_v14  ;;  %v539_v8 = vld [vmem:[%s10523_s15 + $0x558] sm:$0xff]  ;;  %v8822_v14 = vcombine.low %v531_v63, %v535_v0 }
 0x29b   : > { %7304 = vmatprep.subr.bf16.mxu0 %v8741_v24  ;;  %7632 = vmatprep.subr.bf16.mxu1 %v8743_v26  ;;  %v8789_v24 = vcombine.high %v498_v19, %v502_v55  ;;  %v8791_v26 = vcombine.high %v499_v18, %v503_v22  ;;  %v543_v12 = vld [vmem:[%s10523_s15 + $0x578] sm:$0xff] }
 0x29e   : > { %7305 = vmatpush1.bf16.msra.mxu0 %v8740_v33  ;;  %7633 = vmatpush1.bf16.msra.mxu1 %v8742_v1  ;;  %v8788_v33 = vcombine.low %v498_v19, %v502_v55  ;;  %v8790_v1 = vcombine.low %v499_v18, %v503_v22  ;;  %v547_v19 = vld [vmem:[%s10523_s15 + $0x598] sm:$0xff]  ;;  %v8830_v22 = vcombine.low %v539_v8, %v543_v12 }
 0x29f   : > { %7306 = vmatprep.subr.bf16.mxu0 %v8749_v35  ;;  %7634 = vmatprep.subr.bf16.mxu1 %v8751_v36  ;;  %v8797_v35 = vcombine.high %v506_v27, %v510_v28  ;;  %v8799_v36 = vcombine.high %v507_v30, %v511_v32  ;;  %v551_v55 = vld [vmem:[%s10523_s15 + $0x5b8] sm:$0xff] }
 0x2a2   : > { %7307 = vmatpush1.bf16.msra.mxu0 %v8748_v43  ;;  %7635 = vmatpush1.bf16.msra.mxu1 %v8750_v44  ;;  %v8796_v43 = vcombine.low %v506_v27, %v510_v28  ;;  %v8798_v44 = vcombine.low %v507_v30, %v511_v32  ;;  %v555_v27 = vld [vmem:[%s10523_s15 + $0x5d8] sm:$0xff]  ;;  %v8838_v32 = vcombine.low %v547_v19, %v551_v55 }
 0x2a3   : > { %7308 = vmatprep.subr.bf16.mxu0 %v8757_v45  ;;  %7636 = vmatprep.subr.bf16.mxu1 %v8759_v47  ;;  %v8805_v45 = vcombine.high %v514_v37, %v518_v38  ;;  %v8807_v47 = vcombine.high %v515_v41, %v519_v42  ;;  %v559_v28 = vld [vmem:[%s10523_s15 + $0x5f8] sm:$0xff] }
 0x2a6   : > { %7309 = vmatpush1.bf16.msra.mxu0 %v8756_v56  ;;  %7637 = vmatpush1.bf16.msra.mxu1 %v8758_v57  ;;  %v8806_v56 = vcombine.low %v515_v41, %v519_v42  ;;  %v8813_v57 = vcombine.high %v522_v48, %v526_v49  ;;  %v8846_v42 = vcombine.low %v555_v27, %v559_v28  ;;  %v571_v48 = vld [vmem:[%s10523_s15 + $0x658] sm:$0xff] }
 0x2a7   : > { %7310 = vmatprep.subr.bf16.mxu0 %v8765_v58  ;;  %7638 = vmatprep.subr.bf16.mxu1 %v8767_v59  ;;  %v8815_v58 = vcombine.high %v523_v52, %v527_v54  ;;  %v530_v59 = vld [vmem:[%s10523_s15 + $0x510] sm:$0xff]  ;;  %v575_v49 = vld [vmem:[%s10523_s15 + $0x678] sm:$0xff] }
 0x2a8   : > { %v8820_v13 = vcombine.low %v530_v59, %v534_v62 }
 0x2aa   : > { %7311 = vmatpush1.bf16.msra.mxu0 %v8764_v4  ;;  %7639 = vmatpush1.bf16.msra.mxu1 %v8766_v5  ;;  %v8821_v4 = vcombine.high %v530_v59, %v534_v62  ;;  %v8823_v5 = vcombine.high %v531_v63, %v535_v0  ;;  %v579_v59 = vld [vmem:[%s10523_s15 + $0x698] sm:$0xff]  ;;  %v8862_v0 = vcombine.low %v571_v48, %v575_v49 }
 0x2ab   : > { %7312 = vmatprep.subr.bf16.mxu0 %v8773_v6  ;;  %7640 = vmatprep.subr.bf16.mxu1 %v8775_v31  ;;  %v538_v6 = vld [vmem:[%s10523_s15 + $0x550] sm:$0xff]  ;;  %v583_v62 = vld [vmem:[%s10523_s15 + $0x6b8] sm:$0xff] }
 0x2ac   : > { %v542_v31 = vld [vmem:[%s10523_s15 + $0x570] sm:$0xff] }
 0x2ad   : > { %v8828_v18 = vcombine.low %v538_v6, %v542_v31 }
 0x2ae   : > { %7313 = vmatpush1.bf16.msra.mxu0 %v8772_v15  ;;  %7641 = vmatpush1.bf16.msra.mxu1 %v8774_v16  ;;  %v8829_v15 = vcombine.high %v538_v6, %v542_v31  ;;  %v8831_v16 = vcombine.high %v539_v8, %v543_v12  ;;  %v587_v6 = vld [vmem:[%s10523_s15 + $0x6d8] sm:$0xff]  ;;  %v8870_v12 = vcombine.low %v579_v59, %v583_v62 }
 0x2af   : > { %7314 = vmatprep.subr.bf16.mxu0 %v8781_v17  ;;  %7642 = vmatprep.subr.bf16.mxu1 %v8783_v3  ;;  %v546_v17 = vld [vmem:[%s10523_s15 + $0x590] sm:$0xff]  ;;  %v591_v31 = vld [vmem:[%s10523_s15 + $0x6f8] sm:$0xff] }
 0x2b0   : > { %v550_v3 = vld [vmem:[%s10523_s15 + $0x5b0] sm:$0xff] }
 0x2b1   : > { %v8836_v30 = vcombine.low %v546_v17, %v550_v3 }
 0x2b2   : > { %7315 = vmatpush1.bf16.msra.mxu0 %v8780_v23  ;;  %7643 = vmatpush1.bf16.msra.mxu1 %v8782_v11  ;;  %v8837_v23 = vcombine.high %v546_v17, %v550_v3  ;;  %v8839_v11 = vcombine.high %v547_v19, %v551_v55  ;;  %v595_v17 = vld [vmem:[%s10523_s15 + $0x718] sm:$0xff]  ;;  %v8878_v55 = vcombine.low %v587_v6, %v591_v31 }
 0x2b3   : > { %7325 = vmatprep.subr.bf16.mxu0 %v8789_v24  ;;  %7653 = vmatprep.subr.bf16.mxu1 %v8791_v26  ;;  %v554_v24 = vld [vmem:[%s10523_s15 + $0x5d0] sm:$0xff]  ;;  %v599_v3 = vld [vmem:[%s10523_s15 + $0x738] sm:$0xff] }
 0x2b4   : > { %v558_v26 = vld [vmem:[%s10523_s15 + $0x5f0] sm:$0xff] }
 0x2b5   : > { %7317 = vmatmul.mubr.bf16.vlgmr.msra.gmra.mrb[4].mxu0 %v10632_v25  ;;  %7645 = vmatmul.mubr.bf16.vlgmr.msra.gmra.mrb[4].mxu1 %v10632_v25  ;;  %v8804_v25 = vcombine.low %v514_v37, %v518_v38  ;;  %v563_v37 = vld [vmem:[%s10523_s15 + $0x618] sm:$0xff]  ;;  %v8844_v41 = vcombine.low %v554_v24, %v558_v26 }
 0x2b6   : > { %7326 = vmatpush1.bf16.msra.mxu0 %v8788_v33  ;;  %7654 = vmatpush1.bf16.msra.mxu1 %v8790_v1  ;;  %v8845_v33 = vcombine.high %v554_v24, %v558_v26  ;;  %v8847_v1 = vcombine.high %v555_v27, %v559_v28  ;;  %v567_v38 = vld [vmem:[%s10523_s15 + $0x638] sm:$0xff]  ;;  %v8886_v28 = vcombine.low %v595_v17, %v599_v3 }
 0x2b7   : > { %7327 = vmatprep.subr.bf16.mxu0 %v8797_v35  ;;  %7655 = vmatprep.subr.bf16.mxu1 %v8799_v36  ;;  %v562_v35 = vld [vmem:[%s10523_s15 + $0x610] sm:$0xff]  ;;  %v603_v24 = vld [vmem:[%s10523_s15 + $0x758] sm:$0xff] }
 0x2b8   : > { %7357 = vmatprep.mubr.bf16.mxu0 %v10640_v34  ;;  %7685 = vmatprep.mubr.bf16.mxu1 %v10640_v34  ;;  %v8814_v34 = vcombine.low %v523_v52, %v527_v54  ;;  %v566_v36 = vld [vmem:[%s10523_s15 + $0x630] sm:$0xff]  ;;  %v8854_v54 = vcombine.low %v563_v37, %v567_v38  ;;  %v607_v26 = vld [vmem:[%s10523_s15 + $0x778] sm:$0xff] }
 0x2b9   : > { %v8852_v52 = vcombine.low %v562_v35, %v566_v36 }
 0x2ba   : > { %7328 = vmatpush1.bf16.msra.mxu0 %v8796_v43  ;;  %7656 = vmatpush1.bf16.msra.mxu1 %v8798_v44  ;;  %v8853_v43 = vcombine.high %v562_v35, %v566_v36  ;;  %v8855_v44 = vcombine.high %v563_v37, %v567_v38  ;;  %v611_v35 = vld [vmem:[%s10523_s15 + $0x798] sm:$0xff]  ;;  %v8894_v38 = vcombine.low %v603_v24, %v607_v26 }
 0x2bb   : > { %7329 = vmatprep.subr.bf16.mxu0 %v8805_v45  ;;  %7657 = vmatprep.subr.bf16.mxu1 %v8807_v47  ;;  %v570_v45 = vld [vmem:[%s10523_s15 + $0x650] sm:$0xff]  ;;  %v615_v36 = vld [vmem:[%s10523_s15 + $0x7b8] sm:$0xff] }
 0x2bc   : > { %v574_v47 = vld [vmem:[%s10523_s15 + $0x670] sm:$0xff] }
 0x2bd   : > { %v8860_v63 = vcombine.low %v570_v45, %v574_v47 }
 0x2be   : > { %7330 = vmatpush1.bf16.msra.mxu0 %v8804_v25  ;;  %7658 = vmatpush1.bf16.msra.mxu1 %v8806_v56  ;;  %v8861_v25 = vcombine.high %v570_v45, %v574_v47  ;;  %v8863_v56 = vcombine.high %v571_v48, %v575_v49  ;;  %v619_v45 = vld [vmem:[%s10523_s15 + $0x7d8] sm:$0xff]  ;;  %v8902_v49 = vcombine.low %v611_v35, %v615_v36 }
 0x2bf   : > { %7331 = vmatprep.subr.bf16.mxu0 %v8813_v57  ;;  %7659 = vmatprep.subr.bf16.mxu1 %v8815_v58  ;;  %v578_v57 = vld [vmem:[%s10523_s15 + $0x690] sm:$0xff]  ;;  %v623_v47 = vld [vmem:[%s10523_s15 + $0x7f8] sm:$0xff] }
 0x2c0   : > { %v582_v58 = vld [vmem:[%s10523_s15 + $0x6b0] sm:$0xff] }
 0x2c1   : > { %v8868_v8 = vcombine.low %v578_v57, %v582_v58 }
 0x2c2   : > { %7332 = vmatpush1.bf16.msra.mxu0 %v8812_v10  ;;  %7660 = vmatpush1.bf16.msra.mxu1 %v8814_v34  ;;  %v8869_v10 = vcombine.high %v578_v57, %v582_v58  ;;  %v8871_v34 = vcombine.high %v579_v59, %v583_v62  ;;  %v627_v57 = vld [vmem:[%s10523_s15 + $0x818] sm:$0xff]  ;;  %v8910_v62 = vcombine.low %v619_v45, %v623_v47 }
 0x2c3   : > { %7333 = vmatprep.subr.bf16.mxu0 %v8821_v4  ;;  %7661 = vmatprep.subr.bf16.mxu1 %v8823_v5  ;;  %v586_v4 = vld [vmem:[%s10523_s15 + $0x6d0] sm:$0xff]  ;;  %v631_v58 = vld [vmem:[%s10523_s15 + $0x838] sm:$0xff] }
 0x2c4   : > { %v590_v5 = vld [vmem:[%s10523_s15 + $0x6f0] sm:$0xff] }
 0x2c5   : > { %v8876_v19 = vcombine.low %v586_v4, %v590_v5 }
 0x2c6   : > { %7334 = vmatpush1.bf16.msra.mxu0 %v8820_v13  ;;  %7662 = vmatpush1.bf16.msra.mxu1 %v8822_v14  ;;  %v8877_v13 = vcombine.high %v586_v4, %v590_v5  ;;  %v8879_v14 = vcombine.high %v587_v6, %v591_v31  ;;  %v635_v4 = vld [vmem:[%s10523_s15 + $0x858] sm:$0xff]  ;;  %v8918_v31 = vcombine.low %v627_v57, %v631_v58 }
 0x2c7   : > { %7335 = vmatprep.subr.bf16.mxu0 %v8829_v15  ;;  %7663 = vmatprep.subr.bf16.mxu1 %v8831_v16  ;;  %v594_v15 = vld [vmem:[%s10523_s15 + $0x710] sm:$0xff]  ;;  %v639_v5 = vld [vmem:[%s10523_s15 + $0x878] sm:$0xff] }
 0x2c8   : > { %v598_v16 = vld [vmem:[%s10523_s15 + $0x730] sm:$0xff] }
 0x2c9   : > { %v8884_v27 = vcombine.low %v594_v15, %v598_v16 }
 0x2ca   : > { %7336 = vmatpush1.bf16.msra.mxu0 %v8828_v18  ;;  %7664 = vmatpush1.bf16.msra.mxu1 %v8830_v22  ;;  %v8885_v18 = vcombine.high %v594_v15, %v598_v16  ;;  %v8887_v22 = vcombine.high %v595_v17, %v599_v3  ;;  %v643_v15 = vld [vmem:[%s10523_s15 + $0x898] sm:$0xff]  ;;  %v8926_v3 = vcombine.low %v635_v4, %v639_v5 }
 0x2cb   : > { %7337 = vmatprep.subr.bf16.mxu0 %v8837_v23  ;;  %7665 = vmatprep.subr.bf16.mxu1 %v8839_v11  ;;  %v602_v23 = vld [vmem:[%s10523_s15 + $0x750] sm:$0xff]  ;;  %v647_v16 = vld [vmem:[%s10523_s15 + $0x8b8] sm:$0xff] }
 0x2cc   : > { %v606_v11 = vld [vmem:[%s10523_s15 + $0x770] sm:$0xff] }
 0x2cd   : > { %v8892_v37 = vcombine.low %v602_v23, %v606_v11 }
 0x2ce   : > { %7338 = vmatpush1.bf16.msra.mxu0 %v8836_v30  ;;  %7666 = vmatpush1.bf16.msra.mxu1 %v8838_v32  ;;  %v8893_v30 = vcombine.high %v602_v23, %v606_v11  ;;  %v8895_v32 = vcombine.high %v603_v24, %v607_v26  ;;  %v651_v23 = vld [vmem:[%s10523_s15 + $0x8d8] sm:$0xff]  ;;  %v8934_v24 = vcombine.low %v643_v15, %v647_v16 }
 0x2cf   : > { %7339 = vmatprep.subr.bf16.mxu0 %v8845_v33  ;;  %7667 = vmatprep.subr.bf16.mxu1 %v8847_v1  ;;  %v610_v33 = vld [vmem:[%s10523_s15 + $0x790] sm:$0xff]  ;;  %v655_v11 = vld [vmem:[%s10523_s15 + $0x8f8] sm:$0xff] }
 0x2d0   : > { %v614_v1 = vld [vmem:[%s10523_s15 + $0x7b0] sm:$0xff] }
 0x2d1   : > { %v8900_v48 = vcombine.low %v610_v33, %v614_v1 }
 0x2d2   : > { %7340 = vmatpush1.bf16.msra.mxu0 %v8844_v41  ;;  %7668 = vmatpush1.bf16.msra.mxu1 %v8846_v42  ;;  %v8901_v41 = vcombine.high %v610_v33, %v614_v1  ;;  %v8903_v42 = vcombine.high %v611_v35, %v615_v36  ;;  %v663_v33 = vld [vmem:[%s10523_s15 + $0x938] sm:$0xff] }
 0x2d3   : > { %7341 = vmatprep.subr.bf16.mxu0 %v8853_v43  ;;  %7669 = vmatprep.subr.bf16.mxu1 %v8855_v44  ;;  %v618_v43 = vld [vmem:[%s10523_s15 + $0x7d0] sm:$0xff] }
 0x2d4   : > { %v622_v44 = vld [vmem:[%s10523_s15 + $0x7f0] sm:$0xff] }
 0x2d5   : > { %v8908_v59 = vcombine.low %v618_v43, %v622_v44 }
 0x2d6   : > { %7342 = vmatpush1.bf16.msra.mxu0 %v8852_v52  ;;  %7670 = vmatpush1.bf16.msra.mxu1 %v8854_v54  ;;  %v8909_v52 = vcombine.high %v618_v43, %v622_v44  ;;  %v8911_v54 = vcombine.high %v619_v45, %v623_v47 }
 0x2d7   : > { %7343 = vmatprep.subr.bf16.mxu0 %v8861_v25  ;;  %7671 = vmatprep.subr.bf16.mxu1 %v8863_v56  ;;  %v626_v25 = vld [vmem:[%s10523_s15 + $0x810] sm:$0xff] }
 0x2d8   : > { %v630_v56 = vld [vmem:[%s10523_s15 + $0x830] sm:$0xff] }
 0x2d9   : > { %v8916_v6 = vcombine.low %v626_v25, %v630_v56 }
 0x2da   : > { %7344 = vmatpush1.bf16.msra.mxu0 %v8860_v63  ;;  %7672 = vmatpush1.bf16.msra.mxu1 %v8862_v0  ;;  %v8917_v63 = vcombine.high %v626_v25, %v630_v56  ;;  %v8919_v0 = vcombine.high %v627_v57, %v631_v58 }
 0x2db   : > { %7345 = vmatprep.subr.bf16.mxu0 %v8869_v10  ;;  %7673 = vmatprep.subr.bf16.mxu1 %v8871_v34  ;;  %v634_v10 = vld [vmem:[%s10523_s15 + $0x850] sm:$0xff] }
 0x2dc   : > { %v638_v34 = vld [vmem:[%s10523_s15 + $0x870] sm:$0xff] }
 0x2dd   : > { %v8924_v17 = vcombine.low %v634_v10, %v638_v34 }
 0x2de   : > { %7346 = vmatpush1.bf16.msra.mxu0 %v8868_v8  ;;  %7674 = vmatpush1.bf16.msra.mxu1 %v8870_v12  ;;  %v8925_v8 = vcombine.high %v634_v10, %v638_v34  ;;  %v8927_v12 = vcombine.high %v635_v4, %v639_v5 }
 0x2df   : > { %7347 = vmatprep.subr.bf16.mxu0 %v8877_v13  ;;  %7675 = vmatprep.subr.bf16.mxu1 %v8879_v14  ;;  %v642_v13 = vld [vmem:[%s10523_s15 + $0x890] sm:$0xff] }
 0x2e0   : > { %v646_v14 = vld [vmem:[%s10523_s15 + $0x8b0] sm:$0xff] }
 0x2e2   : > { %7348 = vmatpush1.bf16.msra.mxu0 %v8876_v19  ;;  %7676 = vmatpush1.bf16.msra.mxu1 %v8878_v55  ;;  %v8933_v19 = vcombine.high %v642_v13, %v646_v14  ;;  %v8935_v55 = vcombine.high %v643_v15, %v647_v16 }
 0x2e3   : > { %7349 = vmatprep.subr.bf16.mxu0 %v8885_v18  ;;  %7677 = vmatprep.subr.bf16.mxu1 %v8887_v22  ;;  %v650_v18 = vld [vmem:[%s10523_s15 + $0x8d0] sm:$0xff] }
 0x2e4   : > { %v654_v22 = vld [vmem:[%s10523_s15 + $0x8f0] sm:$0xff] }
 0x2e5   : > { %v8941_v26 = vcombine.high %v650_v18, %v654_v22  ;;  %v8940_v1 = vcombine.low %v650_v18, %v654_v22 }
 0x2e6   : > { %7350 = vmatpush1.bf16.msra.mxu0 %v8884_v27  ;;  %7678 = vmatpush1.bf16.msra.mxu1 %v8886_v28  ;;  %v8943_v27 = vcombine.high %v651_v23, %v655_v11  ;;  %v658_v28 = vld [vmem:[%s10523_s15 + $0x910] sm:$0xff] }
 0x2e7   : > { %7351 = vmatprep.subr.bf16.mxu0 %v8893_v30  ;;  %7679 = vmatprep.subr.bf16.mxu1 %v8895_v32  ;;  %v662_v30 = vld [vmem:[%s10523_s15 + $0x930] sm:$0xff]  ;;  %v659_v32 = vld [vmem:[%s10523_s15 + $0x918] sm:$0xff] }
 0x2e8   : > { %v8949_v35 = vcombine.high %v658_v28, %v662_v30  ;;  %v8951_v36 = vcombine.high %v659_v32, %v663_v33  ;;  %v8948_v43 = vcombine.low %v658_v28, %v662_v30  ;;  %v8950_v44 = vcombine.low %v659_v32, %v663_v33 }
 0x2ea   : > { %7352 = vmatpush1.bf16.msra.mxu0 %v8892_v37  ;;  %7680 = vmatpush1.bf16.msra.mxu1 %v8894_v38  ;;  %v666_v37 = vld [vmem:[%s10523_s15 + $0x950] sm:$0xff] }
 0x2eb   : > { %7353 = vmatprep.subr.bf16.mxu0 %v8901_v41  ;;  %7681 = vmatprep.subr.bf16.mxu1 %v8903_v42  ;;  %v670_v38 = vld [vmem:[%s10523_s15 + $0x970] sm:$0xff]  ;;  %v667_v41 = vld [vmem:[%s10523_s15 + $0x958] sm:$0xff] }
 0x2ec   : > { %v671_v42 = vld [vmem:[%s10523_s15 + $0x978] sm:$0xff]  ;;  %v8957_v45 = vcombine.high %v666_v37, %v670_v38  ;;  %v8956_v25 = vcombine.low %v666_v37, %v670_v38 }
 0x2ed   : > { %v8959_v47 = vcombine.high %v667_v41, %v671_v42  ;;  %v8958_v56 = vcombine.low %v667_v41, %v671_v42 }
 0x2ee   : > { %7354 = vmatpush1.bf16.msra.mxu0 %v8900_v48  ;;  %7682 = vmatpush1.bf16.msra.mxu1 %v8902_v49  ;;  %v674_v48 = vld [vmem:[%s10523_s15 + $0x990] sm:$0xff] }
 0x2ef   : > { %7355 = vmatprep.subr.bf16.mxu0 %v8909_v52  ;;  %7683 = vmatprep.subr.bf16.mxu1 %v8911_v54  ;;  %v678_v49 = vld [vmem:[%s10523_s15 + $0x9b0] sm:$0xff]  ;;  %v675_v52 = vld [vmem:[%s10523_s15 + $0x998] sm:$0xff] }
 0x2f0   : > { %v679_v54 = vld [vmem:[%s10523_s15 + $0x9b8] sm:$0xff]  ;;  %v8965_v57 = vcombine.high %v674_v48, %v678_v49  ;;  %v8964_v10 = vcombine.low %v674_v48, %v678_v49 }
 0x2f1   : > { %v8967_v58 = vcombine.high %v675_v52, %v679_v54  ;;  %v8966_v34 = vcombine.low %v675_v52, %v679_v54 }
 0x2f2   : > { %7356 = vmatpush1.bf16.msra.mxu0 %v8908_v59  ;;  %7684 = vmatpush1.bf16.msra.mxu1 %v8910_v62  ;;  %v682_v59 = vld [vmem:[%s10523_s15 + $0x9d0] sm:$0xff] }
 0x2f3   : > { %7366 = vmatprep.subr.bf16.mxu0 %v8917_v63  ;;  %7694 = vmatprep.subr.bf16.mxu1 %v8919_v0  ;;  %v686_v62 = vld [vmem:[%s10523_s15 + $0x9f0] sm:$0xff]  ;;  %v683_v63 = vld [vmem:[%s10523_s15 + $0x9d8] sm:$0xff] }
 0x2f4   : > { %v687_v0 = vld [vmem:[%s10523_s15 + $0x9f8] sm:$0xff]  ;;  %v8973_v4 = vcombine.high %v682_v59, %v686_v62 }
 0x2f5   : > { %7358 = vmatmul.mubr.bf16.vlgmr.msra.gmra.mrb[4].mxu0 %v10715_v40  ;;  %7686 = vmatmul.mubr.bf16.vlgmr.msra.gmra.mrb[4].mxu1 %v10715_v40  ;;  %v8932_v40 = vcombine.low %v642_v13, %v646_v14  ;;  %v8975_v5 = vcombine.high %v683_v63, %v687_v0  ;;  %v8972_v13 = vcombine.low %v682_v59, %v686_v62 }
 0x2f6   : > { %7367 = vmatpush1.bf16.msra.mxu0 %v8916_v6  ;;  %7695 = vmatpush1.bf16.msra.mxu1 %v8918_v31  ;;  %v690_v6 = vld [vmem:[%s10523_s15 + $0xa10] sm:$0xff]  ;;  %v8974_v14 = vcombine.low %v683_v63, %v687_v0 }
 0x2f7   : > { %7368 = vmatprep.subr.bf16.mxu0 %v8925_v8  ;;  %7696 = vmatprep.subr.bf16.mxu1 %v8927_v12  ;;  %v694_v31 = vld [vmem:[%s10523_s15 + $0xa30] sm:$0xff]  ;;  %v691_v8 = vld [vmem:[%s10523_s15 + $0xa18] sm:$0xff] }
 0x2f8   : > { %7398 = vmatprep.mubr.bf16.mxu0 %v10722_v50  ;;  %7726 = vmatprep.mubr.bf16.mxu1 %v10722_v50  ;;  %v8942_v50 = vcombine.low %v651_v23, %v655_v11  ;;  %v695_v12 = vld [vmem:[%s10523_s15 + $0xa38] sm:$0xff]  ;;  %v8981_v15 = vcombine.high %v690_v6, %v694_v31  ;;  %v8980_v18 = vcombine.low %v690_v6, %v694_v31 }
 0x2f9   : > { %v8983_v16 = vcombine.high %v691_v8, %v695_v12  ;;  %v8982_v22 = vcombine.low %v691_v8, %v695_v12 }
 0x2fa   : > { %7369 = vmatpush1.bf16.msra.mxu0 %v8924_v17  ;;  %7697 = vmatpush1.bf16.msra.mxu1 %v8926_v3  ;;  %v698_v17 = vld [vmem:[%s10523_s15 + $0xa50] sm:$0xff] }
 0x2fb   : > { %7370 = vmatprep.subr.bf16.mxu0 %v8933_v19  ;;  %7698 = vmatprep.subr.bf16.mxu1 %v8935_v55  ;;  %v702_v3 = vld [vmem:[%s10523_s15 + $0xa70] sm:$0xff]  ;;  %v699_v19 = vld [vmem:[%s10523_s15 + $0xa58] sm:$0xff] }
 0x2fc   : > { %v703_v55 = vld [vmem:[%s10523_s15 + $0xa78] sm:$0xff]  ;;  %v8989_v23 = vcombine.high %v698_v17, %v702_v3  ;;  %v8988_v28 = vcombine.low %v698_v17, %v702_v3 }
 0x2fd   : > { %v8991_v11 = vcombine.high %v699_v19, %v703_v55  ;;  %v8990_v30 = vcombine.low %v699_v19, %v703_v55 }
 0x2fe   : > { %7371 = vmatpush1.bf16.msra.mxu0 %v8932_v40  ;;  %7699 = vmatpush1.bf16.msra.mxu1 %v8934_v24  ;;  %v706_v40 = vld [vmem:[%s10523_s15 + $0xa90] sm:$0xff] }
 0x2ff   : > { %7372 = vmatprep.subr.bf16.mxu0 %v8941_v26  ;;  %7700 = vmatprep.subr.bf16.mxu1 %v8943_v27  ;;  %v710_v24 = vld [vmem:[%s10523_s15 + $0xab0] sm:$0xff]  ;;  %v707_v26 = vld [vmem:[%s10523_s15 + $0xa98] sm:$0xff] }
 0x300   : > { %v711_v27 = vld [vmem:[%s10523_s15 + $0xab8] sm:$0xff]  ;;  %v8997_v32 = vcombine.high %v706_v40, %v710_v24  ;;  %v8996_v37 = vcombine.low %v706_v40, %v710_v24 }
 0x301   : > { %v8999_v33 = vcombine.high %v707_v26, %v711_v27  ;;  %v8998_v38 = vcombine.low %v707_v26, %v711_v27 }
 0x302   : > { %7373 = vmatpush1.bf16.msra.mxu0 %v8940_v1  ;;  %7701 = vmatpush1.bf16.msra.mxu1 %v8942_v50  ;;  %v714_v1 = vld [vmem:[%s10523_s15 + $0xad0] sm:$0xff] }
 0x303   : > { %7374 = vmatprep.subr.bf16.mxu0 %v8949_v35  ;;  %7702 = vmatprep.subr.bf16.mxu1 %v8951_v36  ;;  %v718_v50 = vld [vmem:[%s10523_s15 + $0xaf0] sm:$0xff]  ;;  %v715_v35 = vld [vmem:[%s10523_s15 + $0xad8] sm:$0xff] }
 0x304   : > { %v719_v36 = vld [vmem:[%s10523_s15 + $0xaf8] sm:$0xff]  ;;  %v9005_v41 = vcombine.high %v714_v1, %v718_v50  ;;  %v9004_v48 = vcombine.low %v714_v1, %v718_v50 }
 0x305   : > { %v9007_v42 = vcombine.high %v715_v35, %v719_v36  ;;  %v9006_v49 = vcombine.low %v715_v35, %v719_v36 }
 0x306   : > { %7375 = vmatpush1.bf16.msra.mxu0 %v8948_v43  ;;  %7703 = vmatpush1.bf16.msra.mxu1 %v8950_v44  ;;  %v722_v43 = vld [vmem:[%s10523_s15 + $0xb10] sm:$0xff] }
 0x307   : > { %7376 = vmatprep.subr.bf16.mxu0 %v8957_v45  ;;  %7704 = vmatprep.subr.bf16.mxu1 %v8959_v47  ;;  %v726_v44 = vld [vmem:[%s10523_s15 + $0xb30] sm:$0xff]  ;;  %v723_v45 = vld [vmem:[%s10523_s15 + $0xb18] sm:$0xff] }
 0x308   : > { %v727_v47 = vld [vmem:[%s10523_s15 + $0xb38] sm:$0xff]  ;;  %v9013_v52 = vcombine.high %v722_v43, %v726_v44  ;;  %v9012_v59 = vcombine.low %v722_v43, %v726_v44 }
 0x309   : > { %v9015_v54 = vcombine.high %v723_v45, %v727_v47  ;;  %v9014_v62 = vcombine.low %v723_v45, %v727_v47 }
 0x30a   : > { %7377 = vmatpush1.bf16.msra.mxu0 %v8956_v25  ;;  %7705 = vmatpush1.bf16.msra.mxu1 %v8958_v56  ;;  %v730_v25 = vld [vmem:[%s10523_s15 + $0xb50] sm:$0xff] }
 0x30b   : > { %7378 = vmatprep.subr.bf16.mxu0 %v8965_v57  ;;  %7706 = vmatprep.subr.bf16.mxu1 %v8967_v58  ;;  %v734_v56 = vld [vmem:[%s10523_s15 + $0xb70] sm:$0xff]  ;;  %v731_v57 = vld [vmem:[%s10523_s15 + $0xb58] sm:$0xff] }
 0x30c   : > { %v735_v58 = vld [vmem:[%s10523_s15 + $0xb78] sm:$0xff]  ;;  %v9021_v63 = vcombine.high %v730_v25, %v734_v56  ;;  %v9020_v6 = vcombine.low %v730_v25, %v734_v56 }
 0x30d   : > { %v9023_v0 = vcombine.high %v731_v57, %v735_v58  ;;  %v9022_v31 = vcombine.low %v731_v57, %v735_v58  ;;  %v786_v58 = vld [vmem:[%s10523_s15 + $0xd10] sm:$0xff] }
 0x30e   : > { %7379 = vmatpush1.bf16.msra.mxu0 %v8964_v10  ;;  %7707 = vmatpush1.bf16.msra.mxu1 %v8966_v34  ;;  %v738_v10 = vld [vmem:[%s10523_s15 + $0xb90] sm:$0xff] }
 0x30f   : > { %7380 = vmatprep.subr.bf16.mxu0 %v8973_v4  ;;  %7708 = vmatprep.subr.bf16.mxu1 %v8975_v5  ;;  %v742_v34 = vld [vmem:[%s10523_s15 + $0xbb0] sm:$0xff]  ;;  %v739_v4 = vld [vmem:[%s10523_s15 + $0xb98] sm:$0xff] }
 0x310   : > { %v743_v5 = vld [vmem:[%s10523_s15 + $0xbb8] sm:$0xff]  ;;  %v9029_v8 = vcombine.high %v738_v10, %v742_v34  ;;  %v9028_v17 = vcombine.low %v738_v10, %v742_v34 }
 0x311   : > { %v9031_v12 = vcombine.high %v739_v4, %v743_v5  ;;  %v9030_v3 = vcombine.low %v739_v4, %v743_v5  ;;  %v10312_v4 = vmov 1983009808  }
 0x312   : > { %7381 = vmatpush1.bf16.msra.mxu0 %v8972_v13  ;;  %7709 = vmatpush1.bf16.msra.mxu1 %v8974_v14  ;;  %v746_v13 = vld [vmem:[%s10523_s15 + $0xbd0] sm:$0xff]  ;;  %v7951_v5 = vunpack.c.l.s4 %v10312_v4  ;;  %v831_v4 = vld [vmem:[%s10523_s15 + $0xe78] sm:$0xff] }
 0x313   : > { %7382 = vmatprep.subr.bf16.mxu0 %v8981_v15  ;;  %7710 = vmatprep.subr.bf16.mxu1 %v8983_v16  ;;  %v750_v14 = vld [vmem:[%s10523_s15 + $0xbf0] sm:$0xff]  ;;  %v747_v15 = vld [vmem:[%s10523_s15 + $0xbd8] sm:$0xff] }
 0x314   : > { %v751_v16 = vld [vmem:[%s10523_s15 + $0xbf8] sm:$0xff]  ;;  %v9037_v19 = vcombine.high %v746_v13, %v750_v14  ;;  %v9036_v40 = vcombine.low %v746_v13, %v750_v14 }
 0x315   : > { %v9039_v55 = vcombine.high %v747_v15, %v751_v16  ;;  %v9038_v24 = vcombine.low %v747_v15, %v751_v16  ;;  %v7952_v16 = vunpack.c.0.s8 %v7951_v5 }
 0x316   : > { %7383 = vmatpush1.bf16.msra.mxu0 %v8980_v18  ;;  %7711 = vmatpush1.bf16.msra.mxu1 %v8982_v22  ;;  %v754_v18 = vld [vmem:[%s10523_s15 + $0xc10] sm:$0xff] }
 0x317   : > { %7384 = vmatprep.subr.bf16.mxu0 %v8989_v23  ;;  %7712 = vmatprep.subr.bf16.mxu1 %v8991_v11  ;;  %v758_v22 = vld [vmem:[%s10523_s15 + $0xc30] sm:$0xff]  ;;  %v755_v23 = vld [vmem:[%s10523_s15 + $0xc18] sm:$0xff] }
 0x318   : > { %v759_v11 = vld [vmem:[%s10523_s15 + $0xc38] sm:$0xff]  ;;  %v9045_v26 = vcombine.high %v754_v18, %v758_v22  ;;  %v9044_v1 = vcombine.low %v754_v18, %v758_v22 }
 0x319   : > { %v9047_v27 = vcombine.high %v755_v23, %v759_v11  ;;  %v9046_v50 = vcombine.low %v755_v23, %v759_v11  ;;  %v807_v18 = vld [vmem:[%s10523_s15 + $0xdb8] sm:$0xff] }
 0x31a   : > { %7385 = vmatpush1.bf16.msra.mxu0 %v8988_v28  ;;  %7713 = vmatpush1.bf16.msra.mxu1 %v8990_v30  ;;  %v762_v28 = vld [vmem:[%s10523_s15 + $0xc50] sm:$0xff] }
 0x31b   : > { %7386 = vmatprep.subr.bf16.mxu0 %v8997_v32  ;;  %7714 = vmatprep.subr.bf16.mxu1 %v8999_v33  ;;  %v766_v30 = vld [vmem:[%s10523_s15 + $0xc70] sm:$0xff]  ;;  %v763_v32 = vld [vmem:[%s10523_s15 + $0xc58] sm:$0xff] }
 0x31c   : > { %v767_v33 = vld [vmem:[%s10523_s15 + $0xc78] sm:$0xff]  ;;  %v9053_v35 = vcombine.high %v762_v28, %v766_v30  ;;  %v9052_v43 = vcombine.low %v762_v28, %v766_v30  ;;  %v814_v28 = vld [vmem:[%s10523_s15 + $0xdf0] sm:$0xff] }
 0x31d   : > { %v9055_v36 = vcombine.high %v763_v32, %v767_v33  ;;  %v9054_v44 = vcombine.low %v763_v32, %v767_v33  ;;  %v811_v33 = vld [vmem:[%s10523_s15 + $0xdd8] sm:$0xff] }
 0x31e   : > { %7387 = vmatpush1.bf16.msra.mxu0 %v8996_v37  ;;  %7715 = vmatpush1.bf16.msra.mxu1 %v8998_v38  ;;  %v770_v37 = vld [vmem:[%s10523_s15 + $0xc90] sm:$0xff] }
 0x31f   : > { %7388 = vmatprep.subr.bf16.mxu0 %v9005_v41  ;;  %7716 = vmatprep.subr.bf16.mxu1 %v9007_v42  ;;  %v774_v38 = vld [vmem:[%s10523_s15 + $0xcb0] sm:$0xff]  ;;  %v771_v41 = vld [vmem:[%s10523_s15 + $0xc98] sm:$0xff] }
 0x320   : > { %v775_v42 = vld [vmem:[%s10523_s15 + $0xcb8] sm:$0xff]  ;;  %v9061_v45 = vcombine.high %v770_v37, %v774_v38 }
 0x321   : > { %v9063_v47 = vcombine.high %v771_v41, %v775_v42  ;;  %v9062_v25 = vcombine.low %v771_v41, %v775_v42 }
 0x322   : > { %7389 = vmatpush1.bf16.msra.mxu0 %v9004_v48  ;;  %7717 = vmatpush1.bf16.msra.mxu1 %v9006_v49  ;;  %v778_v48 = vld [vmem:[%s10523_s15 + $0xcd0] sm:$0xff] }
 0x323   : > { %7390 = vmatprep.subr.bf16.mxu0 %v9013_v52  ;;  %7718 = vmatprep.subr.bf16.mxu1 %v9015_v54  ;;  %v782_v49 = vld [vmem:[%s10523_s15 + $0xcf0] sm:$0xff]  ;;  %v779_v52 = vld [vmem:[%s10523_s15 + $0xcd8] sm:$0xff] }
 0x324   : > { %v783_v54 = vld [vmem:[%s10523_s15 + $0xcf8] sm:$0xff]  ;;  %v9069_v56 = vcombine.high %v778_v48, %v782_v49 }
 0x325   : > { %v9071_v57 = vcombine.high %v779_v52, %v783_v54 }
 0x326   : > { %7391 = vmatpush1.bf16.msra.mxu0 %v9012_v59  ;;  %7719 = vmatpush1.bf16.msra.mxu1 %v9014_v62  ;;  %v790_v59 = vld [vmem:[%s10523_s15 + $0xd30] sm:$0xff]  ;;  %v787_v62 = vld [vmem:[%s10523_s15 + $0xd18] sm:$0xff] }
 0x327   : > { %7392 = vmatprep.subr.bf16.mxu0 %v9021_v63  ;;  %7720 = vmatprep.subr.bf16.mxu1 %v9023_v0  ;;  %v791_v63 = vld [vmem:[%s10523_s15 + $0xd38] sm:$0xff]  ;;  %v9068_v0 = vcombine.low %v778_v48, %v782_v49  ;;  %v9077_v10 = vcombine.high %v786_v58, %v790_v59  ;;  %v9076_v13 = vcombine.low %v786_v58, %v790_v59  ;;  %v818_v49 = vld [vmem:[%s10523_s15 + $0xe10] sm:$0xff] }
 0x328   : > { %v9079_v34 = vcombine.high %v787_v62, %v791_v63  ;;  %v9078_v14 = vcombine.low %v787_v62, %v791_v63 }
 0x32a   : > { %7393 = vmatpush1.bf16.msra.mxu0 %v9020_v6  ;;  %7721 = vmatpush1.bf16.msra.mxu1 %v9022_v31  ;;  %v794_v6 = vld [vmem:[%s10523_s15 + $0xd50] sm:$0xff] }
 0x32b   : > { %7394 = vmatprep.subr.bf16.mxu0 %v9029_v8  ;;  %7722 = vmatprep.subr.bf16.mxu1 %v9031_v12  ;;  %v798_v31 = vld [vmem:[%s10523_s15 + $0xd70] sm:$0xff]  ;;  %v795_v8 = vld [vmem:[%s10523_s15 + $0xd58] sm:$0xff] }
 0x32c   : > { %v799_v12 = vld [vmem:[%s10523_s15 + $0xd78] sm:$0xff]  ;;  %v9085_v15 = vcombine.high %v794_v6, %v798_v31  ;;  %v9084_v22 = vcombine.low %v794_v6, %v798_v31 }
 0x32d   : > { %v9086_v23 = vcombine.low %v795_v8, %v799_v12 }
 0x32e   : > { %7395 = vmatpush1.bf16.msra.mxu0 %v9028_v17  ;;  %7723 = vmatpush1.bf16.msra.mxu1 %v9030_v3  ;;  %v9087_v17 = vcombine.high %v795_v8, %v799_v12  ;;  %v802_v3 = vld [vmem:[%s10523_s15 + $0xd90] sm:$0xff] }
 0x32f   : > { %7396 = vmatprep.subr.bf16.mxu0 %v9037_v19  ;;  %7724 = vmatprep.subr.bf16.mxu1 %v9039_v55  ;;  %v806_v19 = vld [vmem:[%s10523_s15 + $0xdb0] sm:$0xff]  ;;  %v803_v55 = vld [vmem:[%s10523_s15 + $0xd98] sm:$0xff] }
 0x330   : > { %v9093_v11 = vcombine.high %v802_v3, %v806_v19  ;;  %v834_v12 = vld [vmem:[%s10523_s15 + $0xe90] sm:$0xff] }
 0x332   : > { %7397 = vmatpush1.bf16.msra.mxu0 %v9036_v40  ;;  %7725 = vmatpush1.bf16.msra.mxu1 %v9038_v24  ;;  %v11417_v24 = vsub.s32 %v7952_v16, %v10563_v46 }
 0x333   : > { %7407 = vmatprep.subr.bf16.mxu0 %v9045_v26  ;;  %7735 = vmatprep.subr.bf16.mxu1 %v9047_v27  ;;  %v9095_v26 = vcombine.high %v803_v55, %v807_v18  ;;  %v810_v27 = vld [vmem:[%s10523_s15 + $0xdd0] sm:$0xff] }
 0x335   : > { %7399 = vmatmul.mubr.bf16.vlgmr.msra.gmra.mrb[4].mxu0 %v10790_v60  ;;  %7727 = vmatmul.mubr.bf16.vlgmr.msra.gmra.mrb[4].mxu1 %v10790_v60  ;;  %v9060_v60 = vcombine.low %v770_v37, %v774_v38  ;;  %v9092_v37 = vcombine.low %v802_v3, %v806_v19 }
 0x336   : > { %7408 = vmatpush1.bf16.msra.mxu0 %v9044_v1  ;;  %7736 = vmatpush1.bf16.msra.mxu1 %v9046_v50  ;;  %v815_v1 = vld [vmem:[%s10523_s15 + $0xdf8] sm:$0xff] }
 0x337   : > { %7409 = vmatprep.subr.bf16.mxu0 %v9053_v35  ;;  %7737 = vmatprep.subr.bf16.mxu1 %v9055_v36  ;;  %v9103_v48 = vcombine.high %v811_v33, %v815_v1  ;;  %v9102_v59 = vcombine.low %v811_v33, %v815_v1  ;;  %v855_v33 = vld [vmem:[%s10523_s15 + $0xf38] sm:$0xff] }
 0x338   : > { %7439 = vmatprep.mubr.bf16.mxu0 %v10798_v7  ;;  %7767 = vmatprep.mubr.bf16.mxu1 %v10798_v7  ;;  %v9070_v7 = vcombine.low %v779_v52, %v783_v54  ;;  %v822_v52 = vld [vmem:[%s10523_s15 + $0xe30] sm:$0xff] }
 0x339   : > { %v9109_v62 = vcombine.high %v818_v49, %v822_v52  ;;  %v9108_v5 = vcombine.low %v818_v49, %v822_v52  ;;  %v870_v49 = vld [vmem:[%s10523_s15 + $0xfb0] sm:$0xff]  ;;  %v867_v52 = vld [vmem:[%s10523_s15 + $0xf98] sm:$0xff] }
 0x33a   : > { %7410 = vmatpush1.bf16.msra.mxu0 %v9052_v43  ;;  %7738 = vmatpush1.bf16.msra.mxu1 %v9054_v44  ;;  %v9094_v43 = vcombine.low %v803_v55, %v807_v18  ;;  %v9101_v44 = vcombine.high %v810_v27, %v814_v28  ;;  %v842_v55 = vld [vmem:[%s10523_s15 + $0xed0] sm:$0xff] }
 0x33b   : > { %7411 = vmatprep.subr.bf16.mxu0 %v9061_v45  ;;  %7739 = vmatprep.subr.bf16.mxu1 %v9063_v47  ;;  %v846_v18 = vld [vmem:[%s10523_s15 + $0xef0] sm:$0xff] }
 0x33c   : > { %v9132_v1 = vcombine.low %v842_v55, %v846_v18 }
 0x33e   : > { %7412 = vmatpush1.bf16.msra.mxu0 %v9060_v60  ;;  %7740 = vmatpush1.bf16.msra.mxu1 %v9062_v25  ;;  %v819_v60 = vld [vmem:[%s10523_s15 + $0xe18] sm:$0xff] }
 0x33f   : > { %7413 = vmatprep.subr.bf16.mxu0 %v9069_v56  ;;  %7741 = vmatprep.subr.bf16.mxu1 %v9071_v57  ;;  %v823_v25 = vld [vmem:[%s10523_s15 + $0xe38] sm:$0xff]  ;;  %v364_v56 = vld [vmem:[#allocation2] sm:$0xff]  ;;  %v9100_v57 = vcombine.low %v810_v27, %v814_v28 }
 0x340   : > { %v9111_v63 = vcombine.high %v819_v60, %v823_v25  ;;  %v9110_v6 = vcombine.low %v819_v60, %v823_v25  ;;  %v850_v28 = vld [vmem:[%s10523_s15 + $0xf10] sm:$0xff] }
 0x342   : > { %7414 = vmatpush1.bf16.msra.mxu0 %v9068_v0  ;;  %7742 = vmatpush1.bf16.msra.mxu1 %v9070_v7  ;;  %v826_v0 = vld [vmem:[%s10523_s15 + $0xe50] sm:$0xff] }
 0x343   : > { %7415 = vmatprep.subr.bf16.mxu0 %v9077_v10  ;;  %7743 = vmatprep.subr.bf16.mxu1 %v9079_v34  ;;  %v830_v7 = vld [vmem:[%s10523_s15 + $0xe70] sm:$0xff]  ;;  %v827_v34 = vld [vmem:[%s10523_s15 + $0xe58] sm:$0xff] }
 0x344   : > { %v9117_v31 = vcombine.high %v826_v0, %v830_v7  ;;  %v9119_v8 = vcombine.high %v827_v34, %v831_v4  ;;  %v9116_v16 = vcombine.low %v826_v0, %v830_v7 }
 0x346   : > { %7416 = vmatpush1.bf16.msra.mxu0 %v9076_v13  ;;  %7744 = vmatpush1.bf16.msra.mxu1 %v9078_v14  ;;  %v838_v13 = vld [vmem:[%s10523_s15 + $0xeb0] sm:$0xff]  ;;  %v835_v14 = vld [vmem:[%s10523_s15 + $0xe98] sm:$0xff] }
 0x347   : > { %7417 = vmatprep.subr.bf16.mxu0 %v9085_v15  ;;  %7745 = vmatprep.subr.bf16.mxu1 %v9087_v17  ;;  %v839_v15 = vld [vmem:[%s10523_s15 + $0xeb8] sm:$0xff]  ;;  %v9118_v17 = vcombine.low %v827_v34, %v831_v4  ;;  %v9125_v3 = vcombine.high %v834_v12, %v838_v13  ;;  %v882_v4 = vld [vmem:[%s10523_s15 + $0x1010] sm:$0xff] }
 0x348   : > { %v6949_v40 = vpop.f32.mrb[0].mxu0  ;;  %v7277_v30 = vpop.f32.mrb[0].mxu1  ;;  %v9127_v19 = vcombine.high %v835_v14, %v839_v15 }
 0x349   : > { %v6951_v32 = vpop.f32.mrb[1].mxu0  ;;  %v7279_v35 = vpop.f32.mrb[1].mxu1 }
 0x34a   : > { %v7948_v50 = vcombine.low %v6949_v40, %v6951_v32  ;;  %v6953_v36 = vpop.f32.mrb[2].mxu0  ;;  %7418 = vmatpush1.bf16.msra.mxu0 %v9084_v22  ;;  %v7949_v38 = vcombine.low %v7277_v30, %v7279_v35  ;;  %v7281_v41 = vpop.f32.mrb[2].mxu1  ;;  %7746 = vmatpush1.bf16.msra.mxu1 %v9086_v23  ;;  %v843_v22 = vld [vmem:[%s10523_s15 + $0xed8] sm:$0xff]  ;;  %v9126_v40 = vcombine.low %v835_v14, %v839_v15  ;;  %v854_v30 = vld [vmem:[%s10523_s15 + $0xf30] sm:$0xff] }
 0x34b   : > { %v6954_v42 = vpop.f32.mrb[3].mxu0  ;;  %7419 = vmatprep.subr.bf16.mxu0 %v9093_v11  ;;  %v7282_v47 = vpop.f32.mrb[3].mxu1  ;;  %7747 = vmatprep.subr.bf16.mxu1 %v9095_v26  ;;  %v847_v23 = vld [vmem:[%s10523_s15 + $0xef8] sm:$0xff]  ;;  %v9124_v11 = vcombine.low %v834_v12, %v838_v13  ;;  %v9133_v26 = vcombine.high %v842_v55, %v846_v18  ;;  %v9141_v35 = vcombine.high %v850_v28, %v854_v30  ;;  %v890_v15 = vld [vmem:[%s10523_s15 + $0x1050] sm:$0xff] }
 0x34c   : > { %v7956_v45 = vrot.slane %v7948_v50, %v11417_v24  ;;  %v7963_v54 = vrot.slane %v7949_v38, %v11417_v24  ;;  %v9135_v27 = vcombine.high %v843_v22, %v847_v23  ;;  %v851_v32 = vld [vmem:[%s10523_s15 + $0xf18] sm:$0xff]  ;;  %v9134_v50 = vcombine.low %v843_v22, %v847_v23  ;;  %v862_v38 = vld [vmem:[%s10523_s15 + $0xf70] sm:$0xff] }
 0x34d   : > { %v9143_v36 = vcombine.high %v851_v32, %v855_v33  ;;  %v859_v41 = vld [vmem:[%s10523_s15 + $0xf58] sm:$0xff]  ;;  %v898_v23 = vld [vmem:[%s10523_s15 + $0x1090] sm:$0xff] }
 0x34e   : > { %7420 = vmatpush1.bf16.msra.mxu0 %v9092_v37  ;;  %v7964_v58 = vcombine.low %v7956_v45, %v7963_v54  ;;  %7748 = vmatpush1.bf16.msra.mxu1 %v9094_v43  ;;  %v858_v37 = vld [vmem:[%s10523_s15 + $0xf50] sm:$0xff]  ;;  %v863_v42 = vld [vmem:[%s10523_s15 + $0xf78] sm:$0xff]  ;;  %v9140_v43 = vcombine.low %v850_v28, %v854_v30 }
 0x34f   : > { %7421 = vmatprep.subr.bf16.mxu0 %v9101_v44  ;;  %7749 = vmatprep.subr.bf16.mxu1 %v9103_v48  ;;  %v9142_v44 = vcombine.low %v851_v32, %v855_v33  ;;  %v9149_v45 = vcombine.high %v858_v37, %v862_v38  ;;  %v9151_v47 = vcombine.high %v859_v41, %v863_v42  ;;  %v866_v48 = vld [vmem:[%s10523_s15 + $0xf90] sm:$0xff]  ;;  %v871_v54 = vld [vmem:[%s10523_s15 + $0xfb8] sm:$0xff] }
 0x350   : > { %v7984_v10 = vadd.f32 %v7964_v58, %v364_v56  ;;  %v9148_v60 = vcombine.low %v858_v37, %v862_v38  ;;  %v9150_v25 = vcombine.low %v859_v41, %v863_v42  ;;  %v9157_v56 = vcombine.high %v866_v48, %v870_v49  ;;  %v874_v58 = vld [vmem:[%s10523_s15 + $0xfd0] sm:$0xff] }
 0x351   : > { %v9156_v0 = vcombine.low %v866_v48, %v870_v49  ;;  %v9158_v7 = vcombine.low %v867_v52, %v871_v54  ;;  %v906_v33 = vld [vmem:[%s10523_s15 + $0x10d0] sm:$0xff] }
 0x352   : > { %7422 = vmatpush1.bf16.msra.mxu0 %v9100_v57  ;;  %7986 = vst [vmem:[#allocation2] sm:$0xff] %v7984_v10  ;;  %7750 = vmatpush1.bf16.msra.mxu1 %v9102_v59  ;;  %v9159_v57 = vcombine.high %v867_v52, %v871_v54  ;;  %v878_v59 = vld [vmem:[%s10523_s15 + $0xff0] sm:$0xff]  ;;  %v923_v54 = vld [vmem:[%s10523_s15 + $0x1158] sm:$0xff] }
 0x353   : > { %7423 = vmatprep.subr.bf16.mxu0 %v9109_v62  ;;  %7751 = vmatprep.subr.bf16.mxu1 %v9111_v63  ;;  %v875_v62 = vld [vmem:[%s10523_s15 + $0xfd8] sm:$0xff]  ;;  %v9165_v10 = vcombine.high %v874_v58, %v878_v59  ;;  %v914_v41 = vld [vmem:[%s10523_s15 + $0x1110] sm:$0xff] }
 0x354   : > { %v879_v63 = vld [vmem:[%s10523_s15 + $0xff8] sm:$0xff]  ;;  %v918_v42 = vld [vmem:[%s10523_s15 + $0x1130] sm:$0xff] }
 0x355   : > { %v9167_v34 = vcombine.high %v875_v62, %v879_v63  ;;  %v9166_v12 = vcombine.low %v875_v62, %v879_v63  ;;  %v922_v49 = vld [vmem:[%s10523_s15 + $0x1150] sm:$0xff]  ;;  %v931_v63 = vld [vmem:[%s10523_s15 + $0x1198] sm:$0xff] }
 0x356   : > { %7424 = vmatpush1.bf16.msra.mxu0 %v9108_v5  ;;  %7752 = vmatpush1.bf16.msra.mxu1 %v9110_v6  ;;  %v886_v5 = vld [vmem:[%s10523_s15 + $0x1030] sm:$0xff]  ;;  %v883_v6 = vld [vmem:[%s10523_s15 + $0x1018] sm:$0xff] }
 0x357   : > { %7425 = vmatprep.subr.bf16.mxu0 %v9117_v31  ;;  %7753 = vmatprep.subr.bf16.mxu1 %v9119_v8  ;;  %v887_v31 = vld [vmem:[%s10523_s15 + $0x1038] sm:$0xff]  ;;  %v9164_v8 = vcombine.low %v874_v58, %v878_v59  ;;  %v9173_v13 = vcombine.high %v882_v4, %v886_v5  ;;  %v926_v52 = vld [vmem:[%s10523_s15 + $0x1170] sm:$0xff] }
 0x358   : > { %v9175_v14 = vcombine.high %v883_v6, %v887_v31  ;;  %v9174_v55 = vcombine.low %v883_v6, %v887_v31  ;;  %v930_v59 = vld [vmem:[%s10523_s15 + $0x1190] sm:$0xff]  ;;  %v939_v31 = vld [vmem:[%s10523_s15 + $0x11d8] sm:$0xff] }
 0x359   : > { %v934_v62 = vld [vmem:[%s10523_s15 + $0x11b0] sm:$0xff] }
 0x35a   : > { %7426 = vmatpush1.bf16.msra.mxu0 %v9116_v16  ;;  %7754 = vmatpush1.bf16.msra.mxu1 %v9118_v17  ;;  %v894_v16 = vld [vmem:[%s10523_s15 + $0x1070] sm:$0xff]  ;;  %v891_v17 = vld [vmem:[%s10523_s15 + $0x1058] sm:$0xff] }
 0x35b   : > { %7427 = vmatprep.subr.bf16.mxu0 %v9125_v3  ;;  %7755 = vmatprep.subr.bf16.mxu1 %v9127_v19  ;;  %v895_v3 = vld [vmem:[%s10523_s15 + $0x1078] sm:$0xff]  ;;  %v9172_v19 = vcombine.low %v882_v4, %v886_v5  ;;  %v9181_v18 = vcombine.high %v890_v15, %v894_v16  ;;  %v938_v5 = vld [vmem:[%s10523_s15 + $0x11d0] sm:$0xff] }
 0x35c   : > { %v9183_v22 = vcombine.high %v891_v17, %v895_v3  ;;  %v9182_v28 = vcombine.low %v891_v17, %v895_v3  ;;  %v942_v6 = vld [vmem:[%s10523_s15 + $0x11f0] sm:$0xff]  ;;  %v947_v3 = vld [vmem:[%s10523_s15 + $0x1218] sm:$0xff] }
 0x35d   : > { %v950_v17 = vld [vmem:[%s10523_s15 + $0x1230] sm:$0xff] }
 0x35e   : > { %7428 = vmatpush1.bf16.msra.mxu0 %v9124_v11  ;;  %7756 = vmatpush1.bf16.msra.mxu1 %v9126_v40  ;;  %v902_v11 = vld [vmem:[%s10523_s15 + $0x10b0] sm:$0xff]  ;;  %v899_v40 = vld [vmem:[%s10523_s15 + $0x1098] sm:$0xff] }
 0x35f   : > { %7429 = vmatprep.subr.bf16.mxu0 %v9133_v26  ;;  %7757 = vmatprep.subr.bf16.mxu1 %v9135_v27  ;;  %v903_v26 = vld [vmem:[%s10523_s15 + $0x10b8] sm:$0xff]  ;;  %v9180_v27 = vcombine.low %v890_v15, %v894_v16  ;;  %v9189_v30 = vcombine.high %v898_v23, %v902_v11  ;;  %v946_v16 = vld [vmem:[%s10523_s15 + $0x1210] sm:$0xff] }
 0x360   : > { %v9191_v32 = vcombine.high %v899_v40, %v903_v26 }
 0x362   : > { %7430 = vmatpush1.bf16.msra.mxu0 %v9132_v1  ;;  %7758 = vmatpush1.bf16.msra.mxu1 %v9134_v50  ;;  %v910_v1 = vld [vmem:[%s10523_s15 + $0x10f0] sm:$0xff]  ;;  %v907_v50 = vld [vmem:[%s10523_s15 + $0x10d8] sm:$0xff] }
 0x363   : > { %7431 = vmatprep.subr.bf16.mxu0 %v9141_v35  ;;  %7759 = vmatprep.subr.bf16.mxu1 %v9143_v36  ;;  %v911_v35 = vld [vmem:[%s10523_s15 + $0x10f8] sm:$0xff]  ;;  %v9190_v36 = vcombine.low %v899_v40, %v903_v26  ;;  %v9197_v37 = vcombine.high %v906_v33, %v910_v1  ;;  %v958_v40 = vld [vmem:[%s10523_s15 + $0x1270] sm:$0xff] }
 0x364   : > { %v9199_v38 = vcombine.high %v907_v50, %v911_v35  ;;  %v955_v26 = vld [vmem:[%s10523_s15 + $0x1258] sm:$0xff] }
 0x366   : > { %7432 = vmatpush1.bf16.msra.mxu0 %v9140_v43  ;;  %7760 = vmatpush1.bf16.msra.mxu1 %v9142_v44  ;;  %v915_v43 = vld [vmem:[%s10523_s15 + $0x1118] sm:$0xff] }
 0x367   : > { %7433 = vmatprep.subr.bf16.mxu0 %v9149_v45  ;;  %7761 = vmatprep.subr.bf16.mxu1 %v9151_v47  ;;  %v919_v44 = vld [vmem:[%s10523_s15 + $0x1138] sm:$0xff]  ;;  %v9196_v45 = vcombine.low %v906_v33, %v910_v1  ;;  %v9205_v47 = vcombine.high %v914_v41, %v918_v42  ;;  %v962_v1 = vld [vmem:[%s10523_s15 + $0x1290] sm:$0xff] }
 0x368   : > { %v9207_v48 = vcombine.high %v915_v43, %v919_v44 }
 0x36a   : > { %7434 = vmatpush1.bf16.msra.mxu0 %v9148_v60  ;;  %7762 = vmatpush1.bf16.msra.mxu1 %v9150_v25  ;;  %v927_v60 = vld [vmem:[%s10523_s15 + $0x1178] sm:$0xff]  ;;  %v9204_v25 = vcombine.low %v914_v41, %v918_v42  ;;  %v970_v42 = vld [vmem:[%s10523_s15 + $0x12d0] sm:$0xff] }
 0x36b   : > { %7435 = vmatprep.subr.bf16.mxu0 %v9157_v56  ;;  %7763 = vmatprep.subr.bf16.mxu1 %v9159_v57  ;;  %v9206_v56 = vcombine.low %v915_v43, %v919_v44  ;;  %v9213_v57 = vcombine.high %v922_v49, %v926_v52  ;;  %v9215_v58 = vcombine.high %v923_v54, %v927_v60  ;;  %v974_v43 = vld [vmem:[%s10523_s15 + $0x12f0] sm:$0xff]  ;;  %v971_v44 = vld [vmem:[%s10523_s15 + $0x12d8] sm:$0xff] }
 0x36e   : > { %7436 = vmatpush1.bf16.msra.mxu0 %v9156_v0  ;;  %7764 = vmatpush1.bf16.msra.mxu1 %v9158_v7  ;;  %v935_v0 = vld [vmem:[%s10523_s15 + $0x11b8] sm:$0xff]  ;;  %v9212_v7 = vcombine.low %v922_v49, %v926_v52  ;;  %v978_v52 = vld [vmem:[%s10523_s15 + $0x1310] sm:$0xff] }
 0x36f   : > { %7437 = vmatprep.subr.bf16.mxu0 %v9165_v10  ;;  %7765 = vmatprep.subr.bf16.mxu1 %v9167_v34  ;;  %v9214_v10 = vcombine.low %v923_v54, %v927_v60  ;;  %v9221_v34 = vcombine.high %v930_v59, %v934_v62  ;;  %v9223_v4 = vcombine.high %v931_v63, %v935_v0  ;;  %v982_v54 = vld [vmem:[%s10523_s15 + $0x1330] sm:$0xff]  ;;  %v979_v60 = vld [vmem:[%s10523_s15 + $0x1318] sm:$0xff] }
 0x372   : > { %7438 = vmatpush1.bf16.msra.mxu0 %v9164_v8  ;;  %7766 = vmatpush1.bf16.msra.mxu1 %v9166_v12  ;;  %v943_v8 = vld [vmem:[%s10523_s15 + $0x11f8] sm:$0xff]  ;;  %v9220_v12 = vcombine.low %v930_v59, %v934_v62  ;;  %v986_v62 = vld [vmem:[%s10523_s15 + $0x1350] sm:$0xff] }
 0x373   : > { %7448 = vmatprep.subr.bf16.mxu0 %v9173_v13  ;;  %7776 = vmatprep.subr.bf16.mxu1 %v9175_v14  ;;  %v9222_v13 = vcombine.low %v931_v63, %v935_v0  ;;  %v9229_v14 = vcombine.high %v938_v5, %v942_v6  ;;  %v9231_v15 = vcombine.high %v939_v31, %v943_v8  ;;  %v990_v63 = vld [vmem:[%s10523_s15 + $0x1370] sm:$0xff]  ;;  %v987_v0 = vld [vmem:[%s10523_s15 + $0x1358] sm:$0xff] }
 0x375   : > { %7440 = vmatmul.mubr.bf16.vlgmr.msra.gmra.mrb[4].mxu0 %v10875_v21  ;;  %7768 = vmatmul.mubr.bf16.vlgmr.msra.gmra.mrb[4].mxu1 %v10875_v21  ;;  %v9188_v21 = vcombine.low %v898_v23, %v902_v11  ;;  %v954_v11 = vld [vmem:[%s10523_s15 + $0x1250] sm:$0xff] }
 0x376   : > { %7449 = vmatpush1.bf16.msra.mxu0 %v9172_v19  ;;  %7777 = vmatpush1.bf16.msra.mxu1 %v9174_v55  ;;  %v951_v19 = vld [vmem:[%s10523_s15 + $0x1238] sm:$0xff]  ;;  %v9228_v55 = vcombine.low %v938_v5, %v942_v6  ;;  %v994_v6 = vld [vmem:[%s10523_s15 + $0x1390] sm:$0xff] }
 0x377   : > { %7450 = vmatprep.subr.bf16.mxu0 %v9181_v18  ;;  %7778 = vmatprep.subr.bf16.mxu1 %v9183_v22  ;;  %v9230_v18 = vcombine.low %v939_v31, %v943_v8  ;;  %v9237_v22 = vcombine.high %v946_v16, %v950_v17  ;;  %v9239_v23 = vcombine.high %v947_v3, %v951_v19  ;;  %v998_v31 = vld [vmem:[%s10523_s15 + $0x13b0] sm:$0xff]  ;;  %v995_v8 = vld [vmem:[%s10523_s15 + $0x1398] sm:$0xff] }
 0x378   : > { %7480 = vmatprep.mubr.bf16.mxu0 %v10882_v61  ;;  %7808 = vmatprep.mubr.bf16.mxu1 %v10882_v61  ;;  %v9198_v61 = vcombine.low %v907_v50, %v911_v35  ;;  %v966_v50 = vld [vmem:[%s10523_s15 + $0x12b0] sm:$0xff]  ;;  %v963_v35 = vld [vmem:[%s10523_s15 + $0x1298] sm:$0xff] }
 0x37a   : > { %7451 = vmatpush1.bf16.msra.mxu0 %v9180_v27  ;;  %7779 = vmatpush1.bf16.msra.mxu1 %v9182_v28  ;;  %v959_v27 = vld [vmem:[%s10523_s15 + $0x1278] sm:$0xff]  ;;  %v9236_v28 = vcombine.low %v946_v16, %v950_v17  ;;  %v1002_v17 = vld [vmem:[%s10523_s15 + $0x13d0] sm:$0xff] }
 0x37b   : > { %7452 = vmatprep.subr.bf16.mxu0 %v9189_v30  ;;  %7780 = vmatprep.subr.bf16.mxu1 %v9191_v32  ;;  %v9238_v30 = vcombine.low %v947_v3, %v951_v19  ;;  %v9245_v32 = vcombine.high %v954_v11, %v958_v40  ;;  %v9247_v33 = vcombine.high %v955_v26, %v959_v27  ;;  %v1006_v3 = vld [vmem:[%s10523_s15 + $0x13f0] sm:$0xff]  ;;  %v1003_v19 = vld [vmem:[%s10523_s15 + $0x13d8] sm:$0xff] }
 0x37e   : > { %7453 = vmatpush1.bf16.msra.mxu0 %v9188_v21  ;;  %7781 = vmatpush1.bf16.msra.mxu1 %v9190_v36  ;;  %v967_v21 = vld [vmem:[%s10523_s15 + $0x12b8] sm:$0xff]  ;;  %v9244_v36 = vcombine.low %v954_v11, %v958_v40  ;;  %v1010_v40 = vld [vmem:[%s10523_s15 + $0x1410] sm:$0xff] }
 0x37f   : > { %7454 = vmatprep.subr.bf16.mxu0 %v9197_v37  ;;  %7782 = vmatprep.subr.bf16.mxu1 %v9199_v38  ;;  %v9246_v37 = vcombine.low %v955_v26, %v959_v27  ;;  %v9253_v38 = vcombine.high %v962_v1, %v966_v50  ;;  %v9255_v41 = vcombine.high %v963_v35, %v967_v21  ;;  %v1014_v26 = vld [vmem:[%s10523_s15 + $0x1430] sm:$0xff]  ;;  %v1011_v27 = vld [vmem:[%s10523_s15 + $0x1418] sm:$0xff] }
 0x382   : > { %7455 = vmatpush1.bf16.msra.mxu0 %v9196_v45  ;;  %7783 = vmatpush1.bf16.msra.mxu1 %v9198_v61  ;;  %v975_v45 = vld [vmem:[%s10523_s15 + $0x12f8] sm:$0xff]  ;;  %v9252_v61 = vcombine.low %v962_v1, %v966_v50  ;;  %v1018_v50 = vld [vmem:[%s10523_s15 + $0x1450] sm:$0xff] }
 0x383   : > { %7456 = vmatprep.subr.bf16.mxu0 %v9205_v47  ;;  %7784 = vmatprep.subr.bf16.mxu1 %v9207_v48  ;;  %v9254_v47 = vcombine.low %v963_v35, %v967_v21  ;;  %v9261_v48 = vcombine.high %v970_v42, %v974_v43  ;;  %v9263_v49 = vcombine.high %v971_v44, %v975_v45  ;;  %v1022_v35 = vld [vmem:[%s10523_s15 + $0x1470] sm:$0xff]  ;;  %v1019_v21 = vld [vmem:[%s10523_s15 + $0x1458] sm:$0xff] }
 0x386   : > { %7457 = vmatpush1.bf16.msra.mxu0 %v9204_v25  ;;  %7785 = vmatpush1.bf16.msra.mxu1 %v9206_v56  ;;  %v983_v25 = vld [vmem:[%s10523_s15 + $0x1338] sm:$0xff]  ;;  %v9260_v56 = vcombine.low %v970_v42, %v974_v43  ;;  %v1026_v43 = vld [vmem:[%s10523_s15 + $0x1490] sm:$0xff] }
 0x387   : > { %7458 = vmatprep.subr.bf16.mxu0 %v9213_v57  ;;  %7786 = vmatprep.subr.bf16.mxu1 %v9215_v58  ;;  %v9262_v57 = vcombine.low %v971_v44, %v975_v45  ;;  %v9269_v58 = vcombine.high %v978_v52, %v982_v54  ;;  %v9271_v59 = vcombine.high %v979_v60, %v983_v25  ;;  %v1030_v44 = vld [vmem:[%s10523_s15 + $0x14b0] sm:$0xff]  ;;  %v1027_v45 = vld [vmem:[%s10523_s15 + $0x1498] sm:$0xff] }
 0x38a   : > { %7459 = vmatpush1.bf16.msra.mxu0 %v9212_v7  ;;  %7787 = vmatpush1.bf16.msra.mxu1 %v9214_v10  ;;  %v991_v7 = vld [vmem:[%s10523_s15 + $0x1378] sm:$0xff]  ;;  %v9268_v10 = vcombine.low %v978_v52, %v982_v54  ;;  %v1034_v54 = vld [vmem:[%s10523_s15 + $0x14d0] sm:$0xff] }
 0x38b   : > { %7460 = vmatprep.subr.bf16.mxu0 %v9221_v34  ;;  %7788 = vmatprep.subr.bf16.mxu1 %v9223_v4  ;;  %v9270_v34 = vcombine.low %v979_v60, %v983_v25  ;;  %v9277_v4 = vcombine.high %v986_v62, %v990_v63  ;;  %v9279_v5 = vcombine.high %v987_v0, %v991_v7  ;;  %v1038_v60 = vld [vmem:[%s10523_s15 + $0x14f0] sm:$0xff]  ;;  %v1035_v25 = vld [vmem:[%s10523_s15 + $0x14d8] sm:$0xff] }
 0x38e   : > { %7461 = vmatpush1.bf16.msra.mxu0 %v9220_v12  ;;  %7789 = vmatpush1.bf16.msra.mxu1 %v9222_v13  ;;  %v999_v12 = vld [vmem:[%s10523_s15 + $0x13b8] sm:$0xff]  ;;  %v9276_v13 = vcombine.low %v986_v62, %v990_v63  ;;  %v1042_v62 = vld [vmem:[%s10523_s15 + $0x1510] sm:$0xff] }
 0x38f   : > { %7462 = vmatprep.subr.bf16.mxu0 %v9229_v14  ;;  %7790 = vmatprep.subr.bf16.mxu1 %v9231_v15  ;;  %v9278_v14 = vcombine.low %v987_v0, %v991_v7  ;;  %v9285_v15 = vcombine.high %v994_v6, %v998_v31  ;;  %v9287_v16 = vcombine.high %v995_v8, %v999_v12  ;;  %v1046_v63 = vld [vmem:[%s10523_s15 + $0x1530] sm:$0xff]  ;;  %v1043_v0 = vld [vmem:[%s10523_s15 + $0x1518] sm:$0xff] }
 0x390   : > { %v1047_v7 = vld [vmem:[%s10523_s15 + $0x1538] sm:$0xff] }
 0x392   : > { %7463 = vmatpush1.bf16.msra.mxu0 %v9228_v55  ;;  %7791 = vmatpush1.bf16.msra.mxu1 %v9230_v18  ;;  %v1007_v55 = vld [vmem:[%s10523_s15 + $0x13f8] sm:$0xff]  ;;  %v9284_v18 = vcombine.low %v994_v6, %v998_v31  ;;  %v1054_v6 = vld [vmem:[%s10523_s15 + $0x1570] sm:$0xff] }
 0x393   : > { %7464 = vmatprep.subr.bf16.mxu0 %v9237_v22  ;;  %7792 = vmatprep.subr.bf16.mxu1 %v9239_v23  ;;  %v9286_v22 = vcombine.low %v995_v8, %v999_v12  ;;  %v9293_v23 = vcombine.high %v1002_v17, %v1006_v3  ;;  %v9295_v11 = vcombine.high %v1003_v19, %v1007_v55  ;;  %v1051_v31 = vld [vmem:[%s10523_s15 + $0x1558] sm:$0xff] }
 0x394   : > { %v1055_v8 = vld [vmem:[%s10523_s15 + $0x1578] sm:$0xff]  ;;  %v9332_v12 = vcombine.low %v1042_v62, %v1046_v63 }
 0x396   : > { %7465 = vmatpush1.bf16.msra.mxu0 %v9236_v28  ;;  %7793 = vmatpush1.bf16.msra.mxu1 %v9238_v30  ;;  %v1015_v28 = vld [vmem:[%s10523_s15 + $0x1438] sm:$0xff]  ;;  %v9292_v30 = vcombine.low %v1002_v17, %v1006_v3  ;;  %v1062_v17 = vld [vmem:[%s10523_s15 + $0x15b0] sm:$0xff] }
 0x397   : > { %7466 = vmatprep.subr.bf16.mxu0 %v9245_v32  ;;  %7794 = vmatprep.subr.bf16.mxu1 %v9247_v33  ;;  %v9294_v32 = vcombine.low %v1003_v19, %v1007_v55  ;;  %v9301_v33 = vcombine.high %v1010_v40, %v1014_v26  ;;  %v9303_v1 = vcombine.high %v1011_v27, %v1015_v28  ;;  %v1059_v3 = vld [vmem:[%s10523_s15 + $0x1598] sm:$0xff] }
 0x398   : > { %v1063_v19 = vld [vmem:[%s10523_s15 + $0x15b8] sm:$0xff] }
 0x39a   : > { %7467 = vmatpush1.bf16.msra.mxu0 %v9244_v36  ;;  %7795 = vmatpush1.bf16.msra.mxu1 %v9246_v37  ;;  %v1023_v36 = vld [vmem:[%s10523_s15 + $0x1478] sm:$0xff]  ;;  %v9300_v37 = vcombine.low %v1010_v40, %v1014_v26  ;;  %v1070_v40 = vld [vmem:[%s10523_s15 + $0x15f0] sm:$0xff] }
 0x39b   : > { %7468 = vmatprep.subr.bf16.mxu0 %v9253_v38  ;;  %7796 = vmatprep.subr.bf16.mxu1 %v9255_v41  ;;  %v9302_v38 = vcombine.low %v1011_v27, %v1015_v28  ;;  %v9309_v41 = vcombine.high %v1018_v50, %v1022_v35  ;;  %v9311_v42 = vcombine.high %v1019_v21, %v1023_v36  ;;  %v1067_v26 = vld [vmem:[%s10523_s15 + $0x15d8] sm:$0xff] }
 0x39c   : > { %v1071_v27 = vld [vmem:[%s10523_s15 + $0x15f8] sm:$0xff] }
 0x39e   : > { %7469 = vmatpush1.bf16.msra.mxu0 %v9252_v61  ;;  %7797 = vmatpush1.bf16.msra.mxu1 %v9254_v47  ;;  %v1031_v61 = vld [vmem:[%s10523_s15 + $0x14b8] sm:$0xff]  ;;  %v9308_v47 = vcombine.low %v1018_v50, %v1022_v35  ;;  %v1078_v50 = vld [vmem:[%s10523_s15 + $0x1630] sm:$0xff] }
 0x39f   : > { %7470 = vmatprep.subr.bf16.mxu0 %v9261_v48  ;;  %7798 = vmatprep.subr.bf16.mxu1 %v9263_v49  ;;  %v9310_v48 = vcombine.low %v1019_v21, %v1023_v36  ;;  %v9317_v49 = vcombine.high %v1026_v43, %v1030_v44  ;;  %v9319_v52 = vcombine.high %v1027_v45, %v1031_v61  ;;  %v1075_v35 = vld [vmem:[%s10523_s15 + $0x1618] sm:$0xff] }
 0x3a0   : > { %v1079_v21 = vld [vmem:[%s10523_s15 + $0x1638] sm:$0xff] }
 0x3a2   : > { %7471 = vmatpush1.bf16.msra.mxu0 %v9260_v56  ;;  %7799 = vmatpush1.bf16.msra.mxu1 %v9262_v57  ;;  %v1039_v56 = vld [vmem:[%s10523_s15 + $0x14f8] sm:$0xff]  ;;  %v9318_v57 = vcombine.low %v1027_v45, %v1031_v61 }
 0x3a3   : > { %7472 = vmatprep.subr.bf16.mxu0 %v9269_v58  ;;  %7800 = vmatprep.subr.bf16.mxu1 %v9271_v59  ;;  %v9325_v58 = vcombine.high %v1034_v54, %v1038_v60  ;;  %v9327_v59 = vcombine.high %v1035_v25, %v1039_v56  ;;  %v1087_v45 = vld [vmem:[%s10523_s15 + $0x1678] sm:$0xff] }
 0x3a6   : > { %7473 = vmatpush1.bf16.msra.mxu0 %v9268_v10  ;;  %7801 = vmatpush1.bf16.msra.mxu1 %v9270_v34  ;;  %v9324_v10 = vcombine.low %v1034_v54, %v1038_v60  ;;  %v9333_v34 = vcombine.high %v1042_v62, %v1046_v63  ;;  %v1094_v54 = vld [vmem:[%s10523_s15 + $0x16b0] sm:$0xff]  ;;  %v1091_v60 = vld [vmem:[%s10523_s15 + $0x1698] sm:$0xff] }
 0x3a7   : > { %7474 = vmatprep.subr.bf16.mxu0 %v9277_v4  ;;  %7802 = vmatprep.subr.bf16.mxu1 %v9279_v5  ;;  %v9335_v4 = vcombine.high %v1043_v0, %v1047_v7  ;;  %v1050_v5 = vld [vmem:[%s10523_s15 + $0x1550] sm:$0xff]  ;;  %v1099_v63 = vld [vmem:[%s10523_s15 + $0x16d8] sm:$0xff] }
 0x3a8   : > { %v9340_v55 = vcombine.low %v1050_v5, %v1054_v6  ;;  %v1102_v62 = vld [vmem:[%s10523_s15 + $0x16f0] sm:$0xff] }
 0x3aa   : > { %7475 = vmatpush1.bf16.msra.mxu0 %v9276_v13  ;;  %7803 = vmatpush1.bf16.msra.mxu1 %v9278_v14  ;;  %v9334_v13 = vcombine.low %v1043_v0, %v1047_v7  ;;  %v9341_v14 = vcombine.high %v1050_v5, %v1054_v6  ;;  %v1103_v0 = vld [vmem:[%s10523_s15 + $0x16f8] sm:$0xff]  ;;  %v1110_v5 = vld [vmem:[%s10523_s15 + $0x1730] sm:$0xff] }
 0x3ab   : > { %7476 = vmatprep.subr.bf16.mxu0 %v9285_v15  ;;  %7804 = vmatprep.subr.bf16.mxu1 %v9287_v16  ;;  %v9343_v15 = vcombine.high %v1051_v31, %v1055_v8  ;;  %v1058_v16 = vld [vmem:[%s10523_s15 + $0x1590] sm:$0xff]  ;;  %v1107_v6 = vld [vmem:[%s10523_s15 + $0x1718] sm:$0xff] }
 0x3ac   : > { %v9348_v28 = vcombine.low %v1058_v16, %v1062_v17 }
 0x3ae   : > { %7477 = vmatpush1.bf16.msra.mxu0 %v9284_v18  ;;  %7805 = vmatpush1.bf16.msra.mxu1 %v9286_v22  ;;  %v9342_v18 = vcombine.low %v1051_v31, %v1055_v8  ;;  %v9349_v22 = vcombine.high %v1058_v16, %v1062_v17  ;;  %v1111_v31 = vld [vmem:[%s10523_s15 + $0x1738] sm:$0xff]  ;;  %v1118_v16 = vld [vmem:[%s10523_s15 + $0x1770] sm:$0xff] }
 0x3af   : > { %7478 = vmatprep.subr.bf16.mxu0 %v9293_v23  ;;  %7806 = vmatprep.subr.bf16.mxu1 %v9295_v11  ;;  %v9351_v23 = vcombine.high %v1059_v3, %v1063_v19  ;;  %v1066_v11 = vld [vmem:[%s10523_s15 + $0x15d0] sm:$0xff]  ;;  %v1115_v17 = vld [vmem:[%s10523_s15 + $0x1758] sm:$0xff] }
 0x3b0   : > { %v9356_v36 = vcombine.low %v1066_v11, %v1070_v40 }
 0x3b2   : > { %7479 = vmatpush1.bf16.msra.mxu0 %v9292_v30  ;;  %7807 = vmatpush1.bf16.msra.mxu1 %v9294_v32  ;;  %v9350_v30 = vcombine.low %v1059_v3, %v1063_v19  ;;  %v9357_v32 = vcombine.high %v1066_v11, %v1070_v40  ;;  %v1119_v3 = vld [vmem:[%s10523_s15 + $0x1778] sm:$0xff]  ;;  %v1126_v11 = vld [vmem:[%s10523_s15 + $0x17b0] sm:$0xff] }
 0x3b3   : > { %7489 = vmatprep.subr.bf16.mxu0 %v9301_v33  ;;  %7817 = vmatprep.subr.bf16.mxu1 %v9303_v1  ;;  %v9359_v33 = vcombine.high %v1067_v26, %v1071_v27  ;;  %v1074_v1 = vld [vmem:[%s10523_s15 + $0x1610] sm:$0xff]  ;;  %v1123_v40 = vld [vmem:[%s10523_s15 + $0x1798] sm:$0xff] }
 0x3b4   : > { %v9364_v61 = vcombine.low %v1074_v1, %v1078_v50 }
 0x3b5   : > { %7481 = vmatmul.mubr.bf16.vlgmr.msra.gmra.mrb[4].mxu0 %v10950_v53  ;;  %7809 = vmatmul.mubr.bf16.vlgmr.msra.gmra.mrb[4].mxu1 %v10950_v53  ;;  %v9316_v53 = vcombine.low %v1026_v43, %v1030_v44  ;;  %v1086_v43 = vld [vmem:[%s10523_s15 + $0x1670] sm:$0xff]  ;;  %v1083_v44 = vld [vmem:[%s10523_s15 + $0x1658] sm:$0xff] }
 0x3b6   : > { %7490 = vmatpush1.bf16.msra.mxu0 %v9300_v37  ;;  %7818 = vmatpush1.bf16.msra.mxu1 %v9302_v38  ;;  %v9358_v37 = vcombine.low %v1067_v26, %v1071_v27  ;;  %v9365_v38 = vcombine.high %v1074_v1, %v1078_v50  ;;  %v1127_v26 = vld [vmem:[%s10523_s15 + $0x17b8] sm:$0xff]  ;;  %v1134_v1 = vld [vmem:[%s10523_s15 + $0x17f0] sm:$0xff] }
 0x3b7   : > { %7491 = vmatprep.subr.bf16.mxu0 %v9309_v41  ;;  %7819 = vmatprep.subr.bf16.mxu1 %v9311_v42  ;;  %v9367_v41 = vcombine.high %v1075_v35, %v1079_v21  ;;  %v1082_v42 = vld [vmem:[%s10523_s15 + $0x1650] sm:$0xff]  ;;  %v1131_v50 = vld [vmem:[%s10523_s15 + $0x17d8] sm:$0xff] }
 0x3b8   : > { %7521 = vmatprep.mubr.bf16.mxu0 %v10958_v2  ;;  %7849 = vmatprep.mubr.bf16.mxu1 %v10958_v2  ;;  %v9326_v2 = vcombine.low %v1035_v25, %v1039_v56  ;;  %v1095_v25 = vld [vmem:[%s10523_s15 + $0x16b8] sm:$0xff]  ;;  %v9372_v56 = vcombine.low %v1082_v42, %v1086_v43 }
 0x3ba   : > { %7492 = vmatpush1.bf16.msra.mxu0 %v9308_v47  ;;  %7820 = vmatpush1.bf16.msra.mxu1 %v9310_v48  ;;  %v9366_v47 = vcombine.low %v1075_v35, %v1079_v21  ;;  %v9373_v48 = vcombine.high %v1082_v42, %v1086_v43  ;;  %v1135_v35 = vld [vmem:[%s10523_s15 + $0x17f8] sm:$0xff]  ;;  %v1142_v42 = vld [vmem:[%s10523_s15 + $0x1830] sm:$0xff] }
 0x3bb   : > { %7493 = vmatprep.subr.bf16.mxu0 %v9317_v49  ;;  %7821 = vmatprep.subr.bf16.mxu1 %v9319_v52  ;;  %v9375_v49 = vcombine.high %v1083_v44, %v1087_v45  ;;  %v1090_v52 = vld [vmem:[%s10523_s15 + $0x1690] sm:$0xff]  ;;  %v1139_v43 = vld [vmem:[%s10523_s15 + $0x1818] sm:$0xff] }
 0x3bc   : > { %v9380_v7 = vcombine.low %v1090_v52, %v1094_v54 }
 0x3be   : > { %7494 = vmatpush1.bf16.msra.mxu0 %v9316_v53  ;;  %7822 = vmatpush1.bf16.msra.mxu1 %v9318_v57  ;;  %v9374_v53 = vcombine.low %v1083_v44, %v1087_v45  ;;  %v9381_v57 = vcombine.high %v1090_v52, %v1094_v54  ;;  %v1143_v44 = vld [vmem:[%s10523_s15 + $0x1838] sm:$0xff]  ;;  %v1150_v52 = vld [vmem:[%s10523_s15 + $0x1870] sm:$0xff] }
 0x3bf   : > { %7495 = vmatprep.subr.bf16.mxu0 %v9325_v58  ;;  %7823 = vmatprep.subr.bf16.mxu1 %v9327_v59  ;;  %v9383_v58 = vcombine.high %v1091_v60, %v1095_v25  ;;  %v1098_v59 = vld [vmem:[%s10523_s15 + $0x16d0] sm:$0xff]  ;;  %v1147_v54 = vld [vmem:[%s10523_s15 + $0x1858] sm:$0xff] }
 0x3c0   : > { %v9388_v8 = vcombine.low %v1098_v59, %v1102_v62 }
 0x3c2   : > { %7496 = vmatpush1.bf16.msra.mxu0 %v9324_v10  ;;  %7824 = vmatpush1.bf16.msra.mxu1 %v9326_v2  ;;  %v9382_v10 = vcombine.low %v1091_v60, %v1095_v25  ;;  %v9389_v2 = vcombine.high %v1098_v59, %v1102_v62  ;;  %v1151_v60 = vld [vmem:[%s10523_s15 + $0x1878] sm:$0xff]  ;;  %v1158_v59 = vld [vmem:[%s10523_s15 + $0x18b0] sm:$0xff] }
 0x3c3   : > { %7497 = vmatprep.subr.bf16.mxu0 %v9333_v34  ;;  %7825 = vmatprep.subr.bf16.mxu1 %v9335_v4  ;;  %v9391_v34 = vcombine.high %v1099_v63, %v1103_v0  ;;  %v1106_v4 = vld [vmem:[%s10523_s15 + $0x1710] sm:$0xff]  ;;  %v1155_v62 = vld [vmem:[%s10523_s15 + $0x1898] sm:$0xff] }
 0x3c4   : > { %v9396_v19 = vcombine.low %v1106_v4, %v1110_v5 }
 0x3c6   : > { %7498 = vmatpush1.bf16.msra.mxu0 %v9332_v12  ;;  %7826 = vmatpush1.bf16.msra.mxu1 %v9334_v13  ;;  %v9390_v12 = vcombine.low %v1099_v63, %v1103_v0  ;;  %v9397_v13 = vcombine.high %v1106_v4, %v1110_v5  ;;  %v1159_v63 = vld [vmem:[%s10523_s15 + $0x18b8] sm:$0xff]  ;;  %v1166_v4 = vld [vmem:[%s10523_s15 + $0x18f0] sm:$0xff] }
 0x3c7   : > { %7499 = vmatprep.subr.bf16.mxu0 %v9341_v14  ;;  %7827 = vmatprep.subr.bf16.mxu1 %v9343_v15  ;;  %v9399_v14 = vcombine.high %v1107_v6, %v1111_v31  ;;  %v1114_v15 = vld [vmem:[%s10523_s15 + $0x1750] sm:$0xff]  ;;  %v1163_v5 = vld [vmem:[%s10523_s15 + $0x18d8] sm:$0xff] }
 0x3c8   : > { %v9404_v27 = vcombine.low %v1114_v15, %v1118_v16 }
 0x3ca   : > { %7500 = vmatpush1.bf16.msra.mxu0 %v9340_v55  ;;  %7828 = vmatpush1.bf16.msra.mxu1 %v9342_v18  ;;  %v9398_v55 = vcombine.low %v1107_v6, %v1111_v31  ;;  %v9405_v18 = vcombine.high %v1114_v15, %v1118_v16  ;;  %v1167_v6 = vld [vmem:[%s10523_s15 + $0x18f8] sm:$0xff]  ;;  %v9446_v31 = vcombine.low %v1155_v62, %v1159_v63 }
 0x3cb   : > { %7501 = vmatprep.subr.bf16.mxu0 %v9349_v22  ;;  %7829 = vmatprep.subr.bf16.mxu1 %v9351_v23  ;;  %v9407_v22 = vcombine.high %v1115_v17, %v1119_v3  ;;  %v1122_v23 = vld [vmem:[%s10523_s15 + $0x1790] sm:$0xff]  ;;  %v1171_v15 = vld [vmem:[%s10523_s15 + $0x1918] sm:$0xff] }
 0x3cc   : > { %v9412_v21 = vcombine.low %v1122_v23, %v1126_v11  ;;  %v1175_v16 = vld [vmem:[%s10523_s15 + $0x1938] sm:$0xff] }
 0x3ce   : > { %7502 = vmatpush1.bf16.msra.mxu0 %v9348_v28  ;;  %7830 = vmatpush1.bf16.msra.mxu1 %v9350_v30  ;;  %v9406_v28 = vcombine.low %v1115_v17, %v1119_v3  ;;  %v9413_v30 = vcombine.high %v1122_v23, %v1126_v11  ;;  %v1183_v23 = vld [vmem:[%s10523_s15 + $0x1978] sm:$0xff] }
 0x3cf   : > { %7503 = vmatprep.subr.bf16.mxu0 %v9357_v32  ;;  %7831 = vmatprep.subr.bf16.mxu1 %v9359_v33  ;;  %v9415_v32 = vcombine.high %v1123_v40, %v1127_v26  ;;  %v1130_v33 = vld [vmem:[%s10523_s15 + $0x17d0] sm:$0xff] }
 0x3d0   : > { %v9420_v45 = vcombine.low %v1130_v33, %v1134_v1 }
 0x3d2   : > { %7504 = vmatpush1.bf16.msra.mxu0 %v9356_v36  ;;  %7832 = vmatpush1.bf16.msra.mxu1 %v9358_v37  ;;  %v9414_v36 = vcombine.low %v1123_v40, %v1127_v26  ;;  %v9421_v37 = vcombine.high %v1130_v33, %v1134_v1  ;;  %v9462_v40 = vcombine.low %v1171_v15, %v1175_v16  ;;  %v1191_v33 = vld [vmem:[%s10523_s15 + $0x19b8] sm:$0xff] }
 0x3d3   : > { %7505 = vmatprep.subr.bf16.mxu0 %v9365_v38  ;;  %7833 = vmatprep.subr.bf16.mxu1 %v9367_v41  ;;  %v9423_v38 = vcombine.high %v1131_v50, %v1135_v35  ;;  %v1138_v41 = vld [vmem:[%s10523_s15 + $0x1810] sm:$0xff] }
 0x3d4   : > { %v9428_v25 = vcombine.low %v1138_v41, %v1142_v42 }
 0x3d6   : > { %7506 = vmatpush1.bf16.msra.mxu0 %v9364_v61  ;;  %7834 = vmatpush1.bf16.msra.mxu1 %v9366_v47  ;;  %v9422_v61 = vcombine.low %v1131_v50, %v1135_v35  ;;  %v9429_v47 = vcombine.high %v1138_v41, %v1142_v42  ;;  %v1199_v41 = vld [vmem:[%s10523_s15 + $0x19f8] sm:$0xff] }
 0x3d7   : > { %7507 = vmatprep.subr.bf16.mxu0 %v9373_v48  ;;  %7835 = vmatprep.subr.bf16.mxu1 %v9375_v49  ;;  %v9431_v48 = vcombine.high %v1139_v43, %v1143_v44  ;;  %v1146_v49 = vld [vmem:[%s10523_s15 + $0x1850] sm:$0xff] }
 0x3d8   : > { %v9436_v0 = vcombine.low %v1146_v49, %v1150_v52 }
 0x3da   : > { %7508 = vmatpush1.bf16.msra.mxu0 %v9372_v56  ;;  %7836 = vmatpush1.bf16.msra.mxu1 %v9374_v53  ;;  %v9430_v56 = vcombine.low %v1139_v43, %v1143_v44  ;;  %v9437_v53 = vcombine.high %v1146_v49, %v1150_v52  ;;  %v1207_v49 = vld [vmem:[%s10523_s15 + $0x1a38] sm:$0xff] }
 0x3db   : > { %7509 = vmatprep.subr.bf16.mxu0 %v9381_v57  ;;  %7837 = vmatprep.subr.bf16.mxu1 %v9383_v58  ;;  %v9439_v57 = vcombine.high %v1147_v54, %v1151_v60  ;;  %v1154_v58 = vld [vmem:[%s10523_s15 + $0x1890] sm:$0xff] }
 0x3de   : > { %7510 = vmatpush1.bf16.msra.mxu0 %v9380_v7  ;;  %7838 = vmatpush1.bf16.msra.mxu1 %v9382_v10  ;;  %v9438_v7 = vcombine.low %v1147_v54, %v1151_v60  ;;  %v9445_v10 = vcombine.high %v1154_v58, %v1158_v59 }
 0x3df   : > { %7511 = vmatprep.subr.bf16.mxu0 %v9389_v2  ;;  %7839 = vmatprep.subr.bf16.mxu1 %v9391_v34  ;;  %v9447_v2 = vcombine.high %v1155_v62, %v1159_v63  ;;  %v1162_v34 = vld [vmem:[%s10523_s15 + $0x18d0] sm:$0xff] }
 0x3e0   : > { %v9452_v17 = vcombine.low %v1162_v34, %v1166_v4 }
 0x3e2   : > { %7512 = vmatpush1.bf16.msra.mxu0 %v9388_v8  ;;  %7840 = vmatpush1.bf16.msra.mxu1 %v9390_v12  ;;  %v9453_v8 = vcombine.high %v1162_v34, %v1166_v4  ;;  %v9455_v12 = vcombine.high %v1163_v5, %v1167_v6  ;;  %v1223_v34 = vld [vmem:[%s10523_s15 + $0x1ab8] sm:$0xff] }
 0x3e3   : > { %7513 = vmatprep.subr.bf16.mxu0 %v9397_v13  ;;  %7841 = vmatprep.subr.bf16.mxu1 %v9399_v14  ;;  %v1170_v13 = vld [vmem:[%s10523_s15 + $0x1910] sm:$0xff] }
 0x3e4   : > { %v1174_v14 = vld [vmem:[%s10523_s15 + $0x1930] sm:$0xff] }
 0x3e5   : > { %v9461_v3 = vcombine.high %v1170_v13, %v1174_v14  ;;  %v9460_v11 = vcombine.low %v1170_v13, %v1174_v14  ;;  %v1231_v13 = vld [vmem:[%s10523_s15 + $0x1af8] sm:$0xff] }
 0x3e6   : > { %7514 = vmatpush1.bf16.msra.mxu0 %v9396_v19  ;;  %7842 = vmatpush1.bf16.msra.mxu1 %v9398_v55  ;;  %v9463_v19 = vcombine.high %v1171_v15, %v1175_v16  ;;  %v1178_v55 = vld [vmem:[%s10523_s15 + $0x1950] sm:$0xff] }
 0x3e7   : > { %7515 = vmatprep.subr.bf16.mxu0 %v9405_v18  ;;  %7843 = vmatprep.subr.bf16.mxu1 %v9407_v22  ;;  %v1182_v18 = vld [vmem:[%s10523_s15 + $0x1970] sm:$0xff]  ;;  %v1179_v22 = vld [vmem:[%s10523_s15 + $0x1958] sm:$0xff] }
 0x3e8   : > { %v9469_v26 = vcombine.high %v1178_v55, %v1182_v18  ;;  %v9468_v1 = vcombine.low %v1178_v55, %v1182_v18  ;;  %v9470_v50 = vcombine.low %v1179_v22, %v1183_v23  ;;  %v1239_v55 = vld [vmem:[%s10523_s15 + $0x1b38] sm:$0xff] }
 0x3ea   : > { %7516 = vmatpush1.bf16.msra.mxu0 %v9404_v27  ;;  %7844 = vmatpush1.bf16.msra.mxu1 %v9406_v28  ;;  %v9471_v27 = vcombine.high %v1179_v22, %v1183_v23  ;;  %v1186_v28 = vld [vmem:[%s10523_s15 + $0x1990] sm:$0xff] }
 0x3eb   : > { %7517 = vmatprep.subr.bf16.mxu0 %v9413_v30  ;;  %7845 = vmatprep.subr.bf16.mxu1 %v9415_v32  ;;  %v1190_v30 = vld [vmem:[%s10523_s15 + $0x19b0] sm:$0xff]  ;;  %v1187_v32 = vld [vmem:[%s10523_s15 + $0x1998] sm:$0xff] }
 0x3ec   : > { %v9477_v35 = vcombine.high %v1186_v28, %v1190_v30  ;;  %v9476_v42 = vcombine.low %v1186_v28, %v1190_v30  ;;  %v9478_v43 = vcombine.low %v1187_v32, %v1191_v33  ;;  %v1247_v28 = vld [vmem:[%s10523_s15 + $0x1b78] sm:$0xff] }
 0x3ee   : > { %7518 = vmatpush1.bf16.msra.mxu0 %v9412_v21  ;;  %7846 = vmatpush1.bf16.msra.mxu1 %v9414_v36  ;;  %v9479_v21 = vcombine.high %v1187_v32, %v1191_v33  ;;  %v1194_v36 = vld [vmem:[%s10523_s15 + $0x19d0] sm:$0xff] }
 0x3ef   : > { %7519 = vmatprep.subr.bf16.mxu0 %v9421_v37  ;;  %7847 = vmatprep.subr.bf16.mxu1 %v9423_v38  ;;  %v1198_v37 = vld [vmem:[%s10523_s15 + $0x19f0] sm:$0xff]  ;;  %v1195_v38 = vld [vmem:[%s10523_s15 + $0x19d8] sm:$0xff] }
 0x3f0   : > { %v9485_v44 = vcombine.high %v1194_v36, %v1198_v37  ;;  %v9484_v52 = vcombine.low %v1194_v36, %v1198_v37  ;;  %v9486_v54 = vcombine.low %v1195_v38, %v1199_v41  ;;  %v1255_v36 = vld [vmem:[%s10523_s15 + $0x1bb8] sm:$0xff] }
 0x3f2   : > { %7520 = vmatpush1.bf16.msra.mxu0 %v9420_v45  ;;  %7848 = vmatpush1.bf16.msra.mxu1 %v9422_v61  ;;  %v9487_v45 = vcombine.high %v1195_v38, %v1199_v41  ;;  %v1202_v61 = vld [vmem:[%s10523_s15 + $0x1a10] sm:$0xff] }
 0x3f3   : > { %7530 = vmatprep.subr.bf16.mxu0 %v9429_v47  ;;  %7858 = vmatprep.subr.bf16.mxu1 %v9431_v48  ;;  %v1206_v47 = vld [vmem:[%s10523_s15 + $0x1a30] sm:$0xff]  ;;  %v1203_v48 = vld [vmem:[%s10523_s15 + $0x1a18] sm:$0xff] }
 0x3f4   : > { %v9493_v60 = vcombine.high %v1202_v61, %v1206_v47  ;;  %v9494_v62 = vcombine.low %v1203_v48, %v1207_v49 }
 0x3f5   : > { %7522 = vmatmul.mubr.bf16.vlgmr.msra.gmra.mrb[4].mxu0 %v11033_v29  ;;  %7850 = vmatmul.mubr.bf16.vlgmr.msra.gmra.mrb[4].mxu1 %v11033_v29  ;;  %v9444_v29 = vcombine.low %v1154_v58, %v1158_v59  ;;  %v1215_v58 = vld [vmem:[%s10523_s15 + $0x1a78] sm:$0xff]  ;;  %v9492_v59 = vcombine.low %v1202_v61, %v1206_v47 }
 0x3f6   : > { %7531 = vmatpush1.bf16.msra.mxu0 %v9428_v25  ;;  %7859 = vmatpush1.bf16.msra.mxu1 %v9430_v56  ;;  %v9495_v25 = vcombine.high %v1203_v48, %v1207_v49  ;;  %v1210_v56 = vld [vmem:[%s10523_s15 + $0x1a50] sm:$0xff]  ;;  %v1263_v61 = vld [vmem:[%s10523_s15 + $0x1bf8] sm:$0xff] }
 0x3f7   : > { %7532 = vmatprep.subr.bf16.mxu0 %v9437_v53  ;;  %7860 = vmatprep.subr.bf16.mxu1 %v9439_v57  ;;  %v1214_v53 = vld [vmem:[%s10523_s15 + $0x1a70] sm:$0xff]  ;;  %v1211_v57 = vld [vmem:[%s10523_s15 + $0x1a58] sm:$0xff] }
 0x3f8   : > { %7562 = vmatprep.mubr.bf16.mxu0 %v11040_v39  ;;  %7890 = vmatprep.mubr.bf16.mxu1 %v11040_v39  ;;  %v9454_v39 = vcombine.low %v1163_v5, %v1167_v6  ;;  %v9501_v63 = vcombine.high %v1210_v56, %v1214_v53  ;;  %v9500_v4 = vcombine.low %v1210_v56, %v1214_v53  ;;  %v1271_v56 = vld [vmem:[%s10523_s15 + $0x1c38] sm:$0xff] }
 0x3f9   : > { %v9502_v5 = vcombine.low %v1211_v57, %v1215_v58 }
 0x3fa   : > { %7533 = vmatpush1.bf16.msra.mxu0 %v9436_v0  ;;  %7861 = vmatpush1.bf16.msra.mxu1 %v9438_v7  ;;  %v9503_v0 = vcombine.high %v1211_v57, %v1215_v58  ;;  %v1218_v7 = vld [vmem:[%s10523_s15 + $0x1a90] sm:$0xff] }
 0x3fb   : > { %7534 = vmatprep.subr.bf16.mxu0 %v9445_v10  ;;  %7862 = vmatprep.subr.bf16.mxu1 %v9447_v2  ;;  %v1222_v10 = vld [vmem:[%s10523_s15 + $0x1ab0] sm:$0xff]  ;;  %v1219_v2 = vld [vmem:[%s10523_s15 + $0x1a98] sm:$0xff] }
 0x3fc   : > { %v9509_v6 = vcombine.high %v1218_v7, %v1222_v10  ;;  %v9508_v14 = vcombine.low %v1218_v7, %v1222_v10  ;;  %v9510_v15 = vcombine.low %v1219_v2, %v1223_v34  ;;  %v1279_v7 = vld [vmem:[%s10523_s15 + $0x1c78] sm:$0xff] }
 0x3fe   : > { %7535 = vmatpush1.bf16.msra.mxu0 %v9444_v29  ;;  %7863 = vmatpush1.bf16.msra.mxu1 %v9446_v31  ;;  %v9511_v29 = vcombine.high %v1219_v2, %v1223_v34  ;;  %v1226_v31 = vld [vmem:[%s10523_s15 + $0x1ad0] sm:$0xff] }
 0x3ff   : > { %7536 = vmatprep.subr.bf16.mxu0 %v9453_v8  ;;  %7864 = vmatprep.subr.bf16.mxu1 %v9455_v12  ;;  %v1230_v8 = vld [vmem:[%s10523_s15 + $0x1af0] sm:$0xff]  ;;  %v1227_v12 = vld [vmem:[%s10523_s15 + $0x1ad8] sm:$0xff] }
 0x400   : > { %v9517_v16 = vcombine.high %v1226_v31, %v1230_v8  ;;  %v9516_v18 = vcombine.low %v1226_v31, %v1230_v8  ;;  %v9518_v22 = vcombine.low %v1227_v12, %v1231_v13  ;;  %v1287_v31 = vld [vmem:[%s10523_s15 + $0x1cb8] sm:$0xff] }
 0x402   : > { %7537 = vmatpush1.bf16.msra.mxu0 %v9452_v17  ;;  %7865 = vmatpush1.bf16.msra.mxu1 %v9454_v39  ;;  %v9519_v17 = vcombine.high %v1227_v12, %v1231_v13  ;;  %v1234_v39 = vld [vmem:[%s10523_s15 + $0x1b10] sm:$0xff] }
 0x403   : > { %7538 = vmatprep.subr.bf16.mxu0 %v9461_v3  ;;  %7866 = vmatprep.subr.bf16.mxu1 %v9463_v19  ;;  %v1238_v3 = vld [vmem:[%s10523_s15 + $0x1b30] sm:$0xff]  ;;  %v1235_v19 = vld [vmem:[%s10523_s15 + $0x1b18] sm:$0xff] }
 0x404   : > { %v9525_v23 = vcombine.high %v1234_v39, %v1238_v3  ;;  %v9524_v30 = vcombine.low %v1234_v39, %v1238_v3  ;;  %v9526_v32 = vcombine.low %v1235_v19, %v1239_v55  ;;  %v1295_v39 = vld [vmem:[%s10523_s15 + $0x1cf8] sm:$0xff] }
 0x406   : > { %7539 = vmatpush1.bf16.msra.mxu0 %v9460_v11  ;;  %7867 = vmatpush1.bf16.msra.mxu1 %v9462_v40  ;;  %v9527_v11 = vcombine.high %v1235_v19, %v1239_v55  ;;  %v1242_v40 = vld [vmem:[%s10523_s15 + $0x1b50] sm:$0xff] }
 0x407   : > { %7540 = vmatprep.subr.bf16.mxu0 %v9469_v26  ;;  %7868 = vmatprep.subr.bf16.mxu1 %v9471_v27  ;;  %v1246_v26 = vld [vmem:[%s10523_s15 + $0x1b70] sm:$0xff]  ;;  %v1243_v27 = vld [vmem:[%s10523_s15 + $0x1b58] sm:$0xff] }
 0x408   : > { %v9533_v33 = vcombine.high %v1242_v40, %v1246_v26  ;;  %v9532_v37 = vcombine.low %v1242_v40, %v1246_v26  ;;  %v9534_v38 = vcombine.low %v1243_v27, %v1247_v28 }
 0x40a   : > { %7541 = vmatpush1.bf16.msra.mxu0 %v9468_v1  ;;  %7869 = vmatpush1.bf16.msra.mxu1 %v9470_v50  ;;  %v9535_v1 = vcombine.high %v1243_v27, %v1247_v28  ;;  %v1250_v50 = vld [vmem:[%s10523_s15 + $0x1b90] sm:$0xff] }
 0x40b   : > { %7542 = vmatprep.subr.bf16.mxu0 %v9477_v35  ;;  %7870 = vmatprep.subr.bf16.mxu1 %v9479_v21  ;;  %v1254_v35 = vld [vmem:[%s10523_s15 + $0x1bb0] sm:$0xff]  ;;  %v1251_v21 = vld [vmem:[%s10523_s15 + $0x1b98] sm:$0xff] }
 0x40c   : > { %v9541_v41 = vcombine.high %v1250_v50, %v1254_v35  ;;  %v9540_v47 = vcombine.low %v1250_v50, %v1254_v35  ;;  %v9542_v48 = vcombine.low %v1251_v21, %v1255_v36  ;;  %v1306_v28 = vld [vmem:[%s10523_s15 + $0x1d50] sm:$0xff] }
 0x40e   : > { %7543 = vmatpush1.bf16.msra.mxu0 %v9476_v42  ;;  %7871 = vmatpush1.bf16.msra.mxu1 %v9478_v43  ;;  %v9543_v42 = vcombine.high %v1251_v21, %v1255_v36  ;;  %v1258_v43 = vld [vmem:[%s10523_s15 + $0x1bd0] sm:$0xff] }
 0x40f   : > { %7544 = vmatprep.subr.bf16.mxu0 %v9485_v44  ;;  %7872 = vmatprep.subr.bf16.mxu1 %v9487_v45  ;;  %v1262_v44 = vld [vmem:[%s10523_s15 + $0x1bf0] sm:$0xff]  ;;  %v1259_v45 = vld [vmem:[%s10523_s15 + $0x1bd8] sm:$0xff] }
 0x410   : > { %v9549_v49 = vcombine.high %v1258_v43, %v1262_v44  ;;  %v9548_v53 = vcombine.low %v1258_v43, %v1262_v44  ;;  %v9550_v57 = vcombine.low %v1259_v45, %v1263_v61  ;;  %v1314_v36 = vld [vmem:[%s10523_s15 + $0x1d90] sm:$0xff] }
 0x412   : > { %7545 = vmatpush1.bf16.msra.mxu0 %v9484_v52  ;;  %7873 = vmatpush1.bf16.msra.mxu1 %v9486_v54  ;;  %v9551_v52 = vcombine.high %v1259_v45, %v1263_v61  ;;  %v1266_v54 = vld [vmem:[%s10523_s15 + $0x1c10] sm:$0xff] }
 0x413   : > { %7546 = vmatprep.subr.bf16.mxu0 %v9493_v60  ;;  %7874 = vmatprep.subr.bf16.mxu1 %v9495_v25  ;;  %v1270_v60 = vld [vmem:[%s10523_s15 + $0x1c30] sm:$0xff]  ;;  %v1267_v25 = vld [vmem:[%s10523_s15 + $0x1c18] sm:$0xff] }
 0x414   : > { %v9557_v58 = vcombine.high %v1266_v54, %v1270_v60  ;;  %v9556_v10 = vcombine.low %v1266_v54, %v1270_v60  ;;  %v9558_v2 = vcombine.low %v1267_v25, %v1271_v56  ;;  %v1322_v61 = vld [vmem:[%s10523_s15 + $0x1dd0] sm:$0xff] }
 0x416   : > { %7547 = vmatpush1.bf16.msra.mxu0 %v9492_v59  ;;  %7875 = vmatpush1.bf16.msra.mxu1 %v9494_v62  ;;  %v9559_v59 = vcombine.high %v1267_v25, %v1271_v56  ;;  %v1274_v62 = vld [vmem:[%s10523_s15 + $0x1c50] sm:$0xff] }
 0x417   : > { %7548 = vmatprep.subr.bf16.mxu0 %v9501_v63  ;;  %7876 = vmatprep.subr.bf16.mxu1 %v9503_v0  ;;  %v1278_v63 = vld [vmem:[%s10523_s15 + $0x1c70] sm:$0xff]  ;;  %v1275_v0 = vld [vmem:[%s10523_s15 + $0x1c58] sm:$0xff] }
 0x418   : > { %v9565_v34 = vcombine.high %v1274_v62, %v1278_v63  ;;  %v9564_v8 = vcombine.low %v1274_v62, %v1278_v63  ;;  %v9566_v12 = vcombine.low %v1275_v0, %v1279_v7  ;;  %v1330_v56 = vld [vmem:[%s10523_s15 + $0x1e10] sm:$0xff] }
 0x41a   : > { %7549 = vmatpush1.bf16.msra.mxu0 %v9500_v4  ;;  %7877 = vmatpush1.bf16.msra.mxu1 %v9502_v5  ;;  %v9567_v4 = vcombine.high %v1275_v0, %v1279_v7  ;;  %v1282_v5 = vld [vmem:[%s10523_s15 + $0x1c90] sm:$0xff] }
 0x41b   : > { %7550 = vmatprep.subr.bf16.mxu0 %v9509_v6  ;;  %7878 = vmatprep.subr.bf16.mxu1 %v9511_v29  ;;  %v1286_v6 = vld [vmem:[%s10523_s15 + $0x1cb0] sm:$0xff]  ;;  %v1283_v29 = vld [vmem:[%s10523_s15 + $0x1c98] sm:$0xff] }
 0x41c   : > { %v9573_v13 = vcombine.high %v1282_v5, %v1286_v6  ;;  %v9574_v3 = vcombine.low %v1283_v29, %v1287_v31  ;;  %v1338_v7 = vld [vmem:[%s10523_s15 + $0x1e50] sm:$0xff] }
 0x41e   : > { %7551 = vmatpush1.bf16.msra.mxu0 %v9508_v14  ;;  %7879 = vmatpush1.bf16.msra.mxu1 %v9510_v15  ;;  %v9575_v14 = vcombine.high %v1283_v29, %v1287_v31  ;;  %v1290_v15 = vld [vmem:[%s10523_s15 + $0x1cd0] sm:$0xff] }
 0x41f   : > { %7552 = vmatprep.subr.bf16.mxu0 %v9517_v16  ;;  %7880 = vmatprep.subr.bf16.mxu1 %v9519_v17  ;;  %v1294_v16 = vld [vmem:[%s10523_s15 + $0x1cf0] sm:$0xff]  ;;  %v1291_v17 = vld [vmem:[%s10523_s15 + $0x1cd8] sm:$0xff] }
 0x420   : > { %v9581_v19 = vcombine.high %v1290_v15, %v1294_v16  ;;  %v9583_v55 = vcombine.high %v1291_v17, %v1295_v39  ;;  %v9580_v40 = vcombine.low %v1290_v15, %v1294_v16  ;;  %v1346_v31 = vld [vmem:[%s10523_s15 + $0x1e90] sm:$0xff] }
 0x422   : > { %7553 = vmatpush1.bf16.msra.mxu0 %v9516_v18  ;;  %7881 = vmatpush1.bf16.msra.mxu1 %v9518_v22  ;;  %v1298_v18 = vld [vmem:[%s10523_s15 + $0x1d10] sm:$0xff] }
 0x423   : > { %7554 = vmatprep.subr.bf16.mxu0 %v9525_v23  ;;  %7882 = vmatprep.subr.bf16.mxu1 %v9527_v11  ;;  %v1302_v22 = vld [vmem:[%s10523_s15 + $0x1d30] sm:$0xff]  ;;  %v1299_v23 = vld [vmem:[%s10523_s15 + $0x1d18] sm:$0xff] }
 0x424   : > { %v1303_v11 = vld [vmem:[%s10523_s15 + $0x1d38] sm:$0xff]  ;;  %v9589_v26 = vcombine.high %v1298_v18, %v1302_v22 }
 0x425   : > { %v9591_v27 = vcombine.high %v1299_v23, %v1303_v11  ;;  %v9590_v50 = vcombine.low %v1299_v23, %v1303_v11  ;;  %v1362_v11 = vld [vmem:[%s10523_s15 + $0x1f10] sm:$0xff] }
 0x426   : > { %7555 = vmatpush1.bf16.msra.mxu0 %v9524_v30  ;;  %7883 = vmatpush1.bf16.msra.mxu1 %v9526_v32  ;;  %v1310_v30 = vld [vmem:[%s10523_s15 + $0x1d70] sm:$0xff]  ;;  %v1307_v32 = vld [vmem:[%s10523_s15 + $0x1d58] sm:$0xff] }
 0x427   : > { %7556 = vmatprep.subr.bf16.mxu0 %v9533_v33  ;;  %7884 = vmatprep.subr.bf16.mxu1 %v9535_v1  ;;  %v1311_v33 = vld [vmem:[%s10523_s15 + $0x1d78] sm:$0xff]  ;;  %v9588_v1 = vcombine.low %v1298_v18, %v1302_v22  ;;  %v9597_v35 = vcombine.high %v1306_v28, %v1310_v30 }
 0x428   : > { %v9599_v21 = vcombine.high %v1307_v32, %v1311_v33  ;;  %v9598_v43 = vcombine.low %v1307_v32, %v1311_v33  ;;  %v1370_v33 = vld [vmem:[%s10523_s15 + $0x1f50] sm:$0xff] }
 0x42a   : > { %7557 = vmatpush1.bf16.msra.mxu0 %v9532_v37  ;;  %7885 = vmatpush1.bf16.msra.mxu1 %v9534_v38  ;;  %v1318_v37 = vld [vmem:[%s10523_s15 + $0x1db0] sm:$0xff]  ;;  %v1315_v38 = vld [vmem:[%s10523_s15 + $0x1d98] sm:$0xff] }
 0x42b   : > { %7558 = vmatprep.subr.bf16.mxu0 %v9541_v41  ;;  %7886 = vmatprep.subr.bf16.mxu1 %v9543_v42  ;;  %v1319_v41 = vld [vmem:[%s10523_s15 + $0x1db8] sm:$0xff]  ;;  %v9596_v42 = vcombine.low %v1306_v28, %v1310_v30  ;;  %v9605_v44 = vcombine.high %v1314_v36, %v1318_v37 }
 0x42c   : > { %v9607_v45 = vcombine.high %v1315_v38, %v1319_v41  ;;  %v9606_v54 = vcombine.low %v1315_v38, %v1319_v41  ;;  %v1378_v41 = vld [vmem:[%s10523_s15 + $0x1f90] sm:$0xff] }
 0x42e   : > { %7559 = vmatpush1.bf16.msra.mxu0 %v9540_v47  ;;  %7887 = vmatpush1.bf16.msra.mxu1 %v9542_v48  ;;  %v1326_v47 = vld [vmem:[%s10523_s15 + $0x1df0] sm:$0xff]  ;;  %v1323_v48 = vld [vmem:[%s10523_s15 + $0x1dd8] sm:$0xff] }
 0x42f   : > { %7560 = vmatprep.subr.bf16.mxu0 %v9549_v49  ;;  %7888 = vmatprep.subr.bf16.mxu1 %v9551_v52  ;;  %v1327_v49 = vld [vmem:[%s10523_s15 + $0x1df8] sm:$0xff]  ;;  %v9604_v52 = vcombine.low %v1314_v36, %v1318_v37  ;;  %v9613_v60 = vcombine.high %v1322_v61, %v1326_v47 }
 0x430   : > { %v9615_v25 = vcombine.high %v1323_v48, %v1327_v49  ;;  %v9614_v62 = vcombine.low %v1323_v48, %v1327_v49  ;;  %v1386_v49 = vld [vmem:[%s10523_s15 + $0x1fd0] sm:$0xff] }
 0x432   : > { %7561 = vmatpush1.bf16.msra.mxu0 %v9548_v53  ;;  %7889 = vmatpush1.bf16.msra.mxu1 %v9550_v57  ;;  %v1334_v53 = vld [vmem:[%s10523_s15 + $0x1e30] sm:$0xff]  ;;  %v1331_v57 = vld [vmem:[%s10523_s15 + $0x1e18] sm:$0xff] }
 0x433   : > { %7571 = vmatprep.subr.bf16.mxu0 %v9557_v58  ;;  %7899 = vmatprep.subr.bf16.mxu1 %v9559_v59  ;;  %v1335_v58 = vld [vmem:[%s10523_s15 + $0x1e38] sm:$0xff]  ;;  %v9612_v59 = vcombine.low %v1322_v61, %v1326_v47  ;;  %v9621_v63 = vcombine.high %v1330_v56, %v1334_v53 }
 0x434   : > { %v9623_v0 = vcombine.high %v1331_v57, %v1335_v58 }
 0x435   : > { %7563 = vmatmul.mubr.bf16.vlgmr.msra.gmra.mrb[4].mxu0 %v11108_v9  ;;  %7891 = vmatmul.mubr.bf16.vlgmr.msra.gmra.mrb[4].mxu1 %v11108_v9  ;;  %v9572_v9 = vcombine.low %v1282_v5, %v1286_v6  ;;  %v9622_v5 = vcombine.low %v1331_v57, %v1335_v58 }
 0x436   : > { %7572 = vmatpush1.bf16.msra.mxu0 %v9556_v10  ;;  %7900 = vmatpush1.bf16.msra.mxu1 %v9558_v2  ;;  %v1342_v10 = vld [vmem:[%s10523_s15 + $0x1e70] sm:$0xff]  ;;  %v1339_v2 = vld [vmem:[%s10523_s15 + $0x1e58] sm:$0xff] }
 0x437   : > { %7573 = vmatprep.subr.bf16.mxu0 %v9565_v34  ;;  %7901 = vmatprep.subr.bf16.mxu1 %v9567_v4  ;;  %v1343_v34 = vld [vmem:[%s10523_s15 + $0x1e78] sm:$0xff]  ;;  %v9620_v4 = vcombine.low %v1330_v56, %v1334_v53  ;;  %v9629_v6 = vcombine.high %v1338_v7, %v1342_v10 }
 0x438   : > { %7603 = vmatprep.mubr.bf16.mxu0 %v11116_v20  ;;  %7931 = vmatprep.mubr.bf16.mxu1 %v11116_v20  ;;  %v9582_v20 = vcombine.low %v1291_v17, %v1295_v39  ;;  %v9631_v29 = vcombine.high %v1339_v2, %v1343_v34  ;;  %v9630_v15 = vcombine.low %v1339_v2, %v1343_v34  ;;  %v1354_v39 = vld [vmem:[%s10523_s15 + $0x1ed0] sm:$0xff] }
 0x43a   : > { %7574 = vmatpush1.bf16.msra.mxu0 %v9564_v8  ;;  %7902 = vmatpush1.bf16.msra.mxu1 %v9566_v12  ;;  %v1350_v8 = vld [vmem:[%s10523_s15 + $0x1eb0] sm:$0xff]  ;;  %v1347_v12 = vld [vmem:[%s10523_s15 + $0x1e98] sm:$0xff] }
 0x43b   : > { %7575 = vmatprep.subr.bf16.mxu0 %v9573_v13  ;;  %7903 = vmatprep.subr.bf16.mxu1 %v9575_v14  ;;  %v1351_v13 = vld [vmem:[%s10523_s15 + $0x1eb8] sm:$0xff]  ;;  %v9628_v14 = vcombine.low %v1338_v7, %v1342_v10  ;;  %v9637_v16 = vcombine.high %v1346_v31, %v1350_v8 }
 0x43c   : > { %v9639_v17 = vcombine.high %v1347_v12, %v1351_v13  ;;  %v9638_v18 = vcombine.low %v1347_v12, %v1351_v13 }
 0x43e   : > { %7576 = vmatpush1.bf16.msra.mxu0 %v9572_v9  ;;  %7904 = vmatpush1.bf16.msra.mxu1 %v9574_v3  ;;  %v1358_v9 = vld [vmem:[%s10523_s15 + $0x1ef0] sm:$0xff]  ;;  %v1355_v3 = vld [vmem:[%s10523_s15 + $0x1ed8] sm:$0xff] }
 0x43f   : > { %7577 = vmatprep.subr.bf16.mxu0 %v9581_v19  ;;  %7905 = vmatprep.subr.bf16.mxu1 %v9583_v55  ;;  %v1359_v19 = vld [vmem:[%s10523_s15 + $0x1ef8] sm:$0xff]  ;;  %v9636_v55 = vcombine.low %v1346_v31, %v1350_v8  ;;  %v9645_v22 = vcombine.high %v1354_v39, %v1358_v9 }
 0x440   : > { %v9647_v23 = vcombine.high %v1355_v3, %v1359_v19  ;;  %v9646_v28 = vcombine.low %v1355_v3, %v1359_v19  ;;  %v365_v8 = vld [vmem:[#allocation2 + $0x8] sm:$0xff] }
 0x442   : > { %7578 = vmatpush1.bf16.msra.mxu0 %v9580_v40  ;;  %7906 = vmatpush1.bf16.msra.mxu1 %v9582_v20  ;;  %v1366_v40 = vld [vmem:[%s10523_s15 + $0x1f30] sm:$0xff]  ;;  %v1363_v20 = vld [vmem:[%s10523_s15 + $0x1f18] sm:$0xff] }
 0x443   : > { %7579 = vmatprep.subr.bf16.mxu0 %v9589_v26  ;;  %7907 = vmatprep.subr.bf16.mxu1 %v9591_v27  ;;  %v1367_v26 = vld [vmem:[%s10523_s15 + $0x1f38] sm:$0xff]  ;;  %v9644_v27 = vcombine.low %v1354_v39, %v1358_v9  ;;  %v9653_v30 = vcombine.high %v1362_v11, %v1366_v40  ;;  %v8116_v39 = vld [vmem:[%s12186_s3 + $0x180] sm:$0xff] (!%p9680_p6) }
 0x444   : > { %v9655_v32 = vcombine.high %v1363_v20, %v1367_v26  ;;  %v9654_v36 = vcombine.low %v1363_v20, %v1367_v26  ;;  %v8117_v9 = vld [vmem:[%s12186_s3 + $0x188] sm:$0xff] (!%p9680_p6)  ;;  %v8071_v20 = vld [vmem:[%s12186_s3 + $0x18] sm:$0xff] (!%p9680_p6) }
 0x445   : > { %v9861_v19 = vpack.c.bf16 (!%p9680_p6), %v8117_v9, %v8116_v39  ;;  %v8110_v39 = vld [vmem:[%s12186_s3 + $0x150] sm:$0xff] (!%p9680_p6) }
 0x446   : > { %7580 = vmatpush1.bf16.msra.mxu0 %v9588_v1  ;;  %7908 = vmatpush1.bf16.msra.mxu1 %v9590_v50  ;;  %v1374_v1 = vld [vmem:[%s10523_s15 + $0x1f70] sm:$0xff]  ;;  %v1371_v50 = vld [vmem:[%s10523_s15 + $0x1f58] sm:$0xff] }
 0x447   : > { %7581 = vmatprep.subr.bf16.mxu0 %v9597_v35  ;;  %7909 = vmatprep.subr.bf16.mxu1 %v9599_v21  ;;  %v1375_v35 = vld [vmem:[%s10523_s15 + $0x1f78] sm:$0xff]  ;;  %v9652_v21 = vcombine.low %v1362_v11, %v1366_v40  ;;  %v9661_v37 = vcombine.high %v1370_v33, %v1374_v1  ;;  %v8087_v11 = vld [vmem:[%s12186_s3 + $0x98] sm:$0xff] (!%p9680_p6) }
 0x448   : > { %v9663_v38 = vcombine.high %v1371_v50, %v1375_v35  ;;  %v9662_v61 = vcombine.low %v1371_v50, %v1375_v35  ;;  %v8070_v40 = vld [vmem:[%s12186_s3 + $0x10] sm:$0xff] (!%p9680_p6)  ;;  %v8088_v50 = vld [vmem:[%s12186_s3 + $0xa0] sm:$0xff] (!%p9680_p6)  ;;  %v8089_v35 = vld [vmem:[%s12186_s3 + $0xa8] sm:$0xff] (!%p9680_p6) }
 0x44a   : > { %7582 = vmatpush1.bf16.msra.mxu0 %v9596_v42  ;;  %7910 = vmatpush1.bf16.msra.mxu1 %v9598_v43  ;;  %v1382_v42 = vld [vmem:[%s10523_s15 + $0x1fb0] sm:$0xff]  ;;  %v1379_v43 = vld [vmem:[%s10523_s15 + $0x1f98] sm:$0xff] }
 0x44b   : > { %7583 = vmatprep.subr.bf16.mxu0 %v9605_v44  ;;  %7911 = vmatprep.subr.bf16.mxu1 %v9607_v45  ;;  %v1383_v44 = vld [vmem:[%s10523_s15 + $0x1fb8] sm:$0xff]  ;;  %v9660_v45 = vcombine.low %v1370_v33, %v1374_v1  ;;  %v9669_v47 = vcombine.high %v1378_v41, %v1382_v42  ;;  %v8103_v1 = vld [vmem:[%s12186_s3 + $0x118] sm:$0xff] (!%p9680_p6) }
 0x44c   : > { %v9671_v48 = vcombine.high %v1379_v43, %v1383_v44  ;;  %v9670_v56 = vcombine.low %v1379_v43, %v1383_v44  ;;  %v8104_v43 = vld [vmem:[%s12186_s3 + $0x120] sm:$0xff] (!%p9680_p6)  ;;  %v8105_v44 = vld [vmem:[%s12186_s3 + $0x128] sm:$0xff] (!%p9680_p6) }
 0x44e   : > { %7584 = vmatpush1.bf16.msra.mxu0 %v9604_v52  ;;  %7912 = vmatpush1.bf16.msra.mxu1 %v9606_v54  ;;  %v1390_v52 = vld [vmem:[%s10523_s15 + $0x1ff0] sm:$0xff]  ;;  %v1387_v54 = vld [vmem:[%s10523_s15 + $0x1fd8] sm:$0xff] }
 0x44f   : > { %7585 = vmatprep.subr.bf16.mxu0 %v9613_v60  ;;  %7913 = vmatprep.subr.bf16.mxu1 %v9615_v25  ;;  %v1391_v60 = vld [vmem:[%s10523_s15 + $0x1ff8] sm:$0xff]  ;;  %v9668_v25 = vcombine.low %v1378_v41, %v1382_v42  ;;  %v9677_v53 = vcombine.high %v1386_v49, %v1390_v52  ;;  %v9676_v58 = vcombine.low %v1386_v49, %v1390_v52  ;;  %v8120_v41 = vld [vmem:[%s12186_s3 + $0x1a0] sm:$0xff] (!%p9680_p6) }
 0x450   : > { %v9679_v57 = vcombine.high %v1387_v54, %v1391_v60  ;;  %v8121_v42 = vld [vmem:[%s12186_s3 + $0x1a8] sm:$0xff] (!%p9680_p6)  ;;  %v8074_v49 = vld [vmem:[%s12186_s3 + $0x30] sm:$0xff] (!%p9680_p6)  ;;  %v9871_v52 = vpack.c.bf16 (!%p9680_p6), %v8105_v44, %v8104_v43  ;;  %v8131_v43 = vld [vmem:[%s12186_s3 + $0x1f8] sm:$0xff] (!%p9680_p6) }
 0x452   : > { %7586 = vmatpush1.bf16.msra.mxu0 %v9612_v59  ;;  %7914 = vmatpush1.bf16.msra.mxu1 %v9614_v62  ;;  %v9678_v59 = vcombine.low %v1387_v54, %v1391_v60  ;;  %v8075_v60 = vld [vmem:[%s12186_s3 + $0x38] sm:$0xff] (!%p9680_p6) }
 0x453   : > { %7587 = vmatprep.subr.bf16.mxu0 %v9621_v63  ;;  %7915 = vmatprep.subr.bf16.mxu1 %v9623_v0 }
 0x456   : > { %7588 = vmatpush1.bf16.msra.mxu0 %v9620_v4  ;;  %7916 = vmatpush1.bf16.msra.mxu1 %v9622_v5 }
 0x457   : > { %7589 = vmatprep.subr.bf16.mxu0 %v9629_v6  ;;  %7917 = vmatprep.subr.bf16.mxu1 %v9631_v29 }
 0x45a   : > { %7590 = vmatpush1.bf16.msra.mxu0 %v9628_v14  ;;  %7918 = vmatpush1.bf16.msra.mxu1 %v9630_v15  ;;  %v8085_v14 = vld [vmem:[%s12186_s3 + $0x88] sm:$0xff] (!%p9680_p6)  ;;  %v8068_v15 = vld [vmem:[%s12186_s3] sm:$0xff] (!%p9680_p6) }
 0x45b   : > { %7591 = vmatprep.subr.bf16.mxu0 %v9637_v16  ;;  %7919 = vmatprep.subr.bf16.mxu1 %v9639_v17  ;;  %v8069_v17 = vld [vmem:[%s12186_s3 + $0x8] sm:$0xff] (!%p9680_p6) }
 0x45c   : > { %v9831_v3 = vpack.c.bf16 (!%p9680_p6), %v8069_v17, %v8068_v15  ;;  %v8079_v17 = vld [vmem:[%s12186_s3 + $0x58] sm:$0xff] (!%p9680_p6) }
 0x45e   : > { %7592 = vmatpush1.bf16.msra.mxu0 %v9636_v55  ;;  %7920 = vmatpush1.bf16.msra.mxu1 %v9638_v18  ;;  %v8100_v55 = vld [vmem:[%s12186_s3 + $0x100] sm:$0xff] (!%p9680_p6)  ;;  %v8101_v18 = vld [vmem:[%s12186_s3 + $0x108] sm:$0xff] (!%p9680_p6) }
 0x45f   : > { %7593 = vmatprep.subr.bf16.mxu0 %v9645_v22  ;;  %7921 = vmatprep.subr.bf16.mxu1 %v9647_v23  ;;  %v8086_v22 = vld [vmem:[%s12186_s3 + $0x90] sm:$0xff] (!%p9680_p6)  ;;  %v9863_v23 = vpack.c.bf16 (!%p9680_p6), %v8101_v18, %v8100_v55  ;;  %v8097_v55 = vld [vmem:[%s12186_s3 + $0xe8] sm:$0xff] (!%p9680_p6)  ;;  %v7998_v18 = vsub.s32 (!%p9680_p6), 0, %v10563_v46 }
 0x460   : > { %v9833_v26 = vpack.c.bf16 (!%p9680_p6), %v8087_v11, %v8086_v22  ;;  %v8002_v22 = vsub.s32 (!%p9680_p6), 1, %v10563_v46  ;;  %v8128_v11 = vld [vmem:[%s12186_s3 + $0x1e0] sm:$0xff] (!%p9680_p6) }
 0x462   : > { %7594 = vmatpush1.bf16.msra.mxu0 %v9644_v27  ;;  %7922 = vmatpush1.bf16.msra.mxu1 %v9646_v28  ;;  %v9835_v27 = vpack.c.bf16 (!%p9680_p6), %v8071_v20, %v8070_v40  ;;  %v8118_v28 = vld [vmem:[%s12186_s3 + $0x190] sm:$0xff] (!%p9680_p6)  ;;  %v8129_v40 = vld [vmem:[%s12186_s3 + $0x1e8] sm:$0xff] (!%p9680_p6)  ;;  %v8010_v20 = vsub.s32 (!%p9680_p6), 3, %v10563_v46 }
 0x463   : > { %7595 = vmatprep.subr.bf16.mxu0 %v9653_v30  ;;  %7923 = vmatprep.subr.bf16.mxu1 %v9655_v32  ;;  %v8119_v30 = vld [vmem:[%s12186_s3 + $0x198] sm:$0xff] (!%p9680_p6)  ;;  %v8102_v32 = vld [vmem:[%s12186_s3 + $0x110] sm:$0xff] (!%p9680_p6) }
 0x464   : > { %v9865_v33 = vpack.c.bf16 (!%p9680_p6), %v8119_v30, %v8118_v28 }
 0x466   : > { %7596 = vmatpush1.bf16.msra.mxu0 %v9652_v21  ;;  %7924 = vmatpush1.bf16.msra.mxu1 %v9654_v36  ;;  %v9867_v21 = vpack.c.bf16 (!%p9680_p6), %v8103_v1, %v8102_v32  ;;  %v9837_v36 = vpack.c.bf16 (!%p9680_p6), %v8089_v35, %v8088_v50  ;;  %v8081_v32 = vld [vmem:[%s12186_s3 + $0x68] sm:$0xff] (!%p9680_p6)  ;;  %v7994_v1 = vld [vmem:[#allocation7] sm:$0xff] (!%p9680_p6)  ;;  %v9885_v50 = vpack.c.bf16 (!%p9680_p6), %v8129_v40, %v8128_v11 }
 0x467   : > { %7597 = vmatprep.subr.bf16.mxu0 %v9661_v37  ;;  %7925 = vmatprep.subr.bf16.mxu1 %v9663_v38  ;;  %v8072_v37 = vld [vmem:[%s12186_s3 + $0x20] sm:$0xff] (!%p9680_p6)  ;;  %v8073_v38 = vld [vmem:[%s12186_s3 + $0x28] sm:$0xff] (!%p9680_p6)  ;;  %v8011_v44 = vrot.slane (!%p9680_p6), %v7994_v1, %v8010_v20 }
 0x468   : > { %v8113_v35 = vld [vmem:[%s12186_s3 + $0x168] sm:$0xff] (!%p9680_p6) }
 0x46a   : > { %7598 = vmatpush1.bf16.msra.mxu0 %v9660_v45  ;;  %7926 = vmatpush1.bf16.msra.mxu1 %v9662_v61  ;;  %v9839_v45 = vpack.c.bf16 (!%p9680_p6), %v8073_v38, %v8072_v37  ;;  %v9869_v61 = vpack.c.bf16 (!%p9680_p6), %v8121_v42, %v8120_v41  ;;  %v7999_v37 = vrot.slane (!%p9680_p6), %v7994_v1, %v7998_v18  ;;  %v8130_v42 = vld [vmem:[%s12186_s3 + $0x1f0] sm:$0xff] (!%p9680_p6)  ;;  %v8336_v18 = vld [vmem:[%s12188_s5 + $0x100] sm:$0xff] (!%p9680_p6) }
 0x46b   : > { %7599 = vmatprep.subr.bf16.mxu0 %v9669_v47  ;;  %7927 = vmatprep.subr.bf16.mxu1 %v9671_v48  ;;  %v8090_v47 = vld [vmem:[%s12186_s3 + $0xb0] sm:$0xff] (!%p9680_p6)  ;;  %v8091_v48 = vld [vmem:[%s12186_s3 + $0xb8] sm:$0xff] (!%p9680_p6)  ;;  %v8003_v38 = vrot.slane (!%p9680_p6), %v7994_v1, %v8002_v22  ;;  %v8337_v22 = vld [vmem:[%s12188_s5 + $0x108] sm:$0xff] (!%p9680_p6) }
 0x46c   : > { %v9841_v54 = vpack.c.bf16 (!%p9680_p6), %v8091_v48, %v8090_v47  ;;  %v8082_v48 = vld [vmem:[%s12186_s3 + $0x70] sm:$0xff] (!%p9680_p6) }
 0x46e   : > { %7600 = vmatpush1.bf16.msra.mxu0 %v9668_v25  ;;  %7928 = vmatpush1.bf16.msra.mxu1 %v9670_v56  ;;  %v8122_v25 = vld [vmem:[%s12186_s3 + $0x1b0] sm:$0xff] (!%p9680_p6)  ;;  %v8123_v56 = vld [vmem:[%s12186_s3 + $0x1b8] sm:$0xff] (!%p9680_p6) }
 0x46f   : > { %7601 = vmatprep.subr.bf16.mxu0 %v9677_v53  ;;  %7929 = vmatprep.subr.bf16.mxu1 %v9679_v57  ;;  %v9873_v53 = vpack.c.bf16 (!%p9680_p6), %v8123_v56, %v8122_v25  ;;  %v8106_v57 = vld [vmem:[%s12186_s3 + $0x130] sm:$0xff] (!%p9680_p6) }
 0x472   : > { %7602 = vmatpush1.bf16.msra.mxu0 %v9676_v58  ;;  %7930 = vmatpush1.bf16.msra.mxu1 %v9678_v59  ;;  %v8107_v58 = vld [vmem:[%s12186_s3 + $0x138] sm:$0xff] (!%p9680_p6)  ;;  %v8092_v59 = vld [vmem:[%s12186_s3 + $0xc0] sm:$0xff] (!%p9680_p6) }
 0x473   : > { %9862 = vmatprep.subr.bf16.mxu1 (!%p9680_p6), %v9861_v19  ;;  %v8096_v19 = vld [vmem:[%s12186_s3 + $0xe0] sm:$0xff] (!%p9680_p6) }
 0x474   : > { %v9853_v30 = vpack.c.bf16 (!%p9680_p6), %v8097_v55, %v8096_v19  ;;  %v8322_v19 = vld [vmem:[%s12188_s5 + $0x90] sm:$0xff] (!%p9680_p6)  ;;  %v8323_v55 = vld [vmem:[%s12188_s5 + $0x98] sm:$0xff] (!%p9680_p6) }
 0x475   : > { %7604 = vmatmul.mubr.bf16.vlgmr.msra.gmra.mrb[4].mxu0 %v11184_v51  ;;  %7932 = vmatmul.mubr.bf16.vlgmr.msra.gmra.mrb[4].mxu1 %v11184_v51  ;;  %v8084_v51 = vld [vmem:[%s12186_s3 + $0x80] sm:$0xff] (!%p9680_p6) }
 0x476   : > { %v9829_v16 = vpack.c.bf16 (!%p9680_p6), %v8085_v14, %v8084_v51  ;;  %9864 = vmatpush3.bf16.msra.mxu1 (!%p9680_p6), %v9863_v23  ;;  %v8006_v23 = vsub.s32 (!%p9680_p6), 2, %v10563_v46 }
 0x477   : > { %9866 = vmatprep.subr.bf16.mxu1 (!%p9680_p6), %v9865_v33  ;;  %v8112_v33 = vld [vmem:[%s12186_s3 + $0x160] sm:$0xff] (!%p9680_p6) }
 0x478   : > { %9830 = vmatprep.subr.bf16.mxu0 (!%p9680_p6), %v9829_v16  ;;  %v8078_v16 = vld [vmem:[%s12186_s3 + $0x50] sm:$0xff] (!%p9680_p6)  ;;  %v8007_v41 = vrot.slane (!%p9680_p6), %v7994_v1, %v8006_v23  ;;  %v9887_v25 = vpack.c.bf16 (!%p9680_p6), %v8113_v35, %v8112_v33  ;;  %v8307_v33 = vld [vmem:[%s12188_s5 + $0x18] sm:$0xff] (!%p9680_p6)  ;;  %v8324_v35 = vld [vmem:[%s12188_s5 + $0xa0] sm:$0xff] (!%p9680_p6) }
 0x479   : > { %9832 = vmatpush3.bf16.msra.mxu0 (!%p9680_p6), %v9831_v3  ;;  %v8111_v3 = vld [vmem:[%s12186_s3 + $0x158] sm:$0xff] (!%p9680_p6) }
 0x47a   : > { %9834 = vmatprep.subr.bf16.mxu0 (!%p9680_p6), %v9833_v26  ;;  %9868 = vmatpush3.bf16.msra.mxu1 (!%p9680_p6), %v9867_v21  ;;  %v9851_v26 = vpack.c.bf16 (!%p9680_p6), %v8079_v17, %v8078_v16  ;;  %v9883_v28 = vpack.c.bf16 (!%p9680_p6), %v8111_v3, %v8110_v39  ;;  %v8098_v21 = vld [vmem:[%s12186_s3 + $0xf0] sm:$0xff] (!%p9680_p6)  ;;  %v8304_v17 = vld [vmem:[%s12188_s5] sm:$0xff] (!%p9680_p6)  ;;  %v8305_v39 = vld [vmem:[%s12188_s5 + $0x8] sm:$0xff] (!%p9680_p6) }
 0x47b   : > { %9870 = vmatprep.subr.bf16.mxu1 (!%p9680_p6), %v9869_v61  ;;  %v8018_v61 = vsub.s32 (!%p9680_p6), 5, %v10563_v46 }
 0x47d   : > { %9836 = vmatpush3.bf16.msra.mxu0 (!%p9680_p6), %v9835_v27  ;;  %v8080_v27 = vld [vmem:[%s12186_s3 + $0x60] sm:$0xff] (!%p9680_p6) }
 0x47e   : > { %9838 = vmatprep.subr.bf16.mxu0 (!%p9680_p6), %v9837_v36  ;;  %9872 = vmatpush3.bf16.msra.mxu1 (!%p9680_p6), %v9871_v52  ;;  %v8099_v36 = vld [vmem:[%s12186_s3 + $0xf8] sm:$0xff] (!%p9680_p6)  ;;  %v9855_v47 = vpack.c.bf16 (!%p9680_p6), %v8081_v32, %v8080_v27  ;;  %v8028_v52 = vcombine.low (!%p9680_p6), %v7999_v37, %v8003_v38  ;;  %v8354_v27 = vld [vmem:[%s12188_s5 + $0x190] sm:$0xff] (!%p9680_p6) }
 0x47f   : > { %9874 = vmatprep.subr.bf16.mxu1 (!%p9680_p6), %v9873_v53  ;;  %v9857_v56 = vpack.c.bf16 (!%p9680_p6), %v8099_v36, %v8098_v21  ;;  %v8114_v53 = vld [vmem:[%s12186_s3 + $0x170] sm:$0xff] (!%p9680_p6)  ;;  %v8325_v21 = vld [vmem:[%s12188_s5 + $0xa8] sm:$0xff] (!%p9680_p6)  ;;  %v8339_v38 = vld [vmem:[%s12188_s5 + $0x118] sm:$0xff] (!%p9680_p6) }
 0x480   : > { %v8306_v32 = vld [vmem:[%s12188_s5 + $0x10] sm:$0xff] (!%p9680_p6) }
 0x481   : > { %9840 = vmatpush3.bf16.msra.mxu0 (!%p9680_p6), %v9839_v45  ;;  %v8014_v45 = vsub.s32 (!%p9680_p6), 4, %v10563_v46  ;;  %v8338_v37 = vld [vmem:[%s12188_s5 + $0x110] sm:$0xff] (!%p9680_p6) }
 0x482   : > { %9842 = vmatprep.subr.bf16.mxu0 (!%p9680_p6), %v9841_v54  ;;  %v8022_v54 = vsub.s32 (!%p9680_p6), 6, %v10563_v46 }
 0x548   : > { %v7605_v62 = vpop.f32.mrb[4].mxu0  ;;  %v7933_v63 = vpop.f32.mrb[4].mxu1 }
 0x549   : > { %v7607_v0 = vpop.f32.mrb[5].mxu0  ;;  %v7935_v10 = vpop.f32.mrb[5].mxu1 }
 0x54a   : > { %v7965_v7 = vcombine.low %v7605_v62, %v7607_v0  ;;  %v7609_v2 = vpop.f32.mrb[6].mxu0  ;;  %v7966_v34 = vcombine.low %v7933_v63, %v7935_v10  ;;  %v7937_v4 = vpop.f32.mrb[6].mxu1  ;;  %v8093_v62 = vld [vmem:[%s12186_s3 + $0xc8] sm:$0xff] (!%p9680_p6)  ;;  %v9843_v63 = vpack.c.bf16 (!%p9680_p6), %v8075_v60, %v8074_v49  ;;  %v8124_v0 = vld [vmem:[%s12186_s3 + $0x1c0] sm:$0xff] (!%p9680_p6)  ;;  %v9875_v10 = vpack.c.bf16 (!%p9680_p6), %v8107_v58, %v8106_v57  ;;  %v8083_v49 = vld [vmem:[%s12186_s3 + $0x78] sm:$0xff] (!%p9680_p6) }
 0x54b   : > { %v7610_v5 = vpop.f32.mrb[7].mxu0  ;;  %v7938_v29 = vpop.f32.mrb[7].mxu1  ;;  %v9845_v2 = vpack.c.bf16 (!%p9680_p6), %v8093_v62, %v8092_v59  ;;  %v8077_v4 = vld [vmem:[%s12186_s3 + $0x48] sm:$0xff] (!%p9680_p6)  ;;  %v8026_v60 = vsub.s32 (!%p9680_p6), 7, %v10563_v46  ;;  %v8029_v57 = vcombine.low (!%p9680_p6), %v8007_v41, %v8011_v44  ;;  %v9889_v58 = vpack.c.bf16 (!%p9680_p6), %v8131_v43, %v8130_v42  ;;  %v8115_v59 = vld [vmem:[%s12186_s3 + $0x178] sm:$0xff] (!%p9680_p6)  ;;  %v8320_v46 = vld [vmem:[%s12188_s5 + $0x80] sm:$0xff] (!%p9680_p6) }
 0x54c   : > { %v7973_v6 = vrot.slane %v7965_v7, %v11417_v24  ;;  %v7980_v31 = vrot.slane %v7966_v34, %v11417_v24  ;;  %7991 = sbr.rel (%p9680_p6) target bundleno = 1941 (0x795), region = 68  ;;  %v8125_v7 = vld [vmem:[%s12186_s3 + $0x1c8] sm:$0xff] (!%p9680_p6)  ;;  %v8076_v34 = vld [vmem:[%s12186_s3 + $0x40] sm:$0xff] (!%p9680_p6)  ;;  %9844 = vmatpush3.bf16.msra.mxu0 (!%p9680_p6), %v9843_v63  ;;  %9876 = vmatpush3.bf16.msra.mxu1 (!%p9680_p6), %v9875_v10  ;;  %v8036_v62 = vrot.slane (!%p9680_p6), %v8028_v52, %v11417_v24  ;;  %v8327_v52 = vld [vmem:[%s12188_s5 + $0xb8] sm:$0xff] (!%p9680_p6) }
 0x54d   : > { %v8108_v5 = vld [vmem:[%s12186_s3 + $0x140] sm:$0xff] (!%p9680_p6)  ;;  %v8109_v29 = vld [vmem:[%s12186_s3 + $0x148] sm:$0xff] (!%p9680_p6)  ;;  %v9847_v51 = vpack.c.bf16 (!%p9680_p6), %v8077_v4, %v8076_v34  ;;  %9846 = vmatprep.subr.bf16.mxu0 (!%p9680_p6), %v9845_v2  ;;  %v8015_v4 = vrot.slane (!%p9680_p6), %v7994_v1, %v8014_v45  ;;  %v9899_v42 = vpack.c.bf16 (!%p9680_p6), %v8307_v33, %v8306_v32  ;;  %v9901_v45 = vpack.c.bf16 (!%p9680_p6), %v8325_v21, %v8324_v35  ;;  %v8346_v32 = vld [vmem:[%s12188_s5 + $0x150] sm:$0xff] (!%p9680_p6) }
 0x54e   : > { %v7981_v12 = vcombine.low %v7973_v6, %v7980_v31  ;;  %v9877_v6 = vpack.c.bf16 (!%p9680_p6), %v8125_v7, %v8124_v0  ;;  %v8094_v31 = vld [vmem:[%s12186_s3 + $0xd0] sm:$0xff] (!%p9680_p6)  ;;  %v9879_v14 = vpack.c.bf16 (!%p9680_p6), %v8109_v29, %v8108_v5  ;;  %v8321_v63 = vld [vmem:[%s12188_s5 + $0x88] sm:$0xff] (!%p9680_p6)  ;;  %v9859_v0 = vpack.c.bf16 (!%p9680_p6), %v8083_v49, %v8082_v48  ;;  %v8352_v10 = vld [vmem:[%s12188_s5 + $0x180] sm:$0xff] (!%p9680_p6) }
 0x54f   : > { %v8043_v7 = vrot.slane (!%p9680_p6), %v8029_v57, %v11417_v24  ;;  %v8353_v2 = vld [vmem:[%s12188_s5 + $0x188] sm:$0xff] (!%p9680_p6)  ;;  %v7992_v34 = vld [vmem:[#allocation2] sm:$0xff] (!%p9680_p6)  ;;  %v8019_v5 = vrot.slane (!%p9680_p6), %v7994_v1, %v8018_v61  ;;  %v8027_v29 = vrot.slane (!%p9680_p6), %v7994_v1, %v8026_v60  ;;  %v9931_v48 = vpack.c.bf16 (!%p9680_p6), %v8339_v38, %v8338_v37  ;;  %v8326_v49 = vld [vmem:[%s12188_s5 + $0xb0] sm:$0xff] (!%p9680_p6) }
 0x550   : > { %v7985_v13 = vadd.f32 %v7981_v12, %v365_v8  ;;  %v8095_v8 = vld [vmem:[%s12186_s3 + $0xd8] sm:$0xff] (!%p9680_p6)  ;;  %v8126_v12 = vld [vmem:[%s12186_s3 + $0x1d0] sm:$0xff] (!%p9680_p6)  ;;  %9878 = vmatprep.subr.bf16.mxu1 (!%p9680_p6), %v9877_v6  ;;  %9848 = vmatpush3.bf16.msra.mxu0 (!%p9680_p6), %v9847_v51  ;;  %v8023_v6 = vrot.slane (!%p9680_p6), %v7994_v1, %v8022_v54  ;;  %v8356_v43 = vld [vmem:[%s12188_s5 + $0x1a0] sm:$0xff] (!%p9680_p6) }
 0x551   : > { %v9849_v15 = vpack.c.bf16 (!%p9680_p6), %v8095_v8, %v8094_v31  ;;  %9880 = vmatpush3.bf16.msra.mxu1 (!%p9680_p6), %v9879_v14  ;;  %v9891_v31 = vpack.c.bf16 (!%p9680_p6), %v8115_v59, %v8114_v53  ;;  %v8044_v8 = vcombine.low (!%p9680_p6), %v8036_v62, %v8043_v7  ;;  %v8045_v14 = vcombine.low (!%p9680_p6), %v8015_v4, %v8019_v5  ;;  %v8357_v44 = vld [vmem:[%s12188_s5 + $0x1a8] sm:$0xff] (!%p9680_p6)  ;;  %v8308_v61 = vld [vmem:[%s12188_s5 + $0x20] sm:$0xff] (!%p9680_p6)  ;;  %v8359_v59 = vld [vmem:[%s12188_s5 + $0x1b8] sm:$0xff] (!%p9680_p6) }
 0x552   : > { %7987 = vst [vmem:[#allocation2 + $0x8] sm:$0xff] %v7985_v13  ;;  %v8127_v13 = vld [vmem:[%s12186_s3 + $0x1d8] sm:$0xff] (!%p9680_p6)  ;;  %v9933_v60 = vpack.c.bf16 (!%p9680_p6), %v8357_v44, %v8356_v43  ;;  %v9905_v62 = vpack.c.bf16 (!%p9680_p6), %v8327_v52, %v8326_v49  ;;  %v8342_v4 = vld [vmem:[%s12188_s5 + $0x130] sm:$0xff] (!%p9680_p6)  ;;  %v8365_v35 = vld [vmem:[%s12188_s5 + $0x1e8] sm:$0xff] (!%p9680_p6) }
 0x553   : > { %v9881_v9 = vpack.c.bf16 %v8127_v13, %v8126_v12  ;;  %9850 = vmatprep.subr.bf16.mxu0 %v9849_v15  ;;  %v9893_v12 = vpack.c.bf16 %v8321_v63, %v8320_v46  ;;  %v9925_v13 = vpack.c.bf16 %v8353_v2, %v8352_v10  ;;  %v8064_v51 = vadd.f32 %v8044_v8, %v7992_v34  ;;  %v8310_v46 = vld [vmem:[%s12188_s5 + $0x30] sm:$0xff]  ;;  %v8311_v63 = vld [vmem:[%s12188_s5 + $0x38] sm:$0xff]  ;;  %v8328_v10 = vld [vmem:[%s12188_s5 + $0xc0] sm:$0xff] }
 0x554   : > { %9852 = vmatpush3.bf16.msra.mxu0 %v9851_v26  ;;  %v8046_v15 = vcombine.low %v8023_v6, %v8027_v29  ;;  %v8053_v23 = vrot.slane %v8045_v14, %v11417_v24  ;;  %v9895_v26 = vpack.c.bf16 %v8305_v39, %v8304_v17  ;;  %v8329_v2 = vld [vmem:[%s12188_s5 + $0xc8] sm:$0xff]  ;;  %v8343_v5 = vld [vmem:[%s12188_s5 + $0x138] sm:$0xff]  ;;  %v8360_v8 = vld [vmem:[%s12188_s5 + $0x1c0] sm:$0xff] }
 0x555   : > { %9882 = vmatprep.subr.bf16.mxu1 %v9881_v9  ;;  %9854 = vmatprep.subr.bf16.mxu0 %v9853_v30  ;;  %v8066_v16 = vmax.f32 %v8064_v51, 0.0  ;;  %v9897_v30 = vpack.c.bf16 %v8323_v55, %v8322_v19  ;;  %v8312_v51 = vld [vmem:[%s12188_s5 + $0x40] sm:$0xff]  ;;  %v8313_v14 = vld [vmem:[%s12188_s5 + $0x48] sm:$0xff]  ;;  %v9939_v17 = vpack.c.bf16 %v8343_v5, %v8342_v4  ;;  %v8330_v39 = vld [vmem:[%s12188_s5 + $0xd0] sm:$0xff] }
 0x556   : > { %9884 = vmatpush3.bf16.msra.mxu1 %v9883_v28  ;;  %v8060_v11 = vrot.slane %v8046_v15, %v11417_v24  ;;  %v8355_v28 = vld [vmem:[%s12188_s5 + $0x198] sm:$0xff]  ;;  %v8344_v19 = vld [vmem:[%s12188_s5 + $0x140] sm:$0xff]  ;;  %v8317_v37 = vld [vmem:[%s12188_s5 + $0x68] sm:$0xff] }
 0x557   : > { %9886 = vmatprep.subr.bf16.mxu1 %v9885_v50  ;;  %v8147_v9 = vrot.slane %v8066_v16, %v11417_v24  ;;  %v8140_v3 = vcombine.high %v8066_v16, %v8066_v16  ;;  %v9927_v50 = vpack.c.bf16 %v8337_v22, %v8336_v18  ;;  %v9929_v36 = vpack.c.bf16 %v8355_v28, %v8354_v27  ;;  %v8362_v22 = vld [vmem:[%s12188_s5 + $0x1d0] sm:$0xff]  ;;  %v8332_v27 = vld [vmem:[%s12188_s5 + $0xe0] sm:$0xff]  ;;  %v8333_v28 = vld [vmem:[%s12188_s5 + $0xe8] sm:$0xff] }
 0x558   : > { %9856 = vmatpush3.bf16.msra.mxu0 %v9855_v47  ;;  %v8061_v41 = vcombine.low %v8053_v23, %v8060_v11  ;;  %v8309_v47 = vld [vmem:[%s12188_s5 + $0x28] sm:$0xff]  ;;  %v9911_v18 = vpack.c.bf16 %v8313_v14, %v8312_v51  ;;  %v8363_v23 = vld [vmem:[%s12188_s5 + $0x1d8] sm:$0xff]  ;;  %v9917_v21 = vpack.c.bf16 %v8333_v28, %v8332_v27  ;;  %v8348_v44 = vld [vmem:[%s12188_s5 + $0x160] sm:$0xff] }
 0x559   : > { %9858 = vmatprep.subr.bf16.mxu0 %v9857_v56  ;;  %v8155_v40 = vcombine.high %v8147_v9, %v8147_v9  ;;  %v8154_v20 = vrot.slane %v8140_v3, %v11417_v24  ;;  %v7993_v54 = vld [vmem:[#allocation2 + $0x8] sm:$0xff]  ;;  %v9903_v57 = vpack.c.bf16 %v8309_v47, %v8308_v61  ;;  %v8347_v33 = vld [vmem:[%s12188_s5 + $0x158] sm:$0xff]  ;;  %v8366_v47 = vld [vmem:[%s12188_s5 + $0x1f0] sm:$0xff] }
 0x55a   : > { %9888 = vmatpush3.bf16.msra.mxu1 %v9887_v25  ;;  %v8340_v25 = vld [vmem:[%s12188_s5 + $0x120] sm:$0xff]  ;;  %v8341_v56 = vld [vmem:[%s12188_s5 + $0x128] sm:$0xff]  ;;  %v8065_v53 = vadd.f32 %v8061_v41, %v7993_v54  ;;  %v9947_v38 = vpack.c.bf16 %v8347_v33, %v8346_v32  ;;  %v8334_v41 = vld [vmem:[%s12188_s5 + $0xf0] sm:$0xff] }
 0x55b   : > { %9890 = vmatprep.subr.bf16.mxu1 %v9889_v58  ;;  %8225 = vmatprep.mubr.f32.mxu0 %v8155_v40  ;;  %v8156_v1 = vcombine.high %v8154_v20, %v8154_v20  ;;  %v8358_v58 = vld [vmem:[%s12188_s5 + $0x1b0] sm:$0xff]  ;;  %v9935_v7 = vpack.c.bf16 %v8341_v56, %v8340_v25  ;;  %v8319_v54 = vld [vmem:[%s12188_s5 + $0x78] sm:$0xff] }
 0x55c   : > { %9860 = vmatpush3.bf16.msra.mxu0 %v9859_v0  ;;  %v8067_v0 = vmax.f32 %v8065_v53, 0.0  ;;  %v9937_v34 = vpack.c.bf16 %v8359_v59, %v8358_v58  ;;  %v8314_v40 = vld [vmem:[%s12188_s5 + $0x50] sm:$0xff]  ;;  %v8351_v53 = vld [vmem:[%s12188_s5 + $0x178] sm:$0xff] }
 0x55d   : > { %9894 = vmatprep.subr.bf16.mxu0 %v9893_v12  ;;  %8295 = vmatprep.mubr.f32.mxu1 %v8156_v1  ;;  %v8361_v12 = vld [vmem:[%s12188_s5 + $0x1c8] sm:$0xff]  ;;  %v8318_v52 = vld [vmem:[%s12188_s5 + $0x70] sm:$0xff] }
 0x55e   : > { %9892 = vmatpush3.bf16.msra.mxu1 %v9891_v31  ;;  %v12043_v6 = vrot.slane %v8067_v0, %v11417_v24  ;;  %v8376_v29 = vcombine.high %v8067_v0, %v8067_v0  ;;  %v9907_v31 = vpack.c.bf16 %v8311_v63, %v8310_v46  ;;  %v9941_v3 = vpack.c.bf16 %v8361_v12, %v8360_v8  ;;  %v8350_v56 = vld [vmem:[%s12188_s5 + $0x170] sm:$0xff] }
 0x55f   : > { %9926 = vmatprep.subr.bf16.mxu1 %v9925_v13  ;;  %8226 = vmatmul.mubr.f32.vlgmr.msra.gmra.mrb[0].mxu0 %v8147_v9  ;;  %v9909_v13 = vpack.c.bf16 %v8329_v2, %v8328_v10  ;;  %v8331_v9 = vld [vmem:[%s12188_s5 + $0xd8] sm:$0xff]  ;;  %v9955_v58 = vpack.c.bf16 %v8351_v53, %v8350_v56 }
 0x560   : > { %9896 = vmatpush3.bf16.msra.mxu0 %v9895_v26  ;;  %v8391_v15 = vcombine.high %v12043_v6, %v12043_v6  ;;  %v12060_v16 = vrot.slane %v8376_v29, %v11417_v24  ;;  %v8345_v24 = vld [vmem:[%s12188_s5 + $0x148] sm:$0xff]  ;;  %v9913_v11 = vpack.c.bf16 %v8331_v9, %v8330_v39 }
 0x561   : > { %8296 = vmatmul.mubr.f32.vlgmr.msra.gmra.mrb[0].mxu1 %v8154_v20  ;;  %9898 = vmatprep.subr.bf16.mxu0 %v9897_v30  ;;  %v8315_v20 = vld [vmem:[%s12188_s5 + $0x58] sm:$0xff]  ;;  %v9943_v26 = vpack.c.bf16 %v8345_v24, %v8344_v19  ;;  %v9945_v30 = vpack.c.bf16 %v8363_v23, %v8362_v22 }
 0x562   : > { %9928 = vmatpush3.bf16.msra.mxu1 %v9927_v50  ;;  %8461 = vmatprep.mubr.f32.mxu0 %v8391_v15  ;;  %v8392_v55 = vcombine.high %v12060_v16, %v12060_v16  ;;  %v9915_v1 = vpack.c.bf16 %v8315_v20, %v8314_v40  ;;  %v8364_v50 = vld [vmem:[%s12188_s5 + $0x1e0] sm:$0xff] }
 0x563   : > { %9930 = vmatprep.subr.bf16.mxu1 %v9929_v36  ;;  %v8316_v36 = vld [vmem:[%s12188_s5 + $0x60] sm:$0xff]  ;;  %v9949_v43 = vpack.c.bf16 %v8365_v35, %v8364_v50 }
 0x564   : > { %9900 = vmatpush3.bf16.msra.mxu0 %v9899_v42  ;;  %8531 = vmatprep.mubr.f32.mxu1 %v8392_v55  ;;  %v8335_v42 = vld [vmem:[%s12188_s5 + $0xf8] sm:$0xff]  ;;  %v9919_v61 = vpack.c.bf16 %v8317_v37, %v8316_v36 }
 0x565   : > { %9902 = vmatprep.subr.bf16.mxu0 %v9901_v45  ;;  %v8349_v45 = vld [vmem:[%s12188_s5 + $0x168] sm:$0xff]  ;;  %v9921_v49 = vpack.c.bf16 %v8335_v42, %v8334_v41 }
 0x566   : > { %9932 = vmatpush3.bf16.msra.mxu1 %v9931_v48  ;;  %v8367_v48 = vld [vmem:[%s12188_s5 + $0x1f8] sm:$0xff] }
 0x567   : > { %9934 = vmatprep.subr.bf16.mxu1 %v9933_v60  ;;  %v9951_v60 = vpack.c.bf16 %v8349_v45, %v8348_v44  ;;  %v9953_v25 = vpack.c.bf16 %v8367_v48, %v8366_v47 }
 0x568   : > { %9904 = vmatpush3.bf16.msra.mxu0 %v9903_v57  ;;  %v9923_v57 = vpack.c.bf16 %v8319_v54, %v8318_v52 }
 0x569   : > { %9906 = vmatprep.subr.bf16.mxu0 %v9905_v62  ;;  %v9681_v62 = vld [vmem:[#allocation3] ss:$0 sm:$0xff] }
 0x56a   : > { %9936 = vmatpush3.bf16.msra.mxu1 %v9935_v7 }
 0x56b   : > { %9938 = vmatprep.subr.bf16.mxu1 %v9937_v34 }
 0x56c   : > { %9908 = vmatpush3.bf16.msra.mxu0 %v9907_v31 }
 0x56d   : > { %9910 = vmatprep.subr.bf16.mxu0 %v9909_v13 }
 0x56e   : > { %9940 = vmatpush3.bf16.msra.mxu1 %v9939_v17 }
 0x56f   : > { %9942 = vmatprep.subr.bf16.mxu1 %v9941_v3 }
 0x570   : > { %9912 = vmatpush3.bf16.msra.mxu0 %v9911_v18 }
 0x571   : > { %9914 = vmatprep.subr.bf16.mxu0 %v9913_v11 }
 0x572   : > { %9944 = vmatpush3.bf16.msra.mxu1 %v9943_v26 }
 0x573   : > { %9946 = vmatprep.subr.bf16.mxu1 %v9945_v30 }
 0x574   : > { %9916 = vmatpush3.bf16.msra.mxu0 %v9915_v1 }
 0x575   : > { %9918 = vmatprep.subr.bf16.mxu0 %v9917_v21 }
 0x576   : > { %9948 = vmatpush3.bf16.msra.mxu1 %v9947_v38 }
 0x577   : > { %9950 = vmatprep.subr.bf16.mxu1 %v9949_v43 }
 0x578   : > { %9920 = vmatpush3.bf16.msra.mxu0 %v9919_v61 }
 0x579   : > { %9922 = vmatprep.subr.bf16.mxu0 %v9921_v49 }
 0x57a   : > { %9952 = vmatpush3.bf16.msra.mxu1 %v9951_v60 }
 0x57b   : > { %9954 = vmatprep.subr.bf16.mxu1 %v9953_v25 }
 0x57c   : > { %9924 = vmatpush3.bf16.msra.mxu0 %v9923_v57 }
 0x57e   : > { %9956 = vmatpush3.bf16.msra.mxu1 %v9955_v58 }
 0x57f   : > { %8462 = vmatmul.mubr.f32.vlgmr.msra.gmra.mrb[2].mxu0 %v12043_v6  ;;  %v9682_v6 = vld [vmem:[#allocation9] ss:$0 sm:$0xff] }
 0x581   : > { %8532 = vmatmul.mubr.f32.vlgmr.msra.gmra.mrb[2].mxu1 %v12060_v16 }
 0x632   : > { %v9721_v59 = vpop.f32.mrb[0].mxu0 }
 0x633   : > { %v9722_v46 = vpop.f32.mrb[1].mxu0 }
 0x634   : > { %v9723_v63 = vadd.f32 %v9722_v46, %v9721_v59  ;;  %v9756_v0 = vpop.f32.mrb[0].mxu1 }
 0x635   : > { %v9757_v7 = vpop.f32.mrb[1].mxu1 }
 0x636   : > { %v8228_v10 = vadd.f32 %v9723_v63, %v9681_v62  ;;  %v9758_v2 = vadd.f32 %v9757_v7, %v9756_v0 }
 0x638   : > { %v8298_v34 = vadd.f32 %v9758_v2, %v8228_v10 }
 0x63a   : > { %10143 = vtanh.f32 %v8298_v34 }
 0x644   : > { %v10144_v4 = vpop.eup %10143 }
 0x645   : > { %8303 = vst.msk [vmem:[%s12191_s8] sm:$0x3] %vm8302_vm0, %v10144_v4 }
 0x652   : > { %v9791_v5 = vpop.f32.mrb[2].mxu0 }
 0x653   : > { %v9792_v29 = vpop.f32.mrb[3].mxu0 }
 0x654   : > { %v9793_v31 = vadd.f32 %v9792_v29, %v9791_v5  ;;  %v9826_v8 = vpop.f32.mrb[2].mxu1 }
 0x655   : > { %v9827_v12 = vpop.f32.mrb[3].mxu1 }
 0x656   : > { %v8464_v13 = vadd.f32 %v9793_v31, %v9682_v6  ;;  %v9828_v51 = vadd.f32 %v9827_v12, %v9826_v8 }
 0x658   : > { %v8534_v14 = vadd.f32 %v9828_v51, %v8464_v13 }
 0x65a   : > { %v8538_v15 = vsel %vm8537_vm1, %v8534_v14, -inf }
 0x65b   : > { %8539 = vmax.xlane.f32.xlu0 %v8538_v15 }
 0x6e8   : > { %v8540_v16 = vpop.xlane.xlu0 %8539 }
 0x6e9   : > { %v8541_v17 = vsub.f32 %v8534_v14, %v8540_v16 }
 0x6eb   : > { %v8542_v39 = vmul.f32 1.442695, %v8541_v17 }
 0x6ed   : > { %10145 = vpow2.f32 %v8542_v39 }
 0x6f7   : > { %v10146_v9 = vpop.eup %10145 }
 0x6f8   : > { %v8544_v3 = vsel %vm8537_vm1, %v10146_v9, 0.0 }
 0x6f9   : > { %8545 = vadd.xlane.f32.xlu0 %v8544_v3 }
 0x786   : > { %v8546_v19 = vpop.xlane.xlu0 %8545 }
 0x787   : > { %10147 = vrcp.f32 %v8546_v19 }
 0x791   : > { %v10148_v24 = vpop.eup %10147 }
 0x792   : > { %v8548_v55 = vmul.f32 %v10148_v24, %v10146_v9 }
 0x794   : > { %8549 = vst.msk [vmem:[#allocation10] sm:$0x3] %vm8537_vm1, %v8548_v55 }
 0x795 PF: > { %p10099_p7 = scmp.eq.s32.totalorder %s10381_s4, 1  ;;  %s10313_s26 = smov [#allocation10]  }
 0x796   : > { %s8557_s27 = sshll.u32 %s10313_s26, 4  ;;  %s8558_s27 = int_to_ptr.vmem [resolvable:$true] %s8557_s27 }
 0x797   : > { %s10235_s28 = scalar_lea.vmem %s8558_s27, 32  ;;  %p10242_p5 = scmp.lt.s32.totalorder %s8558_s27, %s8558_s27 }
 0x798   : > { %p10236_p11 = scmp.ne.s32.totalorder %s8558_s27, %s10235_s28  ;;  %p10243_p9 = scmp.lt.s32.totalorder %s10235_s28, %s10235_s28 }
 0x79a   : > { %p10237_p12 = pnand %p10236_p11, %p10099_p7  ;;  %p10244_p10 = por %p10243_p9, %p10242_p5 }
 0x79c   : > { %p10238_p13 = pneg %p10237_p12 }
 0x79e   : > { %p10245_p1 = pnand %p10244_p10, %p10238_p13 }
 0x7a0   : > { %10248 = shalt.err (!%p10245_p1)
}
 0x7a1   : > { %s10249_s10 = scalar_lea.hbm %s12190_s7, 32 }
 0x7a2   : > { %p10250_p8 = scmp.ne.s32.totalorder %s12190_s7, %s10249_s10  ;;  %p10255_p3 = scmp.lt.u32.totalorder %s10249_s10, %s12190_s7 }
 0x7a4   : > { %p10251_p0 = pnand %p10250_p8, %p10099_p7 }
 0x7a6   : > { %p10252_p2 = pneg %p10251_p0 }
 0x7a8   : > { %p10257_p4 = pnand %p10255_p3, %p10252_p2 }
 0x7aa   : > { %10260 = shalt.err (!%p10257_p4)
}
 0x7ab   : > { %10080 = dma.vmem_to_hbm [thread:$0]  (%p10099_p7), %s8558_s27, 32, %s12190_s7, [#allocation6]  }
 0x7ac   : > { %10286 = dma.done.wait (%p10099_p7), [#allocation6], 32  }
 0x7ad   : > { %10288 = vsyncadd (%p10099_p7), [#allocation6], 4294967264 }
 0x7ae PF: > { %p23_p6 = scmp.ge.s32.totalorder %s10384_s11, 4   ;;  %s12207_s29 = smov %s10295_s30 }
 0x7af   : > { %s12208_s30 = smov %s10299_s9  ;;  %s12209_s9 = smov %s10394_s14 }
 0x7b0   : > { %s12210_s10 = smov %s10384_s11  ;;  %25 = sbr.rel (!%p23_p6) target bundleno = 8 (0x8), region = 112 }
 0x7b7   :  { %8576 = vsyncpa [#allocation5], 1 }
 0x7b8   :  { %8578 = vsyncpa [#allocation5 + $0x1], 1 }
 0x7b9   :  { %8579 = vsyncpa [#allocation8], 1 }
 0x7ba   :  { %8580 = vsyncpa [#allocation6], 1 }
 0x7bb   :  { %8582 = vsyncpa [#allocation6 + $0x1], 1 }

</bundles_post_ra>
